<compile_context>
chip_gen: v7x
topology: tpu7x:2x2x1
jax: 0.10.0
libtpu: 0.0.40
codegen_flags: <defaults>
</compile_context>

<pallas_src>
import jax
import jax.numpy as jnp
import numpy as np
from jax.experimental import pallas as pl
from jax.experimental.pallas import tpu as pltpu


# ----------------------------------------------------------------------------
# Host-side weight preparation: fused band / selection matrices (pure numpy).
# ----------------------------------------------------------------------------
def _band_conv3(w, W, Wo=None, stride=1):
    """w: (3,3,Cin,Cout) -> (3, W*Cin, Wo*Cout) per-kernel-row band matrices."""
    KH, KW, Cin, Cout = w.shape
    Wo = W if Wo is None else Wo
    A = np.zeros((KH, W * Cin, Wo * Cout), np.float32)
    for kh in range(KH):
        for j in range(Wo):
            for kw in range(KW):
                c = stride * j + kw - 1            # pad=1 folded in (drop OOB taps)
                if 0 <= c < W:
                    A[kh, c * Cin:(c + 1) * Cin, j * Cout:(j + 1) * Cout] = w[kh, kw]
    return A


def _fuse3(w, W, Wo=None, stride=1):
    """3x3 conv -> single fused (3*W*Cin, Wo*Cout) band matrix (taps stacked
    along the contraction axis, matching lane-concat [x_{i-1} | x_i | x_{i+1}])."""
    A = _band_conv3(w, W, Wo=Wo, stride=stride)
    return np.concatenate([A[0], A[1], A[2]], axis=0)


def _band_1x1(w, W):
    """w: (1,1,Cin,Cout) -> (W*Cin, W*Cout) block-diagonal matrix."""
    Cin, Cout = w.shape[2], w.shape[3]
    A = np.zeros((W * Cin, W * Cout), np.float32)
    for j in range(W):
        A[j * Cin:(j + 1) * Cin, j * Cout:(j + 1) * Cout] = w[0, 0]
    return A


def _band_up(w, W):
    """ConvTranspose2d(4, stride=2, pad=1) weights in correlation form:
    w: (4,4,Cin,Cout) -> (4, W*Cin, 2W*Cout); only valid (non-zero) taps kept."""
    KH, KW, Cin, Cout = w.shape
    A = np.zeros((KH, W * Cin, 2 * W * Cout), np.float32)
    for kh in range(KH):
        for oj in range(2 * W):
            for kw in range(KW):
                if (oj + kw) % 2:                  # wrong sub-pixel phase
                    continue
                c = (oj + kw - 2) // 2
                if 0 <= c < W:
                    A[kh, c * Cin:(c + 1) * Cin, oj * Cout:(oj + 1) * Cout] = w[kh, kw]
    return A


def _tile_bias(b, Wo):
    return np.tile(np.asarray(b, np.float32), Wo).reshape(1, -1)


def _masks(N, H):
    """Per-image boundary masks for the row shifts (batch folded into rows)."""
    idx = np.arange(N * H) % H
    mt = (idx != 0).astype(np.float32).reshape(-1, 1)       # zero where i%H == 0
    mb = (idx != H - 1).astype(np.float32).reshape(-1, 1)    # zero where i%H == H-1
    return mt, mb


def _even_select(N, H):
    """(N*H/2, N*H) block-diagonal matrix selecting even rows of each image."""
    Ho = H // 2
    E = np.zeros((N * Ho, N * H), np.float32)
    for n in range(N):
        for i in range(Ho):
            E[n * Ho + i, n * H + 2 * i] = 1.0
    return E


def _interleave_place(N, H):
    """(N*2H, N*H) matrices placing phase-even / phase-odd rows of each image."""
    Pe = np.zeros((N * 2 * H, N * H), np.float32)
    Po = np.zeros((N * 2 * H, N * H), np.float32)
    for n in range(N):
        for i in range(H):
            Pe[n * 2 * H + 2 * i, n * H + i] = 1.0
            Po[n * 2 * H + 2 * i + 1, n * H + i] = 1.0
    return Pe, Po


def prepare_params(params, spatial, batch, out_pad=128):
    """Convert natural conv weights into the kernel-ready fused-band pytree."""
    pnat = jax.tree_util.tree_map(lambda a: np.asarray(a, np.float32), params)

    def prep_res(rp, W):
        d = {"A1": _fuse3(rp["block1"]["w"], W),
             "b1": _tile_bias(rp["block1"]["b"], W),
             "A2": _fuse3(rp["block2"]["w"], W),
             "b2": _tile_bias(rp["block2"]["b"], W)}
        if "res" in rp:
            d["Ar"] = _band_1x1(rp["res"]["w"], W)
            d["br"] = _tile_bias(rp["res"]["b"], W)
        return d

    def prep_res_dual(rp, W):
        # First up-res block consumes lane-concat [x | skip]; weight halves are
        # split and re-ordered so the fused band matches [x_m1|s_m1, x|s, x_p1|s_p1].
        # NOTE: assumes the concatenated halves have equal channel counts (true
        # here: dim_out*2 -> dim_in with both halves = dim_out).
        w1 = rp["block1"]["w"]
        ch = w1.shape[2] // 2
        Ax = _band_conv3(w1[:, :, :ch, :], W)
        As = _band_conv3(w1[:, :, ch:, :], W)
        rw = rp["res"]["w"]
        return {"A1": np.concatenate([Ax[0], As[0], Ax[1], As[1], Ax[2], As[2]], axis=0),
                "b1": _tile_bias(rp["block1"]["b"], W),
                "A2": _fuse3(rp["block2"]["w"], W),
                "b2": _tile_bias(rp["block2"]["b"], W),
                "Ar": np.concatenate([_band_1x1(rw[:, :, :ch, :], W),
                                      _band_1x1(rw[:, :, ch:, :], W)], axis=0),
                "br": _tile_bias(rp["res"]["b"], W)}

    prep = {"masks": {}, "downs": [], "ups": []}

    def add_masks(Wv):
        if str(Wv) not in prep["masks"]:
            mt, mb = _masks(batch, Wv)
            prep["masks"][str(Wv)] = {"mt": mt, "mb": mb}

    W = spatial
    for lvl in pnat["downs"]:
        add_masks(W)
        d = {"res1": prep_res(lvl["res1"], W), "res2": prep_res(lvl["res2"], W)}
        if "down" in lvl:
            d["down"] = {"A": _fuse3(lvl["down"]["w"], W, Wo=W // 2, stride=2),
                         "b": _tile_bias(lvl["down"]["b"], W // 2),
                         "E": _even_select(batch, W)}
            W //= 2
        prep["downs"].append(d)

    add_masks(W)
    prep["mid1"] = prep_res(pnat["mid1"], W)
    prep["mid2"] = prep_res(pnat["mid2"], W)

    for lvl in pnat["ups"]:
        add_masks(W)
        u = {"res1": prep_res_dual(lvl["res1"], W), "res2": prep_res(lvl["res2"], W)}
        if "up" in lvl:
            B = _band_up(lvl["up"]["w"], W)
            Pe, Po = _interleave_place(batch, W)
            u["up"] = {"Ae": np.concatenate([B[0], B[2]], axis=0),   # even out rows
                       "Ao": np.concatenate([B[1], B[3]], axis=0),   # odd out rows
                       "b": _tile_bias(lvl["up"]["b"], 2 * W),
                       "Pe": Pe, "Po": Po}
            W *= 2
        prep["ups"].append(u)

    add_masks(W)
    prep["finb"] = {"A": _fuse3(pnat["final_block"]["w"], W),
                    "b": _tile_bias(pnat["final_block"]["b"], W)}

    # Final 1x1 conv: pad output columns to `out_pad` lanes for unmasked stores.
    Af = _band_1x1(pnat["final_conv"]["w"], W)
    bf = _tile_bias(pnat["final_conv"]["b"], W)
    pad = max(out_pad, Af.shape[1]) - Af.shape[1]
    prep["finc"] = {"A": np.pad(Af, ((0, 0), (0, pad))),
                    "b": np.pad(bf, ((0, 0), (0, pad)))}
    return jax.tree_util.tree_map(jnp.asarray, prep)


# ----------------------------------------------------------------------------
# In-kernel compute helpers.
# ----------------------------------------------------------------------------
def _mish(v):
    # x * tanh(softplus(x)) with a numerically stable softplus (f32 everywhere).
    sp = jnp.maximum(v, 0.0) + jnp.log1p(jnp.exp(-jnp.abs(v)))
    return v * jnp.tanh(sp)


# ----------------------------------------------------------------------------
# Fused whole-network Pallas call (single grid step, batch folded into rows).
# ----------------------------------------------------------------------------
def _fused_unet_call(prep, x2d, batch):
    flat, treedef = jax.tree_util.tree_flatten(prep)
    NH, WC_in = x2d.shape
    out_cols = int(prep["finc"]["A"].shape[1])

    def kernel(x_ref, *rest):
        out_ref = rest[-1]
        P = jax.tree_util.tree_unflatten(treedef, list(rest[:-1]))

        def shift(v):
            # Zero-padded row shifts (row i <- row i-1 / i+1), with per-image
            # boundary masks so batch folding along rows stays correct.
            H = v.shape[0] // batch
            m = P["masks"][str(H)]
            z = jnp.zeros_like(v[:1])
            v_m1 = jnp.concatenate([z, v[:-1]], axis=0) * m["mt"][...]
            v_p1 = jnp.concatenate([v[1:], z], axis=0) * m["mb"][...]
            return v_m1, v_p1

        def conv3(v, A, b):
            # Single fused MXU matmul over all 3 kernel rows.
            v_m1, v_p1 = shift(v)
            vc = jnp.concatenate([v_m1, v, v_p1], axis=-1)
            return jnp.dot(vc, A[...], preferred_element_type=jnp.float32) + b[...]

        def res_block(v, p):
            h = _mish(conv3(v, p["A1"], p["b1"]))
            h = _mish(conv3(h, p["A2"], p["b2"]))
            if "Ar" in p:
                r = jnp.dot(v, p["Ar"][...],
                            preferred_element_type=jnp.float32) + p["br"][...]
            else:
                r = v
            return h + r

        x = x_ref[...]                              # (N*H, W*Cin) lane-dense stack
        skips = []
        for lvl in P["downs"]:
            x = res_block(x, lvl["res1"])
            x = res_block(x, lvl["res2"])
            skips.append(x)
            if "down" in lvl:                       # stride-2 conv: 2 MXU matmuls
                v_m1, v_p1 = shift(x)
                vc = jnp.concatenate([v_m1, x, v_p1], axis=-1)
                ve = jnp.dot(lvl["down"]["E"][...], vc,
                             preferred_element_type=jnp.float32)
                x = jnp.dot(ve, lvl["down"]["A"][...],
                            preferred_element_type=jnp.float32) + lvl["down"]["b"][...]

        x = res_block(x, P["mid1"])
        # use_attn=False -> mid_attn is Identity
        x = res_block(x, P["mid2"])

        for lvl in P["ups"]:
            skip = skips.pop()
            x = res_block(jnp.concatenate([x, skip], axis=-1), lvl["res1"])
            x = res_block(x, lvl["res2"])
            if "up" in lvl:                         # transposed conv: 4 MXU matmuls
                up = lvl["up"]
                v_m1, v_p1 = shift(x)
                ye = jnp.dot(jnp.concatenate([v_m1, x], axis=-1), up["Ae"][...],
                             preferred_element_type=jnp.float32)
                yo = jnp.dot(jnp.concatenate([x, v_p1], axis=-1), up["Ao"][...],
                             preferred_element_type=jnp.float32)
                x = (jnp.dot(up["Pe"][...], ye, preferred_element_type=jnp.float32)
                     + jnp.dot(up["Po"][...], yo, preferred_element_type=jnp.float32)
                     + up["b"][...])

        # final_conv = Block(dim, dim) then Conv2d(dim, out_dim, 1); sigmoid out.
        x = _mish(conv3(x, P["finb"]["A"], P["finb"]["b"]))
        x = jax.nn.sigmoid(
            jnp.dot(x, P["finc"]["A"][...], preferred_element_type=jnp.float32)
            + P["finc"]["b"][...])
        out_ref[...] = x.astype(out_ref.dtype)      # (N*H, 128) lane-dense store

    def _full(a):
        nd = a.ndim
        return pl.BlockSpec(a.shape, lambda i, _nd=nd: (0,) * _nd)

    return pl.pallas_call(
        kernel,
        out_shape=jax.ShapeDtypeStruct((NH, out_cols), jnp.float32),
        grid=(1,),
        in_specs=[pl.BlockSpec((NH, WC_in), lambda i: (0, 0))]
                 + [_full(a) for a in flat],
        out_specs=pl.BlockSpec((NH, out_cols), lambda i: (0, 0)),
        compiler_params=pltpu.CompilerParams(
            dimension_semantics=("arbitrary",),
            vmem_limit_bytes=32 * 1024 * 1024),
    )(x2d, *flat)


def unet_cond_forward(prep, x_nchw, out_dim=3):
    """Public forward: NCHW in / NCHW out, one fused Pallas kernel inside."""
    N, C, H, W = x_nchw.shape
    x2d = jnp.transpose(x_nchw, (0, 2, 3, 1)).reshape(N * H, W * C).astype(jnp.float32)
    out2d = _fused_unet_call(prep, x2d, N)                 # (N*H, padded lanes)
    out = out2d[:, :W * out_dim].reshape(N, H, W, out_dim)
    return jnp.transpose(out, (0, 3, 1, 2))                # NHWC -> NCHW


# ----------------------------------------------------------------------------
# Pure-JAX/XLA reference (same module semantics) for correctness checking.
# ----------------------------------------------------------------------------
def _ref_conv(x, p, *, stride=1, padding=1):
    y = jax.lax.conv_general_dilated(
        x, p["w"], window_strides=(stride, stride),
        padding=[(padding, padding), (padding, padding)],
        dimension_numbers=("NHWC", "HWIO", "NHWC"))
    return y + p["b"]


def _ref_res(x, p):
    h = _mish(_ref_conv(x, p["block1"]))
    h = _mish(_ref_conv(h, p["block2"]))
    r = _ref_conv(x, p["res"], padding=0) if "res" in p else x
    return h + r


def ref_forward(params, x_nchw):
    x = jnp.transpose(x_nchw, (0, 2, 3, 1))
    hs = []
    for lvl in params["downs"]:
        x = _ref_res(x, lvl["res1"])
        x = _ref_res(x, lvl["res2"])
        hs.append(x)
        if "down" in lvl:
            x = _ref_conv(x, lvl["down"], stride=2, padding=1)
    x = _ref_res(x, params["mid1"])
    x = _ref_res(x, params["mid2"])
    for lvl in params["ups"]:
        x = jnp.concatenate([x, hs.pop()], axis=-1)
        x = _ref_res(x, lvl["res1"])
        x = _ref_res(x, lvl["res2"])
        if "up" in lvl:
            y = jax.lax.conv_general_dilated(
                x, lvl["up"]["w"], window_strides=(1, 1),
                padding=[(2, 2), (2, 2)], lhs_dilation=(2, 2),
                dimension_numbers=("NHWC", "HWIO", "NHWC"))
            x = y + lvl["up"]["b"]
    x = _mish(_ref_conv(x, params["final_block"]))
    x = jax.nn.sigmoid(_ref_conv(x, params["final_conv"], padding=0))
    return jnp.transpose(x, (0, 3, 1, 2))


# ----------------------------------------------------------------------------
# Deterministic synthetic parameter initialization (natural conv form).
# ----------------------------------------------------------------------------
def _init_conv(key, kh, kw, cin, cout):
    kwk, kbk = jax.random.split(key)
    w = jax.random.normal(kwk, (kh, kw, cin, cout), jnp.float32) / np.sqrt(kh * kw * cin)
    b = 0.01 * jax.random.normal(kbk, (cout,), jnp.float32)
    return {"w": w, "b": b}


def _init_resnet(key, cin, cout):
    k1, k2, k3 = jax.random.split(key, 3)
    p = {"block1": _init_conv(k1, 3, 3, cin, cout),
         "block2": _init_conv(k2, 3, 3, cout, cout)}
    if cin != cout:
        p["res"] = _init_conv(k3, 1, 1, cin, cout)
    return p


def init_unet_params(key, *, in_dim=3, dim=8, out_dim=3, dim_mults=(1, 2)):
    dims = [in_dim] + [dim * m for m in dim_mults]
    in_out = list(zip(dims[:-1], dims[1:]))
    num_res = len(in_out)
    keys = iter(jax.random.split(key, 64))

    downs = []
    for ind, (ci, co) in enumerate(in_out):
        lvl = {"res1": _init_resnet(next(keys), ci, co),
               "res2": _init_resnet(next(keys), co, co)}
        if ind < num_res - 1:
            lvl["down"] = _init_conv(next(keys), 3, 3, co, co)
        downs.append(lvl)

    mid = dims[-1]
    mid1 = _init_resnet(next(keys), mid, mid)
    mid2 = _init_resnet(next(keys), mid, mid)

    ups = []
    for ind, (ci, co) in enumerate(reversed(in_out[1:])):
        lvl = {"res1": _init_resnet(next(keys), co * 2, ci),
               "res2": _init_resnet(next(keys), ci, ci)}
        if ind < num_res - 1:
            lvl["up"] = _init_conv(next(keys), 4, 4, ci, ci)
        ups.append(lvl)

    final_block = _init_conv(next(keys), 3, 3, dim, dim)
    final_conv = _init_conv(next(keys), 1, 1, dim, out_dim)
    return {"downs": downs, "mid1": mid1, "mid2": mid2, "ups": ups,
            "final_block": final_block, "final_conv": final_conv}


if __name__ == "__main__":
    key = jax.random.PRNGKey(0)
    pkey, xkey = jax.random.split(key)
    params = init_unet_params(pkey, in_dim=3, dim=8, out_dim=3, dim_mults=(1, 2))

    # input image, NCHW like the PyTorch module: batch=2, channels=3, 16x16
    x = jax.random.normal(xkey, (2, 3, 16, 16), jnp.float32)

    prep = prepare_params(params, spatial=16, batch=2)

    fwd = jax.jit(unet_cond_forward)
    out = fwd(prep, x)
    jax.block_until_ready(out)

    # correctness check against a pure-JAX/XLA reference of the same module
    ref = jax.jit(ref_forward)(params, x)
    jax.block_until_ready(ref)

    assert out.shape == (2, 3, 16, 16), out.shape
    assert bool(jnp.all(jnp.isfinite(out)))
    assert bool(jnp.all((out >= 0.0) & (out <= 1.0)))      # sigmoid output range
    err = float(jnp.max(jnp.abs(out - ref)))
    assert err < 2e-3, f"mismatch vs reference: max abs err = {err}"
    print("KERNEL_OK")
</pallas_src>

<mosaic_0001>
module attributes {stable_mosaic.version = 11 : i64} {
  func.func @kernel(%arg0: i32, %arg1: memref<32x48xf32, #tpu.memory_space<vmem>>, %arg2: memref<384x64xf32, #tpu.memory_space<vmem>>, %arg3: memref<16x32xf32, #tpu.memory_space<vmem>>, %arg4: memref<1x64xf32, #tpu.memory_space<vmem>>, %arg5: memref<144x128xf32, #tpu.memory_space<vmem>>, %arg6: memref<384x128xf32, #tpu.memory_space<vmem>>, %arg7: memref<48x128xf32, #tpu.memory_space<vmem>>, %arg8: memref<1x128xf32, #tpu.memory_space<vmem>>, %arg9: memref<1x128xf32, #tpu.memory_space<vmem>>, %arg10: memref<1x128xf32, #tpu.memory_space<vmem>>, %arg11: memref<384x128xf32, #tpu.memory_space<vmem>>, %arg12: memref<384x128xf32, #tpu.memory_space<vmem>>, %arg13: memref<1x128xf32, #tpu.memory_space<vmem>>, %arg14: memref<1x128xf32, #tpu.memory_space<vmem>>, %arg15: memref<192x128xf32, #tpu.memory_space<vmem>>, %arg16: memref<384x128xf32, #tpu.memory_space<vmem>>, %arg17: memref<64x128xf32, #tpu.memory_space<vmem>>, %arg18: memref<1x128xf32, #tpu.memory_space<vmem>>, %arg19: memref<1x128xf32, #tpu.memory_space<vmem>>, %arg20: memref<1x128xf32, #tpu.memory_space<vmem>>, %arg21: memref<384x128xf32, #tpu.memory_space<vmem>>, %arg22: memref<384x128xf32, #tpu.memory_space<vmem>>, %arg23: memref<1x128xf32, #tpu.memory_space<vmem>>, %arg24: memref<1x128xf32, #tpu.memory_space<vmem>>, %arg25: memref<384x128xf32, #tpu.memory_space<vmem>>, %arg26: memref<1x128xf32, #tpu.memory_space<vmem>>, %arg27: memref<128x128xf32, #tpu.memory_space<vmem>>, %arg28: memref<1x128xf32, #tpu.memory_space<vmem>>, %arg29: memref<32x1xf32, #tpu.memory_space<vmem>>, %arg30: memref<32x1xf32, #tpu.memory_space<vmem>>, %arg31: memref<16x1xf32, #tpu.memory_space<vmem>>, %arg32: memref<16x1xf32, #tpu.memory_space<vmem>>, %arg33: memref<384x128xf32, #tpu.memory_space<vmem>>, %arg34: memref<384x128xf32, #tpu.memory_space<vmem>>, %arg35: memref<1x128xf32, #tpu.memory_space<vmem>>, %arg36: memref<1x128xf32, #tpu.memory_space<vmem>>, %arg37: memref<384x128xf32, #tpu.memory_space<vmem>>, %arg38: memref<384x128xf32, #tpu.memory_space<vmem>>, %arg39: memref<1x128xf32, #tpu.memory_space<vmem>>, %arg40: memref<1x128xf32, #tpu.memory_space<vmem>>, %arg41: memref<768x64xf32, #tpu.memory_space<vmem>>, %arg42: memref<192x64xf32, #tpu.memory_space<vmem>>, %arg43: memref<256x64xf32, #tpu.memory_space<vmem>>, %arg44: memref<1x64xf32, #tpu.memory_space<vmem>>, %arg45: memref<1x64xf32, #tpu.memory_space<vmem>>, %arg46: memref<1x64xf32, #tpu.memory_space<vmem>>, %arg47: memref<192x64xf32, #tpu.memory_space<vmem>>, %arg48: memref<192x64xf32, #tpu.memory_space<vmem>>, %arg49: memref<1x64xf32, #tpu.memory_space<vmem>>, %arg50: memref<1x64xf32, #tpu.memory_space<vmem>>, %arg51: memref<128x128xf32, #tpu.memory_space<vmem>>, %arg52: memref<128x128xf32, #tpu.memory_space<vmem>>, %arg53: memref<32x16xf32, #tpu.memory_space<vmem>>, %arg54: memref<32x16xf32, #tpu.memory_space<vmem>>, %arg55: memref<1x128xf32, #tpu.memory_space<vmem>>, %arg56: memref<32x128xf32, #tpu.memory_space<vmem>>) attributes {dimension_semantics = [#tpu.dimension_semantics<arbitrary>], iteration_bounds = array<i64: 1>, scalar_prefetch = 0 : i64, scratch_operands = 0 : i64, tpu.core_type = #tpu.core_type<tc>, window_params = [{pipeline_mode = #tpu.pipeline_mode<synchronous>, transform_indices = @transform_0, window_bounds = array<i64: 32, 48>}, {pipeline_mode = #tpu.pipeline_mode<synchronous>, transform_indices = @transform_1, window_bounds = array<i64: 384, 64>}, {pipeline_mode = #tpu.pipeline_mode<synchronous>, transform_indices = @transform_2, window_bounds = array<i64: 16, 32>}, {pipeline_mode = #tpu.pipeline_mode<synchronous>, transform_indices = @transform_3, window_bounds = array<i64: 1, 64>}, {pipeline_mode = #tpu.pipeline_mode<synchronous>, transform_indices = @transform_4, window_bounds = array<i64: 144, 128>}, {pipeline_mode = #tpu.pipeline_mode<synchronous>, transform_indices = @transform_5, window_bounds = array<i64: 384, 128>}, {pipeline_mode = #tpu.pipeline_mode<synchronous>, transform_indices = @transform_6, window_bounds = array<i64: 48, 128>}, {pipeline_mode = #tpu.pipeline_mode<synchronous>, transform_indices = @transform_7, window_bounds = array<i64: 1, 128>}, {pipeline_mode = #tpu.pipeline_mode<synchronous>, transform_indices = @transform_8, window_bounds = array<i64: 1, 128>}, {pipeline_mode = #tpu.pipeline_mode<synchronous>, transform_indices = @transform_9, window_bounds = array<i64: 1, 128>}, {pipeline_mode = #tpu.pipeline_mode<synchronous>, transform_indices = @transform_10, window_bounds = array<i64: 384, 128>}, {pipeline_mode = #tpu.pipeline_mode<synchronous>, transform_indices = @transform_11, window_bounds = array<i64: 384, 128>}, {pipeline_mode = #tpu.pipeline_mode<synchronous>, transform_indices = @transform_12, window_bounds = array<i64: 1, 128>}, {pipeline_mode = #tpu.pipeline_mode<synchronous>, transform_indices = @transform_13, window_bounds = array<i64: 1, 128>}, {pipeline_mode = #tpu.pipeline_mode<synchronous>, transform_indices = @transform_14, window_bounds = array<i64: 192, 128>}, {pipeline_mode = #tpu.pipeline_mode<synchronous>, transform_indices = @transform_15, window_bounds = array<i64: 384, 128>}, {pipeline_mode = #tpu.pipeline_mode<synchronous>, transform_indices = @transform_16, window_bounds = array<i64: 64, 128>}, {pipeline_mode = #tpu.pipeline_mode<synchronous>, transform_indices = @transform_17, window_bounds = array<i64: 1, 128>}, {pipeline_mode = #tpu.pipeline_mode<synchronous>, transform_indices = @transform_18, window_bounds = array<i64: 1, 128>}, {pipeline_mode = #tpu.pipeline_mode<synchronous>, transform_indices = @transform_19, window_bounds = array<i64: 1, 128>}, {pipeline_mode = #tpu.pipeline_mode<synchronous>, transform_indices = @transform_20, window_bounds = array<i64: 384, 128>}, {pipeline_mode = #tpu.pipeline_mode<synchronous>, transform_indices = @transform_21, window_bounds = array<i64: 384, 128>}, {pipeline_mode = #tpu.pipeline_mode<synchronous>, transform_indices = @transform_22, window_bounds = array<i64: 1, 128>}, {pipeline_mode = #tpu.pipeline_mode<synchronous>, transform_indices = @transform_23, window_bounds = array<i64: 1, 128>}, {pipeline_mode = #tpu.pipeline_mode<synchronous>, transform_indices = @transform_24, window_bounds = array<i64: 384, 128>}, {pipeline_mode = #tpu.pipeline_mode<synchronous>, transform_indices = @transform_25, window_bounds = array<i64: 1, 128>}, {pipeline_mode = #tpu.pipeline_mode<synchronous>, transform_indices = @transform_26, window_bounds = array<i64: 128, 128>}, {pipeline_mode = #tpu.pipeline_mode<synchronous>, transform_indices = @transform_27, window_bounds = array<i64: 1, 128>}, {pipeline_mode = #tpu.pipeline_mode<synchronous>, transform_indices = @transform_28, window_bounds = array<i64: 32, 1>}, {pipeline_mode = #tpu.pipeline_mode<synchronous>, transform_indices = @transform_29, window_bounds = array<i64: 32, 1>}, {pipeline_mode = #tpu.pipeline_mode<synchronous>, transform_indices = @transform_30, window_bounds = array<i64: 16, 1>}, {pipeline_mode = #tpu.pipeline_mode<synchronous>, transform_indices = @transform_31, window_bounds = array<i64: 16, 1>}, {pipeline_mode = #tpu.pipeline_mode<synchronous>, transform_indices = @transform_32, window_bounds = array<i64: 384, 128>}, {pipeline_mode = #tpu.pipeline_mode<synchronous>, transform_indices = @transform_33, window_bounds = array<i64: 384, 128>}, {pipeline_mode = #tpu.pipeline_mode<synchronous>, transform_indices = @transform_34, window_bounds = array<i64: 1, 128>}, {pipeline_mode = #tpu.pipeline_mode<synchronous>, transform_indices = @transform_35, window_bounds = array<i64: 1, 128>}, {pipeline_mode = #tpu.pipeline_mode<synchronous>, transform_indices = @transform_36, window_bounds = array<i64: 384, 128>}, {pipeline_mode = #tpu.pipeline_mode<synchronous>, transform_indices = @transform_37, window_bounds = array<i64: 384, 128>}, {pipeline_mode = #tpu.pipeline_mode<synchronous>, transform_indices = @transform_38, window_bounds = array<i64: 1, 128>}, {pipeline_mode = #tpu.pipeline_mode<synchronous>, transform_indices = @transform_39, window_bounds = array<i64: 1, 128>}, {pipeline_mode = #tpu.pipeline_mode<synchronous>, transform_indices = @transform_40, window_bounds = array<i64: 768, 64>}, {pipeline_mode = #tpu.pipeline_mode<synchronous>, transform_indices = @transform_41, window_bounds = array<i64: 192, 64>}, {pipeline_mode = #tpu.pipeline_mode<synchronous>, transform_indices = @transform_42, window_bounds = array<i64: 256, 64>}, {pipeline_mode = #tpu.pipeline_mode<synchronous>, transform_indices = @transform_43, window_bounds = array<i64: 1, 64>}, {pipeline_mode = #tpu.pipeline_mode<synchronous>, transform_indices = @transform_44, window_bounds = array<i64: 1, 64>}, {pipeline_mode = #tpu.pipeline_mode<synchronous>, transform_indices = @transform_45, window_bounds = array<i64: 1, 64>}, {pipeline_mode = #tpu.pipeline_mode<synchronous>, transform_indices = @transform_46, window_bounds = array<i64: 192, 64>}, {pipeline_mode = #tpu.pipeline_mode<synchronous>, transform_indices = @transform_47, window_bounds = array<i64: 192, 64>}, {pipeline_mode = #tpu.pipeline_mode<synchronous>, transform_indices = @transform_48, window_bounds = array<i64: 1, 64>}, {pipeline_mode = #tpu.pipeline_mode<synchronous>, transform_indices = @transform_49, window_bounds = array<i64: 1, 64>}, {pipeline_mode = #tpu.pipeline_mode<synchronous>, transform_indices = @transform_50, window_bounds = array<i64: 128, 128>}, {pipeline_mode = #tpu.pipeline_mode<synchronous>, transform_indices = @transform_51, window_bounds = array<i64: 128, 128>}, {pipeline_mode = #tpu.pipeline_mode<synchronous>, transform_indices = @transform_52, window_bounds = array<i64: 32, 16>}, {pipeline_mode = #tpu.pipeline_mode<synchronous>, transform_indices = @transform_53, window_bounds = array<i64: 32, 16>}, {pipeline_mode = #tpu.pipeline_mode<synchronous>, transform_indices = @transform_54, window_bounds = array<i64: 1, 128>}, {pipeline_mode = #tpu.pipeline_mode<synchronous>, transform_indices = @transform_55, window_bounds = array<i64: 32, 128>}]} {
    %c0 = arith.constant 0 : index
    %c0_0 = arith.constant 0 : index
    %0 = vector.load %arg1[%c0, %c0_0] : memref<32x48xf32, #tpu.memory_space<vmem>>, vector<32x48xf32>
    %cst = arith.constant 0.000000e+00 : f32
    %1 = vector.broadcast %cst : f32 to vector<1x48xf32>
    %2 = vector.extract_strided_slice %0 {offsets = [0, 0], sizes = [31, 48], strides = [1, 1]} : vector<32x48xf32> to vector<31x48xf32>
    %3 = tpu.concatenate %1, %2 in 0 : vector<1x48xf32>, vector<31x48xf32> -> vector<32x48xf32>
    %c0_1 = arith.constant 0 : index
    %c0_2 = arith.constant 0 : index
    %4 = vector.load %arg30[%c0_1, %c0_2] : memref<32x1xf32, #tpu.memory_space<vmem>>, vector<32x1xf32>
    %5 = vector.broadcast %4 : vector<32x1xf32> to vector<32x48xf32>
    %6 = arith.mulf %3, %5 : vector<32x48xf32>
    %7 = vector.extract_strided_slice %0 {offsets = [1, 0], sizes = [31, 48], strides = [1, 1]} : vector<32x48xf32> to vector<31x48xf32>
    %8 = tpu.concatenate %7, %1 in 0 : vector<31x48xf32>, vector<1x48xf32> -> vector<32x48xf32>
    %c0_3 = arith.constant 0 : index
    %c0_4 = arith.constant 0 : index
    %9 = vector.load %arg29[%c0_3, %c0_4] : memref<32x1xf32, #tpu.memory_space<vmem>>, vector<32x1xf32>
    %10 = vector.broadcast %9 : vector<32x1xf32> to vector<32x48xf32>
    %11 = arith.mulf %8, %10 : vector<32x48xf32>
    %12 = tpu.concatenate %6, %0, %11 in 1 : vector<32x48xf32>, vector<32x48xf32>, vector<32x48xf32> -> vector<32x144xf32>
    %c0_5 = arith.constant 0 : index
    %c0_6 = arith.constant 0 : index
    %13 = vector.load %arg5[%c0_5, %c0_6] : memref<144x128xf32, #tpu.memory_space<vmem>>, vector<144x128xf32>
    %cst_7 = arith.constant dense<0.000000e+00> : vector<32x128xf32>
    %14 = tpu.matmul %12, %13, %cst_7 {dimension_numbers = #tpu.dot_dimension_numbers<[1], [0], [0], [1], [0, 0, 1, 1], [], []>} : vector<32x144xf32>, vector<144x128xf32>, vector<32x128xf32> -> vector<32x128xf32>
    %c0_8 = arith.constant 0 : index
    %c0_9 = arith.constant 0 : index
    %15 = vector.load %arg8[%c0_8, %c0_9] : memref<1x128xf32, #tpu.memory_space<vmem>>, vector<1x128xf32>
    %16 = vector.broadcast %15 : vector<1x128xf32> to vector<32x128xf32>
    %17 = arith.addf %14, %16 : vector<32x128xf32>
    %cst_10 = arith.constant 0.000000e+00 : f32
    %18 = vector.broadcast %cst_10 : f32 to vector<32x128xf32>
    %19 = arith.maximumf %17, %18 : vector<32x128xf32>
    %20 = math.absf %17 : vector<32x128xf32>
    %cst_11 = arith.constant 0.000000e+00 : f32
    %21 = vector.broadcast %cst_11 : f32 to vector<32x128xf32>
    %22 = arith.subf %21, %20 : vector<32x128xf32>
    %23 = math.exp %22 : vector<32x128xf32>
    %24 = math.log1p %23 : vector<32x128xf32>
    %25 = arith.addf %19, %24 : vector<32x128xf32>
    %26 = math.tanh %25 : vector<32x128xf32>
    %27 = arith.mulf %17, %26 : vector<32x128xf32>
    %cst_12 = arith.constant 0.000000e+00 : f32
    %28 = vector.broadcast %cst_12 : f32 to vector<1x128xf32>
    %29 = vector.extract_strided_slice %27 {offsets = [0, 0], sizes = [31, 128], strides = [1, 1]} : vector<32x128xf32> to vector<31x128xf32>
    %30 = tpu.concatenate %28, %29 in 0 : vector<1x128xf32>, vector<31x128xf32> -> vector<32x128xf32>
    %c0_13 = arith.constant 0 : index
    %c0_14 = arith.constant 0 : index
    %31 = vector.load %arg30[%c0_13, %c0_14] : memref<32x1xf32, #tpu.memory_space<vmem>>, vector<32x1xf32>
    %32 = vector.broadcast %31 : vector<32x1xf32> to vector<32x128xf32>
    %33 = arith.mulf %30, %32 : vector<32x128xf32>
    %34 = vector.extract_strided_slice %27 {offsets = [1, 0], sizes = [31, 128], strides = [1, 1]} : vector<32x128xf32> to vector<31x128xf32>
    %35 = tpu.concatenate %34, %28 in 0 : vector<31x128xf32>, vector<1x128xf32> -> vector<32x128xf32>
    %c0_15 = arith.constant 0 : index
    %c0_16 = arith.constant 0 : index
    %36 = vector.load %arg29[%c0_15, %c0_16] : memref<32x1xf32, #tpu.memory_space<vmem>>, vector<32x1xf32>
    %37 = vector.broadcast %36 : vector<32x1xf32> to vector<32x128xf32>
    %38 = arith.mulf %35, %37 : vector<32x128xf32>
    %39 = tpu.concatenate %33, %27, %38 in 1 : vector<32x128xf32>, vector<32x128xf32>, vector<32x128xf32> -> vector<32x384xf32>
    %c0_17 = arith.constant 0 : index
    %c0_18 = arith.constant 0 : index
    %40 = vector.load %arg6[%c0_17, %c0_18] : memref<384x128xf32, #tpu.memory_space<vmem>>, vector<384x128xf32>
    %cst_19 = arith.constant dense<0.000000e+00> : vector<32x128xf32>
    %41 = tpu.matmul %39, %40, %cst_19 {dimension_numbers = #tpu.dot_dimension_numbers<[1], [0], [0], [1], [0, 0, 1, 1], [], []>} : vector<32x384xf32>, vector<384x128xf32>, vector<32x128xf32> -> vector<32x128xf32>
    %c0_20 = arith.constant 0 : index
    %c0_21 = arith.constant 0 : index
    %42 = vector.load %arg9[%c0_20, %c0_21] : memref<1x128xf32, #tpu.memory_space<vmem>>, vector<1x128xf32>
    %43 = vector.broadcast %42 : vector<1x128xf32> to vector<32x128xf32>
    %44 = arith.addf %41, %43 : vector<32x128xf32>
    %cst_22 = arith.constant 0.000000e+00 : f32
    %45 = vector.broadcast %cst_22 : f32 to vector<32x128xf32>
    %46 = arith.maximumf %44, %45 : vector<32x128xf32>
    %47 = math.absf %44 : vector<32x128xf32>
    %cst_23 = arith.constant 0.000000e+00 : f32
    %48 = vector.broadcast %cst_23 : f32 to vector<32x128xf32>
    %49 = arith.subf %48, %47 : vector<32x128xf32>
    %50 = math.exp %49 : vector<32x128xf32>
    %51 = math.log1p %50 : vector<32x128xf32>
    %52 = arith.addf %46, %51 : vector<32x128xf32>
    %53 = math.tanh %52 : vector<32x128xf32>
    %54 = arith.mulf %44, %53 : vector<32x128xf32>
    %c0_24 = arith.constant 0 : index
    %c0_25 = arith.constant 0 : index
    %55 = vector.load %arg7[%c0_24, %c0_25] : memref<48x128xf32, #tpu.memory_space<vmem>>, vector<48x128xf32>
    %cst_26 = arith.constant dense<0.000000e+00> : vector<32x128xf32>
    %56 = tpu.matmul %0, %55, %cst_26 {dimension_numbers = #tpu.dot_dimension_numbers<[1], [0], [0], [1], [0, 0, 1, 1], [], []>} : vector<32x48xf32>, vector<48x128xf32>, vector<32x128xf32> -> vector<32x128xf32>
    %c0_27 = arith.constant 0 : index
    %c0_28 = arith.constant 0 : index
    %57 = vector.load %arg10[%c0_27, %c0_28] : memref<1x128xf32, #tpu.memory_space<vmem>>, vector<1x128xf32>
    %58 = vector.broadcast %57 : vector<1x128xf32> to vector<32x128xf32>
    %59 = arith.addf %56, %58 : vector<32x128xf32>
    %60 = arith.addf %54, %59 : vector<32x128xf32>
    %cst_29 = arith.constant 0.000000e+00 : f32
    %61 = vector.broadcast %cst_29 : f32 to vector<1x128xf32>
    %62 = vector.extract_strided_slice %60 {offsets = [0, 0], sizes = [31, 128], strides = [1, 1]} : vector<32x128xf32> to vector<31x128xf32>
    %63 = tpu.concatenate %61, %62 in 0 : vector<1x128xf32>, vector<31x128xf32> -> vector<32x128xf32>
    %c0_30 = arith.constant 0 : index
    %c0_31 = arith.constant 0 : index
    %64 = vector.load %arg30[%c0_30, %c0_31] : memref<32x1xf32, #tpu.memory_space<vmem>>, vector<32x1xf32>
    %65 = vector.broadcast %64 : vector<32x1xf32> to vector<32x128xf32>
    %66 = arith.mulf %63, %65 : vector<32x128xf32>
    %67 = vector.extract_strided_slice %60 {offsets = [1, 0], sizes = [31, 128], strides = [1, 1]} : vector<32x128xf32> to vector<31x128xf32>
    %68 = tpu.concatenate %67, %61 in 0 : vector<31x128xf32>, vector<1x128xf32> -> vector<32x128xf32>
    %c0_32 = arith.constant 0 : index
    %c0_33 = arith.constant 0 : index
    %69 = vector.load %arg29[%c0_32, %c0_33] : memref<32x1xf32, #tpu.memory_space<vmem>>, vector<32x1xf32>
    %70 = vector.broadcast %69 : vector<32x1xf32> to vector<32x128xf32>
    %71 = arith.mulf %68, %70 : vector<32x128xf32>
    %72 = tpu.concatenate %66, %60, %71 in 1 : vector<32x128xf32>, vector<32x128xf32>, vector<32x128xf32> -> vector<32x384xf32>
    %c0_34 = arith.constant 0 : index
    %c0_35 = arith.constant 0 : index
    %73 = vector.load %arg11[%c0_34, %c0_35] : memref<384x128xf32, #tpu.memory_space<vmem>>, vector<384x128xf32>
    %cst_36 = arith.constant dense<0.000000e+00> : vector<32x128xf32>
    %74 = tpu.matmul %72, %73, %cst_36 {dimension_numbers = #tpu.dot_dimension_numbers<[1], [0], [0], [1], [0, 0, 1, 1], [], []>} : vector<32x384xf32>, vector<384x128xf32>, vector<32x128xf32> -> vector<32x128xf32>
    %c0_37 = arith.constant 0 : index
    %c0_38 = arith.constant 0 : index
    %75 = vector.load %arg13[%c0_37, %c0_38] : memref<1x128xf32, #tpu.memory_space<vmem>>, vector<1x128xf32>
    %76 = vector.broadcast %75 : vector<1x128xf32> to vector<32x128xf32>
    %77 = arith.addf %74, %76 : vector<32x128xf32>
    %cst_39 = arith.constant 0.000000e+00 : f32
    %78 = vector.broadcast %cst_39 : f32 to vector<32x128xf32>
    %79 = arith.maximumf %77, %78 : vector<32x128xf32>
    %80 = math.absf %77 : vector<32x128xf32>
    %cst_40 = arith.constant 0.000000e+00 : f32
    %81 = vector.broadcast %cst_40 : f32 to vector<32x128xf32>
    %82 = arith.subf %81, %80 : vector<32x128xf32>
    %83 = math.exp %82 : vector<32x128xf32>
    %84 = math.log1p %83 : vector<32x128xf32>
    %85 = arith.addf %79, %84 : vector<32x128xf32>
    %86 = math.tanh %85 : vector<32x128xf32>
    %87 = arith.mulf %77, %86 : vector<32x128xf32>
    %cst_41 = arith.constant 0.000000e+00 : f32
    %88 = vector.broadcast %cst_41 : f32 to vector<1x128xf32>
    %89 = vector.extract_strided_slice %87 {offsets = [0, 0], sizes = [31, 128], strides = [1, 1]} : vector<32x128xf32> to vector<31x128xf32>
    %90 = tpu.concatenate %88, %89 in 0 : vector<1x128xf32>, vector<31x128xf32> -> vector<32x128xf32>
    %c0_42 = arith.constant 0 : index
    %c0_43 = arith.constant 0 : index
    %91 = vector.load %arg30[%c0_42, %c0_43] : memref<32x1xf32, #tpu.memory_space<vmem>>, vector<32x1xf32>
    %92 = vector.broadcast %91 : vector<32x1xf32> to vector<32x128xf32>
    %93 = arith.mulf %90, %92 : vector<32x128xf32>
    %94 = vector.extract_strided_slice %87 {offsets = [1, 0], sizes = [31, 128], strides = [1, 1]} : vector<32x128xf32> to vector<31x128xf32>
    %95 = tpu.concatenate %94, %88 in 0 : vector<31x128xf32>, vector<1x128xf32> -> vector<32x128xf32>
    %c0_44 = arith.constant 0 : index
    %c0_45 = arith.constant 0 : index
    %96 = vector.load %arg29[%c0_44, %c0_45] : memref<32x1xf32, #tpu.memory_space<vmem>>, vector<32x1xf32>
    %97 = vector.broadcast %96 : vector<32x1xf32> to vector<32x128xf32>
    %98 = arith.mulf %95, %97 : vector<32x128xf32>
    %99 = tpu.concatenate %93, %87, %98 in 1 : vector<32x128xf32>, vector<32x128xf32>, vector<32x128xf32> -> vector<32x384xf32>
    %c0_46 = arith.constant 0 : index
    %c0_47 = arith.constant 0 : index
    %100 = vector.load %arg12[%c0_46, %c0_47] : memref<384x128xf32, #tpu.memory_space<vmem>>, vector<384x128xf32>
    %cst_48 = arith.constant dense<0.000000e+00> : vector<32x128xf32>
    %101 = tpu.matmul %99, %100, %cst_48 {dimension_numbers = #tpu.dot_dimension_numbers<[1], [0], [0], [1], [0, 0, 1, 1], [], []>} : vector<32x384xf32>, vector<384x128xf32>, vector<32x128xf32> -> vector<32x128xf32>
    %c0_49 = arith.constant 0 : index
    %c0_50 = arith.constant 0 : index
    %102 = vector.load %arg14[%c0_49, %c0_50] : memref<1x128xf32, #tpu.memory_space<vmem>>, vector<1x128xf32>
    %103 = vector.broadcast %102 : vector<1x128xf32> to vector<32x128xf32>
    %104 = arith.addf %101, %103 : vector<32x128xf32>
    %cst_51 = arith.constant 0.000000e+00 : f32
    %105 = vector.broadcast %cst_51 : f32 to vector<32x128xf32>
    %106 = arith.maximumf %104, %105 : vector<32x128xf32>
    %107 = math.absf %104 : vector<32x128xf32>
    %cst_52 = arith.constant 0.000000e+00 : f32
    %108 = vector.broadcast %cst_52 : f32 to vector<32x128xf32>
    %109 = arith.subf %108, %107 : vector<32x128xf32>
    %110 = math.exp %109 : vector<32x128xf32>
    %111 = math.log1p %110 : vector<32x128xf32>
    %112 = arith.addf %106, %111 : vector<32x128xf32>
    %113 = math.tanh %112 : vector<32x128xf32>
    %114 = arith.mulf %104, %113 : vector<32x128xf32>
    %115 = arith.addf %114, %60 : vector<32x128xf32>
    %cst_53 = arith.constant 0.000000e+00 : f32
    %116 = vector.broadcast %cst_53 : f32 to vector<1x128xf32>
    %117 = vector.extract_strided_slice %115 {offsets = [0, 0], sizes = [31, 128], strides = [1, 1]} : vector<32x128xf32> to vector<31x128xf32>
    %118 = tpu.concatenate %116, %117 in 0 : vector<1x128xf32>, vector<31x128xf32> -> vector<32x128xf32>
    %c0_54 = arith.constant 0 : index
    %c0_55 = arith.constant 0 : index
    %119 = vector.load %arg30[%c0_54, %c0_55] : memref<32x1xf32, #tpu.memory_space<vmem>>, vector<32x1xf32>
    %120 = vector.broadcast %119 : vector<32x1xf32> to vector<32x128xf32>
    %121 = arith.mulf %118, %120 : vector<32x128xf32>
    %122 = vector.extract_strided_slice %115 {offsets = [1, 0], sizes = [31, 128], strides = [1, 1]} : vector<32x128xf32> to vector<31x128xf32>
    %123 = tpu.concatenate %122, %116 in 0 : vector<31x128xf32>, vector<1x128xf32> -> vector<32x128xf32>
    %c0_56 = arith.constant 0 : index
    %c0_57 = arith.constant 0 : index
    %124 = vector.load %arg29[%c0_56, %c0_57] : memref<32x1xf32, #tpu.memory_space<vmem>>, vector<32x1xf32>
    %125 = vector.broadcast %124 : vector<32x1xf32> to vector<32x128xf32>
    %126 = arith.mulf %123, %125 : vector<32x128xf32>
    %127 = tpu.concatenate %121, %115, %126 in 1 : vector<32x128xf32>, vector<32x128xf32>, vector<32x128xf32> -> vector<32x384xf32>
    %c0_58 = arith.constant 0 : index
    %c0_59 = arith.constant 0 : index
    %128 = vector.load %arg3[%c0_58, %c0_59] : memref<16x32xf32, #tpu.memory_space<vmem>>, vector<16x32xf32>
    %cst_60 = arith.constant dense<0.000000e+00> : vector<16x384xf32>
    %129 = tpu.matmul %128, %127, %cst_60 {dimension_numbers = #tpu.dot_dimension_numbers<[1], [0], [0], [1], [0, 0, 1, 1], [], []>} : vector<16x32xf32>, vector<32x384xf32>, vector<16x384xf32> -> vector<16x384xf32>
    %c0_61 = arith.constant 0 : index
    %c0_62 = arith.constant 0 : index
    %130 = vector.load %arg2[%c0_61, %c0_62] : memref<384x64xf32, #tpu.memory_space<vmem>>, vector<384x64xf32>
    %cst_63 = arith.constant dense<0.000000e+00> : vector<16x64xf32>
    %131 = tpu.matmul %129, %130, %cst_63 {dimension_numbers = #tpu.dot_dimension_numbers<[1], [0], [0], [1], [0, 0, 1, 1], [], []>} : vector<16x384xf32>, vector<384x64xf32>, vector<16x64xf32> -> vector<16x64xf32>
    %c0_64 = arith.constant 0 : index
    %c0_65 = arith.constant 0 : index
    %132 = vector.load %arg4[%c0_64, %c0_65] : memref<1x64xf32, #tpu.memory_space<vmem>>, vector<1x64xf32>
    %133 = vector.broadcast %132 : vector<1x64xf32> to vector<16x64xf32>
    %134 = arith.addf %131, %133 : vector<16x64xf32>
    %cst_66 = arith.constant 0.000000e+00 : f32
    %135 = vector.broadcast %cst_66 : f32 to vector<1x64xf32>
    %136 = vector.extract_strided_slice %134 {offsets = [0, 0], sizes = [15, 64], strides = [1, 1]} : vector<16x64xf32> to vector<15x64xf32>
    %137 = tpu.concatenate %135, %136 in 0 : vector<1x64xf32>, vector<15x64xf32> -> vector<16x64xf32>
    %c0_67 = arith.constant 0 : index
    %c0_68 = arith.constant 0 : index
    %138 = vector.load %arg32[%c0_67, %c0_68] : memref<16x1xf32, #tpu.memory_space<vmem>>, vector<16x1xf32>
    %139 = vector.broadcast %138 : vector<16x1xf32> to vector<16x64xf32>
    %140 = arith.mulf %137, %139 : vector<16x64xf32>
    %141 = vector.extract_strided_slice %134 {offsets = [1, 0], sizes = [15, 64], strides = [1, 1]} : vector<16x64xf32> to vector<15x64xf32>
    %142 = tpu.concatenate %141, %135 in 0 : vector<15x64xf32>, vector<1x64xf32> -> vector<16x64xf32>
    %c0_69 = arith.constant 0 : index
    %c0_70 = arith.constant 0 : index
    %143 = vector.load %arg31[%c0_69, %c0_70] : memref<16x1xf32, #tpu.memory_space<vmem>>, vector<16x1xf32>
    %144 = vector.broadcast %143 : vector<16x1xf32> to vector<16x64xf32>
    %145 = arith.mulf %142, %144 : vector<16x64xf32>
    %146 = tpu.concatenate %140, %134, %145 in 1 : vector<16x64xf32>, vector<16x64xf32>, vector<16x64xf32> -> vector<16x192xf32>
    %c0_71 = arith.constant 0 : index
    %c0_72 = arith.constant 0 : index
    %147 = vector.load %arg15[%c0_71, %c0_72] : memref<192x128xf32, #tpu.memory_space<vmem>>, vector<192x128xf32>
    %cst_73 = arith.constant dense<0.000000e+00> : vector<16x128xf32>
    %148 = tpu.matmul %146, %147, %cst_73 {dimension_numbers = #tpu.dot_dimension_numbers<[1], [0], [0], [1], [0, 0, 1, 1], [], []>} : vector<16x192xf32>, vector<192x128xf32>, vector<16x128xf32> -> vector<16x128xf32>
    %c0_74 = arith.constant 0 : index
    %c0_75 = arith.constant 0 : index
    %149 = vector.load %arg18[%c0_74, %c0_75] : memref<1x128xf32, #tpu.memory_space<vmem>>, vector<1x128xf32>
    %150 = vector.broadcast %149 : vector<1x128xf32> to vector<16x128xf32>
    %151 = arith.addf %148, %150 : vector<16x128xf32>
    %cst_76 = arith.constant 0.000000e+00 : f32
    %152 = vector.broadcast %cst_76 : f32 to vector<16x128xf32>
    %153 = arith.maximumf %151, %152 : vector<16x128xf32>
    %154 = math.absf %151 : vector<16x128xf32>
    %cst_77 = arith.constant 0.000000e+00 : f32
    %155 = vector.broadcast %cst_77 : f32 to vector<16x128xf32>
    %156 = arith.subf %155, %154 : vector<16x128xf32>
    %157 = math.exp %156 : vector<16x128xf32>
    %158 = math.log1p %157 : vector<16x128xf32>
    %159 = arith.addf %153, %158 : vector<16x128xf32>
    %160 = math.tanh %159 : vector<16x128xf32>
    %161 = arith.mulf %151, %160 : vector<16x128xf32>
    %cst_78 = arith.constant 0.000000e+00 : f32
    %162 = vector.broadcast %cst_78 : f32 to vector<1x128xf32>
    %163 = vector.extract_strided_slice %161 {offsets = [0, 0], sizes = [15, 128], strides = [1, 1]} : vector<16x128xf32> to vector<15x128xf32>
    %164 = tpu.concatenate %162, %163 in 0 : vector<1x128xf32>, vector<15x128xf32> -> vector<16x128xf32>
    %c0_79 = arith.constant 0 : index
    %c0_80 = arith.constant 0 : index
    %165 = vector.load %arg32[%c0_79, %c0_80] : memref<16x1xf32, #tpu.memory_space<vmem>>, vector<16x1xf32>
    %166 = vector.broadcast %165 : vector<16x1xf32> to vector<16x128xf32>
    %167 = arith.mulf %164, %166 : vector<16x128xf32>
    %168 = vector.extract_strided_slice %161 {offsets = [1, 0], sizes = [15, 128], strides = [1, 1]} : vector<16x128xf32> to vector<15x128xf32>
    %169 = tpu.concatenate %168, %162 in 0 : vector<15x128xf32>, vector<1x128xf32> -> vector<16x128xf32>
    %c0_81 = arith.constant 0 : index
    %c0_82 = arith.constant 0 : index
    %170 = vector.load %arg31[%c0_81, %c0_82] : memref<16x1xf32, #tpu.memory_space<vmem>>, vector<16x1xf32>
    %171 = vector.broadcast %170 : vector<16x1xf32> to vector<16x128xf32>
    %172 = arith.mulf %169, %171 : vector<16x128xf32>
    %173 = tpu.concatenate %167, %161, %172 in 1 : vector<16x128xf32>, vector<16x128xf32>, vector<16x128xf32> -> vector<16x384xf32>
    %c0_83 = arith.constant 0 : index
    %c0_84 = arith.constant 0 : index
    %174 = vector.load %arg16[%c0_83, %c0_84] : memref<384x128xf32, #tpu.memory_space<vmem>>, vector<384x128xf32>
    %cst_85 = arith.constant dense<0.000000e+00> : vector<16x128xf32>
    %175 = tpu.matmul %173, %174, %cst_85 {dimension_numbers = #tpu.dot_dimension_numbers<[1], [0], [0], [1], [0, 0, 1, 1], [], []>} : vector<16x384xf32>, vector<384x128xf32>, vector<16x128xf32> -> vector<16x128xf32>
    %c0_86 = arith.constant 0 : index
    %c0_87 = arith.constant 0 : index
    %176 = vector.load %arg19[%c0_86, %c0_87] : memref<1x128xf32, #tpu.memory_space<vmem>>, vector<1x128xf32>
    %177 = vector.broadcast %176 : vector<1x128xf32> to vector<16x128xf32>
    %178 = arith.addf %175, %177 : vector<16x128xf32>
    %cst_88 = arith.constant 0.000000e+00 : f32
    %179 = vector.broadcast %cst_88 : f32 to vector<16x128xf32>
    %180 = arith.maximumf %178, %179 : vector<16x128xf32>
    %181 = math.absf %178 : vector<16x128xf32>
    %cst_89 = arith.constant 0.000000e+00 : f32
    %182 = vector.broadcast %cst_89 : f32 to vector<16x128xf32>
    %183 = arith.subf %182, %181 : vector<16x128xf32>
    %184 = math.exp %183 : vector<16x128xf32>
    %185 = math.log1p %184 : vector<16x128xf32>
    %186 = arith.addf %180, %185 : vector<16x128xf32>
    %187 = math.tanh %186 : vector<16x128xf32>
    %188 = arith.mulf %178, %187 : vector<16x128xf32>
    %c0_90 = arith.constant 0 : index
    %c0_91 = arith.constant 0 : index
    %189 = vector.load %arg17[%c0_90, %c0_91] : memref<64x128xf32, #tpu.memory_space<vmem>>, vector<64x128xf32>
    %cst_92 = arith.constant dense<0.000000e+00> : vector<16x128xf32>
    %190 = tpu.matmul %134, %189, %cst_92 {dimension_numbers = #tpu.dot_dimension_numbers<[1], [0], [0], [1], [0, 0, 1, 1], [], []>} : vector<16x64xf32>, vector<64x128xf32>, vector<16x128xf32> -> vector<16x128xf32>
    %c0_93 = arith.constant 0 : index
    %c0_94 = arith.constant 0 : index
    %191 = vector.load %arg20[%c0_93, %c0_94] : memref<1x128xf32, #tpu.memory_space<vmem>>, vector<1x128xf32>
    %192 = vector.broadcast %191 : vector<1x128xf32> to vector<16x128xf32>
    %193 = arith.addf %190, %192 : vector<16x128xf32>
    %194 = arith.addf %188, %193 : vector<16x128xf32>
    %cst_95 = arith.constant 0.000000e+00 : f32
    %195 = vector.broadcast %cst_95 : f32 to vector<1x128xf32>
    %196 = vector.extract_strided_slice %194 {offsets = [0, 0], sizes = [15, 128], strides = [1, 1]} : vector<16x128xf32> to vector<15x128xf32>
    %197 = tpu.concatenate %195, %196 in 0 : vector<1x128xf32>, vector<15x128xf32> -> vector<16x128xf32>
    %c0_96 = arith.constant 0 : index
    %c0_97 = arith.constant 0 : index
    %198 = vector.load %arg32[%c0_96, %c0_97] : memref<16x1xf32, #tpu.memory_space<vmem>>, vector<16x1xf32>
    %199 = vector.broadcast %198 : vector<16x1xf32> to vector<16x128xf32>
    %200 = arith.mulf %197, %199 : vector<16x128xf32>
    %201 = vector.extract_strided_slice %194 {offsets = [1, 0], sizes = [15, 128], strides = [1, 1]} : vector<16x128xf32> to vector<15x128xf32>
    %202 = tpu.concatenate %201, %195 in 0 : vector<15x128xf32>, vector<1x128xf32> -> vector<16x128xf32>
    %c0_98 = arith.constant 0 : index
    %c0_99 = arith.constant 0 : index
    %203 = vector.load %arg31[%c0_98, %c0_99] : memref<16x1xf32, #tpu.memory_space<vmem>>, vector<16x1xf32>
    %204 = vector.broadcast %203 : vector<16x1xf32> to vector<16x128xf32>
    %205 = arith.mulf %202, %204 : vector<16x128xf32>
    %206 = tpu.concatenate %200, %194, %205 in 1 : vector<16x128xf32>, vector<16x128xf32>, vector<16x128xf32> -> vector<16x384xf32>
    %c0_100 = arith.constant 0 : index
    %c0_101 = arith.constant 0 : index
    %207 = vector.load %arg21[%c0_100, %c0_101] : memref<384x128xf32, #tpu.memory_space<vmem>>, vector<384x128xf32>
    %cst_102 = arith.constant dense<0.000000e+00> : vector<16x128xf32>
    %208 = tpu.matmul %206, %207, %cst_102 {dimension_numbers = #tpu.dot_dimension_numbers<[1], [0], [0], [1], [0, 0, 1, 1], [], []>} : vector<16x384xf32>, vector<384x128xf32>, vector<16x128xf32> -> vector<16x128xf32>
    %c0_103 = arith.constant 0 : index
    %c0_104 = arith.constant 0 : index
    %209 = vector.load %arg23[%c0_103, %c0_104] : memref<1x128xf32, #tpu.memory_space<vmem>>, vector<1x128xf32>
    %210 = vector.broadcast %209 : vector<1x128xf32> to vector<16x128xf32>
    %211 = arith.addf %208, %210 : vector<16x128xf32>
    %cst_105 = arith.constant 0.000000e+00 : f32
    %212 = vector.broadcast %cst_105 : f32 to vector<16x128xf32>
    %213 = arith.maximumf %211, %212 : vector<16x128xf32>
    %214 = math.absf %211 : vector<16x128xf32>
    %cst_106 = arith.constant 0.000000e+00 : f32
    %215 = vector.broadcast %cst_106 : f32 to vector<16x128xf32>
    %216 = arith.subf %215, %214 : vector<16x128xf32>
    %217 = math.exp %216 : vector<16x128xf32>
    %218 = math.log1p %217 : vector<16x128xf32>
    %219 = arith.addf %213, %218 : vector<16x128xf32>
    %220 = math.tanh %219 : vector<16x128xf32>
    %221 = arith.mulf %211, %220 : vector<16x128xf32>
    %cst_107 = arith.constant 0.000000e+00 : f32
    %222 = vector.broadcast %cst_107 : f32 to vector<1x128xf32>
    %223 = vector.extract_strided_slice %221 {offsets = [0, 0], sizes = [15, 128], strides = [1, 1]} : vector<16x128xf32> to vector<15x128xf32>
    %224 = tpu.concatenate %222, %223 in 0 : vector<1x128xf32>, vector<15x128xf32> -> vector<16x128xf32>
    %c0_108 = arith.constant 0 : index
    %c0_109 = arith.constant 0 : index
    %225 = vector.load %arg32[%c0_108, %c0_109] : memref<16x1xf32, #tpu.memory_space<vmem>>, vector<16x1xf32>
    %226 = vector.broadcast %225 : vector<16x1xf32> to vector<16x128xf32>
    %227 = arith.mulf %224, %226 : vector<16x128xf32>
    %228 = vector.extract_strided_slice %221 {offsets = [1, 0], sizes = [15, 128], strides = [1, 1]} : vector<16x128xf32> to vector<15x128xf32>
    %229 = tpu.concatenate %228, %222 in 0 : vector<15x128xf32>, vector<1x128xf32> -> vector<16x128xf32>
    %c0_110 = arith.constant 0 : index
    %c0_111 = arith.constant 0 : index
    %230 = vector.load %arg31[%c0_110, %c0_111] : memref<16x1xf32, #tpu.memory_space<vmem>>, vector<16x1xf32>
    %231 = vector.broadcast %230 : vector<16x1xf32> to vector<16x128xf32>
    %232 = arith.mulf %229, %231 : vector<16x128xf32>
    %233 = tpu.concatenate %227, %221, %232 in 1 : vector<16x128xf32>, vector<16x128xf32>, vector<16x128xf32> -> vector<16x384xf32>
    %c0_112 = arith.constant 0 : index
    %c0_113 = arith.constant 0 : index
    %234 = vector.load %arg22[%c0_112, %c0_113] : memref<384x128xf32, #tpu.memory_space<vmem>>, vector<384x128xf32>
    %cst_114 = arith.constant dense<0.000000e+00> : vector<16x128xf32>
    %235 = tpu.matmul %233, %234, %cst_114 {dimension_numbers = #tpu.dot_dimension_numbers<[1], [0], [0], [1], [0, 0, 1, 1], [], []>} : vector<16x384xf32>, vector<384x128xf32>, vector<16x128xf32> -> vector<16x128xf32>
    %c0_115 = arith.constant 0 : index
    %c0_116 = arith.constant 0 : index
    %236 = vector.load %arg24[%c0_115, %c0_116] : memref<1x128xf32, #tpu.memory_space<vmem>>, vector<1x128xf32>
    %237 = vector.broadcast %236 : vector<1x128xf32> to vector<16x128xf32>
    %238 = arith.addf %235, %237 : vector<16x128xf32>
    %cst_117 = arith.constant 0.000000e+00 : f32
    %239 = vector.broadcast %cst_117 : f32 to vector<16x128xf32>
    %240 = arith.maximumf %238, %239 : vector<16x128xf32>
    %241 = math.absf %238 : vector<16x128xf32>
    %cst_118 = arith.constant 0.000000e+00 : f32
    %242 = vector.broadcast %cst_118 : f32 to vector<16x128xf32>
    %243 = arith.subf %242, %241 : vector<16x128xf32>
    %244 = math.exp %243 : vector<16x128xf32>
    %245 = math.log1p %244 : vector<16x128xf32>
    %246 = arith.addf %240, %245 : vector<16x128xf32>
    %247 = math.tanh %246 : vector<16x128xf32>
    %248 = arith.mulf %238, %247 : vector<16x128xf32>
    %249 = arith.addf %248, %194 : vector<16x128xf32>
    %cst_119 = arith.constant 0.000000e+00 : f32
    %250 = vector.broadcast %cst_119 : f32 to vector<1x128xf32>
    %251 = vector.extract_strided_slice %249 {offsets = [0, 0], sizes = [15, 128], strides = [1, 1]} : vector<16x128xf32> to vector<15x128xf32>
    %252 = tpu.concatenate %250, %251 in 0 : vector<1x128xf32>, vector<15x128xf32> -> vector<16x128xf32>
    %c0_120 = arith.constant 0 : index
    %c0_121 = arith.constant 0 : index
    %253 = vector.load %arg32[%c0_120, %c0_121] : memref<16x1xf32, #tpu.memory_space<vmem>>, vector<16x1xf32>
    %254 = vector.broadcast %253 : vector<16x1xf32> to vector<16x128xf32>
    %255 = arith.mulf %252, %254 : vector<16x128xf32>
    %256 = vector.extract_strided_slice %249 {offsets = [1, 0], sizes = [15, 128], strides = [1, 1]} : vector<16x128xf32> to vector<15x128xf32>
    %257 = tpu.concatenate %256, %250 in 0 : vector<15x128xf32>, vector<1x128xf32> -> vector<16x128xf32>
    %c0_122 = arith.constant 0 : index
    %c0_123 = arith.constant 0 : index
    %258 = vector.load %arg31[%c0_122, %c0_123] : memref<16x1xf32, #tpu.memory_space<vmem>>, vector<16x1xf32>
    %259 = vector.broadcast %258 : vector<16x1xf32> to vector<16x128xf32>
    %260 = arith.mulf %257, %259 : vector<16x128xf32>
    %261 = tpu.concatenate %255, %249, %260 in 1 : vector<16x128xf32>, vector<16x128xf32>, vector<16x128xf32> -> vector<16x384xf32>
    %c0_124 = arith.constant 0 : index
    %c0_125 = arith.constant 0 : index
    %262 = vector.load %arg33[%c0_124, %c0_125] : memref<384x128xf32, #tpu.memory_space<vmem>>, vector<384x128xf32>
    %cst_126 = arith.constant dense<0.000000e+00> : vector<16x128xf32>
    %263 = tpu.matmul %261, %262, %cst_126 {dimension_numbers = #tpu.dot_dimension_numbers<[1], [0], [0], [1], [0, 0, 1, 1], [], []>} : vector<16x384xf32>, vector<384x128xf32>, vector<16x128xf32> -> vector<16x128xf32>
    %c0_127 = arith.constant 0 : index
    %c0_128 = arith.constant 0 : index
    %264 = vector.load %arg35[%c0_127, %c0_128] : memref<1x128xf32, #tpu.memory_space<vmem>>, vector<1x128xf32>
    %265 = vector.broadcast %264 : vector<1x128xf32> to vector<16x128xf32>
    %266 = arith.addf %263, %265 : vector<16x128xf32>
    %cst_129 = arith.constant 0.000000e+00 : f32
    %267 = vector.broadcast %cst_129 : f32 to vector<16x128xf32>
    %268 = arith.maximumf %266, %267 : vector<16x128xf32>
    %269 = math.absf %266 : vector<16x128xf32>
    %cst_130 = arith.constant 0.000000e+00 : f32
    %270 = vector.broadcast %cst_130 : f32 to vector<16x128xf32>
    %271 = arith.subf %270, %269 : vector<16x128xf32>
    %272 = math.exp %271 : vector<16x128xf32>
    %273 = math.log1p %272 : vector<16x128xf32>
    %274 = arith.addf %268, %273 : vector<16x128xf32>
    %275 = math.tanh %274 : vector<16x128xf32>
    %276 = arith.mulf %266, %275 : vector<16x128xf32>
    %cst_131 = arith.constant 0.000000e+00 : f32
    %277 = vector.broadcast %cst_131 : f32 to vector<1x128xf32>
    %278 = vector.extract_strided_slice %276 {offsets = [0, 0], sizes = [15, 128], strides = [1, 1]} : vector<16x128xf32> to vector<15x128xf32>
    %279 = tpu.concatenate %277, %278 in 0 : vector<1x128xf32>, vector<15x128xf32> -> vector<16x128xf32>
    %c0_132 = arith.constant 0 : index
    %c0_133 = arith.constant 0 : index
    %280 = vector.load %arg32[%c0_132, %c0_133] : memref<16x1xf32, #tpu.memory_space<vmem>>, vector<16x1xf32>
    %281 = vector.broadcast %280 : vector<16x1xf32> to vector<16x128xf32>
    %282 = arith.mulf %279, %281 : vector<16x128xf32>
    %283 = vector.extract_strided_slice %276 {offsets = [1, 0], sizes = [15, 128], strides = [1, 1]} : vector<16x128xf32> to vector<15x128xf32>
    %284 = tpu.concatenate %283, %277 in 0 : vector<15x128xf32>, vector<1x128xf32> -> vector<16x128xf32>
    %c0_134 = arith.constant 0 : index
    %c0_135 = arith.constant 0 : index
    %285 = vector.load %arg31[%c0_134, %c0_135] : memref<16x1xf32, #tpu.memory_space<vmem>>, vector<16x1xf32>
    %286 = vector.broadcast %285 : vector<16x1xf32> to vector<16x128xf32>
    %287 = arith.mulf %284, %286 : vector<16x128xf32>
    %288 = tpu.concatenate %282, %276, %287 in 1 : vector<16x128xf32>, vector<16x128xf32>, vector<16x128xf32> -> vector<16x384xf32>
    %c0_136 = arith.constant 0 : index
    %c0_137 = arith.constant 0 : index
    %289 = vector.load %arg34[%c0_136, %c0_137] : memref<384x128xf32, #tpu.memory_space<vmem>>, vector<384x128xf32>
    %cst_138 = arith.constant dense<0.000000e+00> : vector<16x128xf32>
    %290 = tpu.matmul %288, %289, %cst_138 {dimension_numbers = #tpu.dot_dimension_numbers<[1], [0], [0], [1], [0, 0, 1, 1], [], []>} : vector<16x384xf32>, vector<384x128xf32>, vector<16x128xf32> -> vector<16x128xf32>
    %c0_139 = arith.constant 0 : index
    %c0_140 = arith.constant 0 : index
    %291 = vector.load %arg36[%c0_139, %c0_140] : memref<1x128xf32, #tpu.memory_space<vmem>>, vector<1x128xf32>
    %292 = vector.broadcast %291 : vector<1x128xf32> to vector<16x128xf32>
    %293 = arith.addf %290, %292 : vector<16x128xf32>
    %cst_141 = arith.constant 0.000000e+00 : f32
    %294 = vector.broadcast %cst_141 : f32 to vector<16x128xf32>
    %295 = arith.maximumf %293, %294 : vector<16x128xf32>
    %296 = math.absf %293 : vector<16x128xf32>
    %cst_142 = arith.constant 0.000000e+00 : f32
    %297 = vector.broadcast %cst_142 : f32 to vector<16x128xf32>
    %298 = arith.subf %297, %296 : vector<16x128xf32>
    %299 = math.exp %298 : vector<16x128xf32>
    %300 = math.log1p %299 : vector<16x128xf32>
    %301 = arith.addf %295, %300 : vector<16x128xf32>
    %302 = math.tanh %301 : vector<16x128xf32>
    %303 = arith.mulf %293, %302 : vector<16x128xf32>
    %304 = arith.addf %303, %249 : vector<16x128xf32>
    %cst_143 = arith.constant 0.000000e+00 : f32
    %305 = vector.broadcast %cst_143 : f32 to vector<1x128xf32>
    %306 = vector.extract_strided_slice %304 {offsets = [0, 0], sizes = [15, 128], strides = [1, 1]} : vector<16x128xf32> to vector<15x128xf32>
    %307 = tpu.concatenate %305, %306 in 0 : vector<1x128xf32>, vector<15x128xf32> -> vector<16x128xf32>
    %c0_144 = arith.constant 0 : index
    %c0_145 = arith.constant 0 : index
    %308 = vector.load %arg32[%c0_144, %c0_145] : memref<16x1xf32, #tpu.memory_space<vmem>>, vector<16x1xf32>
    %309 = vector.broadcast %308 : vector<16x1xf32> to vector<16x128xf32>
    %310 = arith.mulf %307, %309 : vector<16x128xf32>
    %311 = vector.extract_strided_slice %304 {offsets = [1, 0], sizes = [15, 128], strides = [1, 1]} : vector<16x128xf32> to vector<15x128xf32>
    %312 = tpu.concatenate %311, %305 in 0 : vector<15x128xf32>, vector<1x128xf32> -> vector<16x128xf32>
    %c0_146 = arith.constant 0 : index
    %c0_147 = arith.constant 0 : index
    %313 = vector.load %arg31[%c0_146, %c0_147] : memref<16x1xf32, #tpu.memory_space<vmem>>, vector<16x1xf32>
    %314 = vector.broadcast %313 : vector<16x1xf32> to vector<16x128xf32>
    %315 = arith.mulf %312, %314 : vector<16x128xf32>
    %316 = tpu.concatenate %310, %304, %315 in 1 : vector<16x128xf32>, vector<16x128xf32>, vector<16x128xf32> -> vector<16x384xf32>
    %c0_148 = arith.constant 0 : index
    %c0_149 = arith.constant 0 : index
    %317 = vector.load %arg37[%c0_148, %c0_149] : memref<384x128xf32, #tpu.memory_space<vmem>>, vector<384x128xf32>
    %cst_150 = arith.constant dense<0.000000e+00> : vector<16x128xf32>
    %318 = tpu.matmul %316, %317, %cst_150 {dimension_numbers = #tpu.dot_dimension_numbers<[1], [0], [0], [1], [0, 0, 1, 1], [], []>} : vector<16x384xf32>, vector<384x128xf32>, vector<16x128xf32> -> vector<16x128xf32>
    %c0_151 = arith.constant 0 : index
    %c0_152 = arith.constant 0 : index
    %319 = vector.load %arg39[%c0_151, %c0_152] : memref<1x128xf32, #tpu.memory_space<vmem>>, vector<1x128xf32>
    %320 = vector.broadcast %319 : vector<1x128xf32> to vector<16x128xf32>
    %321 = arith.addf %318, %320 : vector<16x128xf32>
    %cst_153 = arith.constant 0.000000e+00 : f32
    %322 = vector.broadcast %cst_153 : f32 to vector<16x128xf32>
    %323 = arith.maximumf %321, %322 : vector<16x128xf32>
    %324 = math.absf %321 : vector<16x128xf32>
    %cst_154 = arith.constant 0.000000e+00 : f32
    %325 = vector.broadcast %cst_154 : f32 to vector<16x128xf32>
    %326 = arith.subf %325, %324 : vector<16x128xf32>
    %327 = math.exp %326 : vector<16x128xf32>
    %328 = math.log1p %327 : vector<16x128xf32>
    %329 = arith.addf %323, %328 : vector<16x128xf32>
    %330 = math.tanh %329 : vector<16x128xf32>
    %331 = arith.mulf %321, %330 : vector<16x128xf32>
    %cst_155 = arith.constant 0.000000e+00 : f32
    %332 = vector.broadcast %cst_155 : f32 to vector<1x128xf32>
    %333 = vector.extract_strided_slice %331 {offsets = [0, 0], sizes = [15, 128], strides = [1, 1]} : vector<16x128xf32> to vector<15x128xf32>
    %334 = tpu.concatenate %332, %333 in 0 : vector<1x128xf32>, vector<15x128xf32> -> vector<16x128xf32>
    %c0_156 = arith.constant 0 : index
    %c0_157 = arith.constant 0 : index
    %335 = vector.load %arg32[%c0_156, %c0_157] : memref<16x1xf32, #tpu.memory_space<vmem>>, vector<16x1xf32>
    %336 = vector.broadcast %335 : vector<16x1xf32> to vector<16x128xf32>
    %337 = arith.mulf %334, %336 : vector<16x128xf32>
    %338 = vector.extract_strided_slice %331 {offsets = [1, 0], sizes = [15, 128], strides = [1, 1]} : vector<16x128xf32> to vector<15x128xf32>
    %339 = tpu.concatenate %338, %332 in 0 : vector<15x128xf32>, vector<1x128xf32> -> vector<16x128xf32>
    %c0_158 = arith.constant 0 : index
    %c0_159 = arith.constant 0 : index
    %340 = vector.load %arg31[%c0_158, %c0_159] : memref<16x1xf32, #tpu.memory_space<vmem>>, vector<16x1xf32>
    %341 = vector.broadcast %340 : vector<16x1xf32> to vector<16x128xf32>
    %342 = arith.mulf %339, %341 : vector<16x128xf32>
    %343 = tpu.concatenate %337, %331, %342 in 1 : vector<16x128xf32>, vector<16x128xf32>, vector<16x128xf32> -> vector<16x384xf32>
    %c0_160 = arith.constant 0 : index
    %c0_161 = arith.constant 0 : index
    %344 = vector.load %arg38[%c0_160, %c0_161] : memref<384x128xf32, #tpu.memory_space<vmem>>, vector<384x128xf32>
    %cst_162 = arith.constant dense<0.000000e+00> : vector<16x128xf32>
    %345 = tpu.matmul %343, %344, %cst_162 {dimension_numbers = #tpu.dot_dimension_numbers<[1], [0], [0], [1], [0, 0, 1, 1], [], []>} : vector<16x384xf32>, vector<384x128xf32>, vector<16x128xf32> -> vector<16x128xf32>
    %c0_163 = arith.constant 0 : index
    %c0_164 = arith.constant 0 : index
    %346 = vector.load %arg40[%c0_163, %c0_164] : memref<1x128xf32, #tpu.memory_space<vmem>>, vector<1x128xf32>
    %347 = vector.broadcast %346 : vector<1x128xf32> to vector<16x128xf32>
    %348 = arith.addf %345, %347 : vector<16x128xf32>
    %cst_165 = arith.constant 0.000000e+00 : f32
    %349 = vector.broadcast %cst_165 : f32 to vector<16x128xf32>
    %350 = arith.maximumf %348, %349 : vector<16x128xf32>
    %351 = math.absf %348 : vector<16x128xf32>
    %cst_166 = arith.constant 0.000000e+00 : f32
    %352 = vector.broadcast %cst_166 : f32 to vector<16x128xf32>
    %353 = arith.subf %352, %351 : vector<16x128xf32>
    %354 = math.exp %353 : vector<16x128xf32>
    %355 = math.log1p %354 : vector<16x128xf32>
    %356 = arith.addf %350, %355 : vector<16x128xf32>
    %357 = math.tanh %356 : vector<16x128xf32>
    %358 = arith.mulf %348, %357 : vector<16x128xf32>
    %359 = arith.addf %358, %304 : vector<16x128xf32>
    %360 = tpu.concatenate %359, %249 in 1 : vector<16x128xf32>, vector<16x128xf32> -> vector<16x256xf32>
    %cst_167 = arith.constant 0.000000e+00 : f32
    %361 = vector.broadcast %cst_167 : f32 to vector<1x256xf32>
    %362 = vector.extract_strided_slice %360 {offsets = [0, 0], sizes = [15, 256], strides = [1, 1]} : vector<16x256xf32> to vector<15x256xf32>
    %363 = tpu.concatenate %361, %362 in 0 : vector<1x256xf32>, vector<15x256xf32> -> vector<16x256xf32>
    %c0_168 = arith.constant 0 : index
    %c0_169 = arith.constant 0 : index
    %364 = vector.load %arg32[%c0_168, %c0_169] : memref<16x1xf32, #tpu.memory_space<vmem>>, vector<16x1xf32>
    %365 = vector.broadcast %364 : vector<16x1xf32> to vector<16x256xf32>
    %366 = arith.mulf %363, %365 : vector<16x256xf32>
    %367 = vector.extract_strided_slice %360 {offsets = [1, 0], sizes = [15, 256], strides = [1, 1]} : vector<16x256xf32> to vector<15x256xf32>
    %368 = tpu.concatenate %367, %361 in 0 : vector<15x256xf32>, vector<1x256xf32> -> vector<16x256xf32>
    %c0_170 = arith.constant 0 : index
    %c0_171 = arith.constant 0 : index
    %369 = vector.load %arg31[%c0_170, %c0_171] : memref<16x1xf32, #tpu.memory_space<vmem>>, vector<16x1xf32>
    %370 = vector.broadcast %369 : vector<16x1xf32> to vector<16x256xf32>
    %371 = arith.mulf %368, %370 : vector<16x256xf32>
    %372 = tpu.concatenate %366, %360, %371 in 1 : vector<16x256xf32>, vector<16x256xf32>, vector<16x256xf32> -> vector<16x768xf32>
    %c0_172 = arith.constant 0 : index
    %c0_173 = arith.constant 0 : index
    %373 = vector.load %arg41[%c0_172, %c0_173] : memref<768x64xf32, #tpu.memory_space<vmem>>, vector<768x64xf32>
    %cst_174 = arith.constant dense<0.000000e+00> : vector<16x64xf32>
    %374 = tpu.matmul %372, %373, %cst_174 {dimension_numbers = #tpu.dot_dimension_numbers<[1], [0], [0], [1], [0, 0, 1, 1], [], []>} : vector<16x768xf32>, vector<768x64xf32>, vector<16x64xf32> -> vector<16x64xf32>
    %c0_175 = arith.constant 0 : index
    %c0_176 = arith.constant 0 : index
    %375 = vector.load %arg44[%c0_175, %c0_176] : memref<1x64xf32, #tpu.memory_space<vmem>>, vector<1x64xf32>
    %376 = vector.broadcast %375 : vector<1x64xf32> to vector<16x64xf32>
    %377 = arith.addf %374, %376 : vector<16x64xf32>
    %cst_177 = arith.constant 0.000000e+00 : f32
    %378 = vector.broadcast %cst_177 : f32 to vector<16x64xf32>
    %379 = arith.maximumf %377, %378 : vector<16x64xf32>
    %380 = math.absf %377 : vector<16x64xf32>
    %cst_178 = arith.constant 0.000000e+00 : f32
    %381 = vector.broadcast %cst_178 : f32 to vector<16x64xf32>
    %382 = arith.subf %381, %380 : vector<16x64xf32>
    %383 = math.exp %382 : vector<16x64xf32>
    %384 = math.log1p %383 : vector<16x64xf32>
    %385 = arith.addf %379, %384 : vector<16x64xf32>
    %386 = math.tanh %385 : vector<16x64xf32>
    %387 = arith.mulf %377, %386 : vector<16x64xf32>
    %cst_179 = arith.constant 0.000000e+00 : f32
    %388 = vector.broadcast %cst_179 : f32 to vector<1x64xf32>
    %389 = vector.extract_strided_slice %387 {offsets = [0, 0], sizes = [15, 64], strides = [1, 1]} : vector<16x64xf32> to vector<15x64xf32>
    %390 = tpu.concatenate %388, %389 in 0 : vector<1x64xf32>, vector<15x64xf32> -> vector<16x64xf32>
    %c0_180 = arith.constant 0 : index
    %c0_181 = arith.constant 0 : index
    %391 = vector.load %arg32[%c0_180, %c0_181] : memref<16x1xf32, #tpu.memory_space<vmem>>, vector<16x1xf32>
    %392 = vector.broadcast %391 : vector<16x1xf32> to vector<16x64xf32>
    %393 = arith.mulf %390, %392 : vector<16x64xf32>
    %394 = vector.extract_strided_slice %387 {offsets = [1, 0], sizes = [15, 64], strides = [1, 1]} : vector<16x64xf32> to vector<15x64xf32>
    %395 = tpu.concatenate %394, %388 in 0 : vector<15x64xf32>, vector<1x64xf32> -> vector<16x64xf32>
    %c0_182 = arith.constant 0 : index
    %c0_183 = arith.constant 0 : index
    %396 = vector.load %arg31[%c0_182, %c0_183] : memref<16x1xf32, #tpu.memory_space<vmem>>, vector<16x1xf32>
    %397 = vector.broadcast %396 : vector<16x1xf32> to vector<16x64xf32>
    %398 = arith.mulf %395, %397 : vector<16x64xf32>
    %399 = tpu.concatenate %393, %387, %398 in 1 : vector<16x64xf32>, vector<16x64xf32>, vector<16x64xf32> -> vector<16x192xf32>
    %c0_184 = arith.constant 0 : index
    %c0_185 = arith.constant 0 : index
    %400 = vector.load %arg42[%c0_184, %c0_185] : memref<192x64xf32, #tpu.memory_space<vmem>>, vector<192x64xf32>
    %cst_186 = arith.constant dense<0.000000e+00> : vector<16x64xf32>
    %401 = tpu.matmul %399, %400, %cst_186 {dimension_numbers = #tpu.dot_dimension_numbers<[1], [0], [0], [1], [0, 0, 1, 1], [], []>} : vector<16x192xf32>, vector<192x64xf32>, vector<16x64xf32> -> vector<16x64xf32>
    %c0_187 = arith.constant 0 : index
    %c0_188 = arith.constant 0 : index
    %402 = vector.load %arg45[%c0_187, %c0_188] : memref<1x64xf32, #tpu.memory_space<vmem>>, vector<1x64xf32>
    %403 = vector.broadcast %402 : vector<1x64xf32> to vector<16x64xf32>
    %404 = arith.addf %401, %403 : vector<16x64xf32>
    %cst_189 = arith.constant 0.000000e+00 : f32
    %405 = vector.broadcast %cst_189 : f32 to vector<16x64xf32>
    %406 = arith.maximumf %404, %405 : vector<16x64xf32>
    %407 = math.absf %404 : vector<16x64xf32>
    %cst_190 = arith.constant 0.000000e+00 : f32
    %408 = vector.broadcast %cst_190 : f32 to vector<16x64xf32>
    %409 = arith.subf %408, %407 : vector<16x64xf32>
    %410 = math.exp %409 : vector<16x64xf32>
    %411 = math.log1p %410 : vector<16x64xf32>
    %412 = arith.addf %406, %411 : vector<16x64xf32>
    %413 = math.tanh %412 : vector<16x64xf32>
    %414 = arith.mulf %404, %413 : vector<16x64xf32>
    %c0_191 = arith.constant 0 : index
    %c0_192 = arith.constant 0 : index
    %415 = vector.load %arg43[%c0_191, %c0_192] : memref<256x64xf32, #tpu.memory_space<vmem>>, vector<256x64xf32>
    %cst_193 = arith.constant dense<0.000000e+00> : vector<16x64xf32>
    %416 = tpu.matmul %360, %415, %cst_193 {dimension_numbers = #tpu.dot_dimension_numbers<[1], [0], [0], [1], [0, 0, 1, 1], [], []>} : vector<16x256xf32>, vector<256x64xf32>, vector<16x64xf32> -> vector<16x64xf32>
    %c0_194 = arith.constant 0 : index
    %c0_195 = arith.constant 0 : index
    %417 = vector.load %arg46[%c0_194, %c0_195] : memref<1x64xf32, #tpu.memory_space<vmem>>, vector<1x64xf32>
    %418 = vector.broadcast %417 : vector<1x64xf32> to vector<16x64xf32>
    %419 = arith.addf %416, %418 : vector<16x64xf32>
    %420 = arith.addf %414, %419 : vector<16x64xf32>
    %cst_196 = arith.constant 0.000000e+00 : f32
    %421 = vector.broadcast %cst_196 : f32 to vector<1x64xf32>
    %422 = vector.extract_strided_slice %420 {offsets = [0, 0], sizes = [15, 64], strides = [1, 1]} : vector<16x64xf32> to vector<15x64xf32>
    %423 = tpu.concatenate %421, %422 in 0 : vector<1x64xf32>, vector<15x64xf32> -> vector<16x64xf32>
    %c0_197 = arith.constant 0 : index
    %c0_198 = arith.constant 0 : index
    %424 = vector.load %arg32[%c0_197, %c0_198] : memref<16x1xf32, #tpu.memory_space<vmem>>, vector<16x1xf32>
    %425 = vector.broadcast %424 : vector<16x1xf32> to vector<16x64xf32>
    %426 = arith.mulf %423, %425 : vector<16x64xf32>
    %427 = vector.extract_strided_slice %420 {offsets = [1, 0], sizes = [15, 64], strides = [1, 1]} : vector<16x64xf32> to vector<15x64xf32>
    %428 = tpu.concatenate %427, %421 in 0 : vector<15x64xf32>, vector<1x64xf32> -> vector<16x64xf32>
    %c0_199 = arith.constant 0 : index
    %c0_200 = arith.constant 0 : index
    %429 = vector.load %arg31[%c0_199, %c0_200] : memref<16x1xf32, #tpu.memory_space<vmem>>, vector<16x1xf32>
    %430 = vector.broadcast %429 : vector<16x1xf32> to vector<16x64xf32>
    %431 = arith.mulf %428, %430 : vector<16x64xf32>
    %432 = tpu.concatenate %426, %420, %431 in 1 : vector<16x64xf32>, vector<16x64xf32>, vector<16x64xf32> -> vector<16x192xf32>
    %c0_201 = arith.constant 0 : index
    %c0_202 = arith.constant 0 : index
    %433 = vector.load %arg47[%c0_201, %c0_202] : memref<192x64xf32, #tpu.memory_space<vmem>>, vector<192x64xf32>
    %cst_203 = arith.constant dense<0.000000e+00> : vector<16x64xf32>
    %434 = tpu.matmul %432, %433, %cst_203 {dimension_numbers = #tpu.dot_dimension_numbers<[1], [0], [0], [1], [0, 0, 1, 1], [], []>} : vector<16x192xf32>, vector<192x64xf32>, vector<16x64xf32> -> vector<16x64xf32>
    %c0_204 = arith.constant 0 : index
    %c0_205 = arith.constant 0 : index
    %435 = vector.load %arg49[%c0_204, %c0_205] : memref<1x64xf32, #tpu.memory_space<vmem>>, vector<1x64xf32>
    %436 = vector.broadcast %435 : vector<1x64xf32> to vector<16x64xf32>
    %437 = arith.addf %434, %436 : vector<16x64xf32>
    %cst_206 = arith.constant 0.000000e+00 : f32
    %438 = vector.broadcast %cst_206 : f32 to vector<16x64xf32>
    %439 = arith.maximumf %437, %438 : vector<16x64xf32>
    %440 = math.absf %437 : vector<16x64xf32>
    %cst_207 = arith.constant 0.000000e+00 : f32
    %441 = vector.broadcast %cst_207 : f32 to vector<16x64xf32>
    %442 = arith.subf %441, %440 : vector<16x64xf32>
    %443 = math.exp %442 : vector<16x64xf32>
    %444 = math.log1p %443 : vector<16x64xf32>
    %445 = arith.addf %439, %444 : vector<16x64xf32>
    %446 = math.tanh %445 : vector<16x64xf32>
    %447 = arith.mulf %437, %446 : vector<16x64xf32>
    %cst_208 = arith.constant 0.000000e+00 : f32
    %448 = vector.broadcast %cst_208 : f32 to vector<1x64xf32>
    %449 = vector.extract_strided_slice %447 {offsets = [0, 0], sizes = [15, 64], strides = [1, 1]} : vector<16x64xf32> to vector<15x64xf32>
    %450 = tpu.concatenate %448, %449 in 0 : vector<1x64xf32>, vector<15x64xf32> -> vector<16x64xf32>
    %c0_209 = arith.constant 0 : index
    %c0_210 = arith.constant 0 : index
    %451 = vector.load %arg32[%c0_209, %c0_210] : memref<16x1xf32, #tpu.memory_space<vmem>>, vector<16x1xf32>
    %452 = vector.broadcast %451 : vector<16x1xf32> to vector<16x64xf32>
    %453 = arith.mulf %450, %452 : vector<16x64xf32>
    %454 = vector.extract_strided_slice %447 {offsets = [1, 0], sizes = [15, 64], strides = [1, 1]} : vector<16x64xf32> to vector<15x64xf32>
    %455 = tpu.concatenate %454, %448 in 0 : vector<15x64xf32>, vector<1x64xf32> -> vector<16x64xf32>
    %c0_211 = arith.constant 0 : index
    %c0_212 = arith.constant 0 : index
    %456 = vector.load %arg31[%c0_211, %c0_212] : memref<16x1xf32, #tpu.memory_space<vmem>>, vector<16x1xf32>
    %457 = vector.broadcast %456 : vector<16x1xf32> to vector<16x64xf32>
    %458 = arith.mulf %455, %457 : vector<16x64xf32>
    %459 = tpu.concatenate %453, %447, %458 in 1 : vector<16x64xf32>, vector<16x64xf32>, vector<16x64xf32> -> vector<16x192xf32>
    %c0_213 = arith.constant 0 : index
    %c0_214 = arith.constant 0 : index
    %460 = vector.load %arg48[%c0_213, %c0_214] : memref<192x64xf32, #tpu.memory_space<vmem>>, vector<192x64xf32>
    %cst_215 = arith.constant dense<0.000000e+00> : vector<16x64xf32>
    %461 = tpu.matmul %459, %460, %cst_215 {dimension_numbers = #tpu.dot_dimension_numbers<[1], [0], [0], [1], [0, 0, 1, 1], [], []>} : vector<16x192xf32>, vector<192x64xf32>, vector<16x64xf32> -> vector<16x64xf32>
    %c0_216 = arith.constant 0 : index
    %c0_217 = arith.constant 0 : index
    %462 = vector.load %arg50[%c0_216, %c0_217] : memref<1x64xf32, #tpu.memory_space<vmem>>, vector<1x64xf32>
    %463 = vector.broadcast %462 : vector<1x64xf32> to vector<16x64xf32>
    %464 = arith.addf %461, %463 : vector<16x64xf32>
    %cst_218 = arith.constant 0.000000e+00 : f32
    %465 = vector.broadcast %cst_218 : f32 to vector<16x64xf32>
    %466 = arith.maximumf %464, %465 : vector<16x64xf32>
    %467 = math.absf %464 : vector<16x64xf32>
    %cst_219 = arith.constant 0.000000e+00 : f32
    %468 = vector.broadcast %cst_219 : f32 to vector<16x64xf32>
    %469 = arith.subf %468, %467 : vector<16x64xf32>
    %470 = math.exp %469 : vector<16x64xf32>
    %471 = math.log1p %470 : vector<16x64xf32>
    %472 = arith.addf %466, %471 : vector<16x64xf32>
    %473 = math.tanh %472 : vector<16x64xf32>
    %474 = arith.mulf %464, %473 : vector<16x64xf32>
    %475 = arith.addf %474, %420 : vector<16x64xf32>
    %cst_220 = arith.constant 0.000000e+00 : f32
    %476 = vector.broadcast %cst_220 : f32 to vector<1x64xf32>
    %477 = vector.extract_strided_slice %475 {offsets = [0, 0], sizes = [15, 64], strides = [1, 1]} : vector<16x64xf32> to vector<15x64xf32>
    %478 = tpu.concatenate %476, %477 in 0 : vector<1x64xf32>, vector<15x64xf32> -> vector<16x64xf32>
    %c0_221 = arith.constant 0 : index
    %c0_222 = arith.constant 0 : index
    %479 = vector.load %arg32[%c0_221, %c0_222] : memref<16x1xf32, #tpu.memory_space<vmem>>, vector<16x1xf32>
    %480 = vector.broadcast %479 : vector<16x1xf32> to vector<16x64xf32>
    %481 = arith.mulf %478, %480 : vector<16x64xf32>
    %482 = vector.extract_strided_slice %475 {offsets = [1, 0], sizes = [15, 64], strides = [1, 1]} : vector<16x64xf32> to vector<15x64xf32>
    %483 = tpu.concatenate %482, %476 in 0 : vector<15x64xf32>, vector<1x64xf32> -> vector<16x64xf32>
    %c0_223 = arith.constant 0 : index
    %c0_224 = arith.constant 0 : index
    %484 = vector.load %arg31[%c0_223, %c0_224] : memref<16x1xf32, #tpu.memory_space<vmem>>, vector<16x1xf32>
    %485 = vector.broadcast %484 : vector<16x1xf32> to vector<16x64xf32>
    %486 = arith.mulf %483, %485 : vector<16x64xf32>
    %487 = tpu.concatenate %481, %475 in 1 : vector<16x64xf32>, vector<16x64xf32> -> vector<16x128xf32>
    %c0_225 = arith.constant 0 : index
    %c0_226 = arith.constant 0 : index
    %488 = vector.load %arg51[%c0_225, %c0_226] : memref<128x128xf32, #tpu.memory_space<vmem>>, vector<128x128xf32>
    %cst_227 = arith.constant dense<0.000000e+00> : vector<16x128xf32>
    %489 = tpu.matmul %487, %488, %cst_227 {dimension_numbers = #tpu.dot_dimension_numbers<[1], [0], [0], [1], [0, 0, 1, 1], [], []>} : vector<16x128xf32>, vector<128x128xf32>, vector<16x128xf32> -> vector<16x128xf32>
    %490 = tpu.concatenate %475, %486 in 1 : vector<16x64xf32>, vector<16x64xf32> -> vector<16x128xf32>
    %c0_228 = arith.constant 0 : index
    %c0_229 = arith.constant 0 : index
    %491 = vector.load %arg52[%c0_228, %c0_229] : memref<128x128xf32, #tpu.memory_space<vmem>>, vector<128x128xf32>
    %cst_230 = arith.constant dense<0.000000e+00> : vector<16x128xf32>
    %492 = tpu.matmul %490, %491, %cst_230 {dimension_numbers = #tpu.dot_dimension_numbers<[1], [0], [0], [1], [0, 0, 1, 1], [], []>} : vector<16x128xf32>, vector<128x128xf32>, vector<16x128xf32> -> vector<16x128xf32>
    %c0_231 = arith.constant 0 : index
    %c0_232 = arith.constant 0 : index
    %493 = vector.load %arg53[%c0_231, %c0_232] : memref<32x16xf32, #tpu.memory_space<vmem>>, vector<32x16xf32>
    %cst_233 = arith.constant dense<0.000000e+00> : vector<32x128xf32>
    %494 = tpu.matmul %493, %489, %cst_233 {dimension_numbers = #tpu.dot_dimension_numbers<[1], [0], [0], [1], [0, 0, 1, 1], [], []>} : vector<32x16xf32>, vector<16x128xf32>, vector<32x128xf32> -> vector<32x128xf32>
    %c0_234 = arith.constant 0 : index
    %c0_235 = arith.constant 0 : index
    %495 = vector.load %arg54[%c0_234, %c0_235] : memref<32x16xf32, #tpu.memory_space<vmem>>, vector<32x16xf32>
    %cst_236 = arith.constant dense<0.000000e+00> : vector<32x128xf32>
    %496 = tpu.matmul %495, %492, %cst_236 {dimension_numbers = #tpu.dot_dimension_numbers<[1], [0], [0], [1], [0, 0, 1, 1], [], []>} : vector<32x16xf32>, vector<16x128xf32>, vector<32x128xf32> -> vector<32x128xf32>
    %497 = arith.addf %494, %496 : vector<32x128xf32>
    %c0_237 = arith.constant 0 : index
    %c0_238 = arith.constant 0 : index
    %498 = vector.load %arg55[%c0_237, %c0_238] : memref<1x128xf32, #tpu.memory_space<vmem>>, vector<1x128xf32>
    %499 = vector.broadcast %498 : vector<1x128xf32> to vector<32x128xf32>
    %500 = arith.addf %497, %499 : vector<32x128xf32>
    %cst_239 = arith.constant 0.000000e+00 : f32
    %501 = vector.broadcast %cst_239 : f32 to vector<1x128xf32>
    %502 = vector.extract_strided_slice %500 {offsets = [0, 0], sizes = [31, 128], strides = [1, 1]} : vector<32x128xf32> to vector<31x128xf32>
    %503 = tpu.concatenate %501, %502 in 0 : vector<1x128xf32>, vector<31x128xf32> -> vector<32x128xf32>
    %c0_240 = arith.constant 0 : index
    %c0_241 = arith.constant 0 : index
    %504 = vector.load %arg30[%c0_240, %c0_241] : memref<32x1xf32, #tpu.memory_space<vmem>>, vector<32x1xf32>
    %505 = vector.broadcast %504 : vector<32x1xf32> to vector<32x128xf32>
    %506 = arith.mulf %503, %505 : vector<32x128xf32>
    %507 = vector.extract_strided_slice %500 {offsets = [1, 0], sizes = [31, 128], strides = [1, 1]} : vector<32x128xf32> to vector<31x128xf32>
    %508 = tpu.concatenate %507, %501 in 0 : vector<31x128xf32>, vector<1x128xf32> -> vector<32x128xf32>
    %c0_242 = arith.constant 0 : index
    %c0_243 = arith.constant 0 : index
    %509 = vector.load %arg29[%c0_242, %c0_243] : memref<32x1xf32, #tpu.memory_space<vmem>>, vector<32x1xf32>
    %510 = vector.broadcast %509 : vector<32x1xf32> to vector<32x128xf32>
    %511 = arith.mulf %508, %510 : vector<32x128xf32>
    %512 = tpu.concatenate %506, %500, %511 in 1 : vector<32x128xf32>, vector<32x128xf32>, vector<32x128xf32> -> vector<32x384xf32>
    %c0_244 = arith.constant 0 : index
    %c0_245 = arith.constant 0 : index
    %513 = vector.load %arg25[%c0_244, %c0_245] : memref<384x128xf32, #tpu.memory_space<vmem>>, vector<384x128xf32>
    %cst_246 = arith.constant dense<0.000000e+00> : vector<32x128xf32>
    %514 = tpu.matmul %512, %513, %cst_246 {dimension_numbers = #tpu.dot_dimension_numbers<[1], [0], [0], [1], [0, 0, 1, 1], [], []>} : vector<32x384xf32>, vector<384x128xf32>, vector<32x128xf32> -> vector<32x128xf32>
    %c0_247 = arith.constant 0 : index
    %c0_248 = arith.constant 0 : index
    %515 = vector.load %arg26[%c0_247, %c0_248] : memref<1x128xf32, #tpu.memory_space<vmem>>, vector<1x128xf32>
    %516 = vector.broadcast %515 : vector<1x128xf32> to vector<32x128xf32>
    %517 = arith.addf %514, %516 : vector<32x128xf32>
    %cst_249 = arith.constant 0.000000e+00 : f32
    %518 = vector.broadcast %cst_249 : f32 to vector<32x128xf32>
    %519 = arith.maximumf %517, %518 : vector<32x128xf32>
    %520 = math.absf %517 : vector<32x128xf32>
    %cst_250 = arith.constant 0.000000e+00 : f32
    %521 = vector.broadcast %cst_250 : f32 to vector<32x128xf32>
    %522 = arith.subf %521, %520 : vector<32x128xf32>
    %523 = math.exp %522 : vector<32x128xf32>
    %524 = math.log1p %523 : vector<32x128xf32>
    %525 = arith.addf %519, %524 : vector<32x128xf32>
    %526 = math.tanh %525 : vector<32x128xf32>
    %527 = arith.mulf %517, %526 : vector<32x128xf32>
    %c0_251 = arith.constant 0 : index
    %c0_252 = arith.constant 0 : index
    %528 = vector.load %arg27[%c0_251, %c0_252] : memref<128x128xf32, #tpu.memory_space<vmem>>, vector<128x128xf32>
    %cst_253 = arith.constant dense<0.000000e+00> : vector<32x128xf32>
    %529 = tpu.matmul %527, %528, %cst_253 {dimension_numbers = #tpu.dot_dimension_numbers<[1], [0], [0], [1], [0, 0, 1, 1], [], []>} : vector<32x128xf32>, vector<128x128xf32>, vector<32x128xf32> -> vector<32x128xf32>
    %c0_254 = arith.constant 0 : index
    %c0_255 = arith.constant 0 : index
    %530 = vector.load %arg28[%c0_254, %c0_255] : memref<1x128xf32, #tpu.memory_space<vmem>>, vector<1x128xf32>
    %531 = vector.broadcast %530 : vector<1x128xf32> to vector<32x128xf32>
    %532 = arith.addf %529, %531 : vector<32x128xf32>
    %533 = arith.negf %532 : vector<32x128xf32>
    %534 = math.exp %533 : vector<32x128xf32>
    %cst_256 = arith.constant 1.000000e+00 : f32
    %535 = vector.broadcast %cst_256 : f32 to vector<32x128xf32>
    %536 = arith.addf %535, %534 : vector<32x128xf32>
    %537 = arith.divf %535, %536 : vector<32x128xf32>
    %c0_257 = arith.constant 0 : index
    %c0_258 = arith.constant 0 : index
    %538 = vector.load %arg56[%c0_257, %c0_258] : memref<32x128xf32, #tpu.memory_space<vmem>>, vector<32x128xf32>
    tpu.vector_store %arg56[%c0_257, %c0_258], %537 {strides = array<i32>} : memref<32x128xf32, #tpu.memory_space<vmem>>, vector<32x128xf32>,
    return
  }
  func.func @transform_0(%arg0: i32) -> (i32, i32) {
    %c0_i32 = arith.constant 0 : i32
    %c0_i32_0 = arith.constant 0 : i32
    %c0_i32_1 = arith.constant 0 : i32
    return %c0_i32, %c0_i32_0 : i32, i32
  }
  func.func @transform_1(%arg0: i32) -> (i32, i32) {
    %c0_i32 = arith.constant 0 : i32
    %c0_i32_0 = arith.constant 0 : i32
    %c0_i32_1 = arith.constant 0 : i32
    return %c0_i32, %c0_i32_0 : i32, i32
  }
  func.func @transform_2(%arg0: i32) -> (i32, i32) {
    %c0_i32 = arith.constant 0 : i32
    %c0_i32_0 = arith.constant 0 : i32
    %c0_i32_1 = arith.constant 0 : i32
    return %c0_i32, %c0_i32_0 : i32, i32
  }
  func.func @transform_3(%arg0: i32) -> (i32, i32) {
    %c0_i32 = arith.constant 0 : i32
    %c0_i32_0 = arith.constant 0 : i32
    %c0_i32_1 = arith.constant 0 : i32
    return %c0_i32, %c0_i32_0 : i32, i32
  }
  func.func @transform_4(%arg0: i32) -> (i32, i32) {
    %c0_i32 = arith.constant 0 : i32
    %c0_i32_0 = arith.constant 0 : i32
    %c0_i32_1 = arith.constant 0 : i32
    return %c0_i32, %c0_i32_0 : i32, i32
  }
  func.func @transform_5(%arg0: i32) -> (i32, i32) {
    %c0_i32 = arith.constant 0 : i32
    %c0_i32_0 = arith.constant 0 : i32
    %c0_i32_1 = arith.constant 0 : i32
    return %c0_i32, %c0_i32_0 : i32, i32
  }
  func.func @transform_6(%arg0: i32) -> (i32, i32) {
    %c0_i32 = arith.constant 0 : i32
    %c0_i32_0 = arith.constant 0 : i32
    %c0_i32_1 = arith.constant 0 : i32
    return %c0_i32, %c0_i32_0 : i32, i32
  }
  func.func @transform_7(%arg0: i32) -> (i32, i32) {
    %c0_i32 = arith.constant 0 : i32
    %c0_i32_0 = arith.constant 0 : i32
    %c0_i32_1 = arith.constant 0 : i32
    return %c0_i32, %c0_i32_0 : i32, i32
  }
  func.func @transform_8(%arg0: i32) -> (i32, i32) {
    %c0_i32 = arith.constant 0 : i32
    %c0_i32_0 = arith.constant 0 : i32
    %c0_i32_1 = arith.constant 0 : i32
    return %c0_i32, %c0_i32_0 : i32, i32
  }
  func.func @transform_9(%arg0: i32) -> (i32, i32) {
    %c0_i32 = arith.constant 0 : i32
    %c0_i32_0 = arith.constant 0 : i32
    %c0_i32_1 = arith.constant 0 : i32
    return %c0_i32, %c0_i32_0 : i32, i32
  }
  func.func @transform_10(%arg0: i32) -> (i32, i32) {
    %c0_i32 = arith.constant 0 : i32
    %c0_i32_0 = arith.constant 0 : i32
    %c0_i32_1 = arith.constant 0 : i32
    return %c0_i32, %c0_i32_0 : i32, i32
  }
  func.func @transform_11(%arg0: i32) -> (i32, i32) {
    %c0_i32 = arith.constant 0 : i32
    %c0_i32_0 = arith.constant 0 : i32
    %c0_i32_1 = arith.constant 0 : i32
    return %c0_i32, %c0_i32_0 : i32, i32
  }
  func.func @transform_12(%arg0: i32) -> (i32, i32) {
    %c0_i32 = arith.constant 0 : i32
    %c0_i32_0 = arith.constant 0 : i32
    %c0_i32_1 = arith.constant 0 : i32
    return %c0_i32, %c0_i32_0 : i32, i32
  }
  func.func @transform_13(%arg0: i32) -> (i32, i32) {
    %c0_i32 = arith.constant 0 : i32
    %c0_i32_0 = arith.constant 0 : i32
    %c0_i32_1 = arith.constant 0 : i32
    return %c0_i32, %c0_i32_0 : i32, i32
  }
  func.func @transform_14(%arg0: i32) -> (i32, i32) {
    %c0_i32 = arith.constant 0 : i32
    %c0_i32_0 = arith.constant 0 : i32
    %c0_i32_1 = arith.constant 0 : i32
    return %c0_i32, %c0_i32_0 : i32, i32
  }
  func.func @transform_15(%arg0: i32) -> (i32, i32) {
    %c0_i32 = arith.constant 0 : i32
    %c0_i32_0 = arith.constant 0 : i32
    %c0_i32_1 = arith.constant 0 : i32
    return %c0_i32, %c0_i32_0 : i32, i32
  }
  func.func @transform_16(%arg0: i32) -> (i32, i32) {
    %c0_i32 = arith.constant 0 : i32
    %c0_i32_0 = arith.constant 0 : i32
    %c0_i32_1 = arith.constant 0 : i32
    return %c0_i32, %c0_i32_0 : i32, i32
  }
  func.func @transform_17(%arg0: i32) -> (i32, i32) {
    %c0_i32 = arith.constant 0 : i32
    %c0_i32_0 = arith.constant 0 : i32
    %c0_i32_1 = arith.constant 0 : i32
    return %c0_i32, %c0_i32_0 : i32, i32
  }
  func.func @transform_18(%arg0: i32) -> (i32, i32) {
    %c0_i32 = arith.constant 0 : i32
    %c0_i32_0 = arith.constant 0 : i32
    %c0_i32_1 = arith.constant 0 : i32
    return %c0_i32, %c0_i32_0 : i32, i32
  }
  func.func @transform_19(%arg0: i32) -> (i32, i32) {
    %c0_i32 = arith.constant 0 : i32
    %c0_i32_0 = arith.constant 0 : i32
    %c0_i32_1 = arith.constant 0 : i32
    return %c0_i32, %c0_i32_0 : i32, i32
  }
  func.func @transform_20(%arg0: i32) -> (i32, i32) {
    %c0_i32 = arith.constant 0 : i32
    %c0_i32_0 = arith.constant 0 : i32
    %c0_i32_1 = arith.constant 0 : i32
    return %c0_i32, %c0_i32_0 : i32, i32
  }
  func.func @transform_21(%arg0: i32) -> (i32, i32) {
    %c0_i32 = arith.constant 0 : i32
    %c0_i32_0 = arith.constant 0 : i32
    %c0_i32_1 = arith.constant 0 : i32
    return %c0_i32, %c0_i32_0 : i32, i32
  }
  func.func @transform_22(%arg0: i32) -> (i32, i32) {
    %c0_i32 = arith.constant 0 : i32
    %c0_i32_0 = arith.constant 0 : i32
    %c0_i32_1 = arith.constant 0 : i32
    return %c0_i32, %c0_i32_0 : i32, i32
  }
  func.func @transform_23(%arg0: i32) -> (i32, i32) {
    %c0_i32 = arith.constant 0 : i32
    %c0_i32_0 = arith.constant 0 : i32
    %c0_i32_1 = arith.constant 0 : i32
    return %c0_i32, %c0_i32_0 : i32, i32
  }
  func.func @transform_24(%arg0: i32) -> (i32, i32) {
    %c0_i32 = arith.constant 0 : i32
    %c0_i32_0 = arith.constant 0 : i32
    %c0_i32_1 = arith.constant 0 : i32
    return %c0_i32, %c0_i32_0 : i32, i32
  }
  func.func @transform_25(%arg0: i32) -> (i32, i32) {
    %c0_i32 = arith.constant 0 : i32
    %c0_i32_0 = arith.constant 0 : i32
    %c0_i32_1 = arith.constant 0 : i32
    return %c0_i32, %c0_i32_0 : i32, i32
  }
  func.func @transform_26(%arg0: i32) -> (i32, i32) {
    %c0_i32 = arith.constant 0 : i32
    %c0_i32_0 = arith.constant 0 : i32
    %c0_i32_1 = arith.constant 0 : i32
    return %c0_i32, %c0_i32_0 : i32, i32
  }
  func.func @transform_27(%arg0: i32) -> (i32, i32) {
    %c0_i32 = arith.constant 0 : i32
    %c0_i32_0 = arith.constant 0 : i32
    %c0_i32_1 = arith.constant 0 : i32
    return %c0_i32, %c0_i32_0 : i32, i32
  }
  func.func @transform_28(%arg0: i32) -> (i32, i32) {
    %c0_i32 = arith.constant 0 : i32
    %c0_i32_0 = arith.constant 0 : i32
    %c0_i32_1 = arith.constant 0 : i32
    return %c0_i32, %c0_i32_0 : i32, i32
  }
  func.func @transform_29(%arg0: i32) -> (i32, i32) {
    %c0_i32 = arith.constant 0 : i32
    %c0_i32_0 = arith.constant 0 : i32
    %c0_i32_1 = arith.constant 0 : i32
    return %c0_i32, %c0_i32_0 : i32, i32
  }
  func.func @transform_30(%arg0: i32) -> (i32, i32) {
    %c0_i32 = arith.constant 0 : i32
    %c0_i32_0 = arith.constant 0 : i32
    %c0_i32_1 = arith.constant 0 : i32
    return %c0_i32, %c0_i32_0 : i32, i32
  }
  func.func @transform_31(%arg0: i32) -> (i32, i32) {
    %c0_i32 = arith.constant 0 : i32
    %c0_i32_0 = arith.constant 0 : i32
    %c0_i32_1 = arith.constant 0 : i32
    return %c0_i32, %c0_i32_0 : i32, i32
  }
  func.func @transform_32(%arg0: i32) -> (i32, i32) {
    %c0_i32 = arith.constant 0 : i32
    %c0_i32_0 = arith.constant 0 : i32
    %c0_i32_1 = arith.constant 0 : i32
    return %c0_i32, %c0_i32_0 : i32, i32
  }
  func.func @transform_33(%arg0: i32) -> (i32, i32) {
    %c0_i32 = arith.constant 0 : i32
    %c0_i32_0 = arith.constant 0 : i32
    %c0_i32_1 = arith.constant 0 : i32
    return %c0_i32, %c0_i32_0 : i32, i32
  }
  func.func @transform_34(%arg0: i32) -> (i32, i32) {
    %c0_i32 = arith.constant 0 : i32
    %c0_i32_0 = arith.constant 0 : i32
    %c0_i32_1 = arith.constant 0 : i32
    return %c0_i32, %c0_i32_0 : i32, i32
  }
  func.func @transform_35(%arg0: i32) -> (i32, i32) {
    %c0_i32 = arith.constant 0 : i32
    %c0_i32_0 = arith.constant 0 : i32
    %c0_i32_1 = arith.constant 0 : i32
    return %c0_i32, %c0_i32_0 : i32, i32
  }
  func.func @transform_36(%arg0: i32) -> (i32, i32) {
    %c0_i32 = arith.constant 0 : i32
    %c0_i32_0 = arith.constant 0 : i32
    %c0_i32_1 = arith.constant 0 : i32
    return %c0_i32, %c0_i32_0 : i32, i32
  }
  func.func @transform_37(%arg0: i32) -> (i32, i32) {
    %c0_i32 = arith.constant 0 : i32
    %c0_i32_0 = arith.constant 0 : i32
    %c0_i32_1 = arith.constant 0 : i32
    return %c0_i32, %c0_i32_0 : i32, i32
  }
  func.func @transform_38(%arg0: i32) -> (i32, i32) {
    %c0_i32 = arith.constant 0 : i32
    %c0_i32_0 = arith.constant 0 : i32
    %c0_i32_1 = arith.constant 0 : i32
    return %c0_i32, %c0_i32_0 : i32, i32
  }
  func.func @transform_39(%arg0: i32) -> (i32, i32) {
    %c0_i32 = arith.constant 0 : i32
    %c0_i32_0 = arith.constant 0 : i32
    %c0_i32_1 = arith.constant 0 : i32
    return %c0_i32, %c0_i32_0 : i32, i32
  }
  func.func @transform_40(%arg0: i32) -> (i32, i32) {
    %c0_i32 = arith.constant 0 : i32
    %c0_i32_0 = arith.constant 0 : i32
    %c0_i32_1 = arith.constant 0 : i32
    return %c0_i32, %c0_i32_0 : i32, i32
  }
  func.func @transform_41(%arg0: i32) -> (i32, i32) {
    %c0_i32 = arith.constant 0 : i32
    %c0_i32_0 = arith.constant 0 : i32
    %c0_i32_1 = arith.constant 0 : i32
    return %c0_i32, %c0_i32_0 : i32, i32
  }
  func.func @transform_42(%arg0: i32) -> (i32, i32) {
    %c0_i32 = arith.constant 0 : i32
    %c0_i32_0 = arith.constant 0 : i32
    %c0_i32_1 = arith.constant 0 : i32
    return %c0_i32, %c0_i32_0 : i32, i32
  }
  func.func @transform_43(%arg0: i32) -> (i32, i32) {
    %c0_i32 = arith.constant 0 : i32
    %c0_i32_0 = arith.constant 0 : i32
    %c0_i32_1 = arith.constant 0 : i32
    return %c0_i32, %c0_i32_0 : i32, i32
  }
  func.func @transform_44(%arg0: i32) -> (i32, i32) {
    %c0_i32 = arith.constant 0 : i32
    %c0_i32_0 = arith.constant 0 : i32
    %c0_i32_1 = arith.constant 0 : i32
    return %c0_i32, %c0_i32_0 : i32, i32
  }
  func.func @transform_45(%arg0: i32) -> (i32, i32) {
    %c0_i32 = arith.constant 0 : i32
    %c0_i32_0 = arith.constant 0 : i32
    %c0_i32_1 = arith.constant 0 : i32
    return %c0_i32, %c0_i32_0 : i32, i32
  }
  func.func @transform_46(%arg0: i32) -> (i32, i32) {
    %c0_i32 = arith.constant 0 : i32
    %c0_i32_0 = arith.constant 0 : i32
    %c0_i32_1 = arith.constant 0 : i32
    return %c0_i32, %c0_i32_0 : i32, i32
  }
  func.func @transform_47(%arg0: i32) -> (i32, i32) {
    %c0_i32 = arith.constant 0 : i32
    %c0_i32_0 = arith.constant 0 : i32
    %c0_i32_1 = arith.constant 0 : i32
    return %c0_i32, %c0_i32_0 : i32, i32
  }
  func.func @transform_48(%arg0: i32) -> (i32, i32) {
    %c0_i32 = arith.constant 0 : i32
    %c0_i32_0 = arith.constant 0 : i32
    %c0_i32_1 = arith.constant 0 : i32
    return %c0_i32, %c0_i32_0 : i32, i32
  }
  func.func @transform_49(%arg0: i32) -> (i32, i32) {
    %c0_i32 = arith.constant 0 : i32
    %c0_i32_0 = arith.constant 0 : i32
    %c0_i32_1 = arith.constant 0 : i32
    return %c0_i32, %c0_i32_0 : i32, i32
  }
  func.func @transform_50(%arg0: i32) -> (i32, i32) {
    %c0_i32 = arith.constant 0 : i32
    %c0_i32_0 = arith.constant 0 : i32
    %c0_i32_1 = arith.constant 0 : i32
    return %c0_i32, %c0_i32_0 : i32, i32
  }
  func.func @transform_51(%arg0: i32) -> (i32, i32) {
    %c0_i32 = arith.constant 0 : i32
    %c0_i32_0 = arith.constant 0 : i32
    %c0_i32_1 = arith.constant 0 : i32
    return %c0_i32, %c0_i32_0 : i32, i32
  }
  func.func @transform_52(%arg0: i32) -> (i32, i32) {
    %c0_i32 = arith.constant 0 : i32
    %c0_i32_0 = arith.constant 0 : i32
    %c0_i32_1 = arith.constant 0 : i32
    return %c0_i32, %c0_i32_0 : i32, i32
  }
  func.func @transform_53(%arg0: i32) -> (i32, i32) {
    %c0_i32 = arith.constant 0 : i32
    %c0_i32_0 = arith.constant 0 : i32
    %c0_i32_1 = arith.constant 0 : i32
    return %c0_i32, %c0_i32_0 : i32, i32
  }
  func.func @transform_54(%arg0: i32) -> (i32, i32) {
    %c0_i32 = arith.constant 0 : i32
    %c0_i32_0 = arith.constant 0 : i32
    %c0_i32_1 = arith.constant 0 : i32
    return %c0_i32, %c0_i32_0 : i32, i32
  }
  func.func @transform_55(%arg0: i32) -> (i32, i32) {
    %c0_i32 = arith.constant 0 : i32
    %c0_i32_0 = arith.constant 0 : i32
    %c0_i32_1 = arith.constant 0 : i32
    return %c0_i32, %c0_i32_0 : i32, i32
  }
}

</mosaic_0001>

<bundles_post_ra>
// kernel: unet_cond_forward.1
= control target key start
LH: loop header
LB: loop body
LE: loop exit
PB: predicated region body
PF: predicated region fallthrough
CT: control target
= control target key end

     0   :  { %s10292_s6 = smov 1   ;;  %s10293_s10 = smov 2   ;;  %s12183_s0 = inlined_call_operand.smem [shape: u32[56], index: -1, kind: input, shape index: {}] }
   0x1   :  { %s10390_s5 = sld [smem:[%s12183_s0]]   ;;  %s10294_s14 = smov 3  }
   0x2   :  { %s10395_s9 = sld [smem:[%s12183_s0 + %s10292_s6]]   ;;  %s10295_s18 = smov 4  }
   0x3   :  { %s10400_s13 = sld [smem:[%s12183_s0 + %s10293_s10]]   ;;  %s10296_s22 = smov 5  }
   0x4   :  { %s10405_s17 = sld [smem:[%s12183_s0 + %s10294_s14]]   ;;  %s10297_s26 = smov 6  }
   0x5   :  { %s10410_s21 = sld [smem:[%s12183_s0 + %s10295_s18]]   ;;  %s10298_s30 = smov 7  }
   0x6   :  { %s10415_s25 = sld [smem:[%s12183_s0 + %s10296_s22]]   ;;  %s10299_s4 = smov 8  }
   0x7   :  { %12217 = sst [smem:[#allocation57_spill]] %s10390_s5  ;;  %s10300_s10 = smov 9  }
   0x8   :  { %12218 = sst [smem:[#allocation58_spill]] %s10395_s9  ;;  %s10301_s15 = smov 10  }
   0x9   :  { %s10420_s29 = sld [smem:[%s12183_s0 + %s10297_s26]]   ;;  %s10302_s20 = smov 11  }
   0xa   :  { %12219 = sst [smem:[#allocation59_spill]] %s10405_s17  ;;  %s10303_s26 = smov 12  }
   0xb   :  { %s10425_s3 = sld [smem:[%s12183_s0 + %s10298_s30]]   ;;  %s10304_s1 = smov 13  }
   0xc   :  { %12220 = sst [smem:[#allocation60_spill]] %s10415_s25  ;;  %s10305_s7 = smov 14  }
   0xd   :  { %s10430_s8 = sld [smem:[%s12183_s0 + %s10299_s4]]   ;;  %s10307_s22 = smov 16  }
   0xe   :  { %s10435_s14 = sld [smem:[%s12183_s0 + %s10300_s10]]   ;;  %s10308_s28 = smov 17  }
   0xf   :  { %12221 = sst [smem:[#allocation61_spill]] %s10420_s29 }
  0x10   :  { %s10440_s19 = sld [smem:[%s12183_s0 + %s10301_s15]]   ;;  %s10306_s15 = smov 15  }
  0x11   :  { %12222 = sst [smem:[#allocation62_spill]] %s10425_s3 }
  0x12   :  { %s10445_s24 = sld [smem:[%s12183_s0 + %s10302_s20]]  }
  0x13   :  { %12223 = sst [smem:[#allocation63_spill]] %s10430_s8 }
  0x14   :  { %12224 = sst [smem:[#allocation64_spill]] %s10435_s14 }
  0x15   :  { %s10450_s30 = sld [smem:[%s12183_s0 + %s10303_s26]]  }
  0x16   :  { %12225 = sst [smem:[#allocation65_spill]] %s10440_s19 }
  0x17   :  { %s10455_s6 = sld [smem:[%s12183_s0 + %s10304_s1]]  }
  0x18   :  { %12226 = sst [smem:[#allocation66_spill]] %s10445_s24 }
  0x19   :  { %s10460_s12 = sld [smem:[%s12183_s0 + %s10305_s7]]   ;;  %s10309_s7 = smov 18  }
  0x1a   :  { %s10465_s20 = sld [smem:[%s12183_s0 + %s10306_s15]]   ;;  %s10310_s15 = smov 19  }
  0x1b   :  { %12227 = sst [smem:[#allocation67_spill]] %s10450_s30 }
  0x1c   :  { %s10470_s27 = sld [smem:[%s12183_s0 + %s10307_s22]]   ;;  %s10311_s22 = smov 20  }
  0x1d   :  { %s10475_s4 = sld [smem:[%s12183_s0 + %s10308_s28]]   ;;  %s10312_s28 = smov 21  }
  0x1e   :  { %s10480_s17 = sld [smem:[%s12183_s0 + %s10309_s7]]   ;;  %s10313_s7 = smov 22  }
  0x1f   :  { %12228 = sst [smem:[#allocation68_spill]] %s10460_s12 }
  0x20   :  { %12229 = sst [smem:[#allocation69_spill]] %s10465_s20 }
  0x21   :  { %s10485_s20 = sld [smem:[%s12183_s0 + %s10310_s15]]   ;;  %s10314_s15 = smov 23  }
  0x22   :  { %s10490_s9 = sld [smem:[%s12183_s0 + %s10311_s22]]   ;;  %s10315_s22 = smov 24  }
  0x23   :  { %12230 = sst [smem:[#allocation70_spill]] %s10475_s4 }
  0x24   :  { %s10495_s30 = sld [smem:[%s12183_s0 + %s10312_s28]]   ;;  %s10316_s28 = smov 25  }
  0x25   :  { %s10500_s24 = sld [smem:[%s12183_s0 + %s10313_s7]]   ;;  %s10317_s7 = smov 26  }
  0x26   :  { %s10505_s14 = sld [smem:[%s12183_s0 + %s10314_s15]]   ;;  %s10318_s15 = smov 27  }
  0x27   :  { %12231 = sst [smem:[#allocation71_spill]] %s10485_s20 }
  0x28   :  { %12232 = sst [smem:[#allocation72_spill]] %s10490_s9 }
  0x29   :  { %s10510_s9 = sld [smem:[%s12183_s0 + %s10315_s22]]   ;;  %s10319_s22 = smov 28  }
  0x2a   :  { %12233 = sst [smem:[#allocation73_spill]] %s10495_s30 }
  0x2b   :  { %s10515_s30 = sld [smem:[%s12183_s0 + %s10316_s28]]   ;;  %s10320_s28 = smov 29  }
  0x2c   :  { %12234 = sst [smem:[#allocation74_spill]] %s10505_s14 }
  0x2d   :  { %s10520_s8 = sld [smem:[%s12183_s0 + %s10317_s7]]   ;;  %s10321_s7 = smov 30  }
  0x2e   :  { %s10525_s19 = sld [smem:[%s12183_s0 + %s10318_s15]]   ;;  %s10322_s15 = smov 31  }
  0x2f   :  { %12235 = sst [smem:[#allocation75_spill]] %s10510_s9 }
  0x30   :  { %s10530_s9 = sld [smem:[%s12183_s0 + %s10319_s22]]   ;;  %s10323_s22 = smov 32  }
  0x31   :  { %s10535_s3 = sld [smem:[%s12183_s0 + %s10320_s28]]   ;;  %s10324_s28 = smov 33  }
  0x32   :  { %s10540_s25 = sld [smem:[%s12183_s0 + %s10321_s7]]   ;;  %s10325_s7 = smov 34  }
  0x33   :  { %12236 = sst [smem:[#allocation76_spill]] %s10520_s8 }
  0x34   :  { %s10545_s5 = sld [smem:[%s12183_s0 + %s10322_s15]]   ;;  %s10326_s15 = smov 35  }
  0x36   :  { %12237 = sst [smem:[#allocation77_spill]] %s10530_s9 }
  0x37   :  { %12238 = sst [smem:[#allocation78_spill]] %s10535_s3 }
  0x38   :  { %12239 = sst [smem:[#allocation79_spill]] %s10540_s25 }
  0x39   :  { %s10550_s9 = sld [smem:[%s12183_s0 + %s10323_s22]]   ;;  %s10327_s22 = smov 36  }
  0x3a   :  { %12240 = sst [smem:[#allocation80_spill]] %s10545_s5 }
  0x3b   :  { %s10555_s3 = sld [smem:[%s12183_s0 + %s10324_s28]]   ;;  %s10328_s28 = smov 37  }
  0x3c   :  { %s10560_s25 = sld [smem:[%s12183_s0 + %s10325_s7]]   ;;  %s10329_s7 = smov 38  }
  0x3d   :  { %s10565_s5 = sld [smem:[%s12183_s0 + %s10326_s15]]   ;;  %s10330_s15 = smov 39  }
  0x3e   :  { %s10585_s8 = sld [smem:[%s12183_s0 + %s10330_s15]]   ;;  %s10334_s15 = smov 43  }
  0x3f   :  { %12241 = sst [smem:[#allocation81_spill]] %s10550_s9 }
  0x40   :  { %s10570_s9 = sld [smem:[%s12183_s0 + %s10327_s22]]   ;;  %s10331_s22 = smov 40  }
  0x41   :  { %12242 = sst [smem:[#allocation82_spill]] %s10555_s3 }
  0x42   :  { %12243 = sst [smem:[#allocation83_spill]] %s10560_s25 }
  0x43   :  { %s10575_s3 = sld [smem:[%s12183_s0 + %s10328_s28]]   ;;  %s10332_s28 = smov 41  }
  0x44   :  { %s10580_s25 = sld [smem:[%s12183_s0 + %s10329_s7]]   ;;  %s10333_s7 = smov 42  }
  0x45   :  { %s10595_s14 = sld [smem:[%s12183_s0 + %s10332_s28]]   ;;  %s10336_s28 = smov 45  }
  0x46   :  { %12244 = sst [smem:[#allocation84_spill]] %s10570_s9 }
  0x47   :  { %s10590_s9 = sld [smem:[%s12183_s0 + %s10331_s22]]   ;;  %s10335_s22 = smov 44  }
  0x48   :  { %s10605_s20 = sld [smem:[%s12183_s0 + %s10334_s15]]   ;;  %s10338_s15 = smov 47  }
  0x4a   :  { %12245 = sst [smem:[#allocation85_spill]] %s10580_s25 }
  0x4b   :  { %12247 = sst [smem:[#allocation87_spill]] %s10595_s14 }
  0x4c   :  { %s10600_s25 = sld [smem:[%s12183_s0 + %s10333_s7]]   ;;  %s10337_s7 = smov 46  }
  0x4d   :  { %12246 = sst [smem:[#allocation86_spill]] %s10590_s9 }
  0x4e   :  { %12249 = sst [smem:[#allocation89_spill]] %s10605_s20 }
  0x4f   :  { %s10610_s9 = sld [smem:[%s12183_s0 + %s10335_s22]]   ;;  %s10339_s22 = smov 48  }
  0x50   :  { %s10615_s14 = sld [smem:[%s12183_s0 + %s10336_s28]]   ;;  %s10340_s28 = smov 49  }
  0x51   :  { %s10625_s20 = sld [smem:[%s12183_s0 + %s10338_s15]]   ;;  %s10342_s15 = smov 51  }
  0x52   :  { %12248 = sst [smem:[#allocation88_spill]] %s10600_s25 }
  0x53   :  { %s10620_s25 = sld [smem:[%s12183_s0 + %s10337_s7]]   ;;  %s10341_s7 = smov 50  }
  0x54   :  { %s10630_s4 = sld [smem:[%s12183_s0 + %s10339_s22]]   ;;  %s10343_s22 = smov 52  }
  0x55   :  { %s10650_s12 = sld [smem:[%s12183_s0 + %s10343_s22]]  }
  0x56   :  { %12250 = sst [smem:[#allocation90_spill]] %s10615_s14 }
  0x57   :  { %12252 = sst [smem:[#allocation92_spill]] %s10625_s20 }
  0x58   :  { %s10635_s14 = sld [smem:[%s12183_s0 + %s10340_s28]]   ;;  %s10344_s28 = smov 53  }
  0x59   :  { %12251 = sst [smem:[#allocation91_spill]] %s10620_s25 }
  0x5a   :  { %s10640_s25 = sld [smem:[%s12183_s0 + %s10341_s7]]   ;;  %s10345_s7 = smov 54  }
  0x5b   :  { %s10645_s20 = sld [smem:[%s12183_s0 + %s10342_s15]]   ;;  %s10346_s15 = smov 55  }
  0x5c   :  { %s10665_s29 = sld [smem:[%s12183_s0 + %s10346_s15]]  }
  0x5e   :  { %12253 = sst [smem:[#allocation93_spill]] %s10635_s14 }
  0x5f   :  { %s10655_s14 = sld [smem:[%s12183_s0 + %s10344_s28]]  }
  0x60   :  { %12254 = sst [smem:[#allocation94_spill]] %s10640_s25 }
  0x61   :  { %s10660_s25 = sld [smem:[%s12183_s0 + %s10345_s7]]  }
  0x62   :  { %116 = vsyncpa [#allocation3], 0 }
  0x63   :  { %117 = vsyncpa [#allocation5], 0 }
  0x64   :  { %118 = vsyncpa [#allocation8], 0 }
  0x65   :  { %119 = vsyncpa [#allocation11], 0 }
  0x66   :  { %120 = vsyncpa [#allocation14], 0 }
  0x67   :  { %121 = vsyncpa [#allocation17], 0 }
  0x68   :  { %122 = vsyncpa [#allocation20], 0 }
  0x69   :  { %123 = vsyncpa [#allocation23], 0 }
  0x6a   :  { %124 = vsyncpa [#allocation26], 0 }
  0x6b   :  { %125 = vsyncpa [#allocation29], 0 }
  0x6c   :  { %126 = vsyncpa [#allocation32], 0 }
  0x6d   :  { %127 = vsyncpa [#allocation35], 0 }
  0x6e   :  { %128 = vsyncpa [#allocation38], 0 }
  0x6f   :  { %129 = vsyncpa [#allocation41], 0  ;;  %s10347_s22 = smov [#allocation4]   ;;  %s10348_s23 = smov [#allocation7]  }
  0x70   :  { %s153_s0 = sshll.u32 %s10347_s22, 4  ;;  %s192_s26 = sshll.u32 %s10348_s23, 4  ;;  %s154_s0 = int_to_ptr.vmem [resolvable:$true] %s153_s0  ;;  %s10667_s26 = int_to_ptr.vmem [resolvable:$true] %s192_s26 }
  0x71   :  { %s9670_s28 = scalar_lea.hbm %s10410_s21, 2304 }
  0x72   :  { %p9671_p0 = scmp.ne.s32.totalorder %s10410_s21, %s9670_s28  ;;  %p9674_p1 = scmp.lt.u32.totalorder %s9670_s28, %s10410_s21 }
  0x74   :  { %p9676_p2 = pnand %p9674_p1, %p9671_p0 }
  0x76   :  { %9679 = shalt.err (!%p9676_p2)
}
  0x77   :  { %s9680_s1 = scalar_lea.vmem %s154_s0, 2304  ;;  %p9685_p4 = scmp.lt.s32.totalorder %s154_s0, %s154_s0 }
  0x78   :  { %p9681_p3 = scmp.ne.s32.totalorder %s154_s0, %s9680_s1  ;;  %p9686_p5 = scmp.lt.s32.totalorder %s9680_s1, %s9680_s1 }
  0x7a   :  { %p9687_p6 = por %p9686_p5, %p9685_p4 }
  0x7c   :  { %p9688_p7 = pnand %p9687_p6, %p9681_p3 }
  0x7e   :  { %9691 = shalt.err (!%p9688_p7)
}
  0x7f   :  { %s10349_s2 = smov 128   ;;  %s10350_s7 = smov 8  }
  0x80   :  { %159 = dma.hbm_to_vmem [thread:$0]  %s10410_s21, 2304, %s154_s0, [#allocation5], %s10349_s2, %s10349_s2, %s10350_s7  }
  0x81   :  { %s9692_s10 = scalar_lea.hbm %s10455_s6, 16 }
  0x82   :  { %p9693_p8 = scmp.ne.s32.totalorder %s10455_s6, %s9692_s10  ;;  %p9696_p9 = scmp.lt.u32.totalorder %s9692_s10, %s10455_s6 }
  0x84   :  { %p9698_p10 = pnand %p9696_p9, %p9693_p8 }
  0x86   :  { %9701 = shalt.err (!%p9698_p10)
}
  0x87   :  { %s9702_s11 = scalar_lea.vmem %s10667_s26, 16  ;;  %s9706_s15 = scalar_lea.vmem %s10667_s26, 32 }
  0x88   :  { %p9703_p11 = scmp.ne.s32.totalorder %s10667_s26, %s9702_s11  ;;  %p9707_p12 = scmp.lt.s32.totalorder %s10667_s26, %s10667_s26 }
  0x89   :  { %p9708_p13 = scmp.lt.s32.totalorder %s9706_s15, %s9702_s11 }
  0x8b   :  { %p9709_p0 = por %p9708_p13, %p9707_p12 }
  0x8d   :  { %p9710_p1 = pnand %p9709_p0, %p9703_p11 }
  0x8f   :  { %9713 = shalt.err (!%p9710_p1)
}
  0x90   :  { %195 = dma.hbm_to_vmem [thread:$0]  %s10455_s6, 16, %s10667_s26, [#allocation8]  }
  0x91   :  { %s10351_s21 = smov [#allocation10]   ;;  %s10352_s18 = smov [#allocation13]  }
  0x92   :  { %s215_s16 = sshll.u32 %s10351_s21, 4  ;;  %s238_s22 = sshll.u32 %s10352_s18, 4  ;;  %s216_s16 = int_to_ptr.vmem [resolvable:$true] %s215_s16  ;;  %s239_s22 = int_to_ptr.vmem [resolvable:$true] %s238_s22 }
  0x93   :  { %s9714_s0 = scalar_lea.hbm %s10470_s27, 1024 }
  0x94   :  { %p9715_p2 = scmp.ne.s32.totalorder %s10470_s27, %s9714_s0  ;;  %p9718_p3 = scmp.lt.u32.totalorder %s9714_s0, %s10470_s27 }
  0x96   :  { %p9720_p4 = pnand %p9718_p3, %p9715_p2 }
  0x98   :  { %9723 = shalt.err (!%p9720_p4)
}
  0x99   :  { %s9724_s23 = scalar_lea.vmem %s216_s16, 1024  ;;  %p9729_p6 = scmp.lt.s32.totalorder %s216_s16, %s216_s16 }
  0x9a   :  { %p9725_p5 = scmp.ne.s32.totalorder %s216_s16, %s9724_s23  ;;  %p9730_p7 = scmp.lt.s32.totalorder %s9724_s23, %s9724_s23 }
  0x9c   :  { %p9731_p8 = por %p9730_p7, %p9729_p6 }
  0x9e   :  { %p9732_p9 = pnand %p9731_p8, %p9725_p5 }
  0xa0   :  { %9735 = shalt.err (!%p9732_p9)
}
  0xa1   :  { %221 = dma.hbm_to_vmem [thread:$0]  %s10470_s27, 1024, %s216_s16, [#allocation11], %s10349_s2, %s10349_s2, %s10350_s7  }
  0xa2   :  { %s9736_s6 = scalar_lea.hbm %s10480_s17, 16 }
  0xa3   :  { %p9737_p10 = scmp.ne.s32.totalorder %s10480_s17, %s9736_s6  ;;  %p9740_p11 = scmp.lt.u32.totalorder %s9736_s6, %s10480_s17 }
  0xa5   :  { %p9742_p12 = pnand %p9740_p11, %p9737_p10 }
  0xa7   :  { %9745 = shalt.err (!%p9742_p12)
}
  0xa8   :  { %s9746_s26 = scalar_lea.vmem %s239_s22, 16  ;;  %s9750_s28 = scalar_lea.vmem %s239_s22, 32 }
  0xa9   :  { %p9747_p13 = scmp.ne.s32.totalorder %s239_s22, %s9746_s26  ;;  %p9751_p0 = scmp.lt.s32.totalorder %s239_s22, %s239_s22 }
  0xaa   :  { %p9752_p1 = scmp.lt.s32.totalorder %s9750_s28, %s9746_s26 }
  0xac   :  { %p9753_p2 = por %p9752_p1, %p9751_p0 }
  0xae   :  { %p9754_p3 = pnand %p9753_p2, %p9747_p13 }
  0xb0   :  { %9757 = shalt.err (!%p9754_p3)
}
  0xb1   :  { %241 = dma.hbm_to_vmem [thread:$0]  %s10480_s17, 16, %s239_s22, [#allocation14]  }
  0xb2   :  { %s10353_s1 = smov [#allocation16]   ;;  %s10354_s10 = smov [#allocation19]  }
  0xb3   :  { %s262_s27 = sshll.u32 %s10353_s1, 4  ;;  %s284_s11 = sshll.u32 %s10354_s10, 4  ;;  %s263_s27 = int_to_ptr.vmem [resolvable:$true] %s262_s27  ;;  %s285_s11 = int_to_ptr.vmem [resolvable:$true] %s284_s11 }
  0xb4   :  { %s9758_s15 = scalar_lea.hbm %s10500_s24, 16 }
  0xb5   :  { %p9759_p4 = scmp.ne.s32.totalorder %s10500_s24, %s9758_s15  ;;  %p9762_p5 = scmp.lt.u32.totalorder %s9758_s15, %s10500_s24 }
  0xb7   :  { %p9764_p6 = pnand %p9762_p5, %p9759_p4 }
  0xb9   :  { %9767 = shalt.err (!%p9764_p6)
}
  0xba   :  { %s9768_s21 = scalar_lea.vmem %s263_s27, 16  ;;  %s9772_s16 = scalar_lea.vmem %s263_s27, 32 }
  0xbb   :  { %p9769_p7 = scmp.ne.s32.totalorder %s263_s27, %s9768_s21  ;;  %p9773_p8 = scmp.lt.s32.totalorder %s263_s27, %s263_s27 }
  0xbc   :  { %p9774_p9 = scmp.lt.s32.totalorder %s9772_s16, %s9768_s21 }
  0xbe   :  { %p9775_p10 = por %p9774_p9, %p9773_p8 }
  0xc0   :  { %p9776_p11 = pnand %p9775_p10, %p9769_p7 }
  0xc2   :  { %9779 = shalt.err (!%p9776_p11)
}
  0xc3   :  { %265 = dma.hbm_to_vmem [thread:$0]  %s10500_s24, 16, %s263_s27, [#allocation17]  }
  0xc4   :  { %s9780_s17 = scalar_lea.hbm %s10515_s30, 16 }
  0xc5   :  { %p9781_p12 = scmp.ne.s32.totalorder %s10515_s30, %s9780_s17  ;;  %p9784_p13 = scmp.lt.u32.totalorder %s9780_s17, %s10515_s30 }
  0xc7   :  { %p9786_p0 = pnand %p9784_p13, %p9781_p12 }
  0xc9   :  { %9789 = shalt.err (!%p9786_p0)
}
  0xca   :  { %s9790_s18 = scalar_lea.vmem %s285_s11, 16  ;;  %s9794_s22 = scalar_lea.vmem %s285_s11, 32 }
  0xcb   :  { %p9791_p1 = scmp.ne.s32.totalorder %s285_s11, %s9790_s18  ;;  %p9795_p2 = scmp.lt.s32.totalorder %s285_s11, %s285_s11 }
  0xcc   :  { %p9796_p3 = scmp.lt.s32.totalorder %s9794_s22, %s9790_s18 }
  0xce   :  { %p9797_p4 = por %p9796_p3, %p9795_p2 }
  0xd0   :  { %p9798_p5 = pnand %p9797_p4, %p9791_p1 }
  0xd2   :  { %9801 = shalt.err (!%p9798_p5)
}
  0xd3   :  { %287 = dma.hbm_to_vmem [thread:$0]  %s10515_s30, 16, %s285_s11, [#allocation20]  }
  0xd4   :  { %s10355_s0 = smov [#allocation22]   ;;  %s10356_s23 = smov [#allocation25]  }
  0xd5   :  { %s306_s24 = sshll.u32 %s10355_s0, 4  ;;  %s338_s6 = sshll.u32 %s10356_s23, 4  ;;  %s307_s24 = int_to_ptr.vmem [resolvable:$true] %s306_s24  ;;  %s339_s6 = int_to_ptr.vmem [resolvable:$true] %s338_s6 }
  0xd6   :  { %s9802_s26 = scalar_lea.hbm %s10525_s19, 16 }
  0xd7   :  { %p9803_p6 = scmp.ne.s32.totalorder %s10525_s19, %s9802_s26  ;;  %p9806_p7 = scmp.lt.u32.totalorder %s9802_s26, %s10525_s19 }
  0xd9   :  { %p9808_p8 = pnand %p9806_p7, %p9803_p6 }
  0xdb   :  { %9811 = shalt.err (!%p9808_p8)
}
  0xdc   :  { %s9812_s28 = scalar_lea.vmem %s307_s24, 16  ;;  %s9816_s1 = scalar_lea.vmem %s307_s24, 32 }
  0xdd   :  { %p9813_p9 = scmp.ne.s32.totalorder %s307_s24, %s9812_s28  ;;  %p9817_p10 = scmp.lt.s32.totalorder %s307_s24, %s307_s24 }
  0xde   :  { %p9818_p11 = scmp.lt.s32.totalorder %s9816_s1, %s9812_s28 }
  0xe0   :  { %p9819_p12 = por %p9818_p11, %p9817_p10 }
  0xe2   :  { %p9820_p13 = pnand %p9819_p12, %p9813_p9 }
  0xe4   :  { %9823 = shalt.err (!%p9820_p13)
}
  0xe5   :  { %309 = dma.hbm_to_vmem [thread:$0]  %s10525_s19, 16, %s307_s24, [#allocation23]  }
  0xe6   :  { %s9824_s30 = scalar_lea.hbm %s10565_s5, 16 }
  0xe7   :  { %p9825_p0 = scmp.ne.s32.totalorder %s10565_s5, %s9824_s30  ;;  %p9828_p1 = scmp.lt.u32.totalorder %s9824_s30, %s10565_s5 }
  0xe9   :  { %p9830_p2 = pnand %p9828_p1, %p9825_p0 }
  0xeb   :  { %9833 = shalt.err (!%p9830_p2)
}
  0xec   :  { %s9834_s27 = scalar_lea.vmem %s339_s6, 16  ;;  %s9838_s10 = scalar_lea.vmem %s339_s6, 32 }
  0xed   :  { %p9835_p3 = scmp.ne.s32.totalorder %s339_s6, %s9834_s27  ;;  %p9839_p4 = scmp.lt.s32.totalorder %s339_s6, %s339_s6 }
  0xee   :  { %p9840_p5 = scmp.lt.s32.totalorder %s9838_s10, %s9834_s27 }
  0xf0   :  { %p9841_p6 = por %p9840_p5, %p9839_p4 }
  0xf2   :  { %p9842_p7 = pnand %p9841_p6, %p9835_p3 }
  0xf4   :  { %9845 = shalt.err (!%p9842_p7)
}
  0xf5   :  { %341 = dma.hbm_to_vmem [thread:$0]  %s10565_s5, 16, %s339_s6, [#allocation26]  }
  0xf6   :  { %s10357_s11 = smov [#allocation28]   ;;  %s10358_s15 = smov [#allocation31]  }
  0xf7   :  { %s359_s19 = sshll.u32 %s10357_s11, 4  ;;  %s382_s21 = sshll.u32 %s10358_s15, 4  ;;  %s360_s19 = int_to_ptr.vmem [resolvable:$true] %s359_s19  ;;  %s383_s21 = int_to_ptr.vmem [resolvable:$true] %s382_s21 }
  0xf8   :  { %s9846_s16 = scalar_lea.hbm %s10575_s3, 6144 }
  0xf9   :  { %p9847_p8 = scmp.ne.s32.totalorder %s10575_s3, %s9846_s16  ;;  %p9850_p9 = scmp.lt.u32.totalorder %s9846_s16, %s10575_s3 }
  0xfb   :  { %p9852_p10 = pnand %p9850_p9, %p9847_p8 }
  0xfd   :  { %9855 = shalt.err (!%p9852_p10)
}
  0xfe   :  { %s9856_s17 = scalar_lea.vmem %s360_s19, 6144  ;;  %p9861_p12 = scmp.lt.s32.totalorder %s360_s19, %s360_s19 }
  0xff   :  { %p9857_p11 = scmp.ne.s32.totalorder %s360_s19, %s9856_s17  ;;  %p9862_p13 = scmp.lt.s32.totalorder %s9856_s17, %s9856_s17 }
 0x101   :  { %p9863_p0 = por %p9862_p13, %p9861_p12 }
 0x103   :  { %p9864_p1 = pnand %p9863_p0, %p9857_p11 }
 0x105   :  { %9867 = shalt.err (!%p9864_p1)
}
 0x106   :  { %365 = dma.hbm_to_vmem [thread:$0]  %s10575_s3, 6144, %s360_s19, [#allocation29], %s10349_s2, %s10349_s2, %s10350_s7  }
 0x107   :  { %s9868_s5 = scalar_lea.hbm %s10585_s8, 16 }
 0x108   :  { %p9869_p2 = scmp.ne.s32.totalorder %s10585_s8, %s9868_s5  ;;  %p9872_p3 = scmp.lt.u32.totalorder %s9868_s5, %s10585_s8 }
 0x10a   :  { %p9874_p4 = pnand %p9872_p3, %p9869_p2 }
 0x10c   :  { %9877 = shalt.err (!%p9874_p4)
}
 0x10d   :  { %s9878_s18 = scalar_lea.vmem %s383_s21, 16  ;;  %s9882_s22 = scalar_lea.vmem %s383_s21, 32 }
 0x10e   :  { %p9879_p5 = scmp.ne.s32.totalorder %s383_s21, %s9878_s18  ;;  %p9883_p6 = scmp.lt.s32.totalorder %s383_s21, %s383_s21 }
 0x10f   :  { %p9884_p7 = scmp.lt.s32.totalorder %s9882_s22, %s9878_s18 }
 0x111   :  { %p9885_p8 = por %p9884_p7, %p9883_p6 }
 0x113   :  { %p9886_p9 = pnand %p9885_p8, %p9879_p5 }
 0x115   :  { %9889 = shalt.err (!%p9886_p9)
}
 0x116   :  { %385 = dma.hbm_to_vmem [thread:$0]  %s10585_s8, 16, %s383_s21, [#allocation32]  }
 0x117   :  { %s10359_s0 = smov [#allocation34]   ;;  %s10360_s24 = smov [#allocation37]  }
 0x118   :  { %s408_s3 = sshll.u32 %s10359_s0, 4  ;;  %s432_s23 = sshll.u32 %s10360_s24, 4  ;;  %s409_s3 = int_to_ptr.vmem [resolvable:$true] %s408_s3  ;;  %s433_s23 = int_to_ptr.vmem [resolvable:$true] %s432_s23 }
 0x119   :  { %s9890_s6 = scalar_lea.hbm %s10610_s9, 16 }
 0x11a   :  { %p9891_p10 = scmp.ne.s32.totalorder %s10610_s9, %s9890_s6  ;;  %p9894_p11 = scmp.lt.u32.totalorder %s9890_s6, %s10610_s9 }
 0x11c   :  { %p9896_p12 = pnand %p9894_p11, %p9891_p10 }
 0x11e   :  { %9899 = shalt.err (!%p9896_p12)
}
 0x11f   :  { %s9900_s26 = scalar_lea.vmem %s409_s3, 16  ;;  %s9904_s28 = scalar_lea.vmem %s409_s3, 32 }
 0x120   :  { %p9901_p13 = scmp.ne.s32.totalorder %s409_s3, %s9900_s26  ;;  %p9905_p0 = scmp.lt.s32.totalorder %s409_s3, %s409_s3 }
 0x121   :  { %p9906_p1 = scmp.lt.s32.totalorder %s9904_s28, %s9900_s26 }
 0x123   :  { %p9907_p2 = por %p9906_p1, %p9905_p0 }
 0x125   :  { %p9908_p3 = pnand %p9907_p2, %p9901_p13 }
 0x127   :  { %9911 = shalt.err (!%p9908_p3)
}
 0x128   :  { %411 = dma.hbm_to_vmem [thread:$0]  %s10610_s9, 16, %s409_s3, [#allocation35]  }
 0x129   :  { %s9912_s8 = scalar_lea.hbm %s10630_s4, 16 }
 0x12a   :  { %p9913_p4 = scmp.ne.s32.totalorder %s10630_s4, %s9912_s8  ;;  %p9916_p5 = scmp.lt.u32.totalorder %s9912_s8, %s10630_s4 }
 0x12c   :  { %p9918_p6 = pnand %p9916_p5, %p9913_p4 }
 0x12e   :  { %9921 = shalt.err (!%p9918_p6)
}
 0x12f   :  { %s9922_s1 = scalar_lea.vmem %s433_s23, 16  ;;  %s9926_s30 = scalar_lea.vmem %s433_s23, 32 }
 0x130   :  { %p9923_p7 = scmp.ne.s32.totalorder %s433_s23, %s9922_s1  ;;  %p9927_p8 = scmp.lt.s32.totalorder %s433_s23, %s433_s23 }
 0x131   :  { %p9928_p9 = scmp.lt.s32.totalorder %s9926_s30, %s9922_s1 }
 0x133   :  { %p9929_p10 = por %p9928_p9, %p9927_p8 }
 0x135   :  { %p9930_p11 = pnand %p9929_p10, %p9923_p7 }
 0x137   :  { %9933 = shalt.err (!%p9930_p11)
}
 0x138   :  { %435 = dma.hbm_to_vmem [thread:$0]  %s10630_s4, 16, %s433_s23, [#allocation38]  }
 0x139   :  { %s10361_s27 = smov [#allocation40]   ;;  %s10362_s10 = smov [#allocation2]  }
 0x13a   :  { %s453_s9 = sshll.u32 %s10361_s27, 4  ;;  %s139_s11 = sshll.u32 %s10362_s10, 4  ;;  %s454_s9 = int_to_ptr.vmem [resolvable:$true] %s453_s9  ;;  %s10732_s11 = int_to_ptr.vmem [resolvable:$true] %s139_s11 }
 0x13b   :  { %s9934_s19 = scalar_lea.hbm %s10645_s20, 2048 }
 0x13c   :  { %p9935_p12 = scmp.ne.s32.totalorder %s10645_s20, %s9934_s19  ;;  %p9938_p13 = scmp.lt.u32.totalorder %s9934_s19, %s10645_s20 }
 0x13e   :  { %p9940_p0 = pnand %p9938_p13, %p9935_p12 }
 0x140   :  { %9943 = shalt.err (!%p9940_p0)
}
 0x141   :  { %s9944_s15 = scalar_lea.vmem %s454_s9, 2048  ;;  %p9949_p2 = scmp.lt.s32.totalorder %s454_s9, %s454_s9 }
 0x142   :  { %p9945_p1 = scmp.ne.s32.totalorder %s454_s9, %s9944_s15  ;;  %p9950_p3 = scmp.lt.s32.totalorder %s9944_s15, %s9944_s15 }
 0x144   :  { %p9951_p4 = por %p9950_p3, %p9949_p2 }
 0x146   :  { %p9952_p5 = pnand %p9951_p4, %p9945_p1 }
 0x148   :  { %9955 = shalt.err (!%p9952_p5)
}
 0x149   :  { %459 = dma.hbm_to_vmem [thread:$0]  %s10645_s20, 2048, %s454_s9, [#allocation41], %s10349_s2, %s10349_s2, %s10350_s7  }
 0x14a   :  { %s9956_s4 = scalar_lea.hbm %s10400_s13, 256 }
 0x14b   :  { %p9957_p6 = scmp.ne.s32.totalorder %s10400_s13, %s9956_s4  ;;  %p9960_p7 = scmp.lt.u32.totalorder %s9956_s4, %s10400_s13 }
 0x14d   :  { %p9962_p8 = pnand %p9960_p7, %p9957_p6 }
 0x14f   :  { %9965 = shalt.err (!%p9962_p8)
}
 0x150   :  { %s9966_s21 = scalar_lea.vmem %s10732_s11, 256  ;;  %p9971_p10 = scmp.lt.s32.totalorder %s10732_s11, %s10732_s11 }
 0x151   :  { %p9967_p9 = scmp.ne.s32.totalorder %s10732_s11, %s9966_s21  ;;  %p9972_p11 = scmp.lt.s32.totalorder %s9966_s21, %s9966_s21 }
 0x153   :  { %p9973_p12 = por %p9972_p11, %p9971_p10 }
 0x155   :  { %p9974_p13 = pnand %p9973_p12, %p9967_p9 }
 0x157   :  { %9977 = shalt.err (!%p9974_p13)
}
 0x158   :  { %s12255_s20 = sld [smem:[#allocation61_spill]]  ;;  %s10363_s16 = smov [#allocation6]  }
 0x159   :  { %145 = dma.hbm_to_vmem [thread:$0]  %s10400_s13, 256, %s10732_s11, [#allocation3], %s10349_s2, %s10349_s2, %s10350_s7  }
 0x15a   :  { %s167_s17 = sshll.u32 %s10363_s16, 4  ;;  %s10364_s5 = smov [#allocation9]   ;;  %s168_s17 = int_to_ptr.vmem [resolvable:$true] %s167_s17 }
 0x15b   :  { %s201_s18 = sshll.u32 %s10364_s5, 4  ;;  %s10753_s18 = int_to_ptr.vmem [resolvable:$true] %s201_s18 }
 0x15e   :  { %s9978_s22 = scalar_lea.hbm %s12255_s20, 768 }
 0x15f   :  { %p9979_p0 = scmp.ne.s32.totalorder %s12255_s20, %s9978_s22  ;;  %p9982_p1 = scmp.lt.u32.totalorder %s9978_s22, %s12255_s20 }
 0x161   :  { %p9984_p2 = pnand %p9982_p1, %p9979_p0 }
 0x163   :  { %9987 = shalt.err (!%p9984_p2)
}
 0x164   :  { %s9988_s0 = scalar_lea.vmem %s168_s17, 768  ;;  %p9993_p4 = scmp.lt.s32.totalorder %s168_s17, %s168_s17 }
 0x165   :  { %p9989_p3 = scmp.ne.s32.totalorder %s168_s17, %s9988_s0  ;;  %p9994_p5 = scmp.lt.s32.totalorder %s9988_s0, %s9988_s0 }
 0x167   :  { %p9995_p6 = por %p9994_p5, %p9993_p4 }
 0x169   :  { %p9996_p7 = pnand %p9995_p6, %p9989_p3 }
 0x16b   :  { %9999 = shalt.err (!%p9996_p7)
}
 0x16c   :  { %s12256_s13 = sld [smem:[#allocation68_spill]] }
 0x16d   :  { %173 = dma.hbm_to_vmem [thread:$0]  %s12255_s20, 768, %s168_s17, [#allocation5], %s10349_s2, %s10349_s2, %s10350_s7  }
 0x172   :  { %s10000_s3 = scalar_lea.hbm %s12256_s13, 3072 }
 0x173   :  { %p10001_p8 = scmp.ne.s32.totalorder %s12256_s13, %s10000_s3  ;;  %p10004_p9 = scmp.lt.u32.totalorder %s10000_s3, %s12256_s13 }
 0x175   :  { %p10006_p10 = pnand %p10004_p9, %p10001_p8 }
 0x177   :  { %10009 = shalt.err (!%p10006_p10)
}
 0x178   :  { %s10010_s24 = scalar_lea.vmem %s10753_s18, 3072  ;;  %p10015_p12 = scmp.lt.s32.totalorder %s10753_s18, %s10753_s18 }
 0x179   :  { %p10011_p11 = scmp.ne.s32.totalorder %s10753_s18, %s10010_s24  ;;  %p10016_p13 = scmp.lt.s32.totalorder %s10010_s24, %s10010_s24 }
 0x17b   :  { %p10017_p0 = por %p10016_p13, %p10015_p12 }
 0x17d   :  { %p10018_p1 = pnand %p10017_p0, %p10011_p11 }
 0x17f   :  { %10021 = shalt.err (!%p10018_p1)
}
 0x180   :  { %s12257_s23 = sld [smem:[#allocation70_spill]]  ;;  %s10365_s6 = smov [#allocation12]  }
 0x181   :  { %207 = dma.hbm_to_vmem [thread:$0]  %s12256_s13, 3072, %s10753_s18, [#allocation8], %s10349_s2, %s10349_s2, %s10350_s7  }
 0x182   :  { %s228_s26 = sshll.u32 %s10365_s6, 4  ;;  %s10366_s28 = smov [#allocation15]   ;;  %s229_s26 = int_to_ptr.vmem [resolvable:$true] %s228_s26 }
 0x183   :  { %s248_s8 = sshll.u32 %s10366_s28, 4  ;;  %s249_s8 = int_to_ptr.vmem [resolvable:$true] %s248_s8 }
 0x186   :  { %s10022_s1 = scalar_lea.hbm %s12257_s23, 16 }
 0x187   :  { %p10023_p2 = scmp.ne.s32.totalorder %s12257_s23, %s10022_s1  ;;  %p10026_p3 = scmp.lt.u32.totalorder %s10022_s1, %s12257_s23 }
 0x189   :  { %p10028_p4 = pnand %p10026_p3, %p10023_p2 }
 0x18b   :  { %10031 = shalt.err (!%p10028_p4)
}
 0x18c   :  { %s10032_s30 = scalar_lea.vmem %s229_s26, 16  ;;  %s10036_s27 = scalar_lea.vmem %s229_s26, 32 }
 0x18d   :  { %p10033_p5 = scmp.ne.s32.totalorder %s229_s26, %s10032_s30  ;;  %p10037_p6 = scmp.lt.s32.totalorder %s229_s26, %s229_s26 }
 0x18e   :  { %p10038_p7 = scmp.lt.s32.totalorder %s10036_s27, %s10032_s30 }
 0x190   :  { %p10039_p8 = por %p10038_p7, %p10037_p6 }
 0x192   :  { %p10040_p9 = pnand %p10039_p8, %p10033_p5 }
 0x194   :  { %10043 = shalt.err (!%p10040_p9)
}
 0x195   :  { %s12258_s9 = sld [smem:[#allocation71_spill]] }
 0x196   :  { %231 = dma.hbm_to_vmem [thread:$0]  %s12257_s23, 16, %s229_s26, [#allocation11]  }
 0x19b   :  { %s10044_s10 = scalar_lea.hbm %s12258_s9, 16 }
 0x19c   :  { %p10045_p10 = scmp.ne.s32.totalorder %s12258_s9, %s10044_s10  ;;  %p10048_p11 = scmp.lt.u32.totalorder %s10044_s10, %s12258_s9 }
 0x19e   :  { %p10050_p12 = pnand %p10048_p11, %p10045_p10 }
 0x1a0   :  { %10053 = shalt.err (!%p10050_p12)
}
 0x1a1   :  { %s10054_s11 = scalar_lea.vmem %s249_s8, 16  ;;  %s10058_s19 = scalar_lea.vmem %s249_s8, 32 }
 0x1a2   :  { %p10055_p13 = scmp.ne.s32.totalorder %s249_s8, %s10054_s11  ;;  %p10059_p0 = scmp.lt.s32.totalorder %s249_s8, %s249_s8 }
 0x1a3   :  { %p10060_p1 = scmp.lt.s32.totalorder %s10058_s19, %s10054_s11 }
 0x1a5   :  { %p10061_p2 = por %p10060_p1, %p10059_p0 }
 0x1a7   :  { %p10062_p3 = pnand %p10061_p2, %p10055_p13 }
 0x1a9   :  { %10065 = shalt.err (!%p10062_p3)
}
 0x1aa   :  { %s12259_s15 = sld [smem:[#allocation74_spill]]  ;;  %s10367_s4 = smov [#allocation18]  }
 0x1ab   :  { %251 = dma.hbm_to_vmem [thread:$0]  %s12258_s9, 16, %s249_s8, [#allocation14]  }
 0x1ac   :  { %s272_s21 = sshll.u32 %s10367_s4, 4  ;;  %s10368_s20 = smov [#allocation21]   ;;  %s273_s21 = int_to_ptr.vmem [resolvable:$true] %s272_s21 }
 0x1ad   :  { %s293_s16 = sshll.u32 %s10368_s20, 4  ;;  %s10782_s16 = int_to_ptr.vmem [resolvable:$true] %s293_s16 }
 0x1b0   :  { %s10066_s17 = scalar_lea.hbm %s12259_s15, 16 }
 0x1b1   :  { %p10067_p4 = scmp.ne.s32.totalorder %s12259_s15, %s10066_s17  ;;  %p10070_p5 = scmp.lt.u32.totalorder %s10066_s17, %s12259_s15 }
 0x1b3   :  { %p10072_p6 = pnand %p10070_p5, %p10067_p4 }
 0x1b5   :  { %10075 = shalt.err (!%p10072_p6)
}
 0x1b6   :  { %s10076_s5 = scalar_lea.vmem %s273_s21, 16  ;;  %s10080_s18 = scalar_lea.vmem %s273_s21, 32 }
 0x1b7   :  { %p10077_p7 = scmp.ne.s32.totalorder %s273_s21, %s10076_s5  ;;  %p10081_p8 = scmp.lt.s32.totalorder %s273_s21, %s273_s21 }
 0x1b8   :  { %p10082_p9 = scmp.lt.s32.totalorder %s10080_s18, %s10076_s5 }
 0x1ba   :  { %p10083_p10 = por %p10082_p9, %p10081_p8 }
 0x1bc   :  { %p10084_p11 = pnand %p10083_p10, %p10077_p7 }
 0x1be   :  { %10087 = shalt.err (!%p10084_p11)
}
 0x1bf   :  { %s12260_s22 = sld [smem:[#allocation76_spill]] }
 0x1c0   :  { %275 = dma.hbm_to_vmem [thread:$0]  %s12259_s15, 16, %s273_s21, [#allocation17]  }
 0x1c5   :  { %s10088_s0 = scalar_lea.hbm %s12260_s22, 2048 }
 0x1c6   :  { %p10089_p12 = scmp.ne.s32.totalorder %s12260_s22, %s10088_s0  ;;  %p10092_p13 = scmp.lt.u32.totalorder %s10088_s0, %s12260_s22 }
 0x1c8   :  { %p10094_p0 = pnand %p10092_p13, %p10089_p12 }
 0x1ca   :  { %10097 = shalt.err (!%p10094_p0)
}
 0x1cb   :  { %s10098_s13 = scalar_lea.vmem %s10782_s16, 2048  ;;  %p10103_p2 = scmp.lt.s32.totalorder %s10782_s16, %s10782_s16 }
 0x1cc   :  { %p10099_p1 = scmp.ne.s32.totalorder %s10782_s16, %s10098_s13  ;;  %p10104_p3 = scmp.lt.s32.totalorder %s10098_s13, %s10098_s13 }
 0x1ce   :  { %p10105_p4 = por %p10104_p3, %p10103_p2 }
 0x1d0   :  { %p10106_p5 = pnand %p10105_p4, %p10099_p1 }
 0x1d2   :  { %10109 = shalt.err (!%p10106_p5)
}
 0x1d3   :  { %s12261_s3 = sld [smem:[#allocation83_spill]]  ;;  %s10369_s24 = smov [#allocation24]  }
 0x1d4   :  { %299 = dma.hbm_to_vmem [thread:$0]  %s12260_s22, 2048, %s10782_s16, [#allocation20], %s10349_s2, %s10349_s2, %s10350_s7  }
 0x1d5   :  { %s328_s23 = sshll.u32 %s10369_s24, 4  ;;  %s10370_s6 = smov [#allocation27]   ;;  %s329_s23 = int_to_ptr.vmem [resolvable:$true] %s328_s23 }
 0x1d6   :  { %s347_s26 = sshll.u32 %s10370_s6, 4  ;;  %s10800_s26 = int_to_ptr.vmem [resolvable:$true] %s347_s26 }
 0x1d9   :  { %s10110_s28 = scalar_lea.hbm %s12261_s3, 16 }
 0x1da   :  { %p10111_p6 = scmp.ne.s32.totalorder %s12261_s3, %s10110_s28  ;;  %p10114_p7 = scmp.lt.u32.totalorder %s10110_s28, %s12261_s3 }
 0x1dc   :  { %p10116_p8 = pnand %p10114_p7, %p10111_p6 }
 0x1de   :  { %10119 = shalt.err (!%p10116_p8)
}
 0x1df   :  { %s10120_s8 = scalar_lea.vmem %s329_s23, 16  ;;  %s10124_s1 = scalar_lea.vmem %s329_s23, 32 }
 0x1e0   :  { %p10121_p9 = scmp.ne.s32.totalorder %s329_s23, %s10120_s8  ;;  %p10125_p10 = scmp.lt.s32.totalorder %s329_s23, %s329_s23 }
 0x1e1   :  { %p10126_p11 = scmp.lt.s32.totalorder %s10124_s1, %s10120_s8 }
 0x1e3   :  { %p10127_p12 = por %p10126_p11, %p10125_p10 }
 0x1e5   :  { %p10128_p13 = pnand %p10127_p12, %p10121_p9 }
 0x1e7   :  { %10131 = shalt.err (!%p10128_p13)
}
 0x1e8   :  { %s12262_s30 = sld [smem:[#allocation84_spill]] }
 0x1e9   :  { %331 = dma.hbm_to_vmem [thread:$0]  %s12261_s3, 16, %s329_s23, [#allocation23]  }
 0x1ee   :  { %s10132_s27 = scalar_lea.hbm %s12262_s30, 6144 }
 0x1ef   :  { %p10133_p0 = scmp.ne.s32.totalorder %s12262_s30, %s10132_s27  ;;  %p10136_p1 = scmp.lt.u32.totalorder %s10132_s27, %s12262_s30 }
 0x1f1   :  { %p10138_p2 = pnand %p10136_p1, %p10133_p0 }
 0x1f3   :  { %10141 = shalt.err (!%p10138_p2)
}
 0x1f4   :  { %s10142_s9 = scalar_lea.vmem %s10800_s26, 6144  ;;  %p10147_p4 = scmp.lt.s32.totalorder %s10800_s26, %s10800_s26 }
 0x1f5   :  { %p10143_p3 = scmp.ne.s32.totalorder %s10800_s26, %s10142_s9  ;;  %p10148_p5 = scmp.lt.s32.totalorder %s10142_s9, %s10142_s9 }
 0x1f7   :  { %p10149_p6 = por %p10148_p5, %p10147_p4 }
 0x1f9   :  { %p10150_p7 = pnand %p10149_p6, %p10143_p3 }
 0x1fb   :  { %10153 = shalt.err (!%p10150_p7)
}
 0x1fc   :  { %s12263_s10 = sld [smem:[#allocation85_spill]]  ;;  %s10371_s11 = smov [#allocation30]  }
 0x1fd   :  { %353 = dma.hbm_to_vmem [thread:$0]  %s12262_s30, 6144, %s10800_s26, [#allocation26], %s10349_s2, %s10349_s2, %s10350_s7  }
 0x1fe   :  { %s372_s19 = sshll.u32 %s10371_s11, 4  ;;  %s10372_s15 = smov [#allocation33]   ;;  %s373_s19 = int_to_ptr.vmem [resolvable:$true] %s372_s19 }
 0x1ff   :  { %s398_s4 = sshll.u32 %s10372_s15, 4  ;;  %s399_s4 = int_to_ptr.vmem [resolvable:$true] %s398_s4 }
 0x202   :  { %s10154_s21 = scalar_lea.hbm %s12263_s10, 16 }
 0x203   :  { %p10155_p8 = scmp.ne.s32.totalorder %s12263_s10, %s10154_s21  ;;  %p10158_p9 = scmp.lt.u32.totalorder %s10154_s21, %s12263_s10 }
 0x205   :  { %p10160_p10 = pnand %p10158_p9, %p10155_p8 }
 0x207   :  { %10163 = shalt.err (!%p10160_p10)
}
 0x208   :  { %s10164_s20 = scalar_lea.vmem %s373_s19, 16  ;;  %s10168_s16 = scalar_lea.vmem %s373_s19, 32 }
 0x209   :  { %p10165_p11 = scmp.ne.s32.totalorder %s373_s19, %s10164_s20  ;;  %p10169_p12 = scmp.lt.s32.totalorder %s373_s19, %s373_s19 }
 0x20a   :  { %p10170_p13 = scmp.lt.s32.totalorder %s10168_s16, %s10164_s20 }
 0x20c   :  { %p10171_p0 = por %p10170_p13, %p10169_p12 }
 0x20e   :  { %p10172_p1 = pnand %p10171_p0, %p10165_p11 }
 0x210   :  { %10175 = shalt.err (!%p10172_p1)
}
 0x211   :  { %s12264_s2 = sld [smem:[#allocation89_spill]] }
 0x212   :  { %375 = dma.hbm_to_vmem [thread:$0]  %s12263_s10, 16, %s373_s19, [#allocation29]  }
 0x217   :  { %s10176_s7 = scalar_lea.hbm %s12264_s2, 16 }
 0x218   :  { %p10177_p2 = scmp.ne.s32.totalorder %s12264_s2, %s10176_s7  ;;  %p10180_p3 = scmp.lt.u32.totalorder %s10176_s7, %s12264_s2 }
 0x21a   :  { %p10182_p4 = pnand %p10180_p3, %p10177_p2 }
 0x21c   :  { %10185 = shalt.err (!%p10182_p4)
}
 0x21d   :  { %s10186_s17 = scalar_lea.vmem %s399_s4, 16  ;;  %s10190_s5 = scalar_lea.vmem %s399_s4, 32 }
 0x21e   :  { %p10187_p5 = scmp.ne.s32.totalorder %s399_s4, %s10186_s17  ;;  %p10191_p6 = scmp.lt.s32.totalorder %s399_s4, %s399_s4 }
 0x21f   :  { %p10192_p7 = scmp.lt.s32.totalorder %s10190_s5, %s10186_s17 }
 0x221   :  { %p10193_p8 = por %p10192_p7, %p10191_p6 }
 0x223   :  { %p10194_p9 = pnand %p10193_p8, %p10187_p5 }
 0x225   :  { %10197 = shalt.err (!%p10194_p9)
}
 0x226   :  { %s12265_s18 = sld [smem:[#allocation90_spill]]  ;;  %s10373_s22 = smov [#allocation36]  }
 0x227   :  { %401 = dma.hbm_to_vmem [thread:$0]  %s12264_s2, 16, %s399_s4, [#allocation32]  }
 0x228   :  { %s418_s0 = sshll.u32 %s10373_s22, 4  ;;  %s10374_s13 = smov [#allocation39]   ;;  %s419_s0 = int_to_ptr.vmem [resolvable:$true] %s418_s0 }
 0x229   :  { %s442_s3 = sshll.u32 %s10374_s13, 4  ;;  %s443_s3 = int_to_ptr.vmem [resolvable:$true] %s442_s3 }
 0x22c   :  { %s10198_s24 = scalar_lea.hbm %s12265_s18, 16 }
 0x22d   :  { %p10199_p10 = scmp.ne.s32.totalorder %s12265_s18, %s10198_s24  ;;  %p10202_p11 = scmp.lt.u32.totalorder %s10198_s24, %s12265_s18 }
 0x22f   :  { %p10204_p12 = pnand %p10202_p11, %p10199_p10 }
 0x231   :  { %10207 = shalt.err (!%p10204_p12)
}
 0x232   :  { %s10208_s23 = scalar_lea.vmem %s419_s0, 16  ;;  %s10212_s6 = scalar_lea.vmem %s419_s0, 32 }
 0x233   :  { %p10209_p13 = scmp.ne.s32.totalorder %s419_s0, %s10208_s23  ;;  %p10213_p0 = scmp.lt.s32.totalorder %s419_s0, %s419_s0 }
 0x234   :  { %p10214_p1 = scmp.lt.s32.totalorder %s10212_s6, %s10208_s23 }
 0x236   :  { %p10215_p2 = por %p10214_p1, %p10213_p0 }
 0x238   :  { %p10216_p3 = pnand %p10215_p2, %p10209_p13 }
 0x23a   :  { %10219 = shalt.err (!%p10216_p3)
}
 0x23b   :  { %s12266_s26 = sld [smem:[#allocation93_spill]] }
 0x23c   :  { %421 = dma.hbm_to_vmem [thread:$0]  %s12265_s18, 16, %s419_s0, [#allocation35]  }
 0x241   :  { %s10220_s28 = scalar_lea.hbm %s12266_s26, 16 }
 0x242   :  { %p10221_p4 = scmp.ne.s32.totalorder %s12266_s26, %s10220_s28  ;;  %p10224_p5 = scmp.lt.u32.totalorder %s10220_s28, %s12266_s26 }
 0x244   :  { %p10226_p6 = pnand %p10224_p5, %p10221_p4 }
 0x246   :  { %10229 = shalt.err (!%p10226_p6)
}
 0x247   :  { %s10230_s8 = scalar_lea.vmem %s443_s3, 16  ;;  %s10234_s1 = scalar_lea.vmem %s443_s3, 32 }
 0x248   :  { %p10231_p7 = scmp.ne.s32.totalorder %s443_s3, %s10230_s8  ;;  %p10235_p8 = scmp.lt.s32.totalorder %s443_s3, %s443_s3 }
 0x249   :  { %p10236_p9 = scmp.lt.s32.totalorder %s10234_s1, %s10230_s8 }
 0x24b   :  { %p10237_p10 = por %p10236_p9, %p10235_p8 }
 0x24d   :  { %p10238_p11 = pnand %p10237_p10, %p10231_p7 }
 0x24f   :  { %10241 = shalt.err (!%p10238_p11)
}
 0x250   :  { %445 = dma.hbm_to_vmem [thread:$0]  %s12266_s26, 16, %s443_s3, [#allocation38]  }
 0x251   :  { %s10375_s30 = smov [#allocation42]   ;;  %s10242_s9 = scalar_lea.hbm %s10660_s25, 16 }
 0x252   :  { %s470_s27 = sshll.u32 %s10375_s30, 4  ;;  %p10243_p12 = scmp.ne.s32.totalorder %s10660_s25, %s10242_s9  ;;  %s471_s27 = int_to_ptr.vmem [resolvable:$true] %s470_s27 }
 0x253   :  { %p10246_p13 = scmp.lt.u32.totalorder %s10242_s9, %s10660_s25 }
 0x255   :  { %p10248_p0 = pnand %p10246_p13, %p10243_p12 }
 0x257   :  { %10251 = shalt.err (!%p10248_p0)
}
 0x258   :  { %s10252_s10 = scalar_lea.vmem %s471_s27, 16  ;;  %s10256_s11 = scalar_lea.vmem %s471_s27, 32 }
 0x259   :  { %p10253_p1 = scmp.ne.s32.totalorder %s471_s27, %s10252_s10  ;;  %p10257_p2 = scmp.lt.s32.totalorder %s471_s27, %s471_s27 }
 0x25a   :  { %p10258_p3 = scmp.lt.s32.totalorder %s10256_s11, %s10252_s10 }
 0x25c   :  { %p10259_p4 = por %p10258_p3, %p10257_p2 }
 0x25e   :  { %p10260_p5 = pnand %p10259_p4, %p10253_p1 }
 0x260   :  { %10263 = shalt.err (!%p10260_p5)
}
 0x261   :  { %473 = dma.hbm_to_vmem [thread:$0]  %s10660_s25, 16, %s471_s27, [#allocation41]  }
 0x262   :  { %10264 = dma.done.wait [#allocation3], 256  }
 0x263   :  { %10265 = vsyncadd [#allocation3], 4294967040 }
 0x264   :  { %10266 = dma.done.wait [#allocation5], 3072  }
 0x265   :  { %10267 = vsyncadd [#allocation5], 4294964224 }
 0x266   :  { %10268 = dma.done.wait [#allocation8], 3088  }
 0x267   :  { %10269 = vsyncadd [#allocation8], 4294964208 }
 0x268   :  { %10270 = dma.done.wait [#allocation11], 1040  }
 0x269   :  { %10271 = vsyncadd [#allocation11], 4294966256 }
 0x26a   :  { %10272 = dma.done.wait [#allocation14], 32  }
 0x26b   :  { %10273 = vsyncadd [#allocation14], 4294967264 }
 0x26c   :  { %10274 = dma.done.wait [#allocation17], 32  }
 0x26d   :  { %10275 = vsyncadd [#allocation17], 4294967264 }
 0x26e   :  { %10276 = dma.done.wait [#allocation20], 2064  }
 0x26f   :  { %10277 = vsyncadd [#allocation20], 4294965232 }
 0x270   :  { %10278 = dma.done.wait [#allocation23], 32  }
 0x271   :  { %10279 = vsyncadd [#allocation23], 4294967264 }
 0x272   :  { %10280 = dma.done.wait [#allocation26], 6160  }
 0x273   :  { %10281 = vsyncadd [#allocation26], 4294961136 }
 0x274   :  { %10282 = dma.done.wait [#allocation29], 6160  }
 0x275   :  { %10283 = vsyncadd [#allocation29], 4294961136 }
 0x276   :  { %10284 = dma.done.wait [#allocation32], 32  }
 0x277   :  { %10285 = vsyncadd [#allocation32], 4294967264 }
 0x278   :  { %10286 = dma.done.wait [#allocation35], 32  }
 0x279   :  { %10287 = vsyncadd [#allocation35], 4294967264 }
 0x27a   :  { %10288 = dma.done.wait [#allocation38], 32  }
 0x27b   :  { %10289 = vsyncadd [#allocation38], 4294967264 }
 0x27c   :  { %10290 = dma.done.wait [#allocation41], 2064  }
 0x27d   :  { %10291 = vsyncadd [#allocation41], 4294965232  ;;  %s12267_s25 = sld [smem:[#allocation77_spill]]  ;;  %s12268_s19 = sld [smem:[#allocation78_spill]]  ;;  %v10376_v0 = vmov 0   ;;  %v683_v9 = vld [vmem:[#allocation4] sm:$0xff] }
 0x27e   :  { %s12269_s15 = sld [smem:[#allocation57_spill]]  ;;  %9378 = vset.pattern.permute.xlu0 %v10376_v0  ;;  %9379 = vset.pattern.permute.xlu1 %v10376_v0  ;;  %s10377_s4 = smov 48   ;;  %v684_v10 = vld [vmem:[#allocation4 + $0x8] sm:$0xff]  ;;  %v685_v11 = vld [vmem:[#allocation4 + $0x10] sm:$0xff]  ;;  %v10378_v12 = vmov 0.0|0.0   ;;  %v686_v14 = vld [vmem:[#allocation4 + $0x18] sm:$0xff] }
 0x27f   :  { %8069 = vmatprep.subr.bf16.mxu0 %v10378_v12  ;;  %v8070_v13 = vpack.c.bf16 %v684_v10, %v683_v9  ;;  %v8073_v15 = vpack.c.bf16 %v686_v14, %v685_v11  ;;  %v687_v16 = vld [vmem:[#allocation4 + $0x20] sm:$0xff]  ;;  %v688_v17 = vld [vmem:[#allocation4 + $0x28] sm:$0xff]  ;;  %v689_v19 = vld [vmem:[#allocation4 + $0x30] sm:$0xff]  ;;  %vm604_vm0 = vcmask 1046528   ;;  %s10379_s21 = smov 96   ;;  %s12270_s20 = sld [smem:[#allocation79_spill]] }
 0x280   :  { %v8076_v18 = vpack.c.bf16 %v688_v17, %v687_v16  ;;  %v690_v20 = vld [vmem:[#allocation4 + $0x38] sm:$0xff]  ;;  %v691_v22 = vld [vmem:[#allocation4 + $0x40] sm:$0xff]  ;;  %v692_v23 = vld [vmem:[#allocation4 + $0x48] sm:$0xff]  ;;  %s12271_s16 = sld [smem:[#allocation80_spill]]  ;;  %vm563_vm1 = vcmask 1040384   ;;  %vm673_vm2 = vcmask 392192  }
 0x281   :  { %8071 = vmatpush1.bf16.msra.mxu0 %v8070_v13  ;;  %v8079_v21 = vpack.c.bf16 %v690_v20, %v689_v19  ;;  %v8082_v24 = vpack.c.bf16 %v692_v23, %v691_v22  ;;  %v693_v25 = vld [vmem:[#allocation4 + $0x50] sm:$0xff]  ;;  %v694_v26 = vld [vmem:[#allocation4 + $0x58] sm:$0xff]  ;;  %v695_v28 = vld [vmem:[#allocation4 + $0x60] sm:$0xff]  ;;  %vm708_vm3 = vcmask 130048   ;;  %vm678_vm4 = vcmask 785408   ;;  %s12272_s2 = sld [smem:[#allocation60_spill]] }
 0x282   :  { %8072 = vmatprep.subr.bf16.mxu0 %v10378_v12  ;;  %v8085_v27 = vpack.c.bf16 %v694_v26, %v693_v25  ;;  %v696_v29 = vld [vmem:[#allocation4 + $0x68] sm:$0xff]  ;;  %v697_v31 = vld [vmem:[#allocation4 + $0x70] sm:$0xff]  ;;  %v698_v32 = vld [vmem:[#allocation4 + $0x78] sm:$0xff]  ;;  %s12273_s7 = sld [smem:[#allocation62_spill]]  ;;  %s12274_s17 = sld [smem:[#allocation65_spill]] }
 0x283   :  { %v617_v1 = vld [vmem:[%s12267_s25] sm:$0xff]  ;;  %v619_v2 = vld [vmem:[%s12267_s25 + $0x10] sm:$0xff]  ;;  %v618_v3 = vld [vmem:[%s12267_s25 + $0x8] sm:$0xff]  ;;  %v8088_v30 = vpack.c.bf16 %v696_v29, %v695_v28  ;;  %v8091_v33 = vpack.c.bf16 %v698_v32, %v697_v31  ;;  %s12275_s5 = sld [smem:[#allocation63_spill]]  ;;  %s12276_s18 = sld [smem:[#allocation64_spill]] }
 0x284   :  { %623 = vperm.xlu0 %9378, %v617_v1   ;;  %633 = vperm.xlu1 %9379, %v619_v2   ;;  %v620_v4 = vld [vmem:[%s12267_s25 + $0x18] sm:$0xff]  ;;  %v576_v5 = vld [vmem:[%s12268_s19] sm:$0xff]  ;;  %v577_v7 = vld [vmem:[%s12268_s19 + $0x8] sm:$0xff]  ;;  %s12277_s22 = sld [smem:[#allocation66_spill]]  ;;  %s12278_s0 = sld [smem:[#allocation67_spill]] }
 0x285   :  { %v10844_v6 = vld [vmem:[%s12269_s15] sm:$0xff]  ;;  %v579_v8 = vld [vmem:[%s12268_s19 + $0x18] sm:$0xff]  ;;  %8074 = vmatpush1.bf16.msra.mxu0 %v8073_v15  ;;  %v699_v34 = vld [vmem:[#allocation4 + $0x80] sm:$0xff]  ;;  %s12279_s13 = sld [smem:[#allocation58_spill]]  ;;  %s12280_s3 = sld [smem:[#allocation59_spill]] }
 0x286   :  { %8075 = vmatprep.subr.bf16.mxu0 %v10378_v12  ;;  %v700_v35 = vld [vmem:[#allocation4 + $0x88] sm:$0xff]  ;;  %v10860_v37 = vld [vmem:[%s12269_s15 + $0x8] sm:$0xff]  ;;  %v605_v38 = vrot.slane %v10844_v6, 1  ;;  %v10865_v40 = vld [vmem:[%s12269_s15 + $0x10] sm:$0xff]  ;;  %v564_v60 = vrot.slane %v10844_v6, 7  ;;  %s10381_s24 = smov 64  }
 0x287   :  { %v8094_v36 = vpack.c.bf16 %v700_v35, %v699_v34  ;;  %v606_v39 = vrot.slane %v10860_v37, 1  ;;  %v10868_v41 = vld [vmem:[%s12269_s15 + $0x18] sm:$0xff]  ;;  %v608_v43 = vrot.slane %v10865_v40, 1  ;;  %v578_v50 = vld [vmem:[%s12268_s19 + $0x10] sm:$0xff]  ;;  %v2401_v57 = vld [vmem:[%s12270_s20] sm:$0xff]  ;;  %v567_v11 = vrot.slane %v10865_v40, 7 }
 0x288   :  { %628 = vperm.xlu0 %9378, %v618_v3   ;;  %638 = vperm.xlu1 %9379, %v620_v4   ;;  %v610_v45 = vrot.slane %v10868_v41, 1  ;;  %v2382_v58 = vld [vmem:[%s12271_s16 + $0x8] sm:$0xff]  ;;  %v2381_v59 = vld [vmem:[%s12271_s16] sm:$0xff]  ;;  %v575_v63 = vsel %vm563_vm1, 0.0, %v564_v60  ;;  %v569_v16 = vrot.slane %v10868_v41, 7  ;;  %s12281_s23 = sld [smem:[#allocation69_spill]] }
 0x289   :  { %8077 = vmatpush1.bf16.msra.mxu0 %v8076_v18  ;;  %v607_v42 = vsel %vm604_vm0, %v605_v38, %v606_v39  ;;  %v609_v47 = vsel %vm604_vm0, %v606_v39, %v608_v43  ;;  %v923_v31 = vld [vmem:[%s12272_s2 + $0x88] sm:$0xff]  ;;  %v925_v38 = vld [vmem:[%s12272_s2 + $0x98] sm:$0xff]  ;;  %s12282_s6 = sld [smem:[#allocation72_spill]]  ;;  %s12283_s26 = sld [smem:[#allocation73_spill]] }
 0x28a   :  { %8078 = vmatprep.subr.bf16.mxu0 %v10378_v12  ;;  %v611_v51 = vsel %vm604_vm0, %v608_v43, %v610_v45  ;;  %v616_v54 = vsel %vm604_vm0, %v610_v45, 0.0  ;;  %v570_v22 = vsel %vm563_vm1, %v567_v11, %v569_v16  ;;  %v907_v34 = vld [vmem:[%s12272_s2 + $0x8] sm:$0xff]  ;;  %v909_v43 = vld [vmem:[%s12272_s2 + $0x18] sm:$0xff]  ;;  %s12284_s28 = sld [smem:[#allocation81_spill]]  ;;  %s12285_s8 = sld [smem:[#allocation82_spill]] }
 0x28b   :  { %v935_v16 = vld [vmem:[%s12272_s2 + $0xe8] sm:$0xff]  ;;  %s12286_s1 = sld [smem:[#allocation86_spill]]  ;;  %s12287_s30 = sld [smem:[#allocation88_spill]] }
 0x28c   :  { %582 = vperm.xlu0 %9378, %v576_v5   ;;  %645 = vrot.lane.b32.xlu1 %v10844_v6, %s10377_s4  ;;  %s12288_s27 = sld [smem:[#allocation87_spill]]  ;;  %s12289_s9 = sld [smem:[#allocation91_spill]] }
 0x28d   :  { %8080 = vmatpush1.bf16.msra.mxu0 %v8079_v21  ;;  %s12290_s10 = sld [smem:[#allocation92_spill]]  ;;  %s12291_s11 = sld [smem:[#allocation94_spill]] }
 0x28e   :  { %8081 = vmatprep.subr.bf16.mxu0 %v10378_v12  ;;  %s12292_s25 = sld [smem:[#allocation75_spill]] }
 0x290   :  { %587 = vperm.xlu1 %9379, %v577_v7  }
 0x291   :  { %8083 = vmatpush1.bf16.msra.mxu0 %v8082_v24 }
 0x292   :  { %8084 = vmatprep.subr.bf16.mxu0 %v10378_v12 }
 0x294   :  { %597 = vperm.xlu1 %9379, %v579_v8   ;;  %v565_v8 = vrot.slane %v10860_v37, 7 }
 0x295   :  { %8086 = vmatpush1.bf16.msra.mxu0 %v8085_v27 }
 0x296   :  { %8087 = vmatprep.subr.bf16.mxu0 %v10378_v12  ;;  %v566_v10 = vsel %vm563_vm1, %v564_v60, %v565_v8  ;;  %v568_v15 = vsel %vm563_vm1, %v565_v8, %v567_v11  ;;  %v933_v8 = vld [vmem:[%s12272_s2 + $0xd8] sm:$0xff]  ;;  %v916_v11 = vld [vmem:[%s12272_s2 + $0x50] sm:$0xff] }
 0x299   :  { %8089 = vmatpush1.bf16.msra.mxu0 %v8088_v30  ;;  %v922_v30 = vld [vmem:[%s12272_s2 + $0x80] sm:$0xff] }
 0x29a   :  { %8090 = vmatprep.subr.bf16.mxu0 %v10378_v12  ;;  %v8096_v32 = vpack.c.bf16 %v923_v31, %v922_v30  ;;  %v6454_v30 = vld [vmem:[%s12273_s7] ss:$0 sm:$0xff] }
 0x29c   :  { %8097 = vmatprep.subr.bf16.mxu1 %v8096_v32 }
 0x29d   :  { %8092 = vmatpush1.bf16.msra.mxu0 %v8091_v33  ;;  %v906_v33 = vld [vmem:[%s12272_s2] sm:$0xff] }
 0x29e   :  { %8093 = vmatprep.subr.bf16.mxu0 %v10378_v12  ;;  %v8098_v35 = vpack.c.bf16 %v907_v34, %v906_v33 }
 0x2a0   :  { %8099 = vmatpush3.bf16.msra.mxu1 %v8098_v35 }
 0x2a1   :  { %8095 = vmatpush1.bf16.msra.mxu0 %v8094_v36  ;;  %v924_v36 = vld [vmem:[%s12272_s2 + $0x90] sm:$0xff] }
 0x2a2   :  { %v8100_v39 = vpack.c.bf16 %v925_v38, %v924_v36 }
 0x2a4   :  { %8101 = vmatprep.subr.bf16.mxu1 %v8100_v39 }
 0x303   :  { %v10872_v44 = vpop.permute.xlu0 %623  ;;  %v10877_v48 = vpop.permute.xlu1 %633 }
 0x304   :  { %v641_v46 = vmul.f32 %v10872_v44, %v607_v42  ;;  %v643_v53 = vmul.f32 %v10877_v48, %v611_v51  ;;  %v908_v42 = vld [vmem:[%s12272_s2 + $0x10] sm:$0xff]  ;;  %v910_v51 = vld [vmem:[%s12272_s2 + $0x20] sm:$0xff] }
 0x305   :  { %v8102_v45 = vpack.c.bf16 %v909_v43, %v908_v42 }
 0x306   :  { %661 = vrot.lane.b32.xlu0 %v641_v46, %s10379_s21  ;;  %v926_v46 = vld [vmem:[%s12272_s2 + $0xa0] sm:$0xff] }
 0x307   :  { %v10879_v49 = vpop.permute.xlu0 %628  ;;  %v10886_v55 = vpop.permute.xlu1 %638  ;;  %8103 = vmatpush3.bf16.msra.mxu1 %v8102_v45 }
 0x308   :  { %v642_v52 = vmul.f32 %v10879_v49, %v609_v47  ;;  %v644_v56 = vmul.f32 %v10886_v55, %v616_v54  ;;  %v927_v47 = vld [vmem:[%s12272_s2 + $0xa8] sm:$0xff]  ;;  %v928_v54 = vld [vmem:[%s12272_s2 + $0xb0] sm:$0xff] }
 0x30a   :  { %663 = vrot.lane.b32.xlu1 %v642_v52, %s10379_s21  ;;  %592 = vperm.xlu0 %9378, %v578_v50   ;;  %v8104_v50 = vpack.c.bf16 %v927_v47, %v926_v46  ;;  %v911_v52 = vld [vmem:[%s12272_s2 + $0x28] sm:$0xff] }
 0x30b   :  { %v646_v61 = vpop.permute.xlu1 %645  ;;  %v10899_v62 = vpop.permute.xlu0 %582 }
 0x30c   :  { %v600_v1 = vmul.f32 %v10899_v62, %v575_v63  ;;  %8105 = vmatprep.subr.bf16.mxu1 %v8104_v50  ;;  %v931_v63 = vld [vmem:[%s12272_s2 + $0xc8] sm:$0xff] }
 0x30e   :  { %665 = vrot.lane.b32.xlu1 %v643_v53, %s10379_s21  ;;  %647 = vrot.lane.b32.xlu0 %v10860_v37, %s10377_s4  ;;  %v674_v2 = vsel %vm673_vm2, %v600_v1, %v646_v61  ;;  %v8106_v53 = vpack.c.bf16 %v911_v52, %v910_v51  ;;  %v930_v61 = vld [vmem:[%s12272_s2 + $0xc0] sm:$0xff] }
 0x30f   :  { %v10902_v0 = vpop.permute.xlu1 %587  ;;  %v8112_v1 = vpack.c.bf16 %v931_v63, %v930_v61 }
 0x310   :  { %v601_v13 = vmul.f32 %v10902_v0, %v566_v10  ;;  %8107 = vmatpush3.bf16.msra.mxu1 %v8106_v53 }
 0x312   :  { %667 = vrot.lane.b32.xlu1 %v644_v56, %s10379_s21  ;;  %649 = vrot.lane.b32.xlu0 %v10865_v40, %s10377_s4  ;;  %v929_v56 = vld [vmem:[%s12272_s2 + $0xb8] sm:$0xff] }
 0x313   :  { %v10906_v3 = vpop.permute.xlu1 %597 }
 0x314   :  { %v603_v26 = vmul.f32 %v10906_v3, %v570_v22  ;;  %v937_v22 = vld [vmem:[%s12272_s2 + $0xf8] sm:$0xff] }
 0x316   :  { %2405 = vperm.xlu1 %9379, %v2401_v57   ;;  %651 = vrot.lane.b32.xlu0 %v10868_v41, %s10377_s4  ;;  %v8108_v57 = vpack.c.bf16 %v929_v56, %v928_v54 }
 0x318   :  { %8109 = vmatprep.subr.bf16.mxu1 %v8108_v57 }
 0x31a   :  { %2390 = vperm.xlu1 %9379, %v2382_v58   ;;  %2385 = vperm.xlu0 %9378, %v2381_v59   ;;  %v912_v58 = vld [vmem:[%s12272_s2 + $0x30] sm:$0xff]  ;;  %v913_v59 = vld [vmem:[%s12272_s2 + $0x38] sm:$0xff] }
 0x31b   :  { %v8110_v60 = vpack.c.bf16 %v913_v59, %v912_v58 }
 0x31d   :  { %8111 = vmatpush3.bf16.msra.mxu1 %v8110_v60 }
 0x31e   :  { %8113 = vmatprep.subr.bf16.mxu1 %v8112_v1 }
 0x378   :  { %v662_v4 = vpop.permute.xlu0 %661 }
 0x379   :  { %6455 = vmatprep.mubr.msk.f32.mxu0 %vm708_vm3, %v662_v4  ;;  %v679_v5 = vsel %vm678_vm4, %v674_v2, %v662_v4  ;;  %v914_v2 = vld [vmem:[%s12272_s2 + $0x40] sm:$0xff]  ;;  %v915_v4 = vld [vmem:[%s12272_s2 + $0x48] sm:$0xff] }
 0x37a   :  { %782 = vmatmul.mubr.f32.vlgmr.msra.gmra.mrb[0].mxu0 %v679_v5  ;;  %v8114_v5 = vpack.c.bf16 %v915_v4, %v914_v2 }
 0x37c   :  { %v664_v7 = vpop.permute.xlu1 %663  ;;  %8115 = vmatpush3.bf16.msra.mxu1 %v8114_v5 }
 0x37d   :  { %6456 = vmatprep.mubr.msk.f32.mxu0 %vm708_vm3, %v664_v7 }
 0x380   :  { %v666_v17 = vpop.permute.xlu1 %665 }
 0x384   :  { %v668_v25 = vpop.permute.xlu1 %667 }
 0x389   :  { %v10912_v9 = vpop.permute.xlu0 %592 }
 0x38a   :  { %v602_v20 = vmul.f32 %v10912_v9, %v568_v15  ;;  %v934_v15 = vld [vmem:[%s12272_s2 + $0xe0] sm:$0xff] }
 0x38d   :  { %v648_v14 = vpop.permute.xlu0 %647 }
 0x38e   :  { %v675_v18 = vsel %vm673_vm2, %v601_v13, %v648_v14  ;;  %v917_v13 = vld [vmem:[%s12272_s2 + $0x58] sm:$0xff] }
 0x38f   :  { %v680_v19 = vsel %vm678_vm4, %v675_v18, %v664_v7  ;;  %v932_v7 = vld [vmem:[%s12272_s2 + $0xd0] sm:$0xff]  ;;  %v8118_v14 = vpack.c.bf16 %v917_v13, %v916_v11  ;;  %v918_v18 = vld [vmem:[%s12272_s2 + $0x60] sm:$0xff] }
 0x390   :  { %787 = vmatmul.mubr.f32.gmra.mrb[2].mxu0 %v680_v19  ;;  %v8116_v10 = vpack.c.bf16 %v933_v8, %v932_v7  ;;  %v919_v19 = vld [vmem:[%s12272_s2 + $0x68] sm:$0xff] }
 0x391   :  { %v650_v21 = vpop.permute.xlu0 %649  ;;  %6457 = vmatprep.mubr.msk.f32.mxu0 %vm708_vm3, %v666_v17 }
 0x392   :  { %v676_v23 = vsel %vm673_vm2, %v602_v20, %v650_v21  ;;  %8117 = vmatprep.subr.bf16.mxu1 %v8116_v10  ;;  %v8122_v20 = vpack.c.bf16 %v919_v19, %v918_v18  ;;  %v936_v21 = vld [vmem:[%s12272_s2 + $0xf0] sm:$0xff] }
 0x393   :  { %v681_v24 = vsel %vm678_vm4, %v676_v23, %v666_v17  ;;  %8119 = vmatpush3.bf16.msra.mxu1 %v8118_v14  ;;  %v8120_v17 = vpack.c.bf16 %v935_v16, %v934_v15  ;;  %v8124_v23 = vpack.c.bf16 %v937_v22, %v936_v21 }
 0x394   :  { %792 = vmatmul.mubr.f32.gmra.mrb[4].mxu0 %v681_v24  ;;  %v920_v24 = vld [vmem:[%s12272_s2 + $0x70] sm:$0xff] }
 0x395   :  { %v652_v27 = vpop.permute.xlu0 %651  ;;  %6458 = vmatprep.mubr.msk.f32.mxu0 %vm708_vm3, %v668_v25  ;;  %8121 = vmatprep.subr.bf16.mxu1 %v8120_v17 }
 0x396   :  { %v677_v28 = vsel %vm673_vm2, %v603_v26, %v652_v27  ;;  %v938_v27 = vld [vmem:[%s12272_s2 + $0x100] sm:$0xff] }
 0x397   :  { %v682_v29 = vsel %vm678_vm4, %v677_v28, %v668_v25  ;;  %8123 = vmatpush3.bf16.msra.mxu1 %v8122_v20  ;;  %v921_v25 = vld [vmem:[%s12272_s2 + $0x78] sm:$0xff]  ;;  %v939_v28 = vld [vmem:[%s12272_s2 + $0x108] sm:$0xff]  ;;  %vm2009_vm4 = vcmask 261120  }
 0x398   :  { %797 = vmatmul.mubr.f32.gmra.mrb[6].mxu0 %v682_v29  ;;  %v8126_v26 = vpack.c.bf16 %v921_v25, %v920_v24  ;;  %8125 = vmatprep.subr.bf16.mxu1 %v8124_v23  ;;  %v10964_v29 = vpack.c.bf16 %v939_v28, %v938_v27  ;;  %v941_v27 = vld [vmem:[%s12272_s2 + $0x118] sm:$0xff] }
 0x39b   :  { %8127 = vmatpush3.bf16.msra.mxu1 %v8126_v26  ;;  %v940_v26 = vld [vmem:[%s12272_s2 + $0x110] sm:$0xff] }
 0x39c   :  { %8129 = vmatprep.subr.bf16.mxu1 %v10964_v29 }
 0x44d   :  { %v783_v31 = vpop.f32.mrb[0].mxu0 }
 0x44e   :  { %v784_v32 = vadd.f32 %v6454_v30, %v783_v31  ;;  %v785_v33 = vpop.f32.mrb[1].mxu0 }
 0x44f   :  { %v8132_v33 = vpack.c.bf16 %v941_v27, %v940_v26  ;;  %v950_v26 = vld [vmem:[%s12272_s2 + $0x160] sm:$0xff]  ;;  %v951_v27 = vld [vmem:[%s12272_s2 + $0x168] sm:$0xff] }
 0x450   :  { %v806_v34 = vand.u32 2147483647, %v784_v32  ;;  %v802_v7 = vmax.f32 %v784_v32, 0.0 }
 0x452   :  { %v810_v35 = vsub.f32 0.0, %v806_v34 }
 0x454   :  { %v814_v36 = vmul.f32 1.442695, %v810_v35 }
 0x456   :  { %9390 = vpow2.f32 %v814_v36 }
 0x460   :  { %v9391_v38 = vpop.eup %9390 }
 0x461   :  { %v822_v39 = vadd.f32 1.0, %v9391_v38  ;;  %v825_v46 = vmul.f32 -0.5, %v9391_v38  ;;  %v828_v58 = vand.u32 2147483647, %v9391_v38 }
 0x463   :  { %9392 = vlog2.f32 %v822_v39  ;;  %v788_v42 = vpop.f32.mrb[2].mxu0  ;;  %v826_v54 = vadd.f32 1.0, %v825_v46  ;;  %vm829_vm5 = vcmp.lt.f32.partialorder %v828_v58, 0.0004427343  ;;  %v942_v39 = vld [vmem:[%s12272_s2 + $0x120] sm:$0xff] }
 0x464   :  { %v10968_v43 = vadd.f32 %v6454_v30, %v788_v42  ;;  %v790_v45 = vpop.f32.mrb[3].mxu0  ;;  %v943_v42 = vld [vmem:[%s12272_s2 + $0x128] sm:$0xff] }
 0x465   :  { %v827_v4 = vmul.f32 %v9391_v38, %v826_v54 }
 0x466   :  { %v807_v47 = vand.u32 2147483647, %v10968_v43  ;;  %v803_v45 = vmax.f32 %v10968_v43, 0.0 }
 0x467   :  { %v793_v50 = vpop.f32.mrb[4].mxu0 }
 0x468   :  { %v811_v51 = vsub.f32 0.0, %v807_v47  ;;  %v10971_v52 = vadd.f32 %v6454_v30, %v793_v50  ;;  %v795_v53 = vpop.f32.mrb[5].mxu0 }
 0x46a   :  { %v816_v56 = vmul.f32 1.442695, %v811_v51  ;;  %v808_v57 = vand.u32 2147483647, %v10971_v52  ;;  %v804_v58 = vmax.f32 %v10971_v52, 0.0 }
 0x46b   :  { %v798_v59 = vpop.f32.mrb[6].mxu0 }
 0x46c   :  { %9394 = vpow2.f32 %v816_v56  ;;  %v812_v60 = vsub.f32 0.0, %v808_v57  ;;  %v10974_v61 = vadd.f32 %v6454_v30, %v798_v59  ;;  %v800_v63 = vpop.f32.mrb[7].mxu0  ;;  %v8136_v57 = vpack.c.bf16 %v943_v42, %v942_v39  ;;  %v953_v39 = vld [vmem:[%s12272_s2 + $0x178] sm:$0xff] }
 0x46d   :  { %v9393_v1 = vpop.eup %9392  ;;  %v945_v63 = vld [vmem:[%s12272_s2 + $0x138] sm:$0xff] }
 0x46e   :  { %v824_v2 = vmul.f32 0.6931472, %v9393_v1  ;;  %v818_v5 = vmul.f32 1.442695, %v812_v60  ;;  %v809_v8 = vand.u32 2147483647, %v10974_v61 }
 0x46f   :  { %v944_v60 = vld [vmem:[%s12272_s2 + $0x130] sm:$0xff] }
 0x470   :  { %v830_v10 = vsel %vm829_vm5, %v827_v4, %v824_v2  ;;  %9396 = vpow2.f32 %v818_v5  ;;  %v813_v13 = vsub.f32 0.0, %v809_v8 }
 0x471   :  { %v858_v11 = vadd.f32 %v830_v10, %v802_v7  ;;  %v946_v10 = vld [vmem:[%s12272_s2 + $0x140] sm:$0xff] }
 0x472   :  { %v820_v14 = vmul.f32 1.442695, %v813_v13  ;;  %v805_v13 = vmax.f32 %v10974_v61, 0.0 }
 0x473   :  { %9398 = vtanh.f32 %v858_v11  ;;  %v947_v11 = vld [vmem:[%s12272_s2 + $0x148] sm:$0xff] }
 0x474   :  { %9400 = vpow2.f32 %v820_v14 }
 0x476   :  { %v9395_v15 = vpop.eup %9394 }
 0x477   :  { %v831_v16 = vadd.f32 1.0, %v9395_v15  ;;  %v834_v19 = vmul.f32 -0.5, %v9395_v15  ;;  %v837_v28 = vand.u32 2147483647, %v9395_v15 }
 0x479   :  { %9402 = vlog2.f32 %v831_v16  ;;  %v835_v23 = vadd.f32 1.0, %v834_v19  ;;  %vm838_vm6 = vcmp.lt.f32.partialorder %v837_v28, 0.0004427343  ;;  %v8144_v16 = vpack.c.bf16 %v947_v11, %v946_v10  ;;  %v1361_v10 = vld [vmem:[%s12274_s17 + $0x80] sm:$0xff]  ;;  %v1362_v11 = vld [vmem:[%s12274_s17 + $0x88] sm:$0xff] }
 0x47a   :  { %v9397_v17 = vpop.eup %9396 }
 0x47b   :  { %v840_v18 = vadd.f32 1.0, %v9397_v17  ;;  %v843_v24 = vmul.f32 -0.5, %v9397_v17  ;;  %v836_v35 = vmul.f32 %v9395_v15, %v835_v23  ;;  %v846_v46 = vand.u32 2147483647, %v9397_v17 }
 0x47d   :  { %v9399_v20 = vpop.eup %9398  ;;  %9404 = vlog2.f32 %v840_v18  ;;  %v844_v36 = vadd.f32 1.0, %v843_v24  ;;  %vm847_vm7 = vcmp.lt.f32.partialorder %v846_v46, 0.0004427343  ;;  %v949_v18 = vld [vmem:[%s12272_s2 + $0x158] sm:$0xff] }
 0x47e   :  { %v10977_v21 = vmul.f32 %v9399_v20, %v784_v32  ;;  %v9401_v22 = vpop.eup %9400 }
 0x47f   :  { %v849_v25 = vadd.f32 1.0, %v9401_v22  ;;  %v852_v47 = vmul.f32 -0.5, %v9401_v22  ;;  %v845_v56 = vmul.f32 %v9397_v17, %v844_v36  ;;  %v855_v2 = vand.u32 2147483647, %v9401_v22  ;;  %v948_v17 = vld [vmem:[%s12272_s2 + $0x150] sm:$0xff] }
 0x480   :  { %1025 = vmatprep.mubr.f32.mxu1 %v10977_v21  ;;  %v874_v30 = vrot.slane %v10977_v21, 7  ;;  %v890_v23 = vrot.slane %v10977_v21, 1 }
 0x481   :  { %9406 = vlog2.f32 %v849_v25  ;;  %v853_v59 = vadd.f32 1.0, %v852_v47  ;;  %vm856_vm8 = vcmp.lt.f32.partialorder %v855_v2, 0.0004427343 }
 0x482   :  { %v885_v32 = vsel %vm563_vm1, 0.0, %v874_v30 }
 0x483   :  { %v9403_v31 = vpop.eup %9402  ;;  %v886_v38 = vmul.f32 %v885_v32, %v10899_v62  ;;  %v854_v8 = vmul.f32 %v9401_v22, %v853_v59  ;;  %v8148_v22 = vpack.c.bf16 %v949_v18, %v948_v17  ;;  %v1377_v17 = vld [vmem:[%s12274_s17 + $0x100] sm:$0xff]  ;;  %v1378_v18 = vld [vmem:[%s12274_s17 + $0x108] sm:$0xff] }
 0x484   :  { %v833_v34 = vmul.f32 0.6931472, %v9403_v31 }
 0x485   :  { %1026 = vmatmul.mubr.f32.vlgmr.msra.gmra.mrb[0].mxu1 %v886_v38  ;;  %v952_v38 = vld [vmem:[%s12272_s2 + $0x170] sm:$0xff] }
 0x486   :  { %v839_v50 = vsel %vm838_vm6, %v836_v35, %v833_v34  ;;  %8131 = vmatpush3.bf16.msra.mxu1 %v10964_v29  ;;  %v8140_v29 = vpack.c.bf16 %v945_v63, %v944_v60  ;;  %v8152_v34 = vpack.c.bf16 %v951_v27, %v950_v26  ;;  %v8156_v46 = vpack.c.bf16 %v953_v39, %v952_v38  ;;  %v1201_v60 = vld [vmem:[#allocation6 + $0x10] sm:$0xff]  ;;  %v1380_v27 = vld [vmem:[%s12274_s17 + $0x118] sm:$0xff]  ;;  %v1382_v38 = vld [vmem:[%s12274_s17 + $0x128] sm:$0xff] }
 0x487   :  { %v9405_v51 = vpop.eup %9404  ;;  %v859_v53 = vadd.f32 %v839_v50, %v803_v45  ;;  %8133 = vmatprep.subr.bf16.mxu1 %v8132_v33  ;;  %v1351_v39 = vld [vmem:[%s12274_s17 + $0x30] sm:$0xff] }
 0x488   :  { %v842_v54 = vmul.f32 0.6931472, %v9405_v51  ;;  %v1199_v51 = vld [vmem:[#allocation6] sm:$0xff] }
 0x489   :  { %9408 = vtanh.f32 %v859_v53  ;;  %v1200_v53 = vld [vmem:[#allocation6 + $0x8] sm:$0xff] }
 0x48a   :  { %v848_v1 = vsel %vm847_vm7, %v845_v56, %v842_v54  ;;  %8135 = vmatpush3.bf16.msra.mxu1 %v8132_v33 }
 0x48b   :  { %v860_v4 = vadd.f32 %v848_v1, %v804_v58  ;;  %v9407_v5 = vpop.eup %9406  ;;  %8137 = vmatprep.subr.bf16.mxu1 %v8136_v57  ;;  %v8160_v58 = vpack.c.bf16 %v1200_v53, %v1199_v51  ;;  %v1353_v51 = vld [vmem:[%s12274_s17 + $0x40] sm:$0xff]  ;;  %v1354_v53 = vld [vmem:[%s12274_s17 + $0x48] sm:$0xff] }
 0x48c   :  { %v851_v7 = vmul.f32 0.6931472, %v9407_v5  ;;  %v1203_v5 = vld [vmem:[#allocation6 + $0x20] sm:$0xff] }
 0x48d   :  { %9410 = vtanh.f32 %v860_v4 }
 0x48e   :  { %v857_v14 = vsel %vm856_vm8, %v854_v8, %v851_v7  ;;  %8139 = vmatpush3.bf16.msra.mxu1 %v8136_v57 }
 0x48f   :  { %v861_v15 = vadd.f32 %v857_v14, %v805_v13  ;;  %8141 = vmatprep.subr.bf16.mxu1 %v8140_v29  ;;  %v8172_v13 = vpack.c.bf16 %v1362_v11, %v1361_v10  ;;  %v1345_v14 = vld [vmem:[%s12274_s17] sm:$0xff]  ;;  %v1388_v10 = vld [vmem:[%s12274_s17 + $0x158] sm:$0xff] }
 0x490   :  { %v1357_v11 = vld [vmem:[%s12274_s17 + $0x60] sm:$0xff] }
 0x491   :  { %9412 = vtanh.f32 %v861_v15  ;;  %8173 = vmatprep.subr.bf16.mxu0 %v8172_v13 }
 0x492   :  { %8143 = vmatpush3.bf16.msra.mxu1 %v8140_v29  ;;  %v1204_v29 = vld [vmem:[#allocation6 + $0x28] sm:$0xff] }
 0x493   :  { %v9409_v19 = vpop.eup %9408  ;;  %8145 = vmatprep.subr.bf16.mxu1 %v8144_v16  ;;  %v8168_v8 = vpack.c.bf16 %v1204_v29, %v1203_v5  ;;  %v1373_v5 = vld [vmem:[%s12274_s17 + $0xe0] sm:$0xff]  ;;  %v1374_v29 = vld [vmem:[%s12274_s17 + $0xe8] sm:$0xff] }
 0x494   :  { %v867_v20 = vmul.f32 %v9409_v19, %v10968_v43  ;;  %v1348_v19 = vld [vmem:[%s12274_s17 + $0x18] sm:$0xff] }
 0x496   :  { %v875_v24 = vrot.slane %v867_v20, 7  ;;  %v891_v25 = vrot.slane %v867_v20, 1  ;;  %1030 = vmatprep.mubr.f32.mxu1 %v867_v20  ;;  %8147 = vmatpush3.bf16.msra.mxu1 %v8144_v16  ;;  %v1364_v16 = vld [vmem:[%s12274_s17 + $0x98] sm:$0xff]  ;;  %v8204_v20 = vpack.c.bf16 %v1378_v18, %v1377_v17  ;;  %v1359_v18 = vld [vmem:[%s12274_s17 + $0x70] sm:$0xff] }
 0x497   :  { %v9411_v28 = vpop.eup %9410  ;;  %8149 = vmatprep.subr.bf16.mxu1 %v8148_v22 }
 0x498   :  { %v876_v31 = vsel %vm563_vm1, %v874_v30, %v875_v24  ;;  %v868_v43 = vmul.f32 %v9411_v28, %v10971_v52  ;;  %v892_v32 = vsel %vm604_vm0, %v890_v23, %v891_v25  ;;  %v1365_v23 = vld [vmem:[%s12274_s17 + $0xa0] sm:$0xff] }
 0x499   :  { %v887_v33 = vmul.f32 %v876_v31, %v10902_v0  ;;  %v902_v59 = vmul.f32 %v892_v32, %v10872_v44  ;;  %v1349_v28 = vld [vmem:[%s12274_s17 + $0x20] sm:$0xff]  ;;  %v1350_v31 = vld [vmem:[%s12274_s17 + $0x28] sm:$0xff] }
 0x49a   :  { %v877_v35 = vrot.slane %v868_v43, 7  ;;  %v893_v36 = vrot.slane %v868_v43, 1  ;;  %8151 = vmatpush3.bf16.msra.mxu1 %v8148_v22  ;;  %v8182_v32 = vpack.c.bf16 %v1350_v31, %v1349_v28 }
 0x49b   :  { %1031 = vmatmul.mubr.f32.gmra.mrb[2].mxu1 %v887_v33  ;;  %v9413_v42 = vpop.eup %9412  ;;  %8153 = vmatprep.subr.bf16.mxu1 %v8152_v34  ;;  %v1367_v33 = vld [vmem:[%s12274_s17 + $0xb0] sm:$0xff] }
 0x49c   :  { %1035 = vmatprep.mubr.f32.mxu1 %v868_v43  ;;  %v878_v21 = vsel %vm563_vm1, %v875_v24, %v877_v35  ;;  %v894_v30 = vsel %vm604_vm0, %v891_v25, %v893_v36  ;;  %v869_v52 = vmul.f32 %v9413_v42, %v10974_v61  ;;  %v1202_v61 = vld [vmem:[#allocation6 + $0x18] sm:$0xff]  ;;  %v1366_v24 = vld [vmem:[%s12274_s17 + $0xa8] sm:$0xff]  ;;  %v1379_v25 = vld [vmem:[%s12274_s17 + $0x110] sm:$0xff] }
 0x49d   :  { %v888_v45 = vmul.f32 %v878_v21, %v10912_v9  ;;  %v903_v63 = vmul.f32 %v894_v30, %v10879_v49  ;;  %v8164_v1 = vpack.c.bf16 %v1202_v61, %v1201_v60  ;;  %v8180_v26 = vpack.c.bf16 %v1366_v24, %v1365_v23  ;;  %v1352_v42 = vld [vmem:[%s12274_s17 + $0x38] sm:$0xff]  ;;  %v1386_v61 = vld [vmem:[%s12274_s17 + $0x148] sm:$0xff] }
 0x49e   :  { %v879_v47 = vrot.slane %v869_v52, 7  ;;  %v895_v50 = vrot.slane %v869_v52, 1  ;;  %8155 = vmatpush3.bf16.msra.mxu1 %v8152_v34  ;;  %v8208_v43 = vpack.c.bf16 %v1380_v27, %v1379_v25  ;;  %v1368_v34 = vld [vmem:[%s12274_s17 + $0xb8] sm:$0xff]  ;;  %v8186_v30 = vpack.c.bf16 %v1352_v42, %v1351_v39 }
 0x49f   :  { %1036 = vmatmul.mubr.f32.gmra.mrb[4].mxu1 %v888_v45  ;;  %8157 = vmatprep.subr.bf16.mxu1 %v8156_v46  ;;  %v1369_v45 = vld [vmem:[%s12274_s17 + $0xc0] sm:$0xff]  ;;  %v1392_v23 = vld [vmem:[%s12274_s17 + $0x178] sm:$0xff] }
 0x4a0   :  { %1040 = vmatprep.mubr.f32.mxu1 %v869_v52  ;;  %v880_v54 = vsel %vm563_vm1, %v877_v35, %v879_v47  ;;  %v896_v56 = vsel %vm604_vm0, %v893_v36, %v895_v50  ;;  %v901_v4 = vsel %vm604_vm0, %v895_v50, 0.0  ;;  %v1381_v35 = vld [vmem:[%s12274_s17 + $0x120] sm:$0xff]  ;;  %v8184_v36 = vpack.c.bf16 %v1368_v34, %v1367_v33  ;;  %v1370_v52 = vld [vmem:[%s12274_s17 + $0xc8] sm:$0xff]  ;;  %v1384_v50 = vld [vmem:[%s12274_s17 + $0x138] sm:$0xff] }
 0x4a1   :  { %v889_v57 = vmul.f32 %v880_v54, %v10906_v3  ;;  %v904_v2 = vmul.f32 %v896_v56, %v10877_v48  ;;  %v905_v7 = vmul.f32 %v901_v4, %v10886_v55  ;;  %v8212_v21 = vpack.c.bf16 %v1382_v38, %v1381_v35  ;;  %v6459_v38 = vld [vmem:[%s12275_s5] ss:$0 sm:$0xff] }
 0x4a2   :  { %8159 = vmatpush3.bf16.msra.mxu1 %v8156_v46  ;;  %v1383_v46 = vld [vmem:[%s12274_s17 + $0x130] sm:$0xff]  ;;  %v8188_v47 = vpack.c.bf16 %v1370_v52, %v1369_v45  ;;  %v8190_v56 = vpack.c.bf16 %v1354_v53, %v1353_v51 }
 0x4a3   :  { %1041 = vmatmul.mubr.f32.gmra.mrb[6].mxu1 %v889_v57  ;;  %8161 = vmatprep.subr.bf16.mxu1 %v8160_v58  ;;  %v8216_v54 = vpack.c.bf16 %v1384_v50, %v1383_v46  ;;  %v1371_v57 = vld [vmem:[%s12274_s17 + $0xd0] sm:$0xff] }
 0x4a4   :  { %7493 = vmatprep.mubr.f32.mxu1 %v902_v59  ;;  %v1385_v59 = vld [vmem:[%s12274_s17 + $0x140] sm:$0xff] }
 0x4a7   :  { %7494 = vmatmul.mubr.f32.vlgmr.msra.gmra.mrb[8].mxu1 %v903_v63  ;;  %v1355_v63 = vld [vmem:[%s12274_s17 + $0x50] sm:$0xff] }
 0x4a8   :  { %7496 = vmatprep.mubr.f32.mxu1 %v904_v2  ;;  %8163 = vmatpush3.bf16.msra.mxu1 %v8160_v58  ;;  %v1372_v58 = vld [vmem:[%s12274_s17 + $0xd8] sm:$0xff]  ;;  %v8220_v2 = vpack.c.bf16 %v1386_v61, %v1385_v59 }
 0x4a9   :  { %8165 = vmatprep.subr.bf16.mxu1 %v8164_v1  ;;  %v8192_v60 = vpack.c.bf16 %v1372_v58, %v1371_v57 }
 0x4ab   :  { %7497 = vmatmul.mubr.f32.gmra.mrb[10].mxu1 %v905_v7  ;;  %v8196_v7 = vpack.c.bf16 %v1374_v29, %v1373_v5 }
 0x4ac   :  { %8167 = vmatpush3.bf16.msra.mxu1 %v8164_v1  ;;  %7511 = vmatprep.mubr.msk.f32.mxu1 %vm673_vm2, %v10844_v6  ;;  %v1346_v6 = vld [vmem:[%s12274_s17 + $0x8] sm:$0xff]  ;;  %v1356_v1 = vld [vmem:[%s12274_s17 + $0x58] sm:$0xff] }
 0x4ad   :  { %8169 = vmatprep.subr.bf16.mxu1 %v8168_v8  ;;  %v8174_v15 = vpack.c.bf16 %v1346_v6, %v1345_v14  ;;  %v8194_v4 = vpack.c.bf16 %v1356_v1, %v1355_v63  ;;  %v1358_v14 = vld [vmem:[%s12274_s17 + $0x68] sm:$0xff] }
 0x4ae   :  { %v8198_v6 = vpack.c.bf16 %v1358_v14, %v1357_v11 }
 0x4af   :  { %8175 = vmatpush3.bf16.msra.mxu0 %v8174_v15  ;;  %v1375_v15 = vld [vmem:[%s12274_s17 + $0xf0] sm:$0xff] }
 0x4b0   :  { %8171 = vmatpush3.bf16.msra.mxu1 %v8168_v8  ;;  %v1387_v8 = vld [vmem:[%s12274_s17 + $0x150] sm:$0xff] }
 0x4b1   :  { %8205 = vmatprep.subr.bf16.mxu1 %v8204_v20  ;;  %v8224_v13 = vpack.c.bf16 %v1388_v10, %v1387_v8 }
 0x4b3   :  { %7512 = vmatmul.mubr.msk.f32.vlgmr.msra.gmra.mrb[12].mxu1 %vm673_vm2, %v10860_v37  ;;  %v1363_v37 = vld [vmem:[%s12274_s17 + $0x90] sm:$0xff] }
 0x4b4   :  { %7514 = vmatprep.mubr.msk.f32.mxu1 %vm673_vm2, %v10865_v40  ;;  %v8176_v40 = vpack.c.bf16 %v1364_v16, %v1363_v37  ;;  %8207 = vmatpush3.bf16.msra.mxu1 %v8204_v20  ;;  %v1376_v37 = vld [vmem:[%s12274_s17 + $0xf8] sm:$0xff]  ;;  %v1389_v16 = vld [vmem:[%s12274_s17 + $0x160] sm:$0xff] }
 0x4b5   :  { %8209 = vmatprep.subr.bf16.mxu1 %v8208_v43  ;;  %v8200_v17 = vpack.c.bf16 %v1376_v37, %v1375_v15 }
 0x4b6   :  { %8177 = vmatprep.subr.bf16.mxu0 %v8176_v40  ;;  %v1390_v40 = vld [vmem:[%s12274_s17 + $0x168] sm:$0xff] }
 0x4b7   :  { %7515 = vmatmul.mubr.msk.f32.gmra.mrb[14].mxu1 %vm673_vm2, %v10868_v41  ;;  %v1347_v41 = vld [vmem:[%s12274_s17 + $0x10] sm:$0xff] }
 0x4b8   :  { %v8178_v22 = vpack.c.bf16 %v1348_v19, %v1347_v41  ;;  %8211 = vmatpush3.bf16.msra.mxu1 %v8208_v43  ;;  %v1360_v41 = vld [vmem:[%s12274_s17 + $0x78] sm:$0xff]  ;;  %v8228_v19 = vpack.c.bf16 %v1390_v40, %v1389_v16 }
 0x4b9   :  { %8213 = vmatprep.subr.bf16.mxu1 %v8212_v21  ;;  %v8202_v20 = vpack.c.bf16 %v1360_v41, %v1359_v18 }
 0x4ba   :  { %8179 = vmatpush3.bf16.msra.mxu0 %v8178_v22  ;;  %v1391_v22 = vld [vmem:[%s12274_s17 + $0x170] sm:$0xff] }
 0x4bb   :  { %8181 = vmatprep.subr.bf16.mxu0 %v8180_v26  ;;  %v8232_v24 = vpack.c.bf16 %v1392_v23, %v1391_v22 }
 0x4bc   :  { %8215 = vmatpush3.bf16.msra.mxu1 %v8212_v21 }
 0x4bd   :  { %8217 = vmatprep.subr.bf16.mxu1 %v8216_v54 }
 0x4be   :  { %8183 = vmatpush3.bf16.msra.mxu0 %v8182_v32 }
 0x4bf   :  { %8185 = vmatprep.subr.bf16.mxu0 %v8184_v36 }
 0x4c0   :  { %8219 = vmatpush3.bf16.msra.mxu1 %v8216_v54 }
 0x4c1   :  { %8221 = vmatprep.subr.bf16.mxu1 %v8220_v2 }
 0x4c2   :  { %8187 = vmatpush3.bf16.msra.mxu0 %v8186_v30 }
 0x4c3   :  { %8189 = vmatprep.subr.bf16.mxu0 %v8188_v47 }
 0x4c4   :  { %8223 = vmatpush3.bf16.msra.mxu1 %v8220_v2 }
 0x4c5   :  { %8225 = vmatprep.subr.bf16.mxu1 %v8224_v13 }
 0x4c6   :  { %8191 = vmatpush3.bf16.msra.mxu0 %v8190_v56 }
 0x4c7   :  { %8193 = vmatprep.subr.bf16.mxu0 %v8192_v60 }
 0x4c8   :  { %8227 = vmatpush3.bf16.msra.mxu1 %v8224_v13 }
 0x4c9   :  { %8229 = vmatprep.subr.bf16.mxu1 %v8228_v19 }
 0x4ca   :  { %8195 = vmatpush3.bf16.msra.mxu0 %v8194_v4 }
 0x4cb   :  { %8197 = vmatprep.subr.bf16.mxu0 %v8196_v7 }
 0x4cc   :  { %8231 = vmatpush3.bf16.msra.mxu1 %v8228_v19 }
 0x4cd   :  { %8233 = vmatprep.subr.bf16.mxu1 %v8232_v24 }
 0x4ce   :  { %8199 = vmatpush3.bf16.msra.mxu0 %v8198_v6 }
 0x4cf   :  { %8201 = vmatprep.subr.bf16.mxu0 %v8200_v17 }
 0x4d0   :  { %8235 = vmatpush3.bf16.msra.mxu1 %v8232_v24 }
 0x4d2   :  { %8203 = vmatpush3.bf16.msra.mxu0 %v8202_v20 }
 0x558   :  { %v6543_v25 = vpop.f32.mrb[0].mxu1 }
 0x559   :  { %v6544_v26 = vpop.f32.mrb[1].mxu1 }
 0x55a   :  { %v6545_v27 = vadd.f32 %v6544_v26, %v6543_v25 }
 0x55c   :  { %v1028_v30 = vadd.f32 %v6545_v27, %v6459_v38 }
 0x56e   :  { %v6546_v28 = vpop.f32.mrb[2].mxu1 }
 0x56f   :  { %v6547_v31 = vpop.f32.mrb[3].mxu1 }
 0x570   :  { %v6548_v43 = vadd.f32 %v6547_v31, %v6546_v28 }
 0x572   :  { %v6549_v32 = vpop.f32.mrb[4].mxu1  ;;  %v1033_v42 = vadd.f32 %v6548_v43, %v6459_v38 }
 0x573   :  { %v6550_v33 = vpop.f32.mrb[5].mxu1 }
 0x574   :  { %v6551_v34 = vadd.f32 %v6550_v33, %v6549_v32 }
 0x576   :  { %v6552_v35 = vpop.f32.mrb[6].mxu1  ;;  %v1038_v54 = vadd.f32 %v6551_v34, %v6459_v38 }
 0x577   :  { %v6553_v36 = vpop.f32.mrb[7].mxu1 }
 0x578   :  { %v6554_v39 = vadd.f32 %v6553_v36, %v6552_v35 }
 0x57a   :  { %v7495_v21 = vpop.f32.mrb[8].mxu1  ;;  %v1043_v50 = vadd.f32 %v6554_v39, %v6459_v38 }
 0x57b   :  { %v11080_v45 = vadd.f32 %v7495_v21, %v1033_v42  ;;  %v1112_v52 = vpop.f32.mrb[9].mxu1 }
 0x57c   :  { %v11082_v46 = vadd.f32 %v1112_v52, %v1028_v30 }
 0x57d   :  { %v1136_v47 = vand.u32 2147483647, %v11080_v45  ;;  %v1132_v28 = vmax.f32 %v11080_v45, 0.0 }
 0x57e   :  { %v1135_v51 = vand.u32 2147483647, %v11082_v46  ;;  %v7498_v53 = vpop.f32.mrb[10].mxu1  ;;  %v1131_v42 = vmax.f32 %v11082_v46, 0.0 }
 0x57f   :  { %v1140_v56 = vsub.f32 0.0, %v1136_v47  ;;  %v11086_v57 = vadd.f32 %v7498_v53, %v1043_v50  ;;  %v1122_v58 = vpop.f32.mrb[11].mxu1 }
 0x580   :  { %v1139_v59 = vsub.f32 0.0, %v1135_v51  ;;  %v11088_v60 = vadd.f32 %v1122_v58, %v1038_v54 }
 0x581   :  { %v1145_v61 = vmul.f32 1.442695, %v1140_v56  ;;  %v1138_v63 = vand.u32 2147483647, %v11086_v57  ;;  %v1134_v53 = vmax.f32 %v11086_v57, 0.0 }
 0x582   :  { %v1143_v1 = vmul.f32 1.442695, %v1139_v59  ;;  %v1137_v2 = vand.u32 2147483647, %v11088_v60 }
 0x583   :  { %9414 = vpow2.f32 %v1145_v61  ;;  %v1142_v4 = vsub.f32 0.0, %v1138_v63  ;;  %v1133_v63 = vmax.f32 %v11088_v60, 0.0 }
 0x584   :  { %9416 = vpow2.f32 %v1143_v1  ;;  %v1141_v5 = vsub.f32 0.0, %v1137_v2 }
 0x585   :  { %v1149_v29 = vmul.f32 1.442695, %v1142_v4 }
 0x586   :  { %v1147_v7 = vmul.f32 1.442695, %v1141_v5  ;;  %v11092_v8 = vpop.f32.mrb[12].mxu1  ;;  %v6460_v5 = vld [vmem:[%s12276_s18] ss:$0 sm:$0xff] }
 0x587   :  { %9418 = vpow2.f32 %v1149_v29  ;;  %v11094_v10 = vpop.f32.mrb[13].mxu1  ;;  %v1292_v29 = vadd.f32 %v11092_v8, %v6460_v5 }
 0x588   :  { %9420 = vpow2.f32 %v1147_v7 }
 0x58a   :  { %v11096_v11 = vpop.f32.mrb[14].mxu1 }
 0x58b   :  { %v11098_v13 = vpop.f32.mrb[15].mxu1 }
 0x58d   :  { %v9415_v14 = vpop.eup %9414 }
 0x58e   :  { %v9417_v6 = vpop.eup %9416  ;;  %v1160_v15 = vadd.f32 1.0, %v9415_v14  ;;  %v1163_v18 = vmul.f32 -0.5, %v9415_v14  ;;  %v1166_v22 = vand.u32 2147483647, %v9415_v14 }
 0x58f   :  { %v1151_v37 = vadd.f32 1.0, %v9417_v6  ;;  %v1154_v19 = vmul.f32 -0.5, %v9417_v6  ;;  %v1157_v26 = vand.u32 2147483647, %v9417_v6 }
 0x590   :  { %9422 = vlog2.f32 %v1160_v15  ;;  %v1164_v20 = vadd.f32 1.0, %v1163_v18  ;;  %vm1167_vm9 = vcmp.lt.f32.partialorder %v1166_v22, 0.0004427343 }
 0x591   :  { %v9419_v16 = vpop.eup %9418  ;;  %9424 = vlog2.f32 %v1151_v37  ;;  %v1155_v24 = vadd.f32 1.0, %v1154_v19  ;;  %vm1158_vm10 = vcmp.lt.f32.partialorder %v1157_v26, 0.0004427343 }
 0x592   :  { %v9421_v17 = vpop.eup %9420  ;;  %v1178_v40 = vadd.f32 1.0, %v9419_v16  ;;  %v1181_v23 = vmul.f32 -0.5, %v9419_v16  ;;  %v1165_v32 = vmul.f32 %v9415_v14, %v1164_v20  ;;  %v1184_v36 = vand.u32 2147483647, %v9419_v16 }
 0x593   :  { %v1169_v41 = vadd.f32 1.0, %v9421_v17  ;;  %v1172_v25 = vmul.f32 -0.5, %v9421_v17  ;;  %v1156_v35 = vmul.f32 %v9417_v6, %v1155_v24  ;;  %v1175_v21 = vand.u32 2147483647, %v9421_v17 }
 0x594   :  { %9426 = vlog2.f32 %v1178_v40  ;;  %v1182_v33 = vadd.f32 1.0, %v1181_v23  ;;  %vm1185_vm11 = vcmp.lt.f32.partialorder %v1184_v36, 0.0004427343  ;;  %v1287_v14 = vadd.f32 %v6460_v5, %v11094_v10 }
 0x595   :  { %9428 = vlog2.f32 %v1169_v41  ;;  %v1173_v38 = vadd.f32 1.0, %v1172_v25  ;;  %vm1176_vm12 = vcmp.lt.f32.partialorder %v1175_v21, 0.0004427343  ;;  %v1297_v41 = vadd.f32 %v6460_v5, %v11098_v13 }
 0x596   :  { %v1183_v56 = vmul.f32 %v9419_v16, %v1182_v33 }
 0x597   :  { %v1174_v59 = vmul.f32 %v9421_v17, %v1173_v38  ;;  %v1302_v17 = vadd.f32 %v11096_v11, %v6460_v5  ;;  %v1706_v5 = vld [vmem:[%s12277_s22 + $0x100] sm:$0xff] }
 0x59a   :  { %v9423_v27 = vpop.eup %9422 }
 0x59b   :  { %v9425_v31 = vpop.eup %9424  ;;  %v1162_v43 = vmul.f32 0.6931472, %v9423_v27 }
 0x59c   :  { %v1153_v34 = vmul.f32 0.6931472, %v9425_v31 }
 0x59d   :  { %v1168_v39 = vsel %vm1167_vm9, %v1165_v32, %v1162_v43  ;;  %vm2421_vm9 = vcmask 523264  }
 0x59e   :  { %v9427_v30 = vpop.eup %9426  ;;  %v1188_v52 = vadd.f32 %v1168_v39, %v1132_v28  ;;  %v1159_v47 = vsel %vm1158_vm10, %v1156_v35, %v1153_v34 }
 0x59f   :  { %v9429_v50 = vpop.eup %9428  ;;  %v1187_v51 = vadd.f32 %v1159_v47, %v1131_v42  ;;  %v1180_v54 = vmul.f32 0.6931472, %v9427_v30  ;;  %v1691_v47 = vld [vmem:[%s12277_s22 + $0x88] sm:$0xff] }
 0x5a0   :  { %9430 = vtanh.f32 %v1188_v52  ;;  %v1171_v58 = vmul.f32 0.6931472, %v9429_v50  ;;  %v1690_v52 = vld [vmem:[%s12277_s22 + $0x80] sm:$0xff] }
 0x5a1   :  { %9432 = vtanh.f32 %v1187_v51  ;;  %v1186_v61 = vsel %vm1185_vm11, %v1183_v56, %v1180_v54  ;;  %v8236_v50 = vpack.c.bf16 %v1691_v47, %v1690_v52  ;;  %v1674_v51 = vld [vmem:[%s12277_s22] sm:$0xff]  ;;  %v1692_v56 = vld [vmem:[%s12277_s22 + $0x90] sm:$0xff]  ;;  %v1715_v47 = vld [vmem:[%s12277_s22 + $0x148] sm:$0xff] }
 0x5a2   :  { %v1190_v1 = vadd.f32 %v1186_v61, %v1134_v53  ;;  %v1177_v2 = vsel %vm1176_vm12, %v1174_v59, %v1171_v58  ;;  %v1675_v53 = vld [vmem:[%s12277_s22 + $0x8] sm:$0xff]  ;;  %v1693_v58 = vld [vmem:[%s12277_s22 + $0x98] sm:$0xff]  ;;  %v1676_v61 = vld [vmem:[%s12277_s22 + $0x10] sm:$0xff] }
 0x5a3   :  { %v1189_v4 = vadd.f32 %v1177_v2, %v1133_v63  ;;  %v8238_v54 = vpack.c.bf16 %v1675_v53, %v1674_v51  ;;  %8237 = vmatprep.subr.bf16.mxu0 %v8236_v50  ;;  %v8240_v59 = vpack.c.bf16 %v1693_v58, %v1692_v56  ;;  %v1677_v63 = vld [vmem:[%s12277_s22 + $0x18] sm:$0xff]  ;;  %v1694_v2 = vld [vmem:[%s12277_s22 + $0xa0] sm:$0xff]  ;;  %v1687_v51 = vld [vmem:[%s12277_s22 + $0x68] sm:$0xff] }
 0x5a4   :  { %9434 = vtanh.f32 %v1190_v1  ;;  %v8242_v1 = vpack.c.bf16 %v1677_v63, %v1676_v61  ;;  %v1686_v50 = vld [vmem:[%s12277_s22 + $0x60] sm:$0xff]  ;;  %v1704_v56 = vld [vmem:[%s12277_s22 + $0xf0] sm:$0xff]  ;;  %v1705_v58 = vld [vmem:[%s12277_s22 + $0xf8] sm:$0xff] }
 0x5a5   :  { %9436 = vtanh.f32 %v1189_v4  ;;  %v1695_v4 = vld [vmem:[%s12277_s22 + $0xa8] sm:$0xff]  ;;  %v8264_v61 = vpack.c.bf16 %v1705_v58, %v1704_v56  ;;  %v1717_v63 = vld [vmem:[%s12277_s22 + $0x158] sm:$0xff] }
 0x5aa   :  { %v9431_v7 = vpop.eup %9430 }
 0x5ab   :  { %v9433_v6 = vpop.eup %9432  ;;  %v1196_v15 = vmul.f32 %v9431_v7, %v11080_v45  ;;  %v1707_v7 = vld [vmem:[%s12277_s22 + $0x108] sm:$0xff] }
 0x5ac   :  { %v1195_v37 = vmul.f32 %v9433_v6, %v11082_v46  ;;  %v1679_v6 = vld [vmem:[%s12277_s22 + $0x28] sm:$0xff] }
 0x5ad   :  { %v11109_v16 = vadd.f32 %v1292_v29, %v1196_v15  ;;  %v8244_v29 = vpack.c.bf16 %v1695_v4, %v1694_v2  ;;  %v8268_v15 = vpack.c.bf16 %v1707_v7, %v1706_v5  ;;  %v1689_v2 = vld [vmem:[%s12277_s22 + $0x78] sm:$0xff]  ;;  %v1719_v7 = vld [vmem:[%s12277_s22 + $0x168] sm:$0xff] }
 0x5ae   :  { %v9435_v40 = vpop.eup %9434  ;;  %v11112_v18 = vadd.f32 %v1287_v14, %v1195_v37  ;;  %v1678_v14 = vld [vmem:[%s12277_s22 + $0x20] sm:$0xff] }
 0x5af   :  { %v9437_v19 = vpop.eup %9436  ;;  %v1198_v8 = vmul.f32 %v9435_v40, %v11086_v57  ;;  %v1330_v20 = vrot.slane %v11109_v16, 1  ;;  %v1314_v11 = vrot.slane %v11109_v16, 7  ;;  %v8246_v37 = vpack.c.bf16 %v1679_v6, %v1678_v14  ;;  %8269 = vmatprep.subr.bf16.mxu1 %v8268_v15  ;;  %v1697_v40 = vld [vmem:[%s12277_s22 + $0xb8] sm:$0xff]  ;;  %v1720_v6 = vld [vmem:[%s12277_s22 + $0x170] sm:$0xff] }
 0x5b0   :  { %v1313_v10 = vrot.slane %v11112_v18, 7  ;;  %v1197_v45 = vmul.f32 %v9437_v19, %v11088_v60  ;;  %1464 = vmatprep.mubr.f32.mxu0 %v11112_v18  ;;  %v1329_v46 = vrot.slane %v11112_v18, 1 }
 0x5b1   :  { %v11122_v22 = vadd.f32 %v1302_v17, %v1198_v8  ;;  %v1696_v17 = vld [vmem:[%s12277_s22 + $0xb0] sm:$0xff]  ;;  %v1709_v8 = vld [vmem:[%s12277_s22 + $0x118] sm:$0xff] }
 0x5b2   :  { %v1324_v23 = vsel %vm563_vm1, 0.0, %v1313_v10  ;;  %v11125_v13 = vadd.f32 %v1297_v41, %v1197_v45  ;;  %v1331_v57 = vsel %vm604_vm0, %v1329_v46, %v1330_v20  ;;  %v1315_v27 = vsel %vm563_vm1, %v1313_v10, %v1314_v11  ;;  %v1708_v41 = vld [vmem:[%s12277_s22 + $0x110] sm:$0xff]  ;;  %v1681_v10 = vld [vmem:[%s12277_s22 + $0x38] sm:$0xff] }
 0x5b3   :  { %v1325_v24 = vmul.f32 %v1324_v23, %v10899_v62  ;;  %v1341_v25 = vmul.f32 %v1331_v57, %v10872_v44  ;;  %v1334_v60 = vrot.slane %v11122_v22, 1  ;;  %v1326_v32 = vmul.f32 %v1315_v27, %v10902_v0  ;;  %v1699_v23 = vld [vmem:[%s12277_s22 + $0xc8] sm:$0xff]  ;;  %v1710_v57 = vld [vmem:[%s12277_s22 + $0x120] sm:$0xff] }
 0x5b4   :  { %v1332_v26 = vrot.slane %v11125_v13, 1  ;;  %v1316_v28 = vrot.slane %v11125_v13, 7  ;;  %v1318_v38 = vrot.slane %v11122_v22, 7  ;;  %v8248_v19 = vpack.c.bf16 %v1697_v40, %v1696_v17 }
 0x5b5   :  { %1465 = vmatmul.mubr.f32.vlgmr.msra.gmra.mrb[8].mxu0 %v1325_v24  ;;  %7549 = vmatprep.mubr.f32.mxu1 %v1341_v25  ;;  %v1340_v36 = vsel %vm604_vm0, %v1334_v60, 0.0  ;;  %v8272_v45 = vpack.c.bf16 %v1709_v8, %v1708_v41  ;;  %v1711_v25 = vld [vmem:[%s12277_s22 + $0x128] sm:$0xff]  ;;  %v6465_v41 = vld [vmem:[%s12278_s0] ss:$0 sm:$0xff] }
 0x5b6   :  { %1469 = vmatprep.mubr.f32.mxu0 %v11109_v16  ;;  %v1333_v31 = vsel %vm604_vm0, %v1330_v20, %v1332_v26  ;;  %v1335_v43 = vsel %vm604_vm0, %v1332_v26, %v1334_v60  ;;  %v1317_v35 = vsel %vm563_vm1, %v1314_v11, %v1316_v28  ;;  %v1344_v42 = vmul.f32 %v1340_v36, %v10886_v55  ;;  %v1680_v20 = vld [vmem:[%s12277_s22 + $0x30] sm:$0xff]  ;;  %v1698_v11 = vld [vmem:[%s12277_s22 + $0xc0] sm:$0xff]  ;;  %v1683_v26 = vld [vmem:[%s12277_s22 + $0x48] sm:$0xff] }
 0x5b7   :  { %v1342_v33 = vmul.f32 %v1333_v31, %v10879_v49  ;;  %v1343_v34 = vmul.f32 %v1335_v43, %v10877_v48  ;;  %v1327_v39 = vmul.f32 %v1317_v35, %v10912_v9  ;;  %v1319_v21 = vsel %vm563_vm1, %v1316_v28, %v1318_v38  ;;  %8239 = vmatpush3.bf16.msra.mxu0 %v8238_v54  ;;  %v1682_v60 = vld [vmem:[%s12277_s22 + $0x40] sm:$0xff]  ;;  %v1700_v31 = vld [vmem:[%s12277_s22 + $0xd0] sm:$0xff]  ;;  %v1701_v43 = vld [vmem:[%s12277_s22 + $0xd8] sm:$0xff] }
 0x5b8   :  { %v1328_v30 = vmul.f32 %v1319_v21, %v10906_v3  ;;  %8241 = vmatprep.subr.bf16.mxu0 %v8240_v59  ;;  %v8250_v46 = vpack.c.bf16 %v1681_v10, %v1680_v20  ;;  %v8252_v24 = vpack.c.bf16 %v1699_v23, %v1698_v11  ;;  %v8276_v27 = vpack.c.bf16 %v1711_v25, %v1710_v57  ;;  %v1684_v35 = vld [vmem:[%s12277_s22 + $0x50] sm:$0xff]  ;;  %v1685_v36 = vld [vmem:[%s12277_s22 + $0x58] sm:$0xff]  ;;  %v1703_v21 = vld [vmem:[%s12277_s22 + $0xe8] sm:$0xff] }
 0x5b9   :  { %1470 = vmatmul.mubr.f32.gmra.mrb[10].mxu0 %v1326_v32  ;;  %7550 = vmatmul.mubr.f32.vlgmr.msra.gmra.mrb[16].mxu1 %v1342_v33  ;;  %v8254_v28 = vpack.c.bf16 %v1683_v26, %v1682_v60  ;;  %v1712_v32 = vld [vmem:[%s12277_s22 + $0x130] sm:$0xff]  ;;  %v8256_v33 = vpack.c.bf16 %v1701_v43, %v1700_v31  ;;  %v8262_v54 = vpack.c.bf16 %v1687_v51, %v1686_v50 }
 0x5ba   :  { %1474 = vmatprep.mubr.f32.mxu0 %v11125_v13  ;;  %7552 = vmatprep.mubr.f32.mxu1 %v1343_v34  ;;  %v1713_v34 = vld [vmem:[%s12277_s22 + $0x138] sm:$0xff]  ;;  %v1716_v59 = vld [vmem:[%s12277_s22 + $0x150] sm:$0xff] }
 0x5bb   :  { %8243 = vmatpush3.bf16.msra.mxu0 %v8242_v1  ;;  %8271 = vmatpush3.bf16.msra.mxu1 %v8268_v15  ;;  %v8280_v38 = vpack.c.bf16 %v1713_v34, %v1712_v32  ;;  %v1688_v1 = vld [vmem:[%s12277_s22 + $0x70] sm:$0xff]  ;;  %v8288_v4 = vpack.c.bf16 %v1717_v63, %v1716_v59  ;;  %v1721_v15 = vld [vmem:[%s12277_s22 + $0x178] sm:$0xff] }
 0x5bc   :  { %8245 = vmatprep.subr.bf16.mxu0 %v8244_v29  ;;  %8273 = vmatprep.subr.bf16.mxu1 %v8272_v45  ;;  %v8266_v5 = vpack.c.bf16 %v1689_v2, %v1688_v1  ;;  %v1718_v29 = vld [vmem:[%s12277_s22 + $0x160] sm:$0xff] }
 0x5bd   :  { %1475 = vmatmul.mubr.f32.gmra.mrb[12].mxu0 %v1327_v39  ;;  %7553 = vmatmul.mubr.f32.gmra.mrb[18].mxu1 %v1344_v42  ;;  %v8258_v39 = vpack.c.bf16 %v1685_v36, %v1684_v35  ;;  %v1702_v42 = vld [vmem:[%s12277_s22 + $0xe0] sm:$0xff]  ;;  %v8292_v14 = vpack.c.bf16 %v1719_v7, %v1718_v29 }
 0x5be   :  { %1479 = vmatprep.mubr.f32.mxu0 %v11122_v22  ;;  %v8260_v52 = vpack.c.bf16 %v1703_v21, %v1702_v42 }
 0x5bf   :  { %8247 = vmatpush3.bf16.msra.mxu0 %v8246_v37  ;;  %8275 = vmatpush3.bf16.msra.mxu1 %v8272_v45  ;;  %v8296_v37 = vpack.c.bf16 %v1721_v15, %v1720_v6 }
 0x5c0   :  { %8249 = vmatprep.subr.bf16.mxu0 %v8248_v19  ;;  %8277 = vmatprep.subr.bf16.mxu1 %v8276_v27 }
 0x5c1   :  { %1480 = vmatmul.mubr.f32.gmra.mrb[14].mxu0 %v1328_v30  ;;  %v1714_v30 = vld [vmem:[%s12277_s22 + $0x140] sm:$0xff] }
 0x5c2   :  { %v8284_v53 = vpack.c.bf16 %v1715_v47, %v1714_v30 }
 0x5c3   :  { %8251 = vmatpush3.bf16.msra.mxu0 %v8250_v46  ;;  %8279 = vmatpush3.bf16.msra.mxu1 %v8276_v27 }
 0x5c4   :  { %8253 = vmatprep.subr.bf16.mxu0 %v8252_v24  ;;  %8281 = vmatprep.subr.bf16.mxu1 %v8280_v38 }
 0x5c7   :  { %8255 = vmatpush3.bf16.msra.mxu0 %v8254_v28  ;;  %8283 = vmatpush3.bf16.msra.mxu1 %v8280_v38 }
 0x5c8   :  { %8257 = vmatprep.subr.bf16.mxu0 %v8256_v33  ;;  %8285 = vmatprep.subr.bf16.mxu1 %v8284_v53 }
 0x5cb   :  { %8259 = vmatpush3.bf16.msra.mxu0 %v8258_v39  ;;  %8287 = vmatpush3.bf16.msra.mxu1 %v8284_v53 }
 0x5cc   :  { %8261 = vmatprep.subr.bf16.mxu0 %v8260_v52  ;;  %8289 = vmatprep.subr.bf16.mxu1 %v8288_v4 }
 0x5cf   :  { %8263 = vmatpush3.bf16.msra.mxu0 %v8262_v54  ;;  %8291 = vmatpush3.bf16.msra.mxu1 %v8288_v4 }
 0x5d0   :  { %8265 = vmatprep.subr.bf16.mxu0 %v8264_v61  ;;  %8293 = vmatprep.subr.bf16.mxu1 %v8292_v14 }
 0x5d3   :  { %8267 = vmatpush3.bf16.msra.mxu0 %v8266_v5  ;;  %8295 = vmatpush3.bf16.msra.mxu1 %v8292_v14 }
 0x5d4   :  { %8297 = vmatprep.subr.bf16.mxu1 %v8296_v37 }
 0x5d7   :  { %8299 = vmatpush3.bf16.msra.mxu1 %v8296_v37 }
 0x688   :  { %v6617_v17 = vpop.f32.mrb[8].mxu0 }
 0x689   :  { %v6618_v40 = vpop.f32.mrb[9].mxu0 }
 0x68a   :  { %v6619_v19 = vadd.f32 %v6618_v40, %v6617_v17 }
 0x68c   :  { %v6620_v8 = vpop.f32.mrb[10].mxu0  ;;  %v7551_v20 = vpop.f32.mrb[16].mxu1  ;;  %v1467_v10 = vadd.f32 %v6619_v19, %v6465_v41 }
 0x68d   :  { %v6621_v45 = vpop.f32.mrb[11].mxu0  ;;  %v1551_v46 = vpop.f32.mrb[17].mxu1 }
 0x68e   :  { %v6622_v11 = vadd.f32 %v6621_v45, %v6620_v8  ;;  %v11198_v23 = vadd.f32 %v1551_v46, %v1467_v10 }
 0x690   :  { %v1472_v57 = vadd.f32 %v6622_v11, %v6465_v41  ;;  %v1574_v24 = vand.u32 2147483647, %v11198_v23  ;;  %v6623_v25 = vpop.f32.mrb[12].mxu0  ;;  %v7554_v60 = vpop.f32.mrb[18].mxu1  ;;  %v1570_v8 = vmax.f32 %v11198_v23, 0.0 }
 0x691   :  { %v6624_v26 = vpop.f32.mrb[13].mxu0  ;;  %v1561_v27 = vpop.f32.mrb[19].mxu1 }
 0x692   :  { %v11201_v28 = vadd.f32 %v7551_v20, %v1472_v57  ;;  %v1578_v31 = vsub.f32 0.0, %v1574_v24  ;;  %v6625_v43 = vadd.f32 %v6624_v26, %v6623_v25 }
 0x694   :  { %v1575_v32 = vand.u32 2147483647, %v11201_v28  ;;  %v1582_v33 = vmul.f32 1.442695, %v1578_v31  ;;  %v1477_v34 = vadd.f32 %v6625_v43, %v6465_v41  ;;  %v6626_v35 = vpop.f32.mrb[14].mxu0  ;;  %v1571_v25 = vmax.f32 %v11201_v28, 0.0 }
 0x695   :  { %v6627_v36 = vpop.f32.mrb[15].mxu0 }
 0x696   :  { %v1579_v38 = vsub.f32 0.0, %v1575_v32  ;;  %9438 = vpow2.f32 %v1582_v33  ;;  %v11204_v39 = vadd.f32 %v1561_v27, %v1477_v34  ;;  %v6628_v42 = vadd.f32 %v6627_v36, %v6626_v35 }
 0x698   :  { %v1584_v21 = vmul.f32 1.442695, %v1579_v38  ;;  %v1576_v30 = vand.u32 2147483647, %v11204_v39  ;;  %v1482_v52 = vadd.f32 %v6628_v42, %v6465_v41  ;;  %v1572_v34 = vmax.f32 %v11204_v39, 0.0 }
 0x69a   :  { %9440 = vpow2.f32 %v1584_v21  ;;  %v1580_v47 = vsub.f32 0.0, %v1576_v30  ;;  %v11207_v50 = vadd.f32 %v7554_v60, %v1482_v52 }
 0x69c   :  { %v1586_v51 = vmul.f32 1.442695, %v1580_v47  ;;  %v1577_v53 = vand.u32 2147483647, %v11207_v50  ;;  %v1573_v52 = vmax.f32 %v11207_v50, 0.0 }
 0x69e   :  { %9442 = vpow2.f32 %v1586_v51  ;;  %v1581_v54 = vsub.f32 0.0, %v1577_v53 }
 0x6a0   :  { %v9439_v56 = vpop.eup %9438  ;;  %v1588_v58 = vmul.f32 1.442695, %v1581_v54 }
 0x6a1   :  { %v1590_v59 = vadd.f32 1.0, %v9439_v56  ;;  %v1593_v1 = vmul.f32 -0.5, %v9439_v56  ;;  %v1596_v7 = vand.u32 2147483647, %v9439_v56 }
 0x6a2   :  { %9444 = vpow2.f32 %v1588_v58 }
 0x6a3   :  { %9446 = vlog2.f32 %v1590_v59  ;;  %v1594_v29 = vadd.f32 1.0, %v1593_v1  ;;  %vm1597_vm13 = vcmp.lt.f32.partialorder %v1596_v7, 0.0004427343 }
 0x6a4   :  { %v9441_v61 = vpop.eup %9440 }
 0x6a5   :  { %v1599_v63 = vadd.f32 1.0, %v9441_v61  ;;  %v1602_v5 = vmul.f32 -0.5, %v9441_v61  ;;  %v1595_v40 = vmul.f32 %v9439_v56, %v1594_v29  ;;  %v1605_v19 = vand.u32 2147483647, %v9441_v61 }
 0x6a7   :  { %9448 = vlog2.f32 %v1599_v63  ;;  %v1603_v37 = vadd.f32 1.0, %v1602_v5  ;;  %vm1606_vm14 = vcmp.lt.f32.partialorder %v1605_v19, 0.0004427343 }
 0x6a8   :  { %v9443_v2 = vpop.eup %9442 }
 0x6a9   :  { %v1608_v4 = vadd.f32 1.0, %v9443_v2  ;;  %v1611_v41 = vmul.f32 -0.5, %v9443_v2  ;;  %v1604_v11 = vmul.f32 %v9441_v61, %v1603_v37  ;;  %v1614_v60 = vand.u32 2147483647, %v9443_v2 }
 0x6ab   :  { %9450 = vlog2.f32 %v1608_v4  ;;  %v1612_v57 = vadd.f32 1.0, %v1611_v41  ;;  %vm1615_vm15 = vcmp.lt.f32.partialorder %v1614_v60, 0.0004427343 }
 0x6ac   :  { %v9445_v14 = vpop.eup %9444 }
 0x6ad   :  { %v9447_v6 = vpop.eup %9446  ;;  %v1617_v15 = vadd.f32 1.0, %v9445_v14  ;;  %v1620_v24 = vmul.f32 -0.5, %v9445_v14  ;;  %v1613_v32 = vmul.f32 %v9443_v2, %v1612_v57  ;;  %v1623_v35 = vand.u32 2147483647, %v9445_v14 }
 0x6ae   :  { %v1592_v17 = vmul.f32 0.6931472, %v9447_v6 }
 0x6af   :  { %9452 = vlog2.f32 %v1617_v15  ;;  %v1621_v33 = vadd.f32 1.0, %v1620_v24  ;;  %vm1624_vm2 = vcmp.lt.f32.partialorder %v1623_v35, 0.0004427343  ;;  %v10380_v24 = vmov 0.0  }
 0x6b0   :  { %v1598_v20 = vsel %vm1597_vm13, %v1595_v40, %v1592_v17 }
 0x6b1   :  { %v9449_v10 = vpop.eup %9448  ;;  %v1626_v45 = vadd.f32 %v1598_v20, %v1570_v8  ;;  %v1622_v30 = vmul.f32 %v9445_v14, %v1621_v33 }
 0x6b2   :  { %v1601_v46 = vmul.f32 0.6931472, %v9449_v10 }
 0x6b3   :  { %9454 = vtanh.f32 %v1626_v45 }
 0x6b4   :  { %v1607_v26 = vsel %vm1606_vm14, %v1604_v11, %v1601_v46 }
 0x6b5   :  { %v9451_v27 = vpop.eup %9450  ;;  %v1627_v31 = vadd.f32 %v1607_v26, %v1571_v25  ;;  %v11235_v25 = vld [vmem:[#allocation2] sm:$0xff] }
 0x6b6   :  { %v1610_v43 = vmul.f32 0.6931472, %v9451_v27 }
 0x6b7   :  { %9456 = vtanh.f32 %v1627_v31 }
 0x6b8   :  { %v1616_v36 = vsel %vm1615_vm15, %v1613_v32, %v1610_v43  ;;  %v6466_v32 = vld [vmem:[#allocation7] ss:$0 sm:$0xff] }
 0x6b9   :  { %v9453_v38 = vpop.eup %9452  ;;  %v1628_v42 = vadd.f32 %v1616_v36, %v1572_v34 }
 0x6ba   :  { %v1619_v21 = vmul.f32 0.6931472, %v9453_v38 }
 0x6bb   :  { %9458 = vtanh.f32 %v1628_v42 }
 0x6bc   :  { %v1625_v47 = vsel %vm1624_vm2, %v1622_v30, %v1619_v21 }
 0x6bd   :  { %v9455_v51 = vpop.eup %9454  ;;  %v1629_v53 = vadd.f32 %v1625_v47, %v1573_v52 }
 0x6be   :  { %v1634_v54 = vmul.f32 %v9455_v51, %v11198_v23 }
 0x6bf   :  { %9460 = vtanh.f32 %v1629_v53 }
 0x6c0   :  { %v1642_v56 = vrot.slane %v1634_v54, 7  ;;  %1793 = vmatprep.mubr.f32.mxu0 %v1634_v54  ;;  %v1658_v1 = vrot.slane %v1634_v54, 1 }
 0x6c1   :  { %v9457_v58 = vpop.eup %9456 }
 0x6c2   :  { %v1653_v59 = vsel %vm563_vm1, 0.0, %v1642_v56  ;;  %v1635_v61 = vmul.f32 %v9457_v58, %v11201_v28 }
 0x6c3   :  { %v1654_v63 = vmul.f32 %v1653_v59, %v10899_v62 }
 0x6c4   :  { %v1643_v2 = vrot.slane %v1635_v61, 7  ;;  %v1659_v4 = vrot.slane %v1635_v61, 1 }
 0x6c5   :  { %v9459_v5 = vpop.eup %9458  ;;  %1794 = vmatmul.mubr.f32.vlgmr.msra.gmra.mrb[16].mxu0 %v1654_v63 }
 0x6c6   :  { %1798 = vmatprep.mubr.f32.mxu0 %v1635_v61  ;;  %v1644_v29 = vsel %vm563_vm1, %v1642_v56, %v1643_v2  ;;  %v1660_v23 = vsel %vm604_vm0, %v1658_v1, %v1659_v4  ;;  %v1636_v7 = vmul.f32 %v9459_v5, %v11204_v39 }
 0x6c7   :  { %v1655_v14 = vmul.f32 %v1644_v29, %v10902_v0  ;;  %v1670_v6 = vmul.f32 %v1660_v23, %v10872_v44 }
 0x6c8   :  { %v1645_v15 = vrot.slane %v1636_v7, 7  ;;  %v1661_v28 = vrot.slane %v1636_v7, 1 }
 0x6c9   :  { %v9461_v37 = vpop.eup %9460  ;;  %1799 = vmatmul.mubr.f32.gmra.mrb[18].mxu0 %v1655_v14  ;;  %7587 = vmatprep.mubr.f32.mxu1 %v1670_v6 }
 0x6ca   :  { %1803 = vmatprep.mubr.f32.mxu0 %v1636_v7  ;;  %v1646_v17 = vsel %vm563_vm1, %v1643_v2, %v1645_v15  ;;  %v1662_v40 = vsel %vm604_vm0, %v1659_v4, %v1661_v28  ;;  %v1637_v41 = vmul.f32 %v9461_v37, %v11207_v50 }
 0x6cb   :  { %v1656_v19 = vmul.f32 %v1646_v17, %v10912_v9  ;;  %v1671_v39 = vmul.f32 %v1662_v40, %v10879_v49 }
 0x6cc   :  { %v1647_v8 = vrot.slane %v1637_v41, 7  ;;  %v1663_v20 = vrot.slane %v1637_v41, 1 }
 0x6cd   :  { %1804 = vmatmul.mubr.f32.gmra.mrb[20].mxu0 %v1656_v19  ;;  %7588 = vmatmul.mubr.f32.vlgmr.msra.gmra.mrb[20].mxu1 %v1671_v39 }
 0x6ce   :  { %1808 = vmatprep.mubr.f32.mxu0 %v1637_v41  ;;  %v1648_v10 = vsel %vm563_vm1, %v1645_v15, %v1647_v8  ;;  %v1664_v45 = vsel %vm604_vm0, %v1661_v28, %v1663_v20  ;;  %v1669_v46 = vsel %vm604_vm0, %v1663_v20, 0.0 }
 0x6cf   :  { %v1657_v11 = vmul.f32 %v1648_v10, %v10906_v3  ;;  %v1672_v57 = vmul.f32 %v1664_v45, %v10877_v48  ;;  %v1673_v50 = vmul.f32 %v1669_v46, %v10886_v55 }
 0x6d1   :  { %1809 = vmatmul.mubr.f32.gmra.mrb[22].mxu0 %v1657_v11  ;;  %7590 = vmatprep.mubr.f32.mxu1 %v1672_v57 }
 0x6d2   :  { %7591 = vmatmul.mubr.f32.gmra.mrb[22].mxu1 %v1673_v50  ;;  %2080 = vmatprep.mubr.f32.mxu0 %v10380_v24 }
 0x6d3   :  { %7601 = vmatprep.mubr.msk.f32.mxu1 %vm2009_vm4, %v11235_v25 }
 0x798   :  { %v6681_v60 = vpop.f32.mrb[16].mxu0 }
 0x799   :  { %v6682_v26 = vpop.f32.mrb[17].mxu0 }
 0x79a   :  { %v6683_v27 = vadd.f32 %v6682_v26, %v6681_v60 }
 0x79c   :  { %v6684_v31 = vpop.f32.mrb[18].mxu0  ;;  %v1796_v38 = vadd.f32 %v6683_v27, %v6466_v32 }
 0x79d   :  { %v6685_v43 = vpop.f32.mrb[19].mxu0 }
 0x79e   :  { %v6686_v33 = vadd.f32 %v6685_v43, %v6684_v31 }
 0x7a0   :  { %v6687_v34 = vpop.f32.mrb[20].mxu0  ;;  %v1801_v35 = vadd.f32 %v6686_v33, %v6466_v32  ;;  %v7589_v36 = vpop.f32.mrb[20].mxu1 }
 0x7a1   :  { %v6688_v42 = vpop.f32.mrb[21].mxu0  ;;  %v1880_v21 = vpop.f32.mrb[21].mxu1 }
 0x7a2   :  { %v11239_v30 = vadd.f32 %v7589_v36, %v1801_v35  ;;  %v6689_v52 = vadd.f32 %v6688_v42, %v6687_v34  ;;  %v11241_v47 = vadd.f32 %v1880_v21, %v1796_v38 }
 0x7a4   :  { %v1904_v51 = vand.u32 2147483647, %v11239_v30  ;;  %v1903_v53 = vand.u32 2147483647, %v11241_v47  ;;  %v6690_v54 = vpop.f32.mrb[22].mxu0  ;;  %v1806_v58 = vadd.f32 %v6689_v52, %v6466_v32  ;;  %v1899_v52 = vmax.f32 %v11241_v47, 0.0 }
 0x7a5   :  { %v7592_v56 = vpop.f32.mrb[22].mxu1  ;;  %v6691_v63 = vpop.f32.mrb[23].mxu0 }
 0x7a6   :  { %v1908_v59 = vsub.f32 0.0, %v1904_v51  ;;  %v1907_v61 = vsub.f32 0.0, %v1903_v53  ;;  %v1890_v1 = vpop.f32.mrb[23].mxu1  ;;  %v6692_v2 = vadd.f32 %v6691_v63, %v6690_v54 }
 0x7a7   :  { %v11245_v4 = vadd.f32 %v1890_v1, %v1806_v58 }
 0x7a8   :  { %v1913_v5 = vmul.f32 1.442695, %v1908_v59  ;;  %v1911_v29 = vmul.f32 1.442695, %v1907_v61  ;;  %v1811_v23 = vadd.f32 %v6692_v2, %v6466_v32  ;;  %v1900_v32 = vmax.f32 %v11239_v30, 0.0 }
 0x7a9   :  { %v1905_v7 = vand.u32 2147483647, %v11245_v4  ;;  %v1901_v2 = vmax.f32 %v11245_v4, 0.0 }
 0x7aa   :  { %9462 = vpow2.f32 %v1913_v5  ;;  %v11248_v14 = vadd.f32 %v7592_v56, %v1811_v23 }
 0x7ab   :  { %9464 = vpow2.f32 %v1911_v29  ;;  %v1909_v6 = vsub.f32 0.0, %v1905_v7 }
 0x7ac   :  { %v1906_v15 = vand.u32 2147483647, %v11248_v14 }
 0x7ad   :  { %v1915_v28 = vmul.f32 1.442695, %v1909_v6 }
 0x7ae   :  { %v1910_v37 = vsub.f32 0.0, %v1906_v15  ;;  %v1902_v15 = vmax.f32 %v11248_v14, 0.0 }
 0x7af   :  { %9466 = vpow2.f32 %v1915_v28 }
 0x7b0   :  { %v1917_v17 = vmul.f32 1.442695, %v1910_v37 }
 0x7b2   :  { %9468 = vpow2.f32 %v1917_v17 }
 0x7b4   :  { %v9463_v40 = vpop.eup %9462 }
 0x7b5   :  { %v9465_v41 = vpop.eup %9464  ;;  %v1928_v19 = vadd.f32 1.0, %v9463_v40  ;;  %v1931_v20 = vmul.f32 -0.5, %v9463_v40  ;;  %v1934_v57 = vand.u32 2147483647, %v9463_v40 }
 0x7b6   :  { %v1919_v39 = vadd.f32 1.0, %v9465_v41  ;;  %v1922_v45 = vmul.f32 -0.5, %v9465_v41  ;;  %v1925_v27 = vand.u32 2147483647, %v9465_v41 }
 0x7b7   :  { %9470 = vlog2.f32 %v1928_v19  ;;  %v1932_v11 = vadd.f32 1.0, %v1931_v20  ;;  %vm1935_vm5 = vcmp.lt.f32.partialorder %v1934_v57, 0.0004427343 }
 0x7b8   :  { %9472 = vlog2.f32 %v1919_v39  ;;  %v1923_v60 = vadd.f32 1.0, %v1922_v45  ;;  %vm1926_vm6 = vcmp.lt.f32.partialorder %v1925_v27, 0.0004427343 }
 0x7b9   :  { %v9467_v8 = vpop.eup %9466  ;;  %v1933_v34 = vmul.f32 %v9463_v40, %v1932_v11 }
 0x7ba   :  { %v1937_v10 = vadd.f32 1.0, %v9467_v8  ;;  %v1940_v26 = vmul.f32 -0.5, %v9467_v8  ;;  %v1924_v36 = vmul.f32 %v9465_v41, %v1923_v60  ;;  %v1943_v51 = vand.u32 2147483647, %v9467_v8 }
 0x7bc   :  { %9474 = vlog2.f32 %v1937_v10  ;;  %v9469_v46 = vpop.eup %9468  ;;  %v1941_v42 = vadd.f32 1.0, %v1940_v26  ;;  %vm1944_vm7 = vcmp.lt.f32.partialorder %v1943_v51, 0.0004427343  ;;  %v2185_v51 = vld [vmem:[%s12279_s13 + $0x88] sm:$0xff] }
 0x7bd   :  { %v1946_v50 = vadd.f32 1.0, %v9469_v46  ;;  %v1949_v38 = vmul.f32 -0.5, %v9469_v46  ;;  %v1952_v1 = vand.u32 2147483647, %v9469_v46 }
 0x7be   :  { %v1942_v63 = vmul.f32 %v9467_v8, %v1941_v42 }
 0x7bf   :  { %9476 = vlog2.f32 %v1946_v50  ;;  %v1950_v59 = vadd.f32 1.0, %v1949_v38  ;;  %vm1953_vm8 = vcmp.lt.f32.partialorder %v1952_v1, 0.0004427343 }
 0x7c1   :  { %v9471_v31 = vpop.eup %9470  ;;  %v1951_v6 = vmul.f32 %v9469_v46, %v1950_v59 }
 0x7c2   :  { %v9473_v43 = vpop.eup %9472  ;;  %v1930_v33 = vmul.f32 0.6931472, %v9471_v31 }
 0x7c3   :  { %v1921_v35 = vmul.f32 0.6931472, %v9473_v43 }
 0x7c4   :  { %v1936_v21 = vsel %vm1935_vm5, %v1933_v34, %v1930_v33 }
 0x7c5   :  { %v1956_v53 = vadd.f32 %v1936_v21, %v1900_v32  ;;  %v1927_v54 = vsel %vm1926_vm6, %v1924_v36, %v1921_v35 }
 0x7c6   :  { %v9475_v56 = vpop.eup %9474  ;;  %v1955_v58 = vadd.f32 %v1927_v54, %v1899_v52  ;;  %v2184_v52 = vld [vmem:[%s12279_s13 + $0x80] sm:$0xff] }
 0x7c7   :  { %9478 = vtanh.f32 %v1956_v53  ;;  %v1939_v61 = vmul.f32 0.6931472, %v9475_v56  ;;  %v2200_v56 = vld [vmem:[%s12279_s13 + $0x100] sm:$0xff] }
 0x7c8   :  { %9480 = vtanh.f32 %v1955_v58  ;;  %v2201_v58 = vld [vmem:[%s12279_s13 + $0x108] sm:$0xff] }
 0x7c9   :  { %v1945_v5 = vsel %vm1944_vm7, %v1942_v63, %v1939_v61  ;;  %v9477_v29 = vpop.eup %9476 }
 0x7ca   :  { %v1957_v23 = vadd.f32 %v1945_v5, %v1901_v2  ;;  %v1948_v7 = vmul.f32 0.6931472, %v9477_v29  ;;  %v8316_v2 = vpack.c.bf16 %v2185_v51, %v2184_v52  ;;  %v2195_v52 = vld [vmem:[%s12279_s13 + $0xd8] sm:$0xff]  ;;  %v2210_v51 = vld [vmem:[%s12279_s13 + $0x150] sm:$0xff] }
 0x7cc   :  { %9482 = vtanh.f32 %v1957_v23  ;;  %v1954_v28 = vsel %vm1953_vm8, %v1951_v6, %v1948_v7  ;;  %v2168_v23 = vld [vmem:[%s12279_s13] sm:$0xff]  ;;  %v2169_v7 = vld [vmem:[%s12279_s13 + $0x8] sm:$0xff]  ;;  %v2186_v6 = vld [vmem:[%s12279_s13 + $0x90] sm:$0xff] }
 0x7cd   :  { %v1958_v37 = vadd.f32 %v1954_v28, %v1902_v15  ;;  %v8348_v15 = vpack.c.bf16 %v2201_v58, %v2200_v56  ;;  %v2187_v28 = vld [vmem:[%s12279_s13 + $0x98] sm:$0xff]  ;;  %v2178_v56 = vld [vmem:[%s12279_s13 + $0x50] sm:$0xff] }
 0x7ce   :  { %v2179_v58 = vld [vmem:[%s12279_s13 + $0x58] sm:$0xff] }
 0x7cf   :  { %9484 = vtanh.f32 %v1958_v37  ;;  %v2202_v37 = vld [vmem:[%s12279_s13 + $0x110] sm:$0xff] }
 0x7d1   :  { %v9479_v17 = vpop.eup %9478 }
 0x7d2   :  { %v9481_v40 = vpop.eup %9480  ;;  %v1964_v41 = vmul.f32 %v9479_v17, %v11239_v30  ;;  %v2203_v17 = vld [vmem:[%s12279_s13 + $0x118] sm:$0xff] }
 0x7d3   :  { %v1963_v19 = vmul.f32 %v9481_v40, %v11241_v47  ;;  %v2008_v40 = vld [vmem:[#allocation2 + $0x8] sm:$0xff] }
 0x7d4   :  { %v1968_v39 = vadd.f32 %v1964_v41, %v11109_v16  ;;  %v8318_v41 = vpack.c.bf16 %v2169_v7, %v2168_v23  ;;  %v2180_v23 = vld [vmem:[%s12279_s13 + $0x60] sm:$0xff]  ;;  %v2181_v7 = vld [vmem:[%s12279_s13 + $0x68] sm:$0xff] }
 0x7d5   :  { %v1967_v8 = vadd.f32 %v1963_v19, %v11112_v18  ;;  %v8320_v19 = vpack.c.bf16 %v2187_v28, %v2186_v6  ;;  %v2199_v28 = vld [vmem:[%s12279_s13 + $0xf8] sm:$0xff] }
 0x7d6   :  { %v9483_v20 = vpop.eup %9482  ;;  %v1976_v10 = vrot.slane %v1968_v39, 7  ;;  %v1992_v45 = vrot.slane %v1968_v39, 1 }
 0x7d7   :  { %v1975_v46 = vrot.slane %v1967_v8, 7  ;;  %v1965_v11 = vmul.f32 %v9483_v20, %v11245_v4  ;;  %v8300_v57 = vpack.c.bf16 %v1968_v39, %v1967_v8  ;;  %v1991_v50 = vrot.slane %v1967_v8, 1  ;;  %v2170_v39 = vld [vmem:[%s12279_s13 + $0x10] sm:$0xff]  ;;  %v2171_v8 = vld [vmem:[%s12279_s13 + $0x18] sm:$0xff]  ;;  %v2188_v20 = vld [vmem:[%s12279_s13 + $0xa0] sm:$0xff] }
 0x7d9   :  { %v1969_v60 = vadd.f32 %v1965_v11, %v11125_v13  ;;  %8301 = vmatprep.subr.bf16.mxu0 %v8300_v57  ;;  %v1977_v26 = vsel %vm563_vm1, %v1975_v46, %v1976_v10  ;;  %v1986_v30 = vsel %vm563_vm1, 0.0, %v1975_v46  ;;  %v1993_v47 = vsel %vm604_vm0, %v1991_v50, %v1992_v45  ;;  %v9485_v16 = vpop.eup %9484  ;;  %v2204_v46 = vld [vmem:[%s12279_s13 + $0x120] sm:$0xff]  ;;  %v2205_v11 = vld [vmem:[%s12279_s13 + $0x128] sm:$0xff] }
 0x7da   :  { %v1987_v18 = vmul.f32 %v1986_v30, %v10899_v62  ;;  %v1988_v27 = vmul.f32 %v1977_v26, %v10902_v0  ;;  %v1966_v4 = vmul.f32 %v9485_v16, %v11248_v14  ;;  %v2003_v35 = vmul.f32 %v1993_v47, %v10872_v44  ;;  %v2190_v26 = vld [vmem:[%s12279_s13 + $0xb0] sm:$0xff]  ;;  %v2207_v16 = vld [vmem:[%s12279_s13 + $0x138] sm:$0xff] }
 0x7db   :  { %v1978_v31 = vrot.slane %v1969_v60, 7  ;;  %v1994_v43 = vrot.slane %v1969_v60, 1  ;;  %v8322_v57 = vpack.c.bf16 %v2171_v8, %v2170_v39  ;;  %v8356_v30 = vpack.c.bf16 %v2205_v11, %v2204_v46  ;;  %v2206_v47 = vld [vmem:[%s12279_s13 + $0x130] sm:$0xff]  ;;  %v2215_v8 = vld [vmem:[%s12279_s13 + $0x178] sm:$0xff] }
 0x7dc   :  { %v8302_v32 = vpack.c.bf16 %v1988_v27, %v1987_v18  ;;  %v1970_v13 = vadd.f32 %v1966_v4, %v11122_v22  ;;  %v2174_v4 = vld [vmem:[%s12279_s13 + $0x30] sm:$0xff] }
 0x7dd   :  { %v1995_v33 = vsel %vm604_vm0, %v1992_v45, %v1994_v43  ;;  %v1979_v34 = vsel %vm563_vm1, %v1976_v10, %v1978_v31  ;;  %v8352_v10 = vpack.c.bf16 %v2203_v17, %v2202_v37  ;;  %v2189_v45 = vld [vmem:[%s12279_s13 + $0xa8] sm:$0xff]  ;;  %v8342_v37 = vpack.c.bf16 %v2181_v7, %v2180_v23  ;;  %v2214_v39 = vld [vmem:[%s12279_s13 + $0x170] sm:$0xff]  ;;  %v2828_v7 = vld [vmem:[#allocation10 + $0x8] sm:$0xff] }
 0x7de   :  { %8303 = vmatpush1.bf16.msra.mxu0 %v8302_v32  ;;  %v2004_v36 = vmul.f32 %v1995_v33, %v10879_v49  ;;  %v1980_v38 = vrot.slane %v1970_v13, 7  ;;  %v8304_v42 = vpack.c.bf16 %v1970_v13, %v1969_v60  ;;  %v1996_v21 = vrot.slane %v1970_v13, 1  ;;  %v2172_v60 = vld [vmem:[%s12279_s13 + $0x20] sm:$0xff]  ;;  %v2193_v13 = vld [vmem:[%s12279_s13 + $0xc8] sm:$0xff]  ;;  %v2827_v23 = vld [vmem:[#allocation10] sm:$0xff] }
 0x7df   :  { %v1989_v59 = vmul.f32 %v1979_v34, %v10912_v9  ;;  %v8324_v50 = vpack.c.bf16 %v2189_v45, %v2188_v20  ;;  %v8360_v32 = vpack.c.bf16 %v2207_v16, %v2206_v47  ;;  %v2208_v33 = vld [vmem:[%s12279_s13 + $0x140] sm:$0xff]  ;;  %v2209_v34 = vld [vmem:[%s12279_s13 + $0x148] sm:$0xff]  ;;  %v8376_v20 = vpack.c.bf16 %v2215_v8, %v2214_v39  ;;  %v2428_v16 = vld [vmem:[#allocation9 + $0x20] sm:$0xff] }
 0x7e0   :  { %v8308_v14 = vpack.c.bf16 %v2004_v36, %v2003_v35  ;;  %8305 = vmatprep.subr.bf16.mxu0 %v8304_v42  ;;  %v1981_v22 = vsel %vm563_vm1, %v1978_v31, %v1980_v38  ;;  %v1997_v53 = vsel %vm604_vm0, %v1994_v43, %v1996_v21  ;;  %v2002_v54 = vsel %vm604_vm0, %v1996_v21, 0.0  ;;  %v2175_v31 = vld [vmem:[%s12279_s13 + $0x38] sm:$0xff]  ;;  %v2192_v43 = vld [vmem:[%s12279_s13 + $0xc0] sm:$0xff]  ;;  %v2177_v42 = vld [vmem:[%s12279_s13 + $0x48] sm:$0xff] }
 0x7e1   :  { %v1990_v61 = vmul.f32 %v1981_v22, %v10906_v3  ;;  %v2005_v63 = vmul.f32 %v1997_v53, %v10877_v48  ;;  %v2006_v1 = vmul.f32 %v2002_v54, %v10886_v55  ;;  %v8330_v35 = vpack.c.bf16 %v2175_v31, %v2174_v4  ;;  %v2176_v38 = vld [vmem:[%s12279_s13 + $0x40] sm:$0xff]  ;;  %v2194_v21 = vld [vmem:[%s12279_s13 + $0xd0] sm:$0xff]  ;;  %v2211_v22 = vld [vmem:[%s12279_s13 + $0x158] sm:$0xff] }
 0x7e2   :  { %8309 = vmatprep.subr.bf16.mxu1 %v8308_v14  ;;  %v8332_v36 = vpack.c.bf16 %v2193_v13, %v2192_v43  ;;  %v8334_v53 = vpack.c.bf16 %v2177_v42, %v2176_v38  ;;  %v8336_v54 = vpack.c.bf16 %v2195_v52, %v2194_v21  ;;  %v2430_v4 = vld [vmem:[#allocation9 + $0x30] sm:$0xff]  ;;  %v2431_v31 = vld [vmem:[#allocation9 + $0x38] sm:$0xff]  ;;  %v2433_v13 = vld [vmem:[#allocation9 + $0x48] sm:$0xff] }
 0x7e3   :  { %8311 = vmatpush3.bf16.msra.mxu1 %v8308_v14  ;;  %v8306_v5 = vpack.c.bf16 %v1990_v61, %v1989_v59  ;;  %v8312_v29 = vpack.c.bf16 %v2006_v1, %v2005_v63  ;;  %v8364_v14 = vpack.c.bf16 %v2209_v34, %v2208_v33  ;;  %v2196_v59 = vld [vmem:[%s12279_s13 + $0xe0] sm:$0xff]  ;;  %v8368_v61 = vpack.c.bf16 %v2211_v22, %v2210_v51  ;;  %v2197_v63 = vld [vmem:[%s12279_s13 + $0xe8] sm:$0xff]  ;;  %v2436_v38 = vld [vmem:[#allocation9 + $0x60] sm:$0xff] }
 0x7e4   :  { %v2212_v1 = vld [vmem:[%s12279_s13 + $0x160] sm:$0xff]  ;;  %v8390_v43 = vpack.c.bf16 %v2431_v31, %v2430_v4  ;;  %v2439_v52 = vld [vmem:[#allocation9 + $0x78] sm:$0xff]  ;;  %v2440_v22 = vld [vmem:[#allocation9 + $0x80] sm:$0xff] }
 0x7e5   :  { %8307 = vmatpush1.bf16.msra.mxu0 %v8306_v5  ;;  %8313 = vmatprep.subr.bf16.mxu1 %v8312_v29  ;;  %v8338_v5 = vpack.c.bf16 %v2179_v58, %v2178_v56  ;;  %v2434_v34 = vld [vmem:[#allocation9 + $0x50] sm:$0xff]  ;;  %v2437_v42 = vld [vmem:[#allocation9 + $0x68] sm:$0xff]  ;;  %v2443_v58 = vld [vmem:[#allocation9 + $0x98] sm:$0xff] }
 0x7e6   :  { %8317 = vmatprep.subr.bf16.mxu0 %v8316_v2  ;;  %v2213_v2 = vld [vmem:[%s12279_s13 + $0x168] sm:$0xff]  ;;  %v8399_v21 = vpack.c.bf16 %v2437_v42, %v2436_v38 }
 0x7e7   :  { %8315 = vmatpush3.bf16.msra.mxu1 %v8312_v29  ;;  %v8340_v29 = vpack.c.bf16 %v2197_v63, %v2196_v59  ;;  %v8372_v6 = vpack.c.bf16 %v2213_v2, %v2212_v1  ;;  %v2442_v56 = vld [vmem:[#allocation9 + $0x90] sm:$0xff]  ;;  %v2445_v63 = vld [vmem:[#allocation9 + $0xa8] sm:$0xff] }
 0x7e8   :  { %8349 = vmatprep.subr.bf16.mxu1 %v8348_v15  ;;  %6467 = vmatmul.mubr.msk.f32.vlgmr.msra.gmra.mrb[24].mxu0 %vm2009_vm4, %v11235_v25  ;;  %v2173_v25 = vld [vmem:[%s12279_s13 + $0x28] sm:$0xff]  ;;  %v8408_v59 = vpack.c.bf16 %v2443_v58, %v2442_v56  ;;  %v2604_v56 = vld [vmem:[%s12281_s23 + $0x80] sm:$0xff] }
 0x7e9   :  { %2086 = vmatprep.mubr.f32.mxu0 %v10380_v24  ;;  %8319 = vmatpush3.bf16.msra.mxu0 %v8318_v41  ;;  %v2191_v24 = vld [vmem:[%s12279_s13 + $0xb8] sm:$0xff]  ;;  %v8326_v18 = vpack.c.bf16 %v2173_v25, %v2172_v60  ;;  %v2446_v2 = vld [vmem:[#allocation9 + $0xb0] sm:$0xff] }
 0x7ea   :  { %7602 = vmatmul.mubr.msk.f32.vlgmr.msra.gmra.mrb[24].mxu1 %vm2009_vm4, %v2008_v40  ;;  %8321 = vmatprep.subr.bf16.mxu0 %v8320_v19  ;;  %v8328_v27 = vpack.c.bf16 %v2191_v24, %v2190_v26  ;;  %v2183_v41 = vld [vmem:[%s12279_s13 + $0x78] sm:$0xff]  ;;  %v2426_v26 = vld [vmem:[#allocation9 + $0x10] sm:$0xff]  ;;  %v2427_v24 = vld [vmem:[#allocation9 + $0x18] sm:$0xff] }
 0x7eb   :  { %8351 = vmatpush3.bf16.msra.mxu1 %v8348_v15  ;;  %v2198_v15 = vld [vmem:[%s12279_s13 + $0xf0] sm:$0xff]  ;;  %v2425_v25 = vld [vmem:[#allocation9 + $0x8] sm:$0xff]  ;;  %v8384_v47 = vpack.c.bf16 %v2427_v24, %v2426_v26  ;;  %v11353_v24 = vpop.permute.xlu0 %2385  ;;  %v2605_v58 = vld [vmem:[%s12281_s23 + $0x88] sm:$0xff] }
 0x7ec   :  { %8353 = vmatprep.subr.bf16.mxu1 %v8352_v10  ;;  %6468 = vmatmul.mubr.msk.f32.gmra.mrb[26].mxu0 %vm2009_vm4, %v2008_v40  ;;  %v8344_v17 = vpack.c.bf16 %v2199_v28, %v2198_v15  ;;  %v2182_v40 = vld [vmem:[%s12279_s13 + $0x70] sm:$0xff] }
 0x7ed   :  { %8323 = vmatpush3.bf16.msra.mxu0 %v8322_v57  ;;  %v8346_v19 = vpack.c.bf16 %v2183_v41, %v2182_v40  ;;  %v2424_v60 = vld [vmem:[#allocation9] sm:$0xff] }
 0x7ee   :  { %8325 = vmatprep.subr.bf16.mxu0 %v8324_v50 }
 0x7ef   :  { %8355 = vmatpush3.bf16.msra.mxu1 %v8352_v10 }
 0x7f0   :  { %8357 = vmatprep.subr.bf16.mxu1 %v8356_v30 }
 0x7f1   :  { %8327 = vmatpush3.bf16.msra.mxu0 %v8326_v18  ;;  %v2429_v18 = vld [vmem:[#allocation9 + $0x28] sm:$0xff] }
 0x7f2   :  { %8329 = vmatprep.subr.bf16.mxu0 %v8328_v27  ;;  %v8387_v27 = vpack.c.bf16 %v2429_v18, %v2428_v16  ;;  %v2829_v16 = vld [vmem:[#allocation10 + $0x10] sm:$0xff]  ;;  %v2830_v18 = vld [vmem:[#allocation10 + $0x18] sm:$0xff] }
 0x7f3   :  { %8359 = vmatpush3.bf16.msra.mxu1 %v8356_v30  ;;  %v8381_v30 = vpack.c.bf16 %v2425_v25, %v2424_v60  ;;  %v11348_v60 = vpop.permute.xlu1 %2405  ;;  %v8484_v31 = vpack.c.bf16 %v2830_v18, %v2829_v16  ;;  %v2598_v18 = vld [vmem:[%s12281_s23 + $0x50] sm:$0xff] }
 0x7f4   :  { %8361 = vmatprep.subr.bf16.mxu1 %v8360_v32 }
 0x7f5   :  { %8331 = vmatpush3.bf16.msra.mxu0 %v8330_v35  ;;  %v2435_v35 = vld [vmem:[#allocation9 + $0x58] sm:$0xff] }
 0x7f6   :  { %8333 = vmatprep.subr.bf16.mxu0 %v8332_v36  ;;  %v8396_v36 = vpack.c.bf16 %v2435_v35, %v2434_v34  ;;  %v2833_v34 = vld [vmem:[#allocation10 + $0x30] sm:$0xff]  ;;  %v2834_v35 = vld [vmem:[#allocation10 + $0x38] sm:$0xff] }
 0x7f7   :  { %8363 = vmatpush3.bf16.msra.mxu1 %v8360_v32  ;;  %v2432_v32 = vld [vmem:[#allocation9 + $0x40] sm:$0xff]  ;;  %v11358_v42 = vpop.permute.xlu1 %2390 }
 0x7f8   :  { %8365 = vmatprep.subr.bf16.mxu1 %v8364_v14  ;;  %v8393_v33 = vpack.c.bf16 %v2433_v13, %v2432_v32  ;;  %v2831_v32 = vld [vmem:[#allocation10 + $0x20] sm:$0xff]  ;;  %v2832_v13 = vld [vmem:[#allocation10 + $0x28] sm:$0xff] }
 0x7f9   :  { %8335 = vmatpush3.bf16.msra.mxu0 %v8334_v53  ;;  %v2441_v53 = vld [vmem:[#allocation9 + $0x88] sm:$0xff] }
 0x7fa   :  { %8337 = vmatprep.subr.bf16.mxu0 %v8336_v54  ;;  %v8405_v54 = vpack.c.bf16 %v2441_v53, %v2440_v22 }
 0x7fb   :  { %8367 = vmatpush3.bf16.msra.mxu1 %v8364_v14  ;;  %v2438_v14 = vld [vmem:[#allocation9 + $0x70] sm:$0xff] }
 0x7fc   :  { %8369 = vmatprep.subr.bf16.mxu1 %v8368_v61  ;;  %v8402_v51 = vpack.c.bf16 %v2439_v52, %v2438_v14 }
 0x7fd   :  { %8339 = vmatpush3.bf16.msra.mxu0 %v8338_v5  ;;  %v2447_v5 = vld [vmem:[#allocation9 + $0xb8] sm:$0xff] }
 0x7fe   :  { %8341 = vmatprep.subr.bf16.mxu0 %v8340_v29  ;;  %v8414_v29 = vpack.c.bf16 %v2447_v5, %v2446_v2  ;;  %v2606_v2 = vld [vmem:[%s12281_s23 + $0x90] sm:$0xff]  ;;  %v2607_v5 = vld [vmem:[%s12281_s23 + $0x98] sm:$0xff] }
 0x7ff   :  { %8371 = vmatpush3.bf16.msra.mxu1 %v8368_v61  ;;  %v2444_v61 = vld [vmem:[#allocation9 + $0xa0] sm:$0xff] }
 0x800   :  { %8373 = vmatprep.subr.bf16.mxu1 %v8372_v6  ;;  %v8411_v1 = vpack.c.bf16 %v2445_v63, %v2444_v61  ;;  %v2588_v61 = vld [vmem:[%s12281_s23] sm:$0xff]  ;;  %v2589_v63 = vld [vmem:[%s12281_s23 + $0x8] sm:$0xff] }
 0x801   :  { %8343 = vmatpush3.bf16.msra.mxu0 %v8342_v37 }
 0x802   :  { %8345 = vmatprep.subr.bf16.mxu0 %v8344_v17  ;;  %v6471_v17 = vld [vmem:[%s12280_s3] ss:$0 sm:$0xff] }
 0x803   :  { %8375 = vmatpush3.bf16.msra.mxu1 %v8372_v6  ;;  %v8480_v6 = vpack.c.bf16 %v2828_v7, %v2827_v23  ;;  %v2590_v23 = vld [vmem:[%s12281_s23 + $0x10] sm:$0xff]  ;;  %v2591_v7 = vld [vmem:[%s12281_s23 + $0x18] sm:$0xff] }
 0x804   :  { %8377 = vmatprep.subr.bf16.mxu1 %v8376_v20 }
 0x805   :  { %8347 = vmatpush3.bf16.msra.mxu0 %v8346_v19 }
 0x806   :  { %8380 = vmatprep.subr.bf16.mxu0 %v10378_v12 }
 0x807   :  { %8379 = vmatpush3.bf16.msra.mxu1 %v8376_v20 }
 0x8bb   :  { %v2082_v10 = vpop.f32.mrb[24].mxu0 }
 0x8bc   :  { %v2084_v45 = vpop.f32.mrb[25].mxu0 }
 0x8bd   :  { %v7603_v46 = vpop.f32.mrb[24].mxu1  ;;  %2287 = vmatprep.mubr.f32.mxu0 %v2084_v45 }
 0x8be   :  { %v2159_v11 = vpop.f32.mrb[25].mxu1  ;;  %2288 = vmatmul.mubr.f32.vlgmr.msra.gmra.mrb[28].mxu0 %v2082_v10 }
 0x8bf   :  { %7636 = vmatprep.mubr.f32.mxu1 %v2159_v11  ;;  %v2088_v57 = vpop.f32.mrb[26].mxu0  ;;  %8382 = vmatpush1.bf16.msra.mxu0 %v8381_v30 }
 0x8c0   :  { %7637 = vmatmul.mubr.f32.vlgmr.msra.gmra.mrb[26].mxu1 %v7603_v46  ;;  %v2090_v50 = vpop.f32.mrb[27].mxu0  ;;  %8383 = vmatprep.subr.bf16.mxu0 %v10378_v12  ;;  %v2402_v46 = vld [vmem:[%s12270_s20 + $0x8] sm:$0xff] }
 0x8c1   :  { %2292 = vmatprep.mubr.f32.mxu0 %v2090_v50 }
 0x8c2   :  { %2293 = vmatmul.mubr.f32.gmra.mrb[30].mxu0 %v2088_v57 }
 0x8c3   :  { %8385 = vmatpush1.bf16.msra.mxu0 %v8384_v47 }
 0x8c4   :  { %8386 = vmatprep.subr.bf16.mxu0 %v10378_v12 }
 0x8c7   :  { %8388 = vmatpush1.bf16.msra.mxu0 %v8387_v27 }
 0x8c8   :  { %8389 = vmatprep.subr.bf16.mxu0 %v10378_v12 }
 0x8cb   :  { %8391 = vmatpush1.bf16.msra.mxu0 %v8390_v43 }
 0x8cc   :  { %8392 = vmatprep.subr.bf16.mxu0 %v10378_v12 }
 0x8cf   :  { %8394 = vmatpush1.bf16.msra.mxu0 %v8393_v33  ;;  %v8488_v33 = vpack.c.bf16 %v2832_v13, %v2831_v32  ;;  %v2600_v13 = vld [vmem:[%s12281_s23 + $0x60] sm:$0xff] }
 0x8d0   :  { %8395 = vmatprep.subr.bf16.mxu0 %v10378_v12 }
 0x8d3   :  { %8397 = vmatpush1.bf16.msra.mxu0 %v8396_v36  ;;  %v8492_v36 = vpack.c.bf16 %v2834_v35, %v2833_v34  ;;  %v2618_v35 = vld [vmem:[%s12281_s23 + $0xf0] sm:$0xff] }
 0x8d4   :  { %8398 = vmatprep.subr.bf16.mxu0 %v10378_v12 }
 0x8d7   :  { %8400 = vmatpush1.bf16.msra.mxu0 %v8399_v21 }
 0x8d8   :  { %8401 = vmatprep.subr.bf16.mxu0 %v10378_v12 }
 0x8db   :  { %8403 = vmatpush1.bf16.msra.mxu0 %v8402_v51 }
 0x8dc   :  { %8404 = vmatprep.subr.bf16.mxu0 %v10378_v12 }
 0x8df   :  { %8406 = vmatpush1.bf16.msra.mxu0 %v8405_v54 }
 0x8e0   :  { %8407 = vmatprep.subr.bf16.mxu0 %v10378_v12 }
 0x8e3   :  { %8409 = vmatpush1.bf16.msra.mxu0 %v8408_v59  ;;  %v8416_v59 = vpack.c.bf16 %v2605_v58, %v2604_v56  ;;  %v6472_v56 = vld [vmem:[#allocation12] ss:$0 sm:$0xff] }
 0x8e4   :  { %8410 = vmatprep.subr.bf16.mxu0 %v10378_v12 }
 0x8e5   :  { %8417 = vmatprep.subr.bf16.mxu1 %v8416_v59 }
 0x8e7   :  { %8412 = vmatpush1.bf16.msra.mxu0 %v8411_v1  ;;  %v8418_v1 = vpack.c.bf16 %v2589_v63, %v2588_v61 }
 0x8e8   :  { %8413 = vmatprep.subr.bf16.mxu0 %v10378_v12 }
 0x8e9   :  { %8419 = vmatpush3.bf16.msra.mxu1 %v8418_v1 }
 0x8eb   :  { %8415 = vmatpush1.bf16.msra.mxu0 %v8414_v29  ;;  %v8420_v29 = vpack.c.bf16 %v2607_v5, %v2606_v2 }
 0x8ec   :  { %8481 = vmatprep.subr.bf16.mxu0 %v8480_v6 }
 0x8ed   :  { %8421 = vmatprep.subr.bf16.mxu1 %v8420_v29 }
 0x991   :  { %v6751_v15 = vpop.f32.mrb[28].mxu0 }
 0x992   :  { %v6752_v28 = vpop.f32.mrb[29].mxu0 }
 0x993   :  { %v7638_v37 = vpop.f32.mrb[26].mxu1  ;;  %v6753_v40 = vadd.f32 %v6752_v28, %v6751_v15  ;;  %v2608_v15 = vld [vmem:[%s12281_s23 + $0xa0] sm:$0xff]  ;;  %v2609_v28 = vld [vmem:[%s12281_s23 + $0xa8] sm:$0xff] }
 0x994   :  { %v2364_v41 = vpop.f32.mrb[27].mxu1 }
 0x995   :  { %v6754_v19 = vpop.f32.mrb[30].mxu0  ;;  %v2290_v39 = vadd.f32 %v6753_v40, %v6471_v17  ;;  %v2593_v40 = vld [vmem:[%s12281_s23 + $0x28] sm:$0xff] }
 0x996   :  { %v6755_v8 = vpop.f32.mrb[31].mxu0 }
 0x997   :  { %v6756_v20 = vadd.f32 %v6755_v8, %v6754_v19  ;;  %v2365_v10 = vadd.f32 %v2364_v41, %v2290_v39  ;;  %v2610_v19 = vld [vmem:[%s12281_s23 + $0xb0] sm:$0xff]  ;;  %v2611_v39 = vld [vmem:[%s12281_s23 + $0xb8] sm:$0xff] }
 0x998   :  { %v8428_v8 = vpack.c.bf16 %v2611_v39, %v2610_v19 }
 0x999   :  { %v2295_v45 = vadd.f32 %v6756_v20, %v6471_v17  ;;  %2415 = vrot.lane.b32.xlu0 %v2365_v10, %s10381_s24  ;;  %v2395_v50 = vrot.slane %v2365_v10, 1  ;;  %v2375_v30 = vrot.slane %v2365_v10, 7  ;;  %v2592_v17 = vld [vmem:[%s12281_s23 + $0x20] sm:$0xff]  ;;  %v2594_v20 = vld [vmem:[%s12281_s23 + $0x30] sm:$0xff] }
 0x99a   :  { %v8426_v41 = vpack.c.bf16 %v2593_v40, %v2592_v17 }
 0x99b   :  { %v2370_v11 = vadd.f32 %v7638_v37, %v2295_v45  ;;  %v2380_v47 = vsel %vm563_vm1, 0.0, %v2375_v30  ;;  %v8424_v37 = vpack.c.bf16 %v2609_v28, %v2608_v15 }
 0x99c   :  { %v2393_v27 = vmul.f32 %v11353_v24, %v2380_v47  ;;  %v2615_v47 = vld [vmem:[%s12281_s23 + $0xd8] sm:$0xff] }
 0x99d   :  { %v2396_v57 = vrot.slane %v2370_v11, 1  ;;  %2417 = vrot.lane.b32.xlu1 %v2370_v11, %s10381_s24  ;;  %2410 = vperm.xlu0 %9378, %v2402_v46   ;;  %v2376_v38 = vrot.slane %v2370_v11, 7  ;;  %v2612_v46 = vld [vmem:[%s12281_s23 + $0xc0] sm:$0xff] }
 0x99f   :  { %v2397_v25 = vsel %vm604_vm0, %v2395_v50, %v2396_v57  ;;  %v2377_v21 = vsel %vm563_vm1, %v2375_v30, %v2376_v38  ;;  %v2400_v51 = vsel %vm604_vm0, %v2396_v57, 0.0  ;;  %v2596_v50 = vld [vmem:[%s12281_s23 + $0x40] sm:$0xff]  ;;  %v2614_v30 = vld [vmem:[%s12281_s23 + $0xd0] sm:$0xff] }
 0x9a0   :  { %v2413_v26 = vmul.f32 %v11348_v60, %v2397_v25  ;;  %v2394_v53 = vmul.f32 %v11358_v42, %v2377_v21  ;;  %v2597_v25 = vld [vmem:[%s12281_s23 + $0x48] sm:$0xff]  ;;  %v8436_v16 = vpack.c.bf16 %v2615_v47, %v2614_v30  ;;  %v2602_v21 = vld [vmem:[%s12281_s23 + $0x70] sm:$0xff] }
 0x9a2   :  { %6473 = vmatprep.mubr.msk.f32.mxu0 %vm2421_vm9, %v2413_v26  ;;  %v8434_v26 = vpack.c.bf16 %v2597_v25, %v2596_v50 }
 0xa0b   :  { %v2416_v4 = vpop.permute.xlu0 %2415 }
 0xa0c   :  { %v2422_v43 = vsel %vm2421_vm9, %v2393_v27, %v2416_v4  ;;  %v2599_v27 = vld [vmem:[%s12281_s23 + $0x58] sm:$0xff] }
 0xa0d   :  { %2526 = vmatmul.mubr.f32.vlgmr.msra.gmra.mrb[32].mxu0 %v2422_v43  ;;  %v8438_v4 = vpack.c.bf16 %v2599_v27, %v2598_v18  ;;  %v2617_v43 = vld [vmem:[%s12281_s23 + $0xe8] sm:$0xff]  ;;  %v2622_v27 = vld [vmem:[%s12281_s23 + $0x110] sm:$0xff] }
 0xa0e   :  { %8483 = vmatpush3.bf16.msra.mxu0 %v8480_v6  ;;  %v8422_v6 = vpack.c.bf16 %v2591_v7, %v2590_v23 }
 0xa0f   :  { %8485 = vmatprep.subr.bf16.mxu0 %v8484_v31  ;;  %v2418_v14 = vpop.permute.xlu1 %2417 }
 0xa10   :  { %v2423_v54 = vsel %vm2421_vm9, %v2394_v53, %v2418_v14  ;;  %8423 = vmatpush3.bf16.msra.mxu1 %v8422_v6  ;;  %v2603_v14 = vld [vmem:[%s12281_s23 + $0x78] sm:$0xff]  ;;  %v2621_v53 = vld [vmem:[%s12281_s23 + $0x108] sm:$0xff] }
 0xa11   :  { %8425 = vmatprep.subr.bf16.mxu1 %v8424_v37 }
 0xa12   :  { %8487 = vmatpush3.bf16.msra.mxu0 %v8484_v31  ;;  %v2616_v31 = vld [vmem:[%s12281_s23 + $0xe0] sm:$0xff] }
 0xa13   :  { %8489 = vmatprep.subr.bf16.mxu0 %v8488_v33  ;;  %v8440_v32 = vpack.c.bf16 %v2617_v43, %v2616_v31 }
 0xa14   :  { %8427 = vmatpush3.bf16.msra.mxu1 %v8426_v41 }
 0xa15   :  { %8429 = vmatprep.subr.bf16.mxu1 %v8428_v8 }
 0xa16   :  { %8491 = vmatpush3.bf16.msra.mxu0 %v8488_v33  ;;  %v2601_v33 = vld [vmem:[%s12281_s23 + $0x68] sm:$0xff] }
 0xa17   :  { %8493 = vmatprep.subr.bf16.mxu0 %v8492_v36  ;;  %v8442_v34 = vpack.c.bf16 %v2601_v33, %v2600_v13 }
 0xa1a   :  { %8495 = vmatpush3.bf16.msra.mxu0 %v8492_v36  ;;  %v2619_v36 = vld [vmem:[%s12281_s23 + $0xf8] sm:$0xff] }
 0xa1b   :  { %v8444_v38 = vpack.c.bf16 %v2619_v36, %v2618_v35 }
 0xa1c   :  { %v11361_v52 = vpop.permute.xlu0 %2410 }
 0xa1d   :  { %v2414_v22 = vmul.f32 %v11361_v52, %v2400_v51  ;;  %v8446_v51 = vpack.c.bf16 %v2603_v14, %v2602_v21  ;;  %v2625_v21 = vld [vmem:[%s12281_s23 + $0x128] sm:$0xff] }
 0xa1f   :  { %6474 = vmatprep.mubr.msk.f32.mxu0 %vm2421_vm9, %v2414_v22  ;;  %v2620_v22 = vld [vmem:[%s12281_s23 + $0x100] sm:$0xff] }
 0xa20   :  { %2531 = vmatmul.mubr.f32.gmra.mrb[34].mxu0 %v2423_v54  ;;  %v8448_v54 = vpack.c.bf16 %v2621_v53, %v2620_v22  ;;  %v2626_v22 = vld [vmem:[%s12281_s23 + $0x130] sm:$0xff]  ;;  %v2627_v53 = vld [vmem:[%s12281_s23 + $0x138] sm:$0xff] }
 0xa21   :  { %7690 = vmatprep.mubr.msk.f32.mxu0 %vm2421_vm9, %v2365_v10  ;;  %v2595_v10 = vld [vmem:[%s12281_s23 + $0x38] sm:$0xff] }
 0xa22   :  { %v8430_v45 = vpack.c.bf16 %v2595_v10, %v2594_v20 }
 0xa24   :  { %7691 = vmatmul.mubr.msk.f32.vlgmr.msra.gmra.mrb[36].mxu0 %vm2421_vm9, %v2370_v11  ;;  %8431 = vmatpush3.bf16.msra.mxu1 %v8430_v45  ;;  %v2613_v11 = vld [vmem:[%s12281_s23 + $0xc8] sm:$0xff] }
 0xa25   :  { %v8432_v57 = vpack.c.bf16 %v2613_v11, %v2612_v46 }
 0xa27   :  { %8433 = vmatprep.subr.bf16.mxu1 %v8432_v57 }
 0xa28   :  { %8435 = vmatpush3.bf16.msra.mxu1 %v8434_v26 }
 0xa29   :  { %8437 = vmatprep.subr.bf16.mxu1 %v8436_v16 }
 0xa2c   :  { %8439 = vmatpush3.bf16.msra.mxu1 %v8438_v4  ;;  %v2623_v4 = vld [vmem:[%s12281_s23 + $0x118] sm:$0xff] }
 0xa2d   :  { %8441 = vmatprep.subr.bf16.mxu1 %v8440_v32  ;;  %v8452_v35 = vpack.c.bf16 %v2623_v4, %v2622_v27  ;;  %v2959_v27 = vld [vmem:[%s12282_s6 + $0x90] sm:$0xff]  ;;  %v2960_v4 = vld [vmem:[%s12282_s6 + $0x98] sm:$0xff] }
 0xa30   :  { %8443 = vmatpush3.bf16.msra.mxu1 %v8442_v34 }
 0xa31   :  { %8445 = vmatprep.subr.bf16.mxu1 %v8444_v38  ;;  %v2624_v38 = vld [vmem:[%s12281_s23 + $0x120] sm:$0xff] }
 0xa34   :  { %8447 = vmatpush3.bf16.msra.mxu1 %v8446_v51  ;;  %v8456_v51 = vpack.c.bf16 %v2625_v21, %v2624_v38  ;;  %v2962_v38 = vld [vmem:[%s12282_s6 + $0xa8] sm:$0xff] }
 0xa35   :  { %8449 = vmatprep.subr.bf16.mxu1 %v8448_v54 }
 0xae0   :  { %v2527_v58 = vpop.f32.mrb[32].mxu0 }
 0xae1   :  { %v2528_v59 = vadd.f32 %v6472_v56, %v2527_v58  ;;  %v2529_v61 = vpop.f32.mrb[33].mxu0  ;;  %v2628_v58 = vld [vmem:[%s12281_s23 + $0x140] sm:$0xff] }
 0xae3   :  { %v2538_v63 = vand.u32 2147483647, %v2528_v59  ;;  %v2536_v45 = vmax.f32 %v2528_v59, 0.0 }
 0xae5   :  { %v2540_v1 = vsub.f32 0.0, %v2538_v63  ;;  %v2630_v63 = vld [vmem:[%s12281_s23 + $0x150] sm:$0xff] }
 0xae7   :  { %v2542_v2 = vmul.f32 1.442695, %v2540_v1  ;;  %v2631_v1 = vld [vmem:[%s12281_s23 + $0x158] sm:$0xff] }
 0xae9   :  { %9486 = vpow2.f32 %v2542_v2 }
 0xaf3   :  { %v9487_v5 = vpop.eup %9486  ;;  %v2532_v29 = vpop.f32.mrb[34].mxu0 }
 0xaf4   :  { %v2546_v23 = vadd.f32 1.0, %v9487_v5  ;;  %v11404_v7 = vadd.f32 %v6472_v56, %v2532_v29  ;;  %v2534_v6 = vpop.f32.mrb[35].mxu0  ;;  %v2549_v17 = vmul.f32 -0.5, %v9487_v5  ;;  %v2552_v39 = vand.u32 2147483647, %v9487_v5 }
 0xaf5   :  { %v8460_v56 = vpack.c.bf16 %v2627_v53, %v2626_v22  ;;  %v2977_v22 = vld [vmem:[%s12282_s6 + $0x120] sm:$0xff] }
 0xaf6   :  { %9488 = vlog2.f32 %v2546_v23  ;;  %v2539_v15 = vand.u32 2147483647, %v11404_v7  ;;  %v2550_v19 = vadd.f32 1.0, %v2549_v17  ;;  %vm2553_vm10 = vcmp.lt.f32.partialorder %v2552_v39, 0.0004427343  ;;  %v2633_v17 = vld [vmem:[%s12281_s23 + $0x168] sm:$0xff] }
 0xaf7   :  { %v11407_v28 = vpop.f32.mrb[36].mxu0  ;;  %v2537_v33 = vmax.f32 %v11404_v7, 0.0 }
 0xaf8   :  { %v11409_v37 = vpop.f32.mrb[37].mxu0  ;;  %v2541_v40 = vsub.f32 0.0, %v2539_v15  ;;  %v2551_v10 = vmul.f32 %v9487_v5, %v2550_v19  ;;  %v8468_v5 = vpack.c.bf16 %v2631_v1, %v2630_v63  ;;  %v2632_v15 = vld [vmem:[%s12281_s23 + $0x160] sm:$0xff]  ;;  %v2947_v1 = vld [vmem:[%s12282_s6 + $0x30] sm:$0xff] }
 0xaf9   :  { %v8472_v39 = vpack.c.bf16 %v2633_v17, %v2632_v15  ;;  %v2966_v15 = vld [vmem:[%s12282_s6 + $0xc8] sm:$0xff] }
 0xafa   :  { %v2544_v41 = vmul.f32 1.442695, %v2541_v40 }
 0xafc   :  { %9490 = vpow2.f32 %v2544_v41 }
 0xb00   :  { %v9489_v8 = vpop.eup %9488 }
 0xb01   :  { %v2548_v20 = vmul.f32 0.6931472, %v9489_v8  ;;  %v2634_v8 = vld [vmem:[%s12281_s23 + $0x170] sm:$0xff] }
 0xb03   :  { %v2554_v46 = vsel %vm2553_vm10, %v2551_v10, %v2548_v20  ;;  %v2635_v20 = vld [vmem:[%s12281_s23 + $0x178] sm:$0xff] }
 0xb04   :  { %v2564_v11 = vadd.f32 %v2554_v46, %v2536_v45  ;;  %v8476_v10 = vpack.c.bf16 %v2635_v20, %v2634_v8  ;;  %v2967_v20 = vld [vmem:[%s12282_s6 + $0xd0] sm:$0xff] }
 0xb06   :  { %9492 = vtanh.f32 %v2564_v11  ;;  %v9491_v57 = vpop.eup %9490  ;;  %v2957_v11 = vld [vmem:[%s12282_s6 + $0x80] sm:$0xff] }
 0xb07   :  { %v2555_v50 = vadd.f32 1.0, %v9491_v57  ;;  %v2558_v25 = vmul.f32 -0.5, %v9491_v57  ;;  %v2561_v16 = vand.u32 2147483647, %v9491_v57 }
 0xb09   :  { %9494 = vlog2.f32 %v2555_v50  ;;  %v2559_v30 = vadd.f32 1.0, %v2558_v25  ;;  %vm2562_vm11 = vcmp.lt.f32.partialorder %v2561_v16, 0.0004427343  ;;  %v2941_v25 = vld [vmem:[%s12282_s6] sm:$0xff]  ;;  %v2974_v16 = vld [vmem:[%s12282_s6 + $0x108] sm:$0xff] }
 0xb0b   :  { %v2560_v32 = vmul.f32 %v9491_v57, %v2559_v30  ;;  %v2958_v57 = vld [vmem:[%s12282_s6 + $0x88] sm:$0xff]  ;;  %v2973_v30 = vld [vmem:[%s12282_s6 + $0x100] sm:$0xff] }
 0xb0c   :  { %v8496_v50 = vpack.c.bf16 %v2958_v57, %v2957_v11  ;;  %v2952_v11 = vld [vmem:[%s12282_s6 + $0x58] sm:$0xff]  ;;  %v2983_v57 = vld [vmem:[%s12282_s6 + $0x150] sm:$0xff] }
 0xb0e   :  { %8497 = vmatprep.subr.bf16.mxu0 %v8496_v50 }
 0xb10   :  { %v9493_v26 = vpop.eup %9492 }
 0xb11   :  { %v2568_v47 = vmul.f32 %v9493_v26, %v2528_v59  ;;  %v2629_v59 = vld [vmem:[%s12281_s23 + $0x148] sm:$0xff] }
 0xb12   :  { %v8464_v61 = vpack.c.bf16 %v2629_v59, %v2628_v58  ;;  %v2942_v26 = vld [vmem:[%s12282_s6 + $0x8] sm:$0xff]  ;;  %v2963_v59 = vld [vmem:[%s12282_s6 + $0xb0] sm:$0xff] }
 0xb13   :  { %v2572_v18 = vrot.slane %v2568_v47, 7  ;;  %2707 = vmatprep.mubr.f32.mxu1 %v2568_v47  ;;  %v9495_v31 = vpop.eup %9494  ;;  %v2580_v29 = vrot.slane %v2568_v47, 1  ;;  %v8498_v47 = vpack.c.bf16 %v2942_v26, %v2941_v25  ;;  %v2984_v25 = vld [vmem:[%s12282_s6 + $0x158] sm:$0xff] }
 0xb14   :  { %v2557_v43 = vmul.f32 0.6931472, %v9495_v31  ;;  %v8500_v31 = vpack.c.bf16 %v2960_v4, %v2959_v27  ;;  %v8548_v26 = vpack.c.bf16 %v2984_v25, %v2983_v57  ;;  %v2954_v27 = vld [vmem:[%s12282_s6 + $0x68] sm:$0xff]  ;;  %v2985_v4 = vld [vmem:[%s12282_s6 + $0x160] sm:$0xff] }
 0xb15   :  { %v2577_v13 = vsel %vm563_vm1, 0.0, %v2572_v18  ;;  %8499 = vmatpush3.bf16.msra.mxu0 %v8498_v47  ;;  %v2970_v47 = vld [vmem:[%s12282_s6 + $0xe8] sm:$0xff] }
 0xb16   :  { %v2578_v34 = vmul.f32 %v2577_v13, %v11353_v24  ;;  %v2563_v36 = vsel %vm2562_vm11, %v2560_v32, %v2557_v43  ;;  %v2943_v43 = vld [vmem:[%s12282_s6 + $0x10] sm:$0xff]  ;;  %v2944_v32 = vld [vmem:[%s12282_s6 + $0x18] sm:$0xff]  ;;  %8501 = vmatprep.subr.bf16.mxu0 %v8500_v31 }
 0xb17   :  { %v2565_v14 = vadd.f32 %v2563_v36, %v2537_v33  ;;  %v2975_v13 = vld [vmem:[%s12282_s6 + $0x110] sm:$0xff]  ;;  %v8502_v33 = vpack.c.bf16 %v2944_v32, %v2943_v43  ;;  %v2961_v36 = vld [vmem:[%s12282_s6 + $0xa0] sm:$0xff]  ;;  %v2986_v43 = vld [vmem:[%s12282_s6 + $0x168] sm:$0xff] }
 0xb18   :  { %2708 = vmatmul.mubr.f32.vlgmr.msra.gmra.mrb[28].mxu1 %v2578_v34  ;;  %v2976_v34 = vld [vmem:[%s12282_s6 + $0x118] sm:$0xff]  ;;  %v8504_v21 = vpack.c.bf16 %v2962_v38, %v2961_v36  ;;  %v8552_v32 = vpack.c.bf16 %v2986_v43, %v2985_v4  ;;  %v2987_v38 = vld [vmem:[%s12282_s6 + $0x170] sm:$0xff] }
 0xb19   :  { %8451 = vmatpush3.bf16.msra.mxu1 %v8448_v54  ;;  %9496 = vtanh.f32 %v2565_v14  ;;  %8503 = vmatpush3.bf16.msra.mxu0 %v8502_v33  ;;  %v2945_v14 = vld [vmem:[%s12282_s6 + $0x20] sm:$0xff]  ;;  %v2972_v33 = vld [vmem:[%s12282_s6 + $0xf8] sm:$0xff] }
 0xb1a   :  { %8453 = vmatprep.subr.bf16.mxu1 %v8452_v35  ;;  %8505 = vmatprep.subr.bf16.mxu0 %v8504_v21  ;;  %v2956_v36 = vld [vmem:[%s12282_s6 + $0x78] sm:$0xff] }
 0xb1d   :  { %8455 = vmatpush3.bf16.msra.mxu1 %v8452_v35  ;;  %v8532_v35 = vpack.c.bf16 %v2976_v34, %v2975_v13  ;;  %v2971_v13 = vld [vmem:[%s12282_s6 + $0xf0] sm:$0xff] }
 0xb1e   :  { %8457 = vmatprep.subr.bf16.mxu1 %v8456_v51  ;;  %v8524_v34 = vpack.c.bf16 %v2972_v33, %v2971_v13  ;;  %v6476_v33 = vld [vmem:[#allocation15] ss:$0 sm:$0xff] }
 0xb21   :  { %8459 = vmatpush3.bf16.msra.mxu1 %v8456_v51  ;;  %v2946_v51 = vld [vmem:[%s12282_s6 + $0x28] sm:$0xff] }
 0xb22   :  { %8461 = vmatprep.subr.bf16.mxu1 %v8460_v56  ;;  %v8506_v53 = vpack.c.bf16 %v2946_v51, %v2945_v14  ;;  %v2988_v14 = vld [vmem:[%s12282_s6 + $0x178] sm:$0xff] }
 0xb23   :  { %v9497_v2 = vpop.eup %9496  ;;  %v8556_v51 = vpack.c.bf16 %v2988_v14, %v2987_v38 }
 0xb24   :  { %v2569_v54 = vmul.f32 %v9497_v2, %v11404_v7  ;;  %8507 = vmatpush3.bf16.msra.mxu0 %v8506_v53  ;;  %v2948_v2 = vld [vmem:[%s12282_s6 + $0x38] sm:$0xff] }
 0xb25   :  { %8463 = vmatpush3.bf16.msra.mxu1 %v8460_v56  ;;  %v2978_v56 = vld [vmem:[%s12282_s6 + $0x128] sm:$0xff] }
 0xb26   :  { %8465 = vmatprep.subr.bf16.mxu1 %v8464_v61  ;;  %v2573_v23 = vrot.slane %v2569_v54, 7  ;;  %v2581_v6 = vrot.slane %v2569_v54, 1  ;;  %2712 = vmatprep.mubr.f32.mxu1 %v2569_v54  ;;  %v8536_v58 = vpack.c.bf16 %v2978_v56, %v2977_v22  ;;  %v2979_v54 = vld [vmem:[%s12282_s6 + $0x130] sm:$0xff] }
 0xb28   :  { %v2574_v40 = vsel %vm563_vm1, %v2572_v18, %v2573_v23  ;;  %v2582_v41 = vsel %vm604_vm0, %v2580_v29, %v2581_v6  ;;  %v2585_v45 = vsel %vm604_vm0, %v2581_v6, 0.0  ;;  %v8528_v18 = vpack.c.bf16 %v2974_v16, %v2973_v30  ;;  %v2980_v29 = vld [vmem:[%s12282_s6 + $0x138] sm:$0xff]  ;;  %v2965_v6 = vld [vmem:[%s12282_s6 + $0xc0] sm:$0xff] }
 0xb29   :  { %8467 = vmatpush3.bf16.msra.mxu1 %v8464_v61  ;;  %v2579_v19 = vmul.f32 %v2574_v40, %v11358_v42  ;;  %v2586_v7 = vmul.f32 %v2582_v41, %v11348_v60  ;;  %v2587_v46 = vmul.f32 %v2585_v45, %v11361_v52  ;;  %v2964_v61 = vld [vmem:[%s12282_s6 + $0xb8] sm:$0xff]  ;;  %v8540_v23 = vpack.c.bf16 %v2980_v29, %v2979_v54  ;;  %v2949_v40 = vld [vmem:[%s12282_s6 + $0x40] sm:$0xff]  ;;  %v2950_v41 = vld [vmem:[%s12282_s6 + $0x48] sm:$0xff] }
 0xb2a   :  { %8469 = vmatprep.subr.bf16.mxu1 %v8468_v5  ;;  %v8508_v63 = vpack.c.bf16 %v2964_v61, %v2963_v59  ;;  %v8512_v17 = vpack.c.bf16 %v2966_v15, %v2965_v6  ;;  %v2969_v30 = vld [vmem:[%s12282_s6 + $0xe0] sm:$0xff] }
 0xb2b   :  { %2713 = vmatmul.mubr.f32.gmra.mrb[30].mxu1 %v2579_v19  ;;  %v2981_v19 = vld [vmem:[%s12282_s6 + $0x140] sm:$0xff]  ;;  %v8520_v16 = vpack.c.bf16 %v2970_v47, %v2969_v30 }
 0xb2c   :  { %7671 = vmatprep.mubr.f32.mxu1 %v2586_v7  ;;  %8509 = vmatprep.subr.bf16.mxu0 %v8508_v63  ;;  %v8514_v7 = vpack.c.bf16 %v2950_v41, %v2949_v40  ;;  %v6475_v63 = vld [vmem:[#allocation13] ss:$0 sm:$0xff] }
 0xb2d   :  { %8471 = vmatpush3.bf16.msra.mxu1 %v8468_v5  ;;  %v8510_v5 = vpack.c.bf16 %v2948_v2, %v2947_v1 }
 0xb2e   :  { %8473 = vmatprep.subr.bf16.mxu1 %v8472_v39 }
 0xb2f   :  { %8511 = vmatpush3.bf16.msra.mxu0 %v8510_v5 }
 0xb30   :  { %8513 = vmatprep.subr.bf16.mxu0 %v8512_v17 }
 0xb31   :  { %8475 = vmatpush3.bf16.msra.mxu1 %v8472_v39  ;;  %v2982_v39 = vld [vmem:[%s12282_s6 + $0x148] sm:$0xff] }
 0xb32   :  { %8477 = vmatprep.subr.bf16.mxu1 %v8476_v10  ;;  %v8544_v8 = vpack.c.bf16 %v2982_v39, %v2981_v19 }
 0xb33   :  { %8515 = vmatpush3.bf16.msra.mxu0 %v8514_v7 }
 0xb35   :  { %8479 = vmatpush3.bf16.msra.mxu1 %v8476_v10  ;;  %v2968_v10 = vld [vmem:[%s12282_s6 + $0xd8] sm:$0xff] }
 0xb36   :  { %8529 = vmatprep.subr.bf16.mxu1 %v8528_v18  ;;  %v8516_v45 = vpack.c.bf16 %v2968_v10, %v2967_v20 }
 0xb38   :  { %7672 = vmatmul.mubr.f32.vlgmr.msra.gmra.mrb[32].mxu1 %v2587_v46  ;;  %v2951_v46 = vld [vmem:[%s12282_s6 + $0x50] sm:$0xff]  ;;  %8517 = vmatprep.subr.bf16.mxu0 %v8516_v45 }
 0xb39   :  { %8531 = vmatpush3.bf16.msra.mxu1 %v8528_v18  ;;  %v8518_v50 = vpack.c.bf16 %v2952_v11, %v2951_v46  ;;  %v2953_v18 = vld [vmem:[%s12282_s6 + $0x60] sm:$0xff] }
 0xb3a   :  { %8533 = vmatprep.subr.bf16.mxu1 %v8532_v35  ;;  %v8522_v31 = vpack.c.bf16 %v2954_v27, %v2953_v18 }
 0xb3b   :  { %8519 = vmatpush3.bf16.msra.mxu0 %v8518_v50 }
 0xb3c   :  { %8521 = vmatprep.subr.bf16.mxu0 %v8520_v16 }
 0xb3d   :  { %8535 = vmatpush3.bf16.msra.mxu1 %v8532_v35  ;;  %v2955_v35 = vld [vmem:[%s12282_s6 + $0x70] sm:$0xff] }
 0xb3e   :  { %8537 = vmatprep.subr.bf16.mxu1 %v8536_v58  ;;  %v8526_v21 = vpack.c.bf16 %v2956_v36, %v2955_v35  ;;  %v2918_v36 = vadd.f32 %v11407_v28, %v6476_v33 }
 0xb3f   :  { %8523 = vmatpush3.bf16.msra.mxu0 %v8522_v31 }
 0xb40   :  { %8525 = vmatprep.subr.bf16.mxu0 %v8524_v34 }
 0xb41   :  { %8539 = vmatpush3.bf16.msra.mxu1 %v8536_v58 }
 0xb42   :  { %8541 = vmatprep.subr.bf16.mxu1 %v8540_v23 }
 0xb43   :  { %8527 = vmatpush3.bf16.msra.mxu0 %v8526_v21  ;;  %v2913_v21 = vadd.f32 %v6476_v33, %v11409_v37 }
 0xb45   :  { %8543 = vmatpush3.bf16.msra.mxu1 %v8540_v23 }
 0xb46   :  { %8545 = vmatprep.subr.bf16.mxu1 %v8544_v8 }
 0xb49   :  { %8547 = vmatpush3.bf16.msra.mxu1 %v8544_v8 }
 0xb4a   :  { %8549 = vmatprep.subr.bf16.mxu1 %v8548_v26 }
 0xb4d   :  { %8551 = vmatpush3.bf16.msra.mxu1 %v8548_v26 }
 0xb4e   :  { %8553 = vmatprep.subr.bf16.mxu1 %v8552_v32 }
 0xb51   :  { %8555 = vmatpush3.bf16.msra.mxu1 %v8552_v32 }
 0xb52   :  { %8557 = vmatprep.subr.bf16.mxu1 %v8556_v51 }
 0xb55   :  { %8559 = vmatpush3.bf16.msra.mxu1 %v8556_v51 }
 0xbeb   :  { %v6807_v22 = vpop.f32.mrb[28].mxu1 }
 0xbec   :  { %v6808_v53 = vpop.f32.mrb[29].mxu1 }
 0xbed   :  { %v6809_v56 = vadd.f32 %v6808_v53, %v6807_v22 }
 0xbef   :  { %v2710_v54 = vadd.f32 %v6809_v56, %v6475_v63 }
 0xbfe   :  { %v6810_v58 = vpop.f32.mrb[30].mxu1 }
 0xbff   :  { %v6811_v59 = vpop.f32.mrb[31].mxu1 }
 0xc00   :  { %v6812_v61 = vadd.f32 %v6811_v59, %v6810_v58 }
 0xc02   :  { %v2715_v1 = vadd.f32 %v6812_v61, %v6475_v63 }
 0xc0b   :  { %v7673_v2 = vpop.f32.mrb[32].mxu1 }
 0xc0c   :  { %v2790_v5 = vadd.f32 %v7673_v2, %v2715_v1  ;;  %v2784_v29 = vpop.f32.mrb[33].mxu1 }
 0xc0d   :  { %v2785_v23 = vadd.f32 %v2784_v29, %v2710_v54  ;;  %v3214_v29 = vld [vmem:[%s12283_s26 + $0x80] sm:$0xff] }
 0xc0e   :  { %v2796_v6 = vand.u32 2147483647, %v2790_v5  ;;  %v2794_v16 = vmax.f32 %v2790_v5, 0.0 }
 0xc0f   :  { %v2795_v15 = vand.u32 2147483647, %v2785_v23  ;;  %v2793_v31 = vmax.f32 %v2785_v23, 0.0 }
 0xc10   :  { %v2798_v17 = vsub.f32 0.0, %v2796_v6 }
 0xc11   :  { %v2797_v40 = vsub.f32 0.0, %v2795_v15  ;;  %v3198_v15 = vld [vmem:[%s12283_s26] sm:$0xff] }
 0xc12   :  { %v2801_v41 = vmul.f32 1.442695, %v2798_v17  ;;  %v3199_v17 = vld [vmem:[%s12283_s26 + $0x8] sm:$0xff] }
 0xc13   :  { %v2799_v19 = vmul.f32 1.442695, %v2797_v40  ;;  %v8562_v40 = vpack.c.bf16 %v3199_v17, %v3198_v15 }
 0xc14   :  { %9498 = vpow2.f32 %v2801_v41  ;;  %v3216_v41 = vld [vmem:[%s12283_s26 + $0x90] sm:$0xff] }
 0xc15   :  { %9500 = vpow2.f32 %v2799_v19  ;;  %v3217_v19 = vld [vmem:[%s12283_s26 + $0x98] sm:$0xff] }
 0xc1e   :  { %v9499_v7 = vpop.eup %9498 }
 0xc1f   :  { %v9501_v39 = vpop.eup %9500  ;;  %v2812_v8 = vadd.f32 1.0, %v9499_v7  ;;  %v2815_v10 = vmul.f32 -0.5, %v9499_v7  ;;  %v2818_v11 = vand.u32 2147483647, %v9499_v7 }
 0xc20   :  { %v2803_v20 = vadd.f32 1.0, %v9501_v39  ;;  %v2806_v45 = vmul.f32 -0.5, %v9501_v39  ;;  %v2809_v50 = vand.u32 2147483647, %v9501_v39 }
 0xc21   :  { %9502 = vlog2.f32 %v2812_v8  ;;  %v2816_v46 = vadd.f32 1.0, %v2815_v10  ;;  %vm2819_vm12 = vcmp.lt.f32.partialorder %v2818_v11, 0.0004427343  ;;  %v3201_v8 = vld [vmem:[%s12283_s26 + $0x18] sm:$0xff]  ;;  %v3218_v11 = vld [vmem:[%s12283_s26 + $0xa0] sm:$0xff] }
 0xc22   :  { %9504 = vlog2.f32 %v2803_v20  ;;  %v2807_v57 = vadd.f32 1.0, %v2806_v45  ;;  %vm2810_vm13 = vcmp.lt.f32.partialorder %v2809_v50, 0.0004427343  ;;  %v3230_v20 = vld [vmem:[%s12283_s26 + $0x100] sm:$0xff]  ;;  %v3231_v45 = vld [vmem:[%s12283_s26 + $0x108] sm:$0xff] }
 0xc23   :  { %v2817_v47 = vmul.f32 %v9499_v7, %v2816_v46  ;;  %v8564_v7 = vpack.c.bf16 %v3217_v19, %v3216_v41  ;;  %v8592_v46 = vpack.c.bf16 %v3231_v45, %v3230_v20  ;;  %v3211_v41 = vld [vmem:[%s12283_s26 + $0x68] sm:$0xff]  ;;  %v3240_v19 = vld [vmem:[%s12283_s26 + $0x150] sm:$0xff] }
 0xc24   :  { %v2808_v27 = vmul.f32 %v9501_v39, %v2807_v57  ;;  %v3200_v39 = vld [vmem:[%s12283_s26 + $0x10] sm:$0xff]  ;;  %v3219_v57 = vld [vmem:[%s12283_s26 + $0xa8] sm:$0xff] }
 0xc25   :  { %v8566_v10 = vpack.c.bf16 %v3201_v8, %v3200_v39  ;;  %8593 = vmatprep.subr.bf16.mxu1 %v8592_v46  ;;  %v8568_v50 = vpack.c.bf16 %v3219_v57, %v3218_v11  ;;  %v3241_v39 = vld [vmem:[%s12283_s26 + $0x158] sm:$0xff]  ;;  %v3228_v20 = vld [vmem:[%s12283_s26 + $0xf0] sm:$0xff]  ;;  %v3242_v57 = vld [vmem:[%s12283_s26 + $0x160] sm:$0xff] }
 0xc26   :  { %v8612_v8 = vpack.c.bf16 %v3241_v39, %v3240_v19  ;;  %v3213_v11 = vld [vmem:[%s12283_s26 + $0x78] sm:$0xff] }
 0xc2b   :  { %v9503_v25 = vpop.eup %9502 }
 0xc2c   :  { %v9505_v26 = vpop.eup %9504  ;;  %v2814_v30 = vmul.f32 0.6931472, %v9503_v25  ;;  %v3202_v25 = vld [vmem:[%s12283_s26 + $0x20] sm:$0xff] }
 0xc2d   :  { %v2805_v18 = vmul.f32 0.6931472, %v9505_v26  ;;  %v3203_v26 = vld [vmem:[%s12283_s26 + $0x28] sm:$0xff] }
 0xc2e   :  { %v2820_v4 = vsel %vm2819_vm12, %v2817_v47, %v2814_v30  ;;  %v3232_v30 = vld [vmem:[%s12283_s26 + $0x110] sm:$0xff]  ;;  %v8570_v47 = vpack.c.bf16 %v3203_v26, %v3202_v25  ;;  %v3243_v25 = vld [vmem:[%s12283_s26 + $0x168] sm:$0xff] }
 0xc2f   :  { %v2822_v43 = vadd.f32 %v2820_v4, %v2794_v16  ;;  %v2811_v32 = vsel %vm2810_vm13, %v2808_v27, %v2805_v18  ;;  %v3233_v16 = vld [vmem:[%s12283_s26 + $0x118] sm:$0xff]  ;;  %v3220_v27 = vld [vmem:[%s12283_s26 + $0xb0] sm:$0xff]  ;;  %v8616_v26 = vpack.c.bf16 %v3243_v25, %v3242_v57 }
 0xc30   :  { %v2821_v13 = vadd.f32 %v2811_v32, %v2793_v31  ;;  %v8596_v18 = vpack.c.bf16 %v3233_v16, %v3232_v30  ;;  %v3221_v4 = vld [vmem:[%s12283_s26 + $0xb8] sm:$0xff]  ;;  %v3244_v30 = vld [vmem:[%s12283_s26 + $0x170] sm:$0xff] }
 0xc31   :  { %9506 = vtanh.f32 %v2822_v43  ;;  %v8572_v31 = vpack.c.bf16 %v3221_v4, %v3220_v27  ;;  %v3204_v43 = vld [vmem:[%s12283_s26 + $0x30] sm:$0xff]  ;;  %v3205_v32 = vld [vmem:[%s12283_s26 + $0x38] sm:$0xff] }
 0xc32   :  { %9508 = vtanh.f32 %v2821_v13  ;;  %v3234_v13 = vld [vmem:[%s12283_s26 + $0x120] sm:$0xff]  ;;  %v8574_v33 = vpack.c.bf16 %v3205_v32, %v3204_v43 }
 0xc3b   :  { %v9507_v34 = vpop.eup %9506 }
 0xc3c   :  { %v9509_v35 = vpop.eup %9508  ;;  %v2826_v38 = vmul.f32 %v9507_v34, %v2790_v5  ;;  %v3235_v34 = vld [vmem:[%s12283_s26 + $0x128] sm:$0xff] }
 0xc3d   :  { %v2825_v14 = vmul.f32 %v9509_v35, %v2785_v23  ;;  %v3215_v23 = vld [vmem:[%s12283_s26 + $0x88] sm:$0xff]  ;;  %v8600_v35 = vpack.c.bf16 %v3235_v34, %v3234_v13 }
 0xc3e   :  { %v11485_v51 = vadd.f32 %v2918_v36, %v2826_v38  ;;  %v8560_v6 = vpack.c.bf16 %v3215_v23, %v3214_v29  ;;  %v3222_v36 = vld [vmem:[%s12283_s26 + $0xc0] sm:$0xff]  ;;  %v3223_v38 = vld [vmem:[%s12283_s26 + $0xc8] sm:$0xff] }
 0xc3f   :  { %v11487_v22 = vadd.f32 %v2913_v21, %v2825_v14  ;;  %v8576_v21 = vpack.c.bf16 %v3223_v38, %v3222_v36  ;;  %v3206_v14 = vld [vmem:[%s12283_s26 + $0x40] sm:$0xff]  ;;  %v3239_v29 = vld [vmem:[%s12283_s26 + $0x148] sm:$0xff] }
 0xc40   :  { %v2934_v53 = vrot.slane %v11485_v51, 1  ;;  %v2926_v28 = vrot.slane %v11485_v51, 7  ;;  %8561 = vmatprep.subr.bf16.mxu0 %v8560_v6  ;;  %v3226_v23 = vld [vmem:[%s12283_s26 + $0xe0] sm:$0xff]  ;;  %v3227_v6 = vld [vmem:[%s12283_s26 + $0xe8] sm:$0xff] }
 0xc41   :  { %3060 = vmatprep.mubr.f32.mxu0 %v11487_v22  ;;  %v2925_v56 = vrot.slane %v11487_v22, 7  ;;  %v2933_v58 = vrot.slane %v11487_v22, 1  ;;  %v8584_v17 = vpack.c.bf16 %v3227_v6, %v3226_v23 }
 0xc42   :  { %v2938_v59 = vsel %vm604_vm0, %v2934_v53, 0.0 }
 0xc43   :  { %v2930_v37 = vsel %vm563_vm1, 0.0, %v2925_v56  ;;  %v2935_v61 = vsel %vm604_vm0, %v2933_v58, %v2934_v53  ;;  %v2940_v2 = vmul.f32 %v2938_v59, %v11361_v52  ;;  %v2927_v54 = vsel %vm563_vm1, %v2925_v56, %v2926_v28  ;;  %v3207_v53 = vld [vmem:[%s12283_s26 + $0x48] sm:$0xff]  ;;  %v3236_v56 = vld [vmem:[%s12283_s26 + $0x130] sm:$0xff]  ;;  %v3237_v28 = vld [vmem:[%s12283_s26 + $0x138] sm:$0xff] }
 0xc44   :  { %v2931_v63 = vmul.f32 %v2930_v37, %v11353_v24  ;;  %v2939_v1 = vmul.f32 %v2935_v61, %v11348_v60  ;;  %v2932_v5 = vmul.f32 %v2927_v54, %v11358_v42  ;;  %v8578_v58 = vpack.c.bf16 %v3207_v53, %v3206_v14  ;;  %v3224_v37 = vld [vmem:[%s12283_s26 + $0xd0] sm:$0xff]  ;;  %v3225_v61 = vld [vmem:[%s12283_s26 + $0xd8] sm:$0xff]  ;;  %v3238_v54 = vld [vmem:[%s12283_s26 + $0x140] sm:$0xff] }
 0xc45   :  { %v8604_v59 = vpack.c.bf16 %v3237_v28, %v3236_v56  ;;  %v8608_v15 = vpack.c.bf16 %v3239_v29, %v3238_v54 }
 0xc46   :  { %3061 = vmatmul.mubr.f32.vlgmr.msra.gmra.mrb[38].mxu0 %v2931_v63  ;;  %7725 = vmatprep.mubr.f32.mxu1 %v2939_v1  ;;  %v8580_v63 = vpack.c.bf16 %v3225_v61, %v3224_v37  ;;  %v3208_v1 = vld [vmem:[%s12283_s26 + $0x50] sm:$0xff] }
 0xc47   :  { %3065 = vmatprep.mubr.f32.mxu0 %v11485_v51  ;;  %7726 = vmatmul.mubr.f32.vlgmr.msra.gmra.mrb[34].mxu1 %v2940_v2  ;;  %v3209_v2 = vld [vmem:[%s12283_s26 + $0x58] sm:$0xff] }
 0xc48   :  { %8563 = vmatpush3.bf16.msra.mxu0 %v8562_v40  ;;  %8595 = vmatpush3.bf16.msra.mxu1 %v8592_v46  ;;  %v3210_v40 = vld [vmem:[%s12283_s26 + $0x60] sm:$0xff]  ;;  %v3212_v46 = vld [vmem:[%s12283_s26 + $0x70] sm:$0xff] }
 0xc49   :  { %8565 = vmatprep.subr.bf16.mxu0 %v8564_v7  ;;  %8597 = vmatprep.subr.bf16.mxu1 %v8596_v18  ;;  %v8586_v7 = vpack.c.bf16 %v3211_v41, %v3210_v40 }
 0xc4a   :  { %3066 = vmatmul.mubr.f32.gmra.mrb[40].mxu0 %v2932_v5  ;;  %v8582_v5 = vpack.c.bf16 %v3209_v2, %v3208_v1 }
 0xc4c   :  { %8567 = vmatpush3.bf16.msra.mxu0 %v8566_v10  ;;  %8599 = vmatpush3.bf16.msra.mxu1 %v8596_v18  ;;  %v3229_v10 = vld [vmem:[%s12283_s26 + $0xf8] sm:$0xff] }
 0xc4d   :  { %8569 = vmatprep.subr.bf16.mxu0 %v8568_v50  ;;  %8601 = vmatprep.subr.bf16.mxu1 %v8600_v35  ;;  %v8588_v45 = vpack.c.bf16 %v3229_v10, %v3228_v20  ;;  %v8590_v50 = vpack.c.bf16 %v3213_v11, %v3212_v46 }
 0xc50   :  { %8571 = vmatpush3.bf16.msra.mxu0 %v8570_v47  ;;  %8603 = vmatpush3.bf16.msra.mxu1 %v8600_v35  ;;  %v3245_v47 = vld [vmem:[%s12283_s26 + $0x178] sm:$0xff] }
 0xc51   :  { %8573 = vmatprep.subr.bf16.mxu0 %v8572_v31  ;;  %8605 = vmatprep.subr.bf16.mxu1 %v8604_v59  ;;  %v8620_v16 = vpack.c.bf16 %v3245_v47, %v3244_v30  ;;  %v6479_v31 = vld [vmem:[#allocation16] ss:$0 sm:$0xff] }
 0xc54   :  { %8575 = vmatpush3.bf16.msra.mxu0 %v8574_v33  ;;  %8607 = vmatpush3.bf16.msra.mxu1 %v8604_v59 }
 0xc55   :  { %8577 = vmatprep.subr.bf16.mxu0 %v8576_v21  ;;  %8609 = vmatprep.subr.bf16.mxu1 %v8608_v15 }
 0xc58   :  { %8579 = vmatpush3.bf16.msra.mxu0 %v8578_v58  ;;  %8611 = vmatpush3.bf16.msra.mxu1 %v8608_v15 }
 0xc59   :  { %8581 = vmatprep.subr.bf16.mxu0 %v8580_v63  ;;  %8613 = vmatprep.subr.bf16.mxu1 %v8612_v8 }
 0xc5c   :  { %8583 = vmatpush3.bf16.msra.mxu0 %v8582_v5  ;;  %8615 = vmatpush3.bf16.msra.mxu1 %v8612_v8 }
 0xc5d   :  { %8585 = vmatprep.subr.bf16.mxu0 %v8584_v17  ;;  %8617 = vmatprep.subr.bf16.mxu1 %v8616_v26 }
 0xc60   :  { %8587 = vmatpush3.bf16.msra.mxu0 %v8586_v7  ;;  %8619 = vmatpush3.bf16.msra.mxu1 %v8616_v26 }
 0xc61   :  { %8589 = vmatprep.subr.bf16.mxu0 %v8588_v45  ;;  %8621 = vmatprep.subr.bf16.mxu1 %v8620_v16 }
 0xc64   :  { %8591 = vmatpush3.bf16.msra.mxu0 %v8590_v50  ;;  %8623 = vmatpush3.bf16.msra.mxu1 %v8620_v16 }
 0xd19   :  { %v6873_v18 = vpop.f32.mrb[38].mxu0 }
 0xd1a   :  { %v6874_v27 = vpop.f32.mrb[39].mxu0  ;;  %v7727_v4 = vpop.f32.mrb[34].mxu1 }
 0xd1b   :  { %v6875_v43 = vadd.f32 %v6874_v27, %v6873_v18  ;;  %v3137_v32 = vpop.f32.mrb[35].mxu1 }
 0xd1d   :  { %v3063_v13 = vadd.f32 %v6875_v43, %v6479_v31  ;;  %v6876_v33 = vpop.f32.mrb[40].mxu0 }
 0xd1e   :  { %v6877_v34 = vpop.f32.mrb[41].mxu0 }
 0xd1f   :  { %v3138_v35 = vadd.f32 %v3137_v32, %v3063_v13  ;;  %v6878_v36 = vadd.f32 %v6877_v34, %v6876_v33  ;;  %v3473_v34 = vld [vmem:[%s12284_s28 + $0x80] sm:$0xff] }
 0xd21   :  { %v3148_v38 = vand.u32 2147483647, %v3138_v35  ;;  %v3068_v21 = vadd.f32 %v6878_v36, %v6479_v31  ;;  %v3146_v40 = vmax.f32 %v3138_v35, 0.0 }
 0xd23   :  { %v3150_v14 = vsub.f32 0.0, %v3148_v38  ;;  %v3143_v53 = vadd.f32 %v7727_v4, %v3068_v21  ;;  %v3457_v38 = vld [vmem:[%s12284_s28] sm:$0xff]  ;;  %v3458_v21 = vld [vmem:[%s12284_s28 + $0x8] sm:$0xff] }
 0xd25   :  { %v3152_v56 = vmul.f32 1.442695, %v3150_v14  ;;  %v3149_v58 = vand.u32 2147483647, %v3143_v53  ;;  %v3147_v10 = vmax.f32 %v3143_v53, 0.0  ;;  %v8626_v14 = vpack.c.bf16 %v3458_v21, %v3457_v38  ;;  %v3486_v38 = vld [vmem:[%s12284_s28 + $0xe8] sm:$0xff] }
 0xd26   :  { %v3499_v21 = vld [vmem:[%s12284_s28 + $0x150] sm:$0xff] }
 0xd27   :  { %9510 = vpow2.f32 %v3152_v56  ;;  %v3151_v28 = vsub.f32 0.0, %v3149_v58  ;;  %v3476_v56 = vld [vmem:[%s12284_s28 + $0x98] sm:$0xff]  ;;  %v3489_v58 = vld [vmem:[%s12284_s28 + $0x100] sm:$0xff] }
 0xd29   :  { %v3154_v59 = vmul.f32 1.442695, %v3151_v28 }
 0xd2b   :  { %9512 = vpow2.f32 %v3154_v59  ;;  %v3490_v59 = vld [vmem:[%s12284_s28 + $0x108] sm:$0xff] }
 0xd31   :  { %v9511_v37 = vpop.eup %9510 }
 0xd32   :  { %v3156_v61 = vadd.f32 1.0, %v9511_v37  ;;  %v3159_v2 = vmul.f32 -0.5, %v9511_v37  ;;  %v3162_v29 = vand.u32 2147483647, %v9511_v37 }
 0xd34   :  { %9514 = vlog2.f32 %v3156_v61  ;;  %v3160_v54 = vadd.f32 1.0, %v3159_v2  ;;  %vm3163_vm14 = vcmp.lt.f32.partialorder %v3162_v29, 0.0004427343  ;;  %v3460_v61 = vld [vmem:[%s12284_s28 + $0x18] sm:$0xff]  ;;  %v3477_v2 = vld [vmem:[%s12284_s28 + $0xa0] sm:$0xff] }
 0xd35   :  { %v9513_v63 = vpop.eup %9512 }
 0xd36   :  { %v3165_v1 = vadd.f32 1.0, %v9513_v63  ;;  %v3168_v5 = vmul.f32 -0.5, %v9513_v63  ;;  %v3161_v15 = vmul.f32 %v9511_v37, %v3160_v54  ;;  %v3171_v41 = vand.u32 2147483647, %v9513_v63  ;;  %v3459_v37 = vld [vmem:[%s12284_s28 + $0x10] sm:$0xff]  ;;  %v3478_v54 = vld [vmem:[%s12284_s28 + $0xa8] sm:$0xff] }
 0xd37   :  { %v8632_v29 = vpack.c.bf16 %v3478_v54, %v3477_v2  ;;  %v3502_v2 = vld [vmem:[%s12284_s28 + $0x168] sm:$0xff]  ;;  %v3471_v54 = vld [vmem:[%s12284_s28 + $0x70] sm:$0xff] }
 0xd38   :  { %9516 = vlog2.f32 %v3165_v1  ;;  %v3169_v17 = vadd.f32 1.0, %v3168_v5  ;;  %vm3172_vm15 = vcmp.lt.f32.partialorder %v3171_v41, 0.0004427343  ;;  %v8630_v1 = vpack.c.bf16 %v3460_v61, %v3459_v37  ;;  %v3491_v5 = vld [vmem:[%s12284_s28 + $0x110] sm:$0xff]  ;;  %v3488_v61 = vld [vmem:[%s12284_s28 + $0xf8] sm:$0xff] }
 0xd39   :  { %v3479_v41 = vld [vmem:[%s12284_s28 + $0xb0] sm:$0xff] }
 0xd3a   :  { %v3170_v20 = vmul.f32 %v9513_v63, %v3169_v17  ;;  %v8656_v63 = vpack.c.bf16 %v3490_v59, %v3489_v58  ;;  %v3470_v58 = vld [vmem:[%s12284_s28 + $0x68] sm:$0xff]  ;;  %v3487_v37 = vld [vmem:[%s12284_s28 + $0xf0] sm:$0xff] }
 0xd3c   :  { %8657 = vmatprep.subr.bf16.mxu1 %v8656_v63 }
 0xd3e   :  { %v9515_v23 = vpop.eup %9514 }
 0xd3f   :  { %v3158_v6 = vmul.f32 0.6931472, %v9515_v23  ;;  %v3492_v23 = vld [vmem:[%s12284_s28 + $0x118] sm:$0xff] }
 0xd40   :  { %v8660_v17 = vpack.c.bf16 %v3492_v23, %v3491_v5  ;;  %v3472_v5 = vld [vmem:[%s12284_s28 + $0x78] sm:$0xff] }
 0xd41   :  { %v3164_v19 = vsel %vm3163_vm14, %v3161_v15, %v3158_v6  ;;  %v3461_v6 = vld [vmem:[%s12284_s28 + $0x20] sm:$0xff]  ;;  %v3462_v15 = vld [vmem:[%s12284_s28 + $0x28] sm:$0xff]  ;;  %v8654_v23 = vpack.c.bf16 %v3472_v5, %v3471_v54 }
 0xd42   :  { %v9517_v7 = vpop.eup %9516  ;;  %v3174_v39 = vadd.f32 %v3164_v19, %v3146_v40  ;;  %v8634_v40 = vpack.c.bf16 %v3462_v15, %v3461_v6  ;;  %v3480_v19 = vld [vmem:[%s12284_s28 + $0xb8] sm:$0xff]  ;;  %v3503_v6 = vld [vmem:[%s12284_s28 + $0x170] sm:$0xff] }
 0xd43   :  { %v3167_v8 = vmul.f32 0.6931472, %v9517_v7  ;;  %v3493_v7 = vld [vmem:[%s12284_s28 + $0x120] sm:$0xff]  ;;  %v3504_v15 = vld [vmem:[%s12284_s28 + $0x178] sm:$0xff] }
 0xd44   :  { %9518 = vtanh.f32 %v3174_v39  ;;  %v8636_v39 = vpack.c.bf16 %v3480_v19, %v3479_v41  ;;  %v6480_v19 = vld [vmem:[#allocation18] ss:$0 sm:$0xff] }
 0xd45   :  { %v3173_v45 = vsel %vm3172_vm15, %v3170_v20, %v3167_v8  ;;  %v3494_v8 = vld [vmem:[%s12284_s28 + $0x128] sm:$0xff]  ;;  %v3463_v20 = vld [vmem:[%s12284_s28 + $0x30] sm:$0xff] }
 0xd46   :  { %v3175_v46 = vadd.f32 %v3173_v45, %v3147_v10  ;;  %v3464_v10 = vld [vmem:[%s12284_s28 + $0x38] sm:$0xff]  ;;  %v8664_v45 = vpack.c.bf16 %v3494_v8, %v3493_v7 }
 0xd48   :  { %9520 = vtanh.f32 %v3175_v46  ;;  %v8638_v46 = vpack.c.bf16 %v3464_v10, %v3463_v20 }
 0xd4e   :  { %v9519_v11 = vpop.eup %9518 }
 0xd4f   :  { %v3178_v57 = vmul.f32 %v9519_v11, %v3138_v35  ;;  %v3474_v35 = vld [vmem:[%s12284_s28 + $0x88] sm:$0xff]  ;;  %v3481_v11 = vld [vmem:[%s12284_s28 + $0xc0] sm:$0xff] }
 0xd50   :  { %v8624_v36 = vpack.c.bf16 %v3474_v35, %v3473_v34 }
 0xd51   :  { %v3182_v50 = vrot.slane %v3178_v57, 7  ;;  %3317 = vmatprep.mubr.f32.mxu0 %v3178_v57  ;;  %v3190_v16 = vrot.slane %v3178_v57, 1  ;;  %v3482_v57 = vld [vmem:[%s12284_s28 + $0xc8] sm:$0xff] }
 0xd52   :  { %v9521_v25 = vpop.eup %9520  ;;  %8625 = vmatprep.subr.bf16.mxu0 %v8624_v36  ;;  %v3485_v36 = vld [vmem:[%s12284_s28 + $0xe0] sm:$0xff] }
 0xd53   :  { %v3187_v26 = vsel %vm563_vm1, 0.0, %v3182_v50  ;;  %v3179_v30 = vmul.f32 %v9521_v25, %v3143_v53  ;;  %v3475_v53 = vld [vmem:[%s12284_s28 + $0x90] sm:$0xff]  ;;  %v8640_v25 = vpack.c.bf16 %v3482_v57, %v3481_v11 }
 0xd54   :  { %v3188_v47 = vmul.f32 %v3187_v26, %v11353_v24  ;;  %v8628_v28 = vpack.c.bf16 %v3476_v56, %v3475_v53  ;;  %v3496_v26 = vld [vmem:[%s12284_s28 + $0x138] sm:$0xff]  ;;  %v3469_v56 = vld [vmem:[%s12284_s28 + $0x60] sm:$0xff] }
 0xd55   :  { %v3183_v18 = vrot.slane %v3179_v30, 7  ;;  %v3191_v27 = vrot.slane %v3179_v30, 1  ;;  %v3500_v53 = vld [vmem:[%s12284_s28 + $0x158] sm:$0xff]  ;;  %v8650_v59 = vpack.c.bf16 %v3470_v58, %v3469_v56 }
 0xd56   :  { %3318 = vmatmul.mubr.f32.vlgmr.msra.gmra.mrb[42].mxu0 %v3188_v47  ;;  %v3466_v47 = vld [vmem:[%s12284_s28 + $0x48] sm:$0xff] }
 0xd57   :  { %3322 = vmatprep.mubr.f32.mxu0 %v3179_v30  ;;  %v3184_v4 = vsel %vm563_vm1, %v3182_v50, %v3183_v18  ;;  %v3192_v31 = vsel %vm604_vm0, %v3190_v16, %v3191_v27  ;;  %v3195_v43 = vsel %vm604_vm0, %v3191_v27, 0.0  ;;  %8627 = vmatpush3.bf16.msra.mxu0 %v8626_v14  ;;  %v3495_v50 = vld [vmem:[%s12284_s28 + $0x130] sm:$0xff]  ;;  %v3465_v30 = vld [vmem:[%s12284_s28 + $0x40] sm:$0xff]  ;;  %v8648_v14 = vpack.c.bf16 %v3486_v38, %v3485_v36 }
 0xd58   :  { %v3189_v32 = vmul.f32 %v3184_v4, %v11358_v42  ;;  %v3196_v13 = vmul.f32 %v3192_v31, %v11348_v60  ;;  %v3197_v33 = vmul.f32 %v3195_v43, %v11361_v52  ;;  %8629 = vmatprep.subr.bf16.mxu0 %v8628_v28  ;;  %v8668_v16 = vpack.c.bf16 %v3496_v26, %v3495_v50  ;;  %v3483_v27 = vld [vmem:[%s12284_s28 + $0xd0] sm:$0xff]  ;;  %v3484_v4 = vld [vmem:[%s12284_s28 + $0xd8] sm:$0xff]  ;;  %v3497_v31 = vld [vmem:[%s12284_s28 + $0x140] sm:$0xff] }
 0xd59   :  { %v8642_v18 = vpack.c.bf16 %v3466_v47, %v3465_v30  ;;  %v8644_v43 = vpack.c.bf16 %v3484_v4, %v3483_v27  ;;  %v8676_v28 = vpack.c.bf16 %v3500_v53, %v3499_v21 }
 0xd5a   :  { %3323 = vmatmul.mubr.f32.gmra.mrb[44].mxu0 %v3189_v32  ;;  %7760 = vmatprep.mubr.f32.mxu1 %v3196_v13  ;;  %v3498_v32 = vld [vmem:[%s12284_s28 + $0x148] sm:$0xff]  ;;  %v3467_v13 = vld [vmem:[%s12284_s28 + $0x50] sm:$0xff] }
 0xd5b   :  { %7761 = vmatmul.mubr.f32.vlgmr.msra.gmra.mrb[36].mxu1 %v3197_v33  ;;  %8631 = vmatpush3.bf16.msra.mxu0 %v8630_v1  ;;  %v3468_v33 = vld [vmem:[%s12284_s28 + $0x58] sm:$0xff]  ;;  %v8672_v34 = vpack.c.bf16 %v3498_v32, %v3497_v31  ;;  %v8652_v1 = vpack.c.bf16 %v3488_v61, %v3487_v37 }
 0xd5c   :  { %8659 = vmatpush3.bf16.msra.mxu1 %v8656_v63  ;;  %8633 = vmatprep.subr.bf16.mxu0 %v8632_v29  ;;  %v8646_v35 = vpack.c.bf16 %v3468_v33, %v3467_v13  ;;  %v3501_v63 = vld [vmem:[%s12284_s28 + $0x160] sm:$0xff] }
 0xd5d   :  { %8661 = vmatprep.subr.bf16.mxu1 %v8660_v17  ;;  %v8680_v29 = vpack.c.bf16 %v3502_v2, %v3501_v63 }
 0xd5f   :  { %8635 = vmatpush3.bf16.msra.mxu0 %v8634_v40 }
 0xd60   :  { %8663 = vmatpush3.bf16.msra.mxu1 %v8660_v17  ;;  %8637 = vmatprep.subr.bf16.mxu0 %v8636_v39  ;;  %v8684_v17 = vpack.c.bf16 %v3504_v15, %v3503_v6 }
 0xd61   :  { %8665 = vmatprep.subr.bf16.mxu1 %v8664_v45 }
 0xd63   :  { %8639 = vmatpush3.bf16.msra.mxu0 %v8638_v46 }
 0xd64   :  { %8667 = vmatpush3.bf16.msra.mxu1 %v8664_v45  ;;  %8641 = vmatprep.subr.bf16.mxu0 %v8640_v25 }
 0xd65   :  { %8669 = vmatprep.subr.bf16.mxu1 %v8668_v16 }
 0xd67   :  { %8643 = vmatpush3.bf16.msra.mxu0 %v8642_v18 }
 0xd68   :  { %8671 = vmatpush3.bf16.msra.mxu1 %v8668_v16  ;;  %8645 = vmatprep.subr.bf16.mxu0 %v8644_v43 }
 0xd69   :  { %8673 = vmatprep.subr.bf16.mxu1 %v8672_v34 }
 0xd6b   :  { %8647 = vmatpush3.bf16.msra.mxu0 %v8646_v35 }
 0xd6c   :  { %8675 = vmatpush3.bf16.msra.mxu1 %v8672_v34  ;;  %8649 = vmatprep.subr.bf16.mxu0 %v8648_v14 }
 0xd6d   :  { %8677 = vmatprep.subr.bf16.mxu1 %v8676_v28 }
 0xd6f   :  { %8651 = vmatpush3.bf16.msra.mxu0 %v8650_v59 }
 0xd70   :  { %8679 = vmatpush3.bf16.msra.mxu1 %v8676_v28  ;;  %8653 = vmatprep.subr.bf16.mxu0 %v8652_v1 }
 0xd71   :  { %8681 = vmatprep.subr.bf16.mxu1 %v8680_v29 }
 0xd73   :  { %8655 = vmatpush3.bf16.msra.mxu0 %v8654_v23 }
 0xd74   :  { %8683 = vmatpush3.bf16.msra.mxu1 %v8680_v29 }
 0xd75   :  { %8685 = vmatprep.subr.bf16.mxu1 %v8684_v17 }
 0xd78   :  { %8687 = vmatpush3.bf16.msra.mxu1 %v8684_v17 }
 0xe29   :  { %v6929_v40 = vpop.f32.mrb[42].mxu0 }
 0xe2a   :  { %v6930_v41 = vpop.f32.mrb[43].mxu0 }
 0xe2b   :  { %v6931_v7 = vadd.f32 %v6930_v41, %v6929_v40 }
 0xe2d   :  { %v6932_v39 = vpop.f32.mrb[44].mxu0  ;;  %v3320_v8 = vadd.f32 %v6931_v7, %v6480_v19 }
 0xe2e   :  { %v6933_v20 = vpop.f32.mrb[45].mxu0  ;;  %v7762_v10 = vpop.f32.mrb[36].mxu1 }
 0xe2f   :  { %v6934_v45 = vadd.f32 %v6933_v20, %v6932_v39  ;;  %v3394_v46 = vpop.f32.mrb[37].mxu1 }
 0xe30   :  { %v3395_v11 = vadd.f32 %v3394_v46, %v3320_v8  ;;  %v3731_v46 = vld [vmem:[%s12285_s8 + $0x88] sm:$0xff] }
 0xe31   :  { %v3325_v57 = vadd.f32 %v6934_v45, %v6480_v19  ;;  %v3730_v45 = vld [vmem:[%s12285_s8 + $0x80] sm:$0xff] }
 0xe32   :  { %v3405_v50 = vand.u32 2147483647, %v3395_v11  ;;  %v3403_v53 = vmax.f32 %v3395_v11, 0.0 }
 0xe33   :  { %v3400_v25 = vadd.f32 %v7762_v10, %v3325_v57  ;;  %v3714_v57 = vld [vmem:[%s12285_s8] sm:$0xff] }
 0xe34   :  { %v3407_v26 = vsub.f32 0.0, %v3405_v50  ;;  %v3715_v50 = vld [vmem:[%s12285_s8 + $0x8] sm:$0xff] }
 0xe35   :  { %v3406_v30 = vand.u32 2147483647, %v3400_v25  ;;  %v3404_v61 = vmax.f32 %v3400_v25, 0.0 }
 0xe36   :  { %v3409_v47 = vmul.f32 1.442695, %v3407_v26  ;;  %v3732_v26 = vld [vmem:[%s12285_s8 + $0x90] sm:$0xff] }
 0xe37   :  { %v3408_v16 = vsub.f32 0.0, %v3406_v30  ;;  %v3733_v30 = vld [vmem:[%s12285_s8 + $0x98] sm:$0xff] }
 0xe38   :  { %9522 = vpow2.f32 %v3409_v47  ;;  %v8692_v47 = vpack.c.bf16 %v3733_v30, %v3732_v26  ;;  %v3743_v26 = vld [vmem:[%s12285_s8 + $0xe8] sm:$0xff] }
 0xe39   :  { %v3411_v18 = vmul.f32 1.442695, %v3408_v16  ;;  %v3716_v16 = vld [vmem:[%s12285_s8 + $0x10] sm:$0xff] }
 0xe3b   :  { %9524 = vpow2.f32 %v3411_v18  ;;  %v3717_v18 = vld [vmem:[%s12285_s8 + $0x18] sm:$0xff] }
 0xe42   :  { %v9523_v27 = vpop.eup %9522 }
 0xe43   :  { %v3413_v4 = vadd.f32 1.0, %v9523_v27  ;;  %v3416_v32 = vmul.f32 -0.5, %v9523_v27  ;;  %v3419_v34 = vand.u32 2147483647, %v9523_v27 }
 0xe45   :  { %v9525_v31 = vpop.eup %9524  ;;  %9526 = vlog2.f32 %v3413_v4  ;;  %v3417_v33 = vadd.f32 1.0, %v3416_v32  ;;  %vm3420_vm2 = vcmp.lt.f32.partialorder %v3419_v34, 0.0004427343  ;;  %v8694_v4 = vpack.c.bf16 %v3717_v18, %v3716_v16  ;;  %v3734_v32 = vld [vmem:[%s12285_s8 + $0xa0] sm:$0xff]  ;;  %v3727_v18 = vld [vmem:[%s12285_s8 + $0x68] sm:$0xff] }
 0xe46   :  { %v3422_v43 = vadd.f32 1.0, %v9525_v31  ;;  %v3425_v13 = vmul.f32 -0.5, %v9525_v31  ;;  %v3428_v38 = vand.u32 2147483647, %v9525_v31  ;;  %v3718_v34 = vld [vmem:[%s12285_s8 + $0x20] sm:$0xff] }
 0xe47   :  { %v3418_v14 = vmul.f32 %v9523_v27, %v3417_v33  ;;  %v3746_v27 = vld [vmem:[%s12285_s8 + $0x100] sm:$0xff] }
 0xe48   :  { %9528 = vlog2.f32 %v3422_v43  ;;  %v3426_v36 = vadd.f32 1.0, %v3425_v13  ;;  %vm3429_vm4 = vcmp.lt.f32.partialorder %v3428_v38, 0.0004427343  ;;  %v3735_v13 = vld [vmem:[%s12285_s8 + $0xa8] sm:$0xff]  ;;  %v3726_v16 = vld [vmem:[%s12285_s8 + $0x60] sm:$0xff] }
 0xe49   :  { %v8696_v33 = vpack.c.bf16 %v3735_v13, %v3734_v32  ;;  %v3744_v32 = vld [vmem:[%s12285_s8 + $0xf0] sm:$0xff]  ;;  %v3745_v13 = vld [vmem:[%s12285_s8 + $0xf8] sm:$0xff] }
 0xe4a   :  { %v3427_v59 = vmul.f32 %v9525_v31, %v3426_v36  ;;  %v3747_v31 = vld [vmem:[%s12285_s8 + $0x108] sm:$0xff]  ;;  %v3748_v36 = vld [vmem:[%s12285_s8 + $0x110] sm:$0xff] }
 0xe4b   :  { %v8720_v43 = vpack.c.bf16 %v3747_v31, %v3746_v27  ;;  %v3756_v27 = vld [vmem:[%s12285_s8 + $0x150] sm:$0xff]  ;;  %v3757_v31 = vld [vmem:[%s12285_s8 + $0x158] sm:$0xff] }
 0xe4d   :  { %8721 = vmatprep.subr.bf16.mxu1 %v8720_v43 }
 0xe4f   :  { %v9527_v35 = vpop.eup %9526 }
 0xe50   :  { %v3415_v21 = vmul.f32 0.6931472, %v9527_v35  ;;  %v3719_v35 = vld [vmem:[%s12285_s8 + $0x28] sm:$0xff] }
 0xe51   :  { %v8698_v38 = vpack.c.bf16 %v3719_v35, %v3718_v34  ;;  %v3728_v34 = vld [vmem:[%s12285_s8 + $0x70] sm:$0xff]  ;;  %v3729_v35 = vld [vmem:[%s12285_s8 + $0x78] sm:$0xff] }
 0xe52   :  { %v9529_v56 = vpop.eup %9528  ;;  %v3421_v58 = vsel %vm3420_vm2, %v3418_v14, %v3415_v21  ;;  %v3749_v21 = vld [vmem:[%s12285_s8 + $0x118] sm:$0xff] }
 0xe53   :  { %v3424_v28 = vmul.f32 0.6931472, %v9529_v56  ;;  %v3431_v37 = vadd.f32 %v3421_v58, %v3403_v53  ;;  %v8724_v14 = vpack.c.bf16 %v3749_v21, %v3748_v36  ;;  %v3736_v53 = vld [vmem:[%s12285_s8 + $0xb0] sm:$0xff]  ;;  %v3737_v56 = vld [vmem:[%s12285_s8 + $0xb8] sm:$0xff]  ;;  %v3758_v36 = vld [vmem:[%s12285_s8 + $0x160] sm:$0xff] }
 0xe54   :  { %v8700_v58 = vpack.c.bf16 %v3737_v56, %v3736_v53  ;;  %v3759_v21 = vld [vmem:[%s12285_s8 + $0x168] sm:$0xff]  ;;  %v3760_v53 = vld [vmem:[%s12285_s8 + $0x170] sm:$0xff]  ;;  %v3761_v56 = vld [vmem:[%s12285_s8 + $0x178] sm:$0xff] }
 0xe55   :  { %v3430_v63 = vsel %vm3429_vm4, %v3427_v59, %v3424_v28  ;;  %9530 = vtanh.f32 %v3431_v37  ;;  %v3720_v28 = vld [vmem:[%s12285_s8 + $0x30] sm:$0xff]  ;;  %v3721_v59 = vld [vmem:[%s12285_s8 + $0x38] sm:$0xff]  ;;  %v3750_v37 = vld [vmem:[%s12285_s8 + $0x120] sm:$0xff] }
 0xe56   :  { %v3432_v1 = vadd.f32 %v3430_v63, %v3404_v61  ;;  %v8702_v61 = vpack.c.bf16 %v3721_v59, %v3720_v28  ;;  %v3751_v63 = vld [vmem:[%s12285_s8 + $0x128] sm:$0xff] }
 0xe58   :  { %9532 = vtanh.f32 %v3432_v1  ;;  %v8728_v1 = vpack.c.bf16 %v3751_v63, %v3750_v37  ;;  %v6481_v37 = vld [vmem:[#allocation24] ss:$0 sm:$0xff] }
 0xe5f   :  { %v9531_v2 = vpop.eup %9530 }
 0xe60   :  { %v3435_v54 = vmul.f32 %v9531_v2, %v3395_v11  ;;  %v8688_v11 = vpack.c.bf16 %v3731_v46, %v3730_v45  ;;  %v3738_v2 = vld [vmem:[%s12285_s8 + $0xc0] sm:$0xff]  ;;  %v3724_v45 = vld [vmem:[%s12285_s8 + $0x50] sm:$0xff]  ;;  %v3725_v46 = vld [vmem:[%s12285_s8 + $0x58] sm:$0xff] }
 0xe62   :  { %v9533_v5 = vpop.eup %9532  ;;  %v11608_v29 = vadd.f32 %v3435_v54, %v11487_v22  ;;  %8689 = vmatprep.subr.bf16.mxu0 %v8688_v11  ;;  %v3739_v54 = vld [vmem:[%s12285_s8 + $0xc8] sm:$0xff]  ;;  %v3754_v11 = vld [vmem:[%s12285_s8 + $0x140] sm:$0xff] }
 0xe63   :  { %v3436_v23 = vmul.f32 %v9533_v5, %v3400_v25  ;;  %v8690_v25 = vpack.c.bf16 %v3715_v50, %v3714_v57  ;;  %v8704_v5 = vpack.c.bf16 %v3739_v54, %v3738_v2  ;;  %v8710_v57 = vpack.c.bf16 %v3725_v46, %v3724_v45  ;;  %v3755_v50 = vld [vmem:[%s12285_s8 + $0x148] sm:$0xff] }
 0xe64   :  { %3576 = vmatprep.mubr.f32.mxu0 %v11608_v29  ;;  %v3441_v6 = vrot.slane %v11608_v29, 7  ;;  %v3449_v41 = vrot.slane %v11608_v29, 1  ;;  %v8736_v30 = vpack.c.bf16 %v3755_v50, %v3754_v11 }
 0xe65   :  { %v11613_v15 = vadd.f32 %v3436_v23, %v11485_v51  ;;  %v3722_v23 = vld [vmem:[%s12285_s8 + $0x40] sm:$0xff] }
 0xe66   :  { %v3446_v17 = vsel %vm563_vm1, 0.0, %v3441_v6 }
 0xe67   :  { %v11617_v40 = vmul.f32 %v3446_v17, %v11353_v24  ;;  %v3450_v22 = vrot.slane %v11613_v15, 1  ;;  %v3442_v19 = vrot.slane %v11613_v15, 7  ;;  %v3752_v17 = vld [vmem:[%s12285_s8 + $0x130] sm:$0xff] }
 0xe69   :  { %3577 = vmatmul.mubr.f32.vlgmr.msra.gmra.mrb[46].mxu0 %v11617_v40  ;;  %v3451_v51 = vsel %vm604_vm0, %v3449_v41, %v3450_v22  ;;  %v3443_v7 = vsel %vm563_vm1, %v3441_v6, %v3442_v19  ;;  %v3454_v39 = vsel %vm604_vm0, %v3450_v22, 0.0  ;;  %v3723_v6 = vld [vmem:[%s12285_s8 + $0x48] sm:$0xff]  ;;  %v3753_v22 = vld [vmem:[%s12285_s8 + $0x138] sm:$0xff] }
 0xe6a   :  { %3581 = vmatprep.mubr.f32.mxu0 %v11613_v15  ;;  %v11628_v8 = vmul.f32 %v3451_v51, %v11348_v60  ;;  %v11631_v20 = vmul.f32 %v3443_v7, %v11358_v42  ;;  %v11634_v10 = vmul.f32 %v3454_v39, %v11361_v52  ;;  %8691 = vmatpush3.bf16.msra.mxu0 %v8690_v25  ;;  %v3740_v51 = vld [vmem:[%s12285_s8 + $0xd0] sm:$0xff]  ;;  %v3741_v7 = vld [vmem:[%s12285_s8 + $0xd8] sm:$0xff]  ;;  %v3742_v25 = vld [vmem:[%s12285_s8 + $0xe0] sm:$0xff] }
 0xe6b   :  { %8693 = vmatprep.subr.bf16.mxu0 %v8692_v47  ;;  %v8706_v41 = vpack.c.bf16 %v3723_v6, %v3722_v23  ;;  %v8732_v19 = vpack.c.bf16 %v3753_v22, %v3752_v17  ;;  %v8708_v39 = vpack.c.bf16 %v3741_v7, %v3740_v51  ;;  %v8712_v47 = vpack.c.bf16 %v3743_v26, %v3742_v25 }
 0xe6c   :  { %7795 = vmatprep.mubr.f32.mxu1 %v11628_v8 }
 0xe6d   :  { %3582 = vmatmul.mubr.f32.gmra.mrb[48].mxu0 %v11631_v20  ;;  %7796 = vmatmul.mubr.f32.vlgmr.msra.gmra.mrb[38].mxu1 %v11634_v10 }
 0xe6e   :  { %8695 = vmatpush3.bf16.msra.mxu0 %v8694_v4  ;;  %8723 = vmatpush3.bf16.msra.mxu1 %v8720_v43  ;;  %v8714_v4 = vpack.c.bf16 %v3727_v18, %v3726_v16  ;;  %v8740_v43 = vpack.c.bf16 %v3757_v31, %v3756_v27 }
 0xe6f   :  { %8697 = vmatprep.subr.bf16.mxu0 %v8696_v33  ;;  %8725 = vmatprep.subr.bf16.mxu1 %v8724_v14  ;;  %v8716_v33 = vpack.c.bf16 %v3745_v13, %v3744_v32 }
 0xe72   :  { %8699 = vmatpush3.bf16.msra.mxu0 %v8698_v38  ;;  %8727 = vmatpush3.bf16.msra.mxu1 %v8724_v14  ;;  %v8718_v38 = vpack.c.bf16 %v3729_v35, %v3728_v34  ;;  %v8744_v14 = vpack.c.bf16 %v3759_v21, %v3758_v36 }
 0xe73   :  { %8701 = vmatprep.subr.bf16.mxu0 %v8700_v58  ;;  %8729 = vmatprep.subr.bf16.mxu1 %v8728_v1  ;;  %v8748_v58 = vpack.c.bf16 %v3761_v56, %v3760_v53 }
 0xe76   :  { %8703 = vmatpush3.bf16.msra.mxu0 %v8702_v61  ;;  %8731 = vmatpush3.bf16.msra.mxu1 %v8728_v1 }
 0xe77   :  { %8705 = vmatprep.subr.bf16.mxu0 %v8704_v5  ;;  %8733 = vmatprep.subr.bf16.mxu1 %v8732_v19 }
 0xe7a   :  { %8707 = vmatpush3.bf16.msra.mxu0 %v8706_v41  ;;  %8735 = vmatpush3.bf16.msra.mxu1 %v8732_v19 }
 0xe7b   :  { %8709 = vmatprep.subr.bf16.mxu0 %v8708_v39  ;;  %8737 = vmatprep.subr.bf16.mxu1 %v8736_v30 }
 0xe7e   :  { %8711 = vmatpush3.bf16.msra.mxu0 %v8710_v57  ;;  %8739 = vmatpush3.bf16.msra.mxu1 %v8736_v30 }
 0xe7f   :  { %8713 = vmatprep.subr.bf16.mxu0 %v8712_v47  ;;  %8741 = vmatprep.subr.bf16.mxu1 %v8740_v43 }
 0xe82   :  { %8715 = vmatpush3.bf16.msra.mxu0 %v8714_v4  ;;  %8743 = vmatpush3.bf16.msra.mxu1 %v8740_v43 }
 0xe83   :  { %8717 = vmatprep.subr.bf16.mxu0 %v8716_v33  ;;  %8745 = vmatprep.subr.bf16.mxu1 %v8744_v14 }
 0xe86   :  { %8719 = vmatpush3.bf16.msra.mxu0 %v8718_v38  ;;  %8747 = vmatpush3.bf16.msra.mxu1 %v8744_v14 }
 0xe87   :  { %8749 = vmatprep.subr.bf16.mxu1 %v8748_v58 }
 0xe8a   :  { %8751 = vmatpush3.bf16.msra.mxu1 %v8748_v58 }
 0xf3c   :  { %v6985_v28 = vpop.f32.mrb[46].mxu0 }
 0xf3d   :  { %v6986_v59 = vpop.f32.mrb[47].mxu0 }
 0xf3e   :  { %v6987_v61 = vadd.f32 %v6986_v59, %v6985_v28 }
 0xf40   :  { %v6988_v63 = vpop.f32.mrb[48].mxu0  ;;  %v7797_v1 = vpop.f32.mrb[38].mxu1  ;;  %v3579_v2 = vadd.f32 %v6987_v61, %v6481_v37 }
 0xf41   :  { %v6989_v54 = vpop.f32.mrb[49].mxu0  ;;  %v3653_v5 = vpop.f32.mrb[39].mxu1 }
 0xf42   :  { %v6990_v23 = vadd.f32 %v6989_v54, %v6988_v63  ;;  %v3654_v6 = vadd.f32 %v3653_v5, %v3579_v2 }
 0xf44   :  { %v3584_v17 = vadd.f32 %v6990_v23, %v6481_v37  ;;  %v3664_v41 = vand.u32 2147483647, %v3654_v6  ;;  %v3662_v43 = vmax.f32 %v3654_v6, 0.0 }
 0xf46   :  { %v3659_v22 = vadd.f32 %v7797_v1, %v3584_v17  ;;  %v3666_v19 = vsub.f32 0.0, %v3664_v41  ;;  %v3989_v41 = vld [vmem:[#allocation27 + $0x80] sm:$0xff] }
 0xf48   :  { %v3665_v51 = vand.u32 2147483647, %v3659_v22  ;;  %v3668_v7 = vmul.f32 1.442695, %v3666_v19  ;;  %v3663_v36 = vmax.f32 %v3659_v22, 0.0 }
 0xf4a   :  { %v3667_v39 = vsub.f32 0.0, %v3665_v51  ;;  %9534 = vpow2.f32 %v3668_v7  ;;  %v3973_v51 = vld [vmem:[#allocation27] sm:$0xff]  ;;  %v3974_v7 = vld [vmem:[#allocation27 + $0x8] sm:$0xff] }
 0xf4c   :  { %v3670_v45 = vmul.f32 1.442695, %v3667_v39  ;;  %v8754_v39 = vpack.c.bf16 %v3974_v7, %v3973_v51  ;;  %v3984_v51 = vld [vmem:[#allocation27 + $0x58] sm:$0xff] }
 0xf4e   :  { %9536 = vpow2.f32 %v3670_v45  ;;  %v3991_v45 = vld [vmem:[#allocation27 + $0x90] sm:$0xff] }
 0xf54   :  { %v9535_v46 = vpop.eup %9534 }
 0xf55   :  { %v3672_v11 = vadd.f32 1.0, %v9535_v46  ;;  %v3675_v25 = vmul.f32 -0.5, %v9535_v46  ;;  %v3678_v47 = vand.u32 2147483647, %v9535_v46 }
 0xf57   :  { %9538 = vlog2.f32 %v3672_v11  ;;  %v3676_v30 = vadd.f32 1.0, %v3675_v25  ;;  %vm3679_vm5 = vcmp.lt.f32.partialorder %v3678_v47, 0.0004427343  ;;  %v4005_v11 = vld [vmem:[#allocation27 + $0x100] sm:$0xff]  ;;  %v3975_v25 = vld [vmem:[#allocation27 + $0x10] sm:$0xff] }
 0xf58   :  { %v9537_v57 = vpop.eup %9536 }
 0xf59   :  { %v3681_v50 = vadd.f32 1.0, %v9537_v57  ;;  %v3684_v26 = vmul.f32 -0.5, %v9537_v57  ;;  %v3677_v4 = vmul.f32 %v9535_v46, %v3676_v30  ;;  %v3687_v31 = vand.u32 2147483647, %v9537_v57  ;;  %v3992_v46 = vld [vmem:[#allocation27 + $0x98] sm:$0xff] }
 0xf5b   :  { %9540 = vlog2.f32 %v3681_v50  ;;  %v3685_v18 = vadd.f32 1.0, %v3684_v26  ;;  %vm3688_vm6 = vcmp.lt.f32.partialorder %v3687_v31, 0.0004427343  ;;  %v4006_v50 = vld [vmem:[#allocation27 + $0x108] sm:$0xff]  ;;  %v3976_v26 = vld [vmem:[#allocation27 + $0x18] sm:$0xff] }
 0xf5c   :  { %v8784_v30 = vpack.c.bf16 %v4006_v50, %v4005_v11  ;;  %v8758_v47 = vpack.c.bf16 %v3976_v26, %v3975_v25  ;;  %v4008_v31 = vld [vmem:[#allocation27 + $0x118] sm:$0xff]  ;;  %v4015_v11 = vld [vmem:[#allocation27 + $0x150] sm:$0xff]  ;;  %v3985_v25 = vld [vmem:[#allocation27 + $0x60] sm:$0xff] }
 0xf5d   :  { %v3686_v35 = vmul.f32 %v9537_v57, %v3685_v18  ;;  %v8756_v57 = vpack.c.bf16 %v3992_v46, %v3991_v45  ;;  %v3994_v18 = vld [vmem:[#allocation27 + $0xa8] sm:$0xff]  ;;  %v4001_v45 = vld [vmem:[#allocation27 + $0xe0] sm:$0xff]  ;;  %v4016_v50 = vld [vmem:[#allocation27 + $0x158] sm:$0xff] }
 0xf5e   :  { %8785 = vmatprep.subr.bf16.mxu1 %v8784_v30  ;;  %v4002_v46 = vld [vmem:[#allocation27 + $0xe8] sm:$0xff] }
 0xf5f   :  { %v3986_v26 = vld [vmem:[#allocation27 + $0x68] sm:$0xff] }
 0xf61   :  { %v9539_v16 = vpop.eup %9538 }
 0xf62   :  { %v3674_v27 = vmul.f32 0.6931472, %v9539_v16  ;;  %v3993_v16 = vld [vmem:[#allocation27 + $0xa0] sm:$0xff] }
 0xf64   :  { %v3680_v32 = vsel %vm3679_vm5, %v3677_v4, %v3674_v27  ;;  %v4007_v27 = vld [vmem:[#allocation27 + $0x110] sm:$0xff]  ;;  %v8760_v4 = vpack.c.bf16 %v3994_v18, %v3993_v16  ;;  %v4004_v18 = vld [vmem:[#allocation27 + $0xf8] sm:$0xff] }
 0xf65   :  { %v9541_v13 = vpop.eup %9540  ;;  %v3690_v33 = vadd.f32 %v3680_v32, %v3662_v43  ;;  %v3977_v43 = vld [vmem:[#allocation27 + $0x20] sm:$0xff]  ;;  %v3978_v32 = vld [vmem:[#allocation27 + $0x28] sm:$0xff]  ;;  %v4003_v16 = vld [vmem:[#allocation27 + $0xf0] sm:$0xff] }
 0xf66   :  { %v3683_v34 = vmul.f32 0.6931472, %v9541_v13  ;;  %v8788_v13 = vpack.c.bf16 %v4008_v31, %v4007_v27  ;;  %v4017_v27 = vld [vmem:[#allocation27 + $0x160] sm:$0xff]  ;;  %v4018_v31 = vld [vmem:[#allocation27 + $0x168] sm:$0xff] }
 0xf67   :  { %9542 = vtanh.f32 %v3690_v33  ;;  %v8762_v33 = vpack.c.bf16 %v3978_v32, %v3977_v43  ;;  %v3987_v43 = vld [vmem:[#allocation27 + $0x70] sm:$0xff]  ;;  %v3988_v32 = vld [vmem:[#allocation27 + $0x78] sm:$0xff] }
 0xf68   :  { %v3689_v38 = vsel %vm3688_vm6, %v3686_v35, %v3683_v34  ;;  %v3995_v34 = vld [vmem:[#allocation27 + $0xb0] sm:$0xff]  ;;  %v3996_v35 = vld [vmem:[#allocation27 + $0xb8] sm:$0xff] }
 0xf69   :  { %v3691_v21 = vadd.f32 %v3689_v38, %v3663_v36  ;;  %v4009_v36 = vld [vmem:[#allocation27 + $0x120] sm:$0xff]  ;;  %v8764_v38 = vpack.c.bf16 %v3996_v35, %v3995_v34  ;;  %v4019_v34 = vld [vmem:[#allocation27 + $0x170] sm:$0xff]  ;;  %v4020_v35 = vld [vmem:[#allocation27 + $0x178] sm:$0xff] }
 0xf6b   :  { %9544 = vtanh.f32 %v3691_v21  ;;  %v4010_v21 = vld [vmem:[#allocation27 + $0x128] sm:$0xff] }
 0xf71   :  { %v9543_v14 = vpop.eup %9542 }
 0xf72   :  { %v3694_v53 = vmul.f32 %v9543_v14, %v3654_v6  ;;  %v3979_v14 = vld [vmem:[#allocation27 + $0x30] sm:$0xff] }
 0xf74   :  { %v3698_v56 = vrot.slane %v3694_v53, 7  ;;  %3833 = vmatprep.mubr.f32.mxu0 %v3694_v53  ;;  %v3706_v61 = vrot.slane %v3694_v53, 1  ;;  %v3980_v53 = vld [vmem:[#allocation27 + $0x38] sm:$0xff] }
 0xf75   :  { %v9545_v58 = vpop.eup %9544 }
 0xf76   :  { %v3703_v28 = vsel %vm563_vm1, 0.0, %v3698_v56  ;;  %v3695_v59 = vmul.f32 %v9545_v58, %v3659_v22  ;;  %v3990_v22 = vld [vmem:[#allocation27 + $0x88] sm:$0xff]  ;;  %v8766_v58 = vpack.c.bf16 %v3980_v53, %v3979_v14  ;;  %v6482_v14 = vld [vmem:[#allocation25] ss:$0 sm:$0xff] }
 0xf77   :  { %v3704_v37 = vmul.f32 %v3703_v28, %v11353_v24  ;;  %v8752_v19 = vpack.c.bf16 %v3990_v22, %v3989_v41  ;;  %v3997_v28 = vld [vmem:[#allocation27 + $0xc0] sm:$0xff]  ;;  %v4014_v22 = vld [vmem:[#allocation27 + $0x148] sm:$0xff] }
 0xf78   :  { %v3699_v63 = vrot.slane %v3695_v59, 7  ;;  %v3707_v1 = vrot.slane %v3695_v59, 1 }
 0xf79   :  { %3834 = vmatmul.mubr.f32.vlgmr.msra.gmra.mrb[50].mxu0 %v3704_v37  ;;  %8753 = vmatprep.subr.bf16.mxu0 %v8752_v19  ;;  %v4011_v37 = vld [vmem:[#allocation27 + $0x130] sm:$0xff] }
 0xf7a   :  { %3838 = vmatprep.mubr.f32.mxu0 %v3695_v59  ;;  %v3700_v2 = vsel %vm563_vm1, %v3698_v56, %v3699_v63  ;;  %v3708_v54 = vsel %vm604_vm0, %v3706_v61, %v3707_v1  ;;  %v3711_v5 = vsel %vm604_vm0, %v3707_v1, 0.0  ;;  %8755 = vmatpush3.bf16.msra.mxu0 %v8754_v39  ;;  %v8792_v56 = vpack.c.bf16 %v4010_v21, %v4009_v36  ;;  %v3998_v59 = vld [vmem:[#allocation27 + $0xc8] sm:$0xff]  ;;  %v4012_v63 = vld [vmem:[#allocation27 + $0x138] sm:$0xff]  ;;  %v3981_v1 = vld [vmem:[#allocation27 + $0x40] sm:$0xff] }
 0xf7b   :  { %v3705_v23 = vmul.f32 %v3700_v2, %v11358_v42  ;;  %v3712_v6 = vmul.f32 %v3708_v54, %v11348_v60  ;;  %v3713_v17 = vmul.f32 %v3711_v5, %v11361_v52  ;;  %8757 = vmatprep.subr.bf16.mxu0 %v8756_v57  ;;  %v8768_v61 = vpack.c.bf16 %v3998_v59, %v3997_v28  ;;  %v3982_v2 = vld [vmem:[#allocation27 + $0x48] sm:$0xff]  ;;  %v3983_v19 = vld [vmem:[#allocation27 + $0x50] sm:$0xff] }
 0xf7c   :  { %v8796_v54 = vpack.c.bf16 %v4012_v63, %v4011_v37  ;;  %v8770_v5 = vpack.c.bf16 %v3982_v2, %v3981_v1  ;;  %v8774_v39 = vpack.c.bf16 %v3984_v51, %v3983_v19  ;;  %v8776_v57 = vpack.c.bf16 %v4002_v46, %v4001_v45 }
 0xf7d   :  { %3839 = vmatmul.mubr.f32.gmra.mrb[52].mxu0 %v3705_v23  ;;  %7830 = vmatprep.mubr.f32.mxu1 %v3712_v6  ;;  %v3999_v23 = vld [vmem:[#allocation27 + $0xd0] sm:$0xff]  ;;  %v4000_v6 = vld [vmem:[#allocation27 + $0xd8] sm:$0xff]  ;;  %v8812_v36 = vpack.c.bf16 %v4020_v35, %v4019_v34 }
 0xf7e   :  { %7831 = vmatmul.mubr.f32.vlgmr.msra.gmra.mrb[40].mxu1 %v3713_v17  ;;  %8759 = vmatpush3.bf16.msra.mxu0 %v8758_v47  ;;  %v4013_v17 = vld [vmem:[#allocation27 + $0x140] sm:$0xff]  ;;  %v8772_v41 = vpack.c.bf16 %v4000_v6, %v3999_v23  ;;  %v8778_v47 = vpack.c.bf16 %v3986_v26, %v3985_v25 }
 0xf7f   :  { %8787 = vmatpush3.bf16.msra.mxu1 %v8784_v30  ;;  %8761 = vmatprep.subr.bf16.mxu0 %v8760_v4  ;;  %v8800_v7 = vpack.c.bf16 %v4014_v22, %v4013_v17  ;;  %v8804_v30 = vpack.c.bf16 %v4016_v50, %v4015_v11  ;;  %v8780_v4 = vpack.c.bf16 %v4004_v18, %v4003_v16 }
 0xf80   :  { %8789 = vmatprep.subr.bf16.mxu1 %v8788_v13 }
 0xf82   :  { %8763 = vmatpush3.bf16.msra.mxu0 %v8762_v33  ;;  %v8782_v33 = vpack.c.bf16 %v3988_v32, %v3987_v43 }
 0xf83   :  { %8791 = vmatpush3.bf16.msra.mxu1 %v8788_v13  ;;  %8765 = vmatprep.subr.bf16.mxu0 %v8764_v38  ;;  %v8808_v13 = vpack.c.bf16 %v4018_v31, %v4017_v27 }
 0xf84   :  { %8793 = vmatprep.subr.bf16.mxu1 %v8792_v56 }
 0xf86   :  { %8767 = vmatpush3.bf16.msra.mxu0 %v8766_v58 }
 0xf87   :  { %8795 = vmatpush3.bf16.msra.mxu1 %v8792_v56  ;;  %8769 = vmatprep.subr.bf16.mxu0 %v8768_v61 }
 0xf88   :  { %8797 = vmatprep.subr.bf16.mxu1 %v8796_v54 }
 0xf8a   :  { %8771 = vmatpush3.bf16.msra.mxu0 %v8770_v5 }
 0xf8b   :  { %8799 = vmatpush3.bf16.msra.mxu1 %v8796_v54  ;;  %8773 = vmatprep.subr.bf16.mxu0 %v8772_v41 }
 0xf8c   :  { %8801 = vmatprep.subr.bf16.mxu1 %v8800_v7 }
 0xf8e   :  { %8775 = vmatpush3.bf16.msra.mxu0 %v8774_v39 }
 0xf8f   :  { %8803 = vmatpush3.bf16.msra.mxu1 %v8800_v7  ;;  %8777 = vmatprep.subr.bf16.mxu0 %v8776_v57 }
 0xf90   :  { %8805 = vmatprep.subr.bf16.mxu1 %v8804_v30 }
 0xf92   :  { %8779 = vmatpush3.bf16.msra.mxu0 %v8778_v47 }
 0xf93   :  { %8807 = vmatpush3.bf16.msra.mxu1 %v8804_v30  ;;  %8781 = vmatprep.subr.bf16.mxu0 %v8780_v4 }
 0xf94   :  { %8809 = vmatprep.subr.bf16.mxu1 %v8808_v13 }
 0xf96   :  { %8783 = vmatpush3.bf16.msra.mxu0 %v8782_v33 }
 0xf97   :  { %8811 = vmatpush3.bf16.msra.mxu1 %v8808_v13 }
 0xf98   :  { %8813 = vmatprep.subr.bf16.mxu1 %v8812_v36 }
 0xf9b   :  { %8815 = vmatpush3.bf16.msra.mxu1 %v8812_v36 }
0x104c   :  { %v7041_v38 = vpop.f32.mrb[50].mxu0 }
0x104d   :  { %v7042_v21 = vpop.f32.mrb[51].mxu0 }
0x104e   :  { %v7043_v53 = vadd.f32 %v7042_v21, %v7041_v38 }
0x1050   :  { %v7044_v56 = vpop.f32.mrb[52].mxu0  ;;  %v3836_v58 = vadd.f32 %v7043_v53, %v6482_v14 }
0x1051   :  { %v7045_v28 = vpop.f32.mrb[53].mxu0  ;;  %v7832_v59 = vpop.f32.mrb[40].mxu1 }
0x1052   :  { %v7046_v37 = vadd.f32 %v7045_v28, %v7044_v56  ;;  %v3910_v61 = vpop.f32.mrb[41].mxu1 }
0x1053   :  { %v3911_v63 = vadd.f32 %v3910_v61, %v3836_v58 }
0x1054   :  { %v3841_v1 = vadd.f32 %v7046_v37, %v6482_v14 }
0x1055   :  { %v3921_v2 = vand.u32 2147483647, %v3911_v63  ;;  %v3919_v47 = vmax.f32 %v3911_v63, 0.0 }
0x1056   :  { %v3916_v54 = vadd.f32 %v7832_v59, %v3841_v1 }
0x1057   :  { %v3923_v5 = vsub.f32 0.0, %v3921_v2 }
0x1058   :  { %v3922_v23 = vand.u32 2147483647, %v3916_v54  ;;  %v3920_v43 = vmax.f32 %v3916_v54, 0.0 }
0x1059   :  { %v3925_v6 = vmul.f32 1.442695, %v3923_v5  ;;  %v4246_v5 = vld [vmem:[#allocation28 + $0x80] sm:$0xff] }
0x105a   :  { %v3924_v17 = vsub.f32 0.0, %v3922_v23  ;;  %v4247_v23 = vld [vmem:[#allocation28 + $0x88] sm:$0xff] }
0x105b   :  { %9546 = vpow2.f32 %v3925_v6  ;;  %v8816_v6 = vpack.c.bf16 %v4247_v23, %v4246_v5  ;;  %v4257_v5 = vld [vmem:[#allocation28 + $0xd8] sm:$0xff] }
0x105c   :  { %v3927_v41 = vmul.f32 1.442695, %v3924_v17  ;;  %v4230_v17 = vld [vmem:[#allocation28] sm:$0xff] }
0x105d   :  { %8817 = vmatprep.subr.bf16.mxu0 %v8816_v6  ;;  %v4240_v6 = vld [vmem:[#allocation28 + $0x50] sm:$0xff] }
0x105e   :  { %9548 = vpow2.f32 %v3927_v41  ;;  %v4231_v41 = vld [vmem:[#allocation28 + $0x8] sm:$0xff] }
0x1065   :  { %v9547_v22 = vpop.eup %9546 }
0x1066   :  { %v3929_v19 = vadd.f32 1.0, %v9547_v22  ;;  %v3932_v39 = vmul.f32 -0.5, %v9547_v22  ;;  %v3935_v11 = vand.u32 2147483647, %v9547_v22 }
0x1068   :  { %v9549_v51 = vpop.eup %9548  ;;  %9550 = vlog2.f32 %v3929_v19  ;;  %v3933_v46 = vadd.f32 1.0, %v3932_v39  ;;  %vm3936_vm7 = vcmp.lt.f32.partialorder %v3935_v11, 0.0004427343  ;;  %v4248_v19 = vld [vmem:[#allocation28 + $0x90] sm:$0xff] }
0x1069   :  { %v3938_v7 = vadd.f32 1.0, %v9549_v51  ;;  %v3941_v45 = vmul.f32 -0.5, %v9549_v51  ;;  %v3944_v25 = vand.u32 2147483647, %v9549_v51  ;;  %v4232_v39 = vld [vmem:[#allocation28 + $0x10] sm:$0xff] }
0x106a   :  { %v3934_v30 = vmul.f32 %v9547_v22, %v3933_v46  ;;  %v8818_v22 = vpack.c.bf16 %v4231_v41, %v4230_v17  ;;  %v4262_v46 = vld [vmem:[#allocation28 + $0x100] sm:$0xff]  ;;  %v4241_v17 = vld [vmem:[#allocation28 + $0x58] sm:$0xff] }
0x106b   :  { %9552 = vlog2.f32 %v3938_v7  ;;  %v3942_v50 = vadd.f32 1.0, %v3941_v45  ;;  %vm3945_vm8 = vcmp.lt.f32.partialorder %v3944_v25, 0.0004427343  ;;  %v4233_v45 = vld [vmem:[#allocation28 + $0x18] sm:$0xff]  ;;  %v4250_v25 = vld [vmem:[#allocation28 + $0xa0] sm:$0xff] }
0x106c   :  { %v8822_v11 = vpack.c.bf16 %v4233_v45, %v4232_v39  ;;  %v4270_v41 = vld [vmem:[#allocation28 + $0x140] sm:$0xff] }
0x106d   :  { %v3943_v4 = vmul.f32 %v9549_v51, %v3942_v50  ;;  %v4249_v51 = vld [vmem:[#allocation28 + $0x98] sm:$0xff] }
0x106e   :  { %v8820_v7 = vpack.c.bf16 %v4249_v51, %v4248_v19  ;;  %v4271_v19 = vld [vmem:[#allocation28 + $0x148] sm:$0xff]  ;;  %v4258_v51 = vld [vmem:[#allocation28 + $0xe0] sm:$0xff] }
0x106f   :  { %v8864_v39 = vpack.c.bf16 %v4271_v19, %v4270_v41 }
0x1072   :  { %v9551_v57 = vpop.eup %9550 }
0x1073   :  { %v3931_v26 = vmul.f32 0.6931472, %v9551_v57  ;;  %v4263_v57 = vld [vmem:[#allocation28 + $0x108] sm:$0xff] }
0x1074   :  { %v8848_v50 = vpack.c.bf16 %v4263_v57, %v4262_v46  ;;  %v4242_v46 = vld [vmem:[#allocation28 + $0x60] sm:$0xff]  ;;  %v4272_v57 = vld [vmem:[#allocation28 + $0x150] sm:$0xff] }
0x1075   :  { %v9553_v16 = vpop.eup %9552  ;;  %v3937_v18 = vsel %vm3936_vm7, %v3934_v30, %v3931_v26  ;;  %v4251_v26 = vld [vmem:[#allocation28 + $0xa8] sm:$0xff] }
0x1076   :  { %v3940_v27 = vmul.f32 0.6931472, %v9553_v16  ;;  %v3947_v31 = vadd.f32 %v3937_v18, %v3919_v47  ;;  %8849 = vmatprep.subr.bf16.mxu1 %v8848_v50  ;;  %v8824_v30 = vpack.c.bf16 %v4251_v26, %v4250_v25  ;;  %v4234_v47 = vld [vmem:[#allocation28 + $0x20] sm:$0xff]  ;;  %v4235_v16 = vld [vmem:[#allocation28 + $0x28] sm:$0xff]  ;;  %v4264_v18 = vld [vmem:[#allocation28 + $0x110] sm:$0xff] }
0x1077   :  { %v4273_v25 = vld [vmem:[#allocation28 + $0x158] sm:$0xff] }
0x1078   :  { %v3946_v32 = vsel %vm3945_vm8, %v3943_v4, %v3940_v27  ;;  %9554 = vtanh.f32 %v3947_v31  ;;  %v8826_v27 = vpack.c.bf16 %v4235_v16, %v4234_v47  ;;  %v4265_v4 = vld [vmem:[#allocation28 + $0x118] sm:$0xff]  ;;  %v8868_v26 = vpack.c.bf16 %v4273_v25, %v4272_v57 }
0x1079   :  { %v3948_v13 = vadd.f32 %v3946_v32, %v3920_v43  ;;  %v8852_v31 = vpack.c.bf16 %v4265_v4, %v4264_v18  ;;  %v4252_v43 = vld [vmem:[#allocation28 + $0xb0] sm:$0xff]  ;;  %v4253_v32 = vld [vmem:[#allocation28 + $0xb8] sm:$0xff]  ;;  %v4274_v4 = vld [vmem:[#allocation28 + $0x160] sm:$0xff] }
0x107a   :  { %v4261_v47 = vld [vmem:[#allocation28 + $0xf8] sm:$0xff]  ;;  %v4244_v18 = vld [vmem:[#allocation28 + $0x70] sm:$0xff] }
0x107b   :  { %9556 = vtanh.f32 %v3948_v13  ;;  %v8828_v13 = vpack.c.bf16 %v4253_v32, %v4252_v43  ;;  %v4275_v43 = vld [vmem:[#allocation28 + $0x168] sm:$0xff] }
0x107c   :  { %v8872_v32 = vpack.c.bf16 %v4275_v43, %v4274_v4 }
0x1082   :  { %v9555_v33 = vpop.eup %9554 }
0x1083   :  { %v3951_v34 = vmul.f32 %v9555_v33, %v3911_v63  ;;  %v4236_v33 = vld [vmem:[#allocation28 + $0x30] sm:$0xff] }
0x1085   :  { %v9557_v35 = vpop.eup %9556  ;;  %v11696_v36 = vadd.f32 %v3951_v34, %v11608_v29  ;;  %v4237_v34 = vld [vmem:[#allocation28 + $0x38] sm:$0xff] }
0x1086   :  { %v3952_v38 = vmul.f32 %v9557_v35, %v3916_v54  ;;  %v4266_v35 = vld [vmem:[#allocation28 + $0x120] sm:$0xff] }
0x1087   :  { %4092 = vmatprep.mubr.f32.mxu0 %v11696_v36  ;;  %v3957_v21 = vrot.slane %v11696_v36, 7  ;;  %v3965_v58 = vrot.slane %v11696_v36, 1 }
0x1088   :  { %v11701_v14 = vadd.f32 %v3952_v38, %v11613_v15  ;;  %v8830_v38 = vpack.c.bf16 %v4237_v34, %v4236_v33  ;;  %v4277_v33 = vld [vmem:[#allocation28 + $0x178] sm:$0xff] }
0x1089   :  { %v3962_v53 = vsel %vm563_vm1, 0.0, %v3957_v21 }
0x108a   :  { %v3963_v56 = vmul.f32 %v3962_v53, %v11353_v24  ;;  %v3966_v28 = vrot.slane %v11701_v14, 1  ;;  %v3958_v59 = vrot.slane %v11701_v14, 7 }
0x108c   :  { %4093 = vmatmul.mubr.f32.vlgmr.msra.gmra.mrb[54].mxu0 %v3963_v56  ;;  %v3967_v37 = vsel %vm604_vm0, %v3965_v58, %v3966_v28  ;;  %v3959_v61 = vsel %vm563_vm1, %v3957_v21, %v3958_v59  ;;  %v3970_v63 = vsel %vm604_vm0, %v3966_v28, 0.0  ;;  %v4267_v21 = vld [vmem:[#allocation28 + $0x128] sm:$0xff]  ;;  %v4254_v56 = vld [vmem:[#allocation28 + $0xc0] sm:$0xff] }
0x108d   :  { %4097 = vmatprep.mubr.f32.mxu0 %v11701_v14  ;;  %v3971_v1 = vmul.f32 %v3967_v37, %v11348_v60  ;;  %v3964_v2 = vmul.f32 %v3959_v61, %v11358_v42  ;;  %v3972_v54 = vmul.f32 %v3970_v63, %v11361_v52  ;;  %8819 = vmatpush3.bf16.msra.mxu0 %v8818_v22  ;;  %v4255_v58 = vld [vmem:[#allocation28 + $0xc8] sm:$0xff]  ;;  %v4238_v59 = vld [vmem:[#allocation28 + $0x40] sm:$0xff]  ;;  %v4268_v61 = vld [vmem:[#allocation28 + $0x130] sm:$0xff] }
0x108e   :  { %8821 = vmatprep.subr.bf16.mxu0 %v8820_v7  ;;  %v8856_v53 = vpack.c.bf16 %v4267_v21, %v4266_v35  ;;  %v8832_v28 = vpack.c.bf16 %v4255_v58, %v4254_v56  ;;  %v4239_v37 = vld [vmem:[#allocation28 + $0x48] sm:$0xff]  ;;  %v8838_v22 = vpack.c.bf16 %v4241_v17, %v4240_v6  ;;  %v6483_v21 = vld [vmem:[#allocation30] ss:$0 sm:$0xff] }
0x108f   :  { %7865 = vmatprep.mubr.f32.mxu1 %v3971_v1  ;;  %v8834_v63 = vpack.c.bf16 %v4239_v37, %v4238_v59  ;;  %v4269_v1 = vld [vmem:[#allocation28 + $0x138] sm:$0xff]  ;;  %v4259_v7 = vld [vmem:[#allocation28 + $0xe8] sm:$0xff] }
0x1090   :  { %4098 = vmatmul.mubr.f32.gmra.mrb[56].mxu0 %v3964_v2  ;;  %7866 = vmatmul.mubr.f32.vlgmr.msra.gmra.mrb[42].mxu1 %v3972_v54  ;;  %v8860_v2 = vpack.c.bf16 %v4269_v1, %v4268_v61  ;;  %v4256_v54 = vld [vmem:[#allocation28 + $0xd0] sm:$0xff]  ;;  %v8840_v45 = vpack.c.bf16 %v4259_v7, %v4258_v51 }
0x1091   :  { %8823 = vmatpush3.bf16.msra.mxu0 %v8822_v11  ;;  %8851 = vmatpush3.bf16.msra.mxu1 %v8848_v50  ;;  %v8836_v23 = vpack.c.bf16 %v4257_v5, %v4256_v54  ;;  %v4243_v11 = vld [vmem:[#allocation28 + $0x68] sm:$0xff] }
0x1092   :  { %8825 = vmatprep.subr.bf16.mxu0 %v8824_v30  ;;  %8853 = vmatprep.subr.bf16.mxu1 %v8852_v31  ;;  %v8842_v50 = vpack.c.bf16 %v4243_v11, %v4242_v46  ;;  %v4260_v30 = vld [vmem:[#allocation28 + $0xf0] sm:$0xff] }
0x1093   :  { %v8844_v16 = vpack.c.bf16 %v4261_v47, %v4260_v30 }
0x1095   :  { %8827 = vmatpush3.bf16.msra.mxu0 %v8826_v27  ;;  %8855 = vmatpush3.bf16.msra.mxu1 %v8852_v31  ;;  %v4245_v27 = vld [vmem:[#allocation28 + $0x78] sm:$0xff] }
0x1096   :  { %8829 = vmatprep.subr.bf16.mxu0 %v8828_v13  ;;  %8857 = vmatprep.subr.bf16.mxu1 %v8856_v53  ;;  %v8846_v31 = vpack.c.bf16 %v4245_v27, %v4244_v18  ;;  %v4276_v13 = vld [vmem:[#allocation28 + $0x170] sm:$0xff] }
0x1097   :  { %v8876_v34 = vpack.c.bf16 %v4277_v33, %v4276_v13 }
0x1099   :  { %8831 = vmatpush3.bf16.msra.mxu0 %v8830_v38  ;;  %8859 = vmatpush3.bf16.msra.mxu1 %v8856_v53 }
0x109a   :  { %8833 = vmatprep.subr.bf16.mxu0 %v8832_v28  ;;  %8861 = vmatprep.subr.bf16.mxu1 %v8860_v2 }
0x109d   :  { %8835 = vmatpush3.bf16.msra.mxu0 %v8834_v63  ;;  %8863 = vmatpush3.bf16.msra.mxu1 %v8860_v2 }
0x109e   :  { %8837 = vmatprep.subr.bf16.mxu0 %v8836_v23  ;;  %8865 = vmatprep.subr.bf16.mxu1 %v8864_v39 }
0x10a1   :  { %8839 = vmatpush3.bf16.msra.mxu0 %v8838_v22  ;;  %8867 = vmatpush3.bf16.msra.mxu1 %v8864_v39 }
0x10a2   :  { %8841 = vmatprep.subr.bf16.mxu0 %v8840_v45  ;;  %8869 = vmatprep.subr.bf16.mxu1 %v8868_v26 }
0x10a5   :  { %8843 = vmatpush3.bf16.msra.mxu0 %v8842_v50  ;;  %8871 = vmatpush3.bf16.msra.mxu1 %v8868_v26 }
0x10a6   :  { %8845 = vmatprep.subr.bf16.mxu0 %v8844_v16  ;;  %8873 = vmatprep.subr.bf16.mxu1 %v8872_v32 }
0x10a9   :  { %8847 = vmatpush3.bf16.msra.mxu0 %v8846_v31  ;;  %8875 = vmatpush3.bf16.msra.mxu1 %v8872_v32 }
0x10aa   :  { %8877 = vmatprep.subr.bf16.mxu1 %v8876_v34 }
0x10ad   :  { %8879 = vmatpush3.bf16.msra.mxu1 %v8876_v34 }
0x115f   :  { %v7097_v35 = vpop.f32.mrb[54].mxu0 }
0x1160   :  { %v7098_v38 = vpop.f32.mrb[55].mxu0 }
0x1161   :  { %v7099_v53 = vadd.f32 %v7098_v38, %v7097_v35 }
0x1163   :  { %v7100_v56 = vpop.f32.mrb[56].mxu0  ;;  %v7867_v58 = vpop.f32.mrb[42].mxu1  ;;  %v4095_v28 = vadd.f32 %v7099_v53, %v6483_v21 }
0x1164   :  { %v7101_v59 = vpop.f32.mrb[57].mxu0  ;;  %v4169_v37 = vpop.f32.mrb[43].mxu1 }
0x1165   :  { %v7102_v61 = vadd.f32 %v7101_v59, %v7100_v56  ;;  %v4170_v63 = vadd.f32 %v4169_v37, %v4095_v28 }
0x1167   :  { %v4100_v1 = vadd.f32 %v7102_v61, %v6483_v21  ;;  %v4180_v2 = vand.u32 2147483647, %v4170_v63  ;;  %v4178_v47 = vmax.f32 %v4170_v63, 0.0 }
0x1169   :  { %v4175_v54 = vadd.f32 %v7867_v58, %v4100_v1  ;;  %v4182_v5 = vsub.f32 0.0, %v4180_v2 }
0x116b   :  { %v4181_v23 = vand.u32 2147483647, %v4175_v54  ;;  %v4184_v6 = vmul.f32 1.442695, %v4182_v5  ;;  %v4179_v43 = vmax.f32 %v4175_v54, 0.0  ;;  %v4537_v5 = vld [vmem:[%s12286_s1 + $0x180] sm:$0xff] }
0x116d   :  { %v4183_v17 = vsub.f32 0.0, %v4181_v23  ;;  %9558 = vpow2.f32 %v4184_v6  ;;  %v4538_v23 = vld [vmem:[%s12286_s1 + $0x188] sm:$0xff] }
0x116e   :  { %v8912_v6 = vpack.c.bf16 %v4538_v23, %v4537_v5  ;;  %v4545_v5 = vld [vmem:[%s12286_s1 + $0x1c0] sm:$0xff] }
0x116f   :  { %v4186_v41 = vmul.f32 1.442695, %v4183_v17  ;;  %v4521_v17 = vld [vmem:[%s12286_s1 + $0x100] sm:$0xff] }
0x1170   :  { %8913 = vmatprep.subr.bf16.mxu1 %v8912_v6  ;;  %v4546_v6 = vld [vmem:[%s12286_s1 + $0x1c8] sm:$0xff] }
0x1171   :  { %9560 = vpow2.f32 %v4186_v41  ;;  %v4522_v41 = vld [vmem:[%s12286_s1 + $0x108] sm:$0xff] }
0x1177   :  { %v9559_v22 = vpop.eup %9558 }
0x1178   :  { %v4188_v19 = vadd.f32 1.0, %v9559_v22  ;;  %v4191_v39 = vmul.f32 -0.5, %v9559_v22  ;;  %v4194_v11 = vand.u32 2147483647, %v9559_v22 }
0x117a   :  { %9562 = vlog2.f32 %v4188_v19  ;;  %v4192_v46 = vadd.f32 1.0, %v4191_v39  ;;  %vm4195_vm10 = vcmp.lt.f32.partialorder %v4194_v11, 0.0004427343  ;;  %v4505_v19 = vld [vmem:[%s12286_s1 + $0x80] sm:$0xff]  ;;  %v4540_v39 = vld [vmem:[%s12286_s1 + $0x198] sm:$0xff] }
0x117b   :  { %v9561_v51 = vpop.eup %9560 }
0x117c   :  { %v4197_v7 = vadd.f32 1.0, %v9561_v51  ;;  %v4200_v45 = vmul.f32 -0.5, %v9561_v51  ;;  %v4193_v26 = vmul.f32 %v9559_v22, %v4192_v46  ;;  %v4203_v30 = vand.u32 2147483647, %v9561_v51  ;;  %v4490_v46 = vld [vmem:[%s12286_s1 + $0x8] sm:$0xff] }
0x117d   :  { %v8914_v22 = vpack.c.bf16 %v4522_v41, %v4521_v17  ;;  %v4495_v17 = vld [vmem:[%s12286_s1 + $0x30] sm:$0xff]  ;;  %v4496_v41 = vld [vmem:[%s12286_s1 + $0x38] sm:$0xff] }
0x117e   :  { %9564 = vlog2.f32 %v4197_v7  ;;  %v4201_v50 = vadd.f32 1.0, %v4200_v45  ;;  %vm4204_vm11 = vcmp.lt.f32.partialorder %v4203_v30, 0.0004427343  ;;  %v4539_v7 = vld [vmem:[%s12286_s1 + $0x190] sm:$0xff]  ;;  %v4489_v45 = vld [vmem:[%s12286_s1] sm:$0xff] }
0x117f   :  { %v8916_v11 = vpack.c.bf16 %v4540_v39, %v4539_v7  ;;  %v4507_v30 = vld [vmem:[%s12286_s1 + $0x90] sm:$0xff]  ;;  %v4530_v7 = vld [vmem:[%s12286_s1 + $0x148] sm:$0xff]  ;;  %v4513_v39 = vld [vmem:[%s12286_s1 + $0xc0] sm:$0xff] }
0x1180   :  { %v4202_v31 = vmul.f32 %v9561_v51, %v4201_v50  ;;  %v4506_v51 = vld [vmem:[%s12286_s1 + $0x88] sm:$0xff]  ;;  %v4523_v50 = vld [vmem:[%s12286_s1 + $0x110] sm:$0xff] }
0x1184   :  { %v9563_v57 = vpop.eup %9562 }
0x1185   :  { %v4190_v25 = vmul.f32 0.6931472, %v9563_v57  ;;  %v8882_v57 = vpack.c.bf16 %v4490_v46, %v4489_v45  ;;  %v4514_v45 = vld [vmem:[%s12286_s1 + $0xc8] sm:$0xff]  ;;  %v4547_v46 = vld [vmem:[%s12286_s1 + $0x1d0] sm:$0xff] }
0x1187   :  { %v4196_v16 = vsel %vm4195_vm10, %v4193_v26, %v4190_v25  ;;  %v4524_v25 = vld [vmem:[%s12286_s1 + $0x118] sm:$0xff] }
0x1188   :  { %v9565_v18 = vpop.eup %9564  ;;  %v4206_v27 = vadd.f32 %v4196_v16, %v4178_v47  ;;  %v8918_v26 = vpack.c.bf16 %v4524_v25, %v4523_v50  ;;  %v4508_v47 = vld [vmem:[%s12286_s1 + $0x98] sm:$0xff]  ;;  %v4541_v16 = vld [vmem:[%s12286_s1 + $0x1a0] sm:$0xff]  ;;  %v4498_v25 = vld [vmem:[%s12286_s1 + $0x48] sm:$0xff] }
0x1189   :  { %v4199_v4 = vmul.f32 0.6931472, %v9565_v18  ;;  %v8884_v18 = vpack.c.bf16 %v4508_v47, %v4507_v30  ;;  %v4497_v50 = vld [vmem:[%s12286_s1 + $0x40] sm:$0xff]  ;;  %v4531_v47 = vld [vmem:[%s12286_s1 + $0x150] sm:$0xff] }
0x118a   :  { %9566 = vtanh.f32 %v4206_v27  ;;  %v4542_v27 = vld [vmem:[%s12286_s1 + $0x1a8] sm:$0xff]  ;;  %v8898_v30 = vpack.c.bf16 %v4498_v25, %v4497_v50 }
0x118b   :  { %v4205_v32 = vsel %vm4204_vm11, %v4202_v31, %v4199_v4  ;;  %v4491_v4 = vld [vmem:[%s12286_s1 + $0x10] sm:$0xff]  ;;  %v4492_v31 = vld [vmem:[%s12286_s1 + $0x18] sm:$0xff] }
0x118c   :  { %v4207_v13 = vadd.f32 %v4205_v32, %v4179_v43  ;;  %v8920_v43 = vpack.c.bf16 %v4542_v27, %v4541_v16  ;;  %v8886_v32 = vpack.c.bf16 %v4492_v31, %v4491_v4  ;;  %v4532_v16 = vld [vmem:[%s12286_s1 + $0x158] sm:$0xff]  ;;  %v4515_v27 = vld [vmem:[%s12286_s1 + $0xd0] sm:$0xff]  ;;  %v4549_v31 = vld [vmem:[%s12286_s1 + $0x1e0] sm:$0xff] }
0x118d   :  { %v4516_v4 = vld [vmem:[%s12286_s1 + $0xd8] sm:$0xff] }
0x118e   :  { %9568 = vtanh.f32 %v4207_v13  ;;  %v4525_v13 = vld [vmem:[%s12286_s1 + $0x120] sm:$0xff] }
0x1194   :  { %v9567_v33 = vpop.eup %9566 }
0x1195   :  { %v4210_v34 = vmul.f32 %v9567_v33, %v4170_v63  ;;  %v4526_v33 = vld [vmem:[%s12286_s1 + $0x128] sm:$0xff] }
0x1197   :  { %v4214_v35 = vrot.slane %v4210_v34, 7  ;;  %4349 = vmatprep.mubr.f32.mxu0 %v4210_v34  ;;  %v4222_v58 = vrot.slane %v4210_v34, 1  ;;  %v8922_v34 = vpack.c.bf16 %v4526_v33, %v4525_v13  ;;  %v4499_v13 = vld [vmem:[%s12286_s1 + $0x50] sm:$0xff]  ;;  %v4500_v33 = vld [vmem:[%s12286_s1 + $0x58] sm:$0xff] }
0x1198   :  { %v9569_v38 = vpop.eup %9568 }
0x1199   :  { %v4219_v21 = vsel %vm563_vm1, 0.0, %v4214_v35  ;;  %v4211_v53 = vmul.f32 %v9569_v38, %v4175_v54  ;;  %v4510_v38 = vld [vmem:[%s12286_s1 + $0xa8] sm:$0xff] }
0x119a   :  { %v4220_v56 = vmul.f32 %v4219_v21, %v11353_v24  ;;  %v4543_v21 = vld [vmem:[%s12286_s1 + $0x1b0] sm:$0xff] }
0x119b   :  { %v4215_v28 = vrot.slane %v4211_v53, 7  ;;  %v4223_v59 = vrot.slane %v4211_v53, 1 }
0x119c   :  { %4350 = vmatmul.mubr.f32.vlgmr.msra.gmra.mrb[58].mxu0 %v4220_v56  ;;  %v4544_v56 = vld [vmem:[%s12286_s1 + $0x1b8] sm:$0xff] }
0x119d   :  { %4354 = vmatprep.mubr.f32.mxu0 %v4211_v53  ;;  %v4216_v37 = vsel %vm563_vm1, %v4214_v35, %v4215_v28  ;;  %v4224_v61 = vsel %vm604_vm0, %v4222_v58, %v4223_v59  ;;  %v4227_v63 = vsel %vm604_vm0, %v4223_v59, 0.0  ;;  %v4509_v35 = vld [vmem:[%s12286_s1 + $0xa0] sm:$0xff]  ;;  %v4494_v28 = vld [vmem:[%s12286_s1 + $0x28] sm:$0xff]  ;;  %v8924_v59 = vpack.c.bf16 %v4544_v56, %v4543_v21 }
0x119e   :  { %v4221_v1 = vmul.f32 %v4216_v37, %v11358_v42  ;;  %v4228_v2 = vmul.f32 %v4224_v61, %v11348_v60  ;;  %v4229_v54 = vmul.f32 %v4227_v63, %v11361_v52  ;;  %v8888_v53 = vpack.c.bf16 %v4510_v38, %v4509_v35  ;;  %v4493_v58 = vld [vmem:[%s12286_s1 + $0x20] sm:$0xff]  ;;  %v4527_v61 = vld [vmem:[%s12286_s1 + $0x130] sm:$0xff]  ;;  %v4528_v63 = vld [vmem:[%s12286_s1 + $0x138] sm:$0xff] }
0x119f   :  { %v8890_v37 = vpack.c.bf16 %v4494_v28, %v4493_v58  ;;  %v8902_v35 = vpack.c.bf16 %v4500_v33, %v4499_v13  ;;  %v4533_v38 = vld [vmem:[%s12286_s1 + $0x160] sm:$0xff]  ;;  %v4534_v21 = vld [vmem:[%s12286_s1 + $0x168] sm:$0xff]  ;;  %v4551_v28 = vld [vmem:[%s12286_s1 + $0x1f0] sm:$0xff] }
0x11a0   :  { %4355 = vmatmul.mubr.f32.gmra.mrb[60].mxu0 %v4221_v1  ;;  %7900 = vmatprep.mubr.f32.mxu1 %v4228_v2  ;;  %v8926_v1 = vpack.c.bf16 %v4528_v63, %v4527_v61  ;;  %v4511_v2 = vld [vmem:[%s12286_s1 + $0xb0] sm:$0xff]  ;;  %v4517_v56 = vld [vmem:[%s12286_s1 + $0xe0] sm:$0xff]  ;;  %v4518_v58 = vld [vmem:[%s12286_s1 + $0xe8] sm:$0xff] }
0x11a1   :  { %7901 = vmatmul.mubr.f32.vlgmr.msra.gmra.mrb[44].mxu1 %v4229_v54  ;;  %4656 = vmatprep.mubr.f32.mxu0 %v11617_v40  ;;  %v8880_v40 = vpack.c.bf16 %v4506_v51, %v4505_v19  ;;  %v4512_v54 = vld [vmem:[%s12286_s1 + $0xb8] sm:$0xff]  ;;  %v8894_v19 = vpack.c.bf16 %v4496_v41, %v4495_v17  ;;  %v4529_v51 = vld [vmem:[%s12286_s1 + $0x140] sm:$0xff]  ;;  %v4502_v63 = vld [vmem:[%s12286_s1 + $0x68] sm:$0xff] }
0x11a2   :  { %4731 = vmatprep.mubr.f32.mxu1 %v11608_v29  ;;  %8915 = vmatpush3.bf16.msra.mxu1 %v8914_v22  ;;  %v8892_v23 = vpack.c.bf16 %v4512_v54, %v4511_v2  ;;  %v8928_v22 = vpack.c.bf16 %v4546_v6, %v4545_v5  ;;  %v4501_v61 = vld [vmem:[%s12286_s1 + $0x60] sm:$0xff]  ;;  %v4535_v54 = vld [vmem:[%s12286_s1 + $0x170] sm:$0xff]  ;;  %v4536_v5 = vld [vmem:[%s12286_s1 + $0x178] sm:$0xff] }
0x11a3   :  { %8881 = vmatprep.subr.bf16.mxu0 %v8880_v40  ;;  %8917 = vmatprep.subr.bf16.mxu1 %v8916_v11  ;;  %v8930_v40 = vpack.c.bf16 %v4530_v7, %v4529_v51  ;;  %v8896_v11 = vpack.c.bf16 %v4514_v45, %v4513_v39  ;;  %v8906_v2 = vpack.c.bf16 %v4502_v63, %v4501_v61  ;;  %v4519_v6 = vld [vmem:[%s12286_s1 + $0xf0] sm:$0xff]  ;;  %v4520_v17 = vld [vmem:[%s12286_s1 + $0xf8] sm:$0xff]  ;;  %v4569_v7 = vld [vmem:[%s12286_s1 + $0x280] sm:$0xff] }
0x11a4   :  { %8883 = vmatpush3.bf16.msra.mxu0 %v8882_v57  ;;  %v4548_v57 = vld [vmem:[%s12286_s1 + $0x1d8] sm:$0xff]  ;;  %v8908_v41 = vpack.c.bf16 %v4520_v17, %v4519_v6 }
0x11a5   :  { %8885 = vmatprep.subr.bf16.mxu0 %v8884_v18  ;;  %v8934_v18 = vpack.c.bf16 %v4532_v16, %v4531_v47 }
0x11a6   :  { %8919 = vmatpush3.bf16.msra.mxu1 %v8918_v26  ;;  %v8932_v26 = vpack.c.bf16 %v4548_v57, %v4547_v46 }
0x11a7   :  { %8921 = vmatprep.subr.bf16.mxu1 %v8920_v43  ;;  %v8900_v43 = vpack.c.bf16 %v4516_v4, %v4515_v27 }
0x11a8   :  { %8887 = vmatpush3.bf16.msra.mxu0 %v8886_v32  ;;  %v4550_v32 = vld [vmem:[%s12286_s1 + $0x1e8] sm:$0xff] }
0x11a9   :  { %8889 = vmatprep.subr.bf16.mxu0 %v8888_v53  ;;  %v8938_v53 = vpack.c.bf16 %v4534_v21, %v4533_v38 }
0x11aa   :  { %8923 = vmatpush3.bf16.msra.mxu1 %v8922_v34  ;;  %v8936_v34 = vpack.c.bf16 %v4550_v32, %v4549_v31 }
0x11ab   :  { %8925 = vmatprep.subr.bf16.mxu1 %v8924_v59  ;;  %v8904_v59 = vpack.c.bf16 %v4518_v58, %v4517_v56 }
0x11ac   :  { %8891 = vmatpush3.bf16.msra.mxu0 %v8890_v37  ;;  %v4552_v37 = vld [vmem:[%s12286_s1 + $0x1f8] sm:$0xff] }
0x11ad   :  { %8893 = vmatprep.subr.bf16.mxu0 %v8892_v23  ;;  %v8942_v23 = vpack.c.bf16 %v4536_v5, %v4535_v54 }
0x11ae   :  { %8927 = vmatpush3.bf16.msra.mxu1 %v8926_v1  ;;  %v8940_v1 = vpack.c.bf16 %v4552_v37, %v4551_v28 }
0x11af   :  { %8929 = vmatprep.subr.bf16.mxu1 %v8928_v22  ;;  %v4503_v22 = vld [vmem:[%s12286_s1 + $0x70] sm:$0xff] }
0x11b0   :  { %8895 = vmatpush3.bf16.msra.mxu0 %v8894_v19  ;;  %v4504_v19 = vld [vmem:[%s12286_s1 + $0x78] sm:$0xff] }
0x11b1   :  { %8897 = vmatprep.subr.bf16.mxu0 %v8896_v11  ;;  %v8910_v51 = vpack.c.bf16 %v4504_v19, %v4503_v22  ;;  %v6484_v11 = vld [vmem:[#allocation31] ss:$0 sm:$0xff] }
0x11b2   :  { %8931 = vmatpush3.bf16.msra.mxu1 %v8930_v40  ;;  %v4570_v40 = vld [vmem:[%s12286_s1 + $0x288] sm:$0xff] }
0x11b3   :  { %8933 = vmatprep.subr.bf16.mxu1 %v8932_v26  ;;  %v8944_v39 = vpack.c.bf16 %v4570_v40, %v4569_v7 }
0x11b4   :  { %8899 = vmatpush3.bf16.msra.mxu0 %v8898_v30 }
0x11b5   :  { %8901 = vmatprep.subr.bf16.mxu0 %v8900_v43 }
0x11b6   :  { %8935 = vmatpush3.bf16.msra.mxu1 %v8934_v18 }
0x11b7   :  { %8937 = vmatprep.subr.bf16.mxu1 %v8936_v34 }
0x11b8   :  { %8903 = vmatpush3.bf16.msra.mxu0 %v8902_v35 }
0x11b9   :  { %8905 = vmatprep.subr.bf16.mxu0 %v8904_v59 }
0x11ba   :  { %8939 = vmatpush3.bf16.msra.mxu1 %v8938_v53 }
0x11bb   :  { %8941 = vmatprep.subr.bf16.mxu1 %v8940_v1 }
0x11bc   :  { %8907 = vmatpush3.bf16.msra.mxu0 %v8906_v2 }
0x11bd   :  { %8909 = vmatprep.subr.bf16.mxu0 %v8908_v41 }
0x11be   :  { %8943 = vmatpush3.bf16.msra.mxu1 %v8942_v23 }
0x11bf   :  { %8976 = vmatprep.subr.bf16.mxu1 %v10378_v12 }
0x11c0   :  { %8911 = vmatpush3.bf16.msra.mxu0 %v8910_v51 }
0x11c1   :  { %8945 = vmatprep.subr.bf16.mxu0 %v8944_v39 }
0x126f   :  { %v7153_v45 = vpop.f32.mrb[58].mxu0 }
0x1270   :  { %v7154_v46 = vpop.f32.mrb[59].mxu0 }
0x1271   :  { %v7155_v57 = vadd.f32 %v7154_v46, %v7153_v45 }
0x1273   :  { %v7156_v50 = vpop.f32.mrb[60].mxu0  ;;  %v4352_v25 = vadd.f32 %v7155_v57, %v6484_v11  ;;  %v4554_v57 = vld [vmem:[%s12286_s1 + $0x208] sm:$0xff] }
0x1274   :  { %v7157_v26 = vpop.f32.mrb[61].mxu0  ;;  %v7902_v30 = vpop.f32.mrb[44].mxu1 }
0x1275   :  { %v7158_v47 = vadd.f32 %v7157_v26, %v7156_v50  ;;  %v4426_v16 = vpop.f32.mrb[45].mxu1  ;;  %v4572_v26 = vld [vmem:[%s12286_s1 + $0x298] sm:$0xff] }
0x1276   :  { %v4427_v18 = vadd.f32 %v4426_v16, %v4352_v25  ;;  %v4571_v25 = vld [vmem:[%s12286_s1 + $0x290] sm:$0xff] }
0x1277   :  { %v4357_v27 = vadd.f32 %v7158_v47, %v6484_v11  ;;  %v4553_v11 = vld [vmem:[%s12286_s1 + $0x200] sm:$0xff] }
0x1278   :  { %v4437_v4 = vand.u32 2147483647, %v4427_v18  ;;  %v4435_v54 = vmax.f32 %v4427_v18, 0.0  ;;  %v8946_v47 = vpack.c.bf16 %v4554_v57, %v4553_v11 }
0x1279   :  { %v4432_v31 = vadd.f32 %v7902_v30, %v4357_v27 }
0x127a   :  { %v4439_v43 = vsub.f32 0.0, %v4437_v4  ;;  %v4555_v4 = vld [vmem:[%s12286_s1 + $0x210] sm:$0xff] }
0x127b   :  { %v4438_v32 = vand.u32 2147483647, %v4432_v31  ;;  %v4436_v22 = vmax.f32 %v4432_v31, 0.0 }
0x127c   :  { %v4441_v13 = vmul.f32 1.442695, %v4439_v43  ;;  %v4574_v43 = vld [vmem:[%s12286_s1 + $0x2a8] sm:$0xff] }
0x127d   :  { %v4440_v33 = vsub.f32 0.0, %v4438_v32 }
0x127e   :  { %9570 = vpow2.f32 %v4441_v13 }
0x127f   :  { %v4443_v34 = vmul.f32 1.442695, %v4440_v33 }
0x1281   :  { %9572 = vpow2.f32 %v4443_v34 }
0x1288   :  { %v9571_v35 = vpop.eup %9570 }
0x1289   :  { %v4445_v38 = vadd.f32 1.0, %v9571_v35  ;;  %v4448_v56 = vmul.f32 -0.5, %v9571_v35  ;;  %v4451_v59 = vand.u32 2147483647, %v9571_v35 }
0x128b   :  { %v9573_v21 = vpop.eup %9572  ;;  %9574 = vlog2.f32 %v4445_v38  ;;  %v4449_v28 = vadd.f32 1.0, %v4448_v56  ;;  %vm4452_vm12 = vcmp.lt.f32.partialorder %v4451_v59, 0.0004427343  ;;  %v4558_v38 = vld [vmem:[%s12286_s1 + $0x228] sm:$0xff]  ;;  %v4577_v59 = vld [vmem:[%s12286_s1 + $0x2c0] sm:$0xff] }
0x128c   :  { %v4454_v53 = vadd.f32 1.0, %v9573_v21  ;;  %v4457_v58 = vmul.f32 -0.5, %v9573_v21  ;;  %v4460_v63 = vand.u32 2147483647, %v9573_v21 }
0x128d   :  { %v4450_v2 = vmul.f32 %v9571_v35, %v4449_v28  ;;  %v4557_v35 = vld [vmem:[%s12286_s1 + $0x220] sm:$0xff]  ;;  %v4560_v28 = vld [vmem:[%s12286_s1 + $0x238] sm:$0xff] }
0x128e   :  { %9576 = vlog2.f32 %v4454_v53  ;;  %v4458_v61 = vadd.f32 1.0, %v4457_v58  ;;  %vm4461_vm13 = vcmp.lt.f32.partialorder %v4460_v63, 0.0004427343  ;;  %v4576_v53 = vld [vmem:[%s12286_s1 + $0x2b8] sm:$0xff]  ;;  %v4559_v58 = vld [vmem:[%s12286_s1 + $0x230] sm:$0xff] }
0x1290   :  { %v4459_v17 = vmul.f32 %v9573_v21, %v4458_v61  ;;  %v4575_v21 = vld [vmem:[%s12286_s1 + $0x2b0] sm:$0xff]  ;;  %v8958_v61 = vpack.c.bf16 %v4560_v28, %v4559_v58 }
0x1291   :  { %v8956_v56 = vpack.c.bf16 %v4576_v53, %v4575_v21  ;;  %v5043_v53 = vld [vmem:[%s12287_s30 + $0xa0] sm:$0xff] }
0x1295   :  { %v9575_v37 = vpop.eup %9574 }
0x1296   :  { %v4447_v1 = vmul.f32 0.6931472, %v9575_v37  ;;  %v4578_v37 = vld [vmem:[%s12286_s1 + $0x2c8] sm:$0xff] }
0x1297   :  { %v8960_v63 = vpack.c.bf16 %v4578_v37, %v4577_v59  ;;  %v5027_v59 = vld [vmem:[%s12287_s30 + $0x20] sm:$0xff]  ;;  %v5028_v37 = vld [vmem:[%s12287_s30 + $0x28] sm:$0xff] }
0x1298   :  { %v9577_v5 = vpop.eup %9576  ;;  %v4453_v23 = vsel %vm4452_vm12, %v4450_v2, %v4447_v1  ;;  %v4561_v1 = vld [vmem:[%s12286_s1 + $0x240] sm:$0xff]  ;;  %v4562_v2 = vld [vmem:[%s12286_s1 + $0x248] sm:$0xff] }
0x1299   :  { %v4456_v6 = vmul.f32 0.6931472, %v9577_v5  ;;  %v4463_v41 = vadd.f32 %v4453_v23, %v4435_v54  ;;  %v4580_v54 = vld [vmem:[%s12286_s1 + $0x2d8] sm:$0xff]  ;;  %v8962_v5 = vpack.c.bf16 %v4562_v2, %v4561_v1  ;;  %v5029_v2 = vld [vmem:[%s12287_s30 + $0x30] sm:$0xff] }
0x129b   :  { %v4462_v19 = vsel %vm4461_vm13, %v4459_v17, %v4456_v6  ;;  %9578 = vtanh.f32 %v4463_v41  ;;  %v4563_v6 = vld [vmem:[%s12286_s1 + $0x250] sm:$0xff]  ;;  %v4564_v17 = vld [vmem:[%s12286_s1 + $0x258] sm:$0xff]  ;;  %v4581_v41 = vld [vmem:[%s12286_s1 + $0x2e0] sm:$0xff] }
0x129c   :  { %v4464_v51 = vadd.f32 %v4462_v19, %v4436_v22  ;;  %v4582_v22 = vld [vmem:[%s12286_s1 + $0x2e8] sm:$0xff]  ;;  %v8966_v19 = vpack.c.bf16 %v4564_v17, %v4563_v6  ;;  %v5031_v17 = vld [vmem:[%s12287_s30 + $0x40] sm:$0xff] }
0x129e   :  { %9580 = vtanh.f32 %v4464_v51  ;;  %v8968_v51 = vpack.c.bf16 %v4582_v22, %v4581_v41  ;;  %v5032_v41 = vld [vmem:[%s12287_s30 + $0x48] sm:$0xff]  ;;  %v5050_v22 = vld [vmem:[%s12287_s30 + $0xd8] sm:$0xff] }
0x12a5   :  { %v9579_v7 = vpop.eup %9578 }
0x12a6   :  { %v4467_v40 = vmul.f32 %v9579_v7, %v4427_v18  ;;  %v8948_v18 = vpack.c.bf16 %v4572_v26, %v4571_v25  ;;  %v4565_v7 = vld [vmem:[%s12286_s1 + $0x260] sm:$0xff]  ;;  %v4568_v25 = vld [vmem:[%s12286_s1 + $0x278] sm:$0xff] }
0x12a8   :  { %v9581_v39 = vpop.eup %9580  ;;  %v11793_v45 = vadd.f32 %v4467_v40, %v11696_v36  ;;  %v4566_v40 = vld [vmem:[%s12286_s1 + $0x268] sm:$0xff] }
0x12a9   :  { %v4468_v46 = vmul.f32 %v9581_v39, %v4432_v31  ;;  %v4556_v31 = vld [vmem:[%s12286_s1 + $0x218] sm:$0xff]  ;;  %v4583_v39 = vld [vmem:[%s12286_s1 + $0x2f0] sm:$0xff]  ;;  %v8970_v11 = vpack.c.bf16 %v4566_v40, %v4565_v7 }
0x12aa   :  { %4732 = vmatmul.mubr.f32.vlgmr.msra.gmra.mrb[46].mxu1 %v11793_v45  ;;  %v4473_v50 = vrot.slane %v11793_v45, 7  ;;  %v8950_v33 = vpack.c.bf16 %v4556_v31, %v4555_v4  ;;  %v5023_v4 = vld [vmem:[%s12287_s30] sm:$0xff]  ;;  %v5024_v31 = vld [vmem:[%s12287_s30 + $0x8] sm:$0xff]  ;;  %v5033_v7 = vld [vmem:[%s12287_s30 + $0x50] sm:$0xff] }
0x12ab   :  { %v11802_v30 = vadd.f32 %v4468_v46, %v11701_v14  ;;  %4736 = vmatprep.mubr.f32.mxu1 %v11613_v15  ;;  %v4573_v14 = vld [vmem:[%s12286_s1 + $0x2a0] sm:$0xff]  ;;  %v4584_v46 = vld [vmem:[%s12286_s1 + $0x2f8] sm:$0xff] }
0x12ac   :  { %v4478_v36 = vsel %vm563_vm1, 0.0, %v4473_v50  ;;  %v8952_v34 = vpack.c.bf16 %v4574_v43, %v4573_v14  ;;  %v8972_v57 = vpack.c.bf16 %v4584_v46, %v4583_v39  ;;  %v5041_v43 = vld [vmem:[%s12287_s30 + $0x90] sm:$0xff]  ;;  %v5034_v40 = vld [vmem:[%s12287_s30 + $0x58] sm:$0xff]  ;;  %v5051_v39 = vld [vmem:[%s12287_s30 + $0xe0] sm:$0xff] }
0x12ad   :  { %v4479_v16 = vmul.f32 %v4478_v36, %v11353_v24  ;;  %v4474_v27 = vrot.slane %v11802_v30, 7  ;;  %v4482_v26 = vrot.slane %v11802_v30, 1  ;;  %v5039_v36 = vld [vmem:[%s12287_s30 + $0x80] sm:$0xff]  ;;  %v5052_v46 = vld [vmem:[%s12287_s30 + $0xe8] sm:$0xff] }
0x12ae   :  { %4737 = vmatmul.mubr.f32.gmra.mrb[48].mxu1 %v11802_v30 }
0x12af   :  { %4657 = vmatmul.mubr.f32.vlgmr.msra.gmra.mrb[62].mxu0 %v4479_v16  ;;  %v4475_v32 = vsel %vm563_vm1, %v4473_v50, %v4474_v27  ;;  %v4567_v50 = vld [vmem:[%s12286_s1 + $0x270] sm:$0xff]  ;;  %v4481_v16 = vrot.slane %v11793_v45, 1  ;;  %v4486_v21 = vsel %vm604_vm0, %v4482_v26, 0.0 }
0x12b0   :  { %8947 = vmatpush3.bf16.msra.mxu0 %v8946_v47  ;;  %4661 = vmatprep.mubr.f32.mxu0 %v11631_v20  ;;  %v4480_v13 = vmul.f32 %v4475_v32, %v11358_v42  ;;  %v8954_v20 = vpack.c.bf16 %v4558_v38, %v4557_v35  ;;  %v5040_v47 = vld [vmem:[%s12287_s30 + $0x88] sm:$0xff]  ;;  %v5042_v32 = vld [vmem:[%s12287_s30 + $0x98] sm:$0xff]  ;;  %v5025_v35 = vld [vmem:[%s12287_s30 + $0x10] sm:$0xff]  ;;  %v4488_v58 = vmul.f32 %v4486_v21, %v11361_v52 }
0x12b1   :  { %8949 = vmatprep.subr.bf16.mxu0 %v8948_v18  ;;  %v8974_v18 = vpack.c.bf16 %v4568_v25, %v4567_v50  ;;  %v9012_v27 = vpack.c.bf16 %v5040_v47, %v5039_v36  ;;  %v4483_v14 = vsel %vm604_vm0, %v4481_v16, %v4482_v26  ;;  %v5026_v38 = vld [vmem:[%s12287_s30 + $0x18] sm:$0xff]  ;;  %v5035_v50 = vld [vmem:[%s12287_s30 + $0x60] sm:$0xff]  ;;  %v5036_v25 = vld [vmem:[%s12287_s30 + $0x68] sm:$0xff] }
0x12b2   :  { %v5053_v26 = vld [vmem:[%s12287_s30 + $0xf0] sm:$0xff]  ;;  %v5054_v36 = vld [vmem:[%s12287_s30 + $0xf8] sm:$0xff]  ;;  %v9038_v47 = vpack.c.bf16 %v5036_v25, %v5035_v50  ;;  %v4885_v21 = vld [vmem:[%s12288_s27 + $0x40] sm:$0xff] }
0x12b3   :  { %4662 = vmatmul.mubr.f32.gmra.mrb[64].mxu0 %v4480_v13  ;;  %v9014_v13 = vpack.c.bf16 %v5024_v31, %v5023_v4  ;;  %v9040_v16 = vpack.c.bf16 %v5054_v36, %v5053_v26  ;;  %v4877_v31 = vld [vmem:[%s12288_s27] sm:$0xff] }
0x12b4   :  { %8951 = vmatpush3.bf16.msra.mxu0 %v8950_v33  ;;  %4806 = vmatprep.mubr.f32.mxu0 %v11628_v8  ;;  %v4579_v8 = vld [vmem:[%s12286_s1 + $0x2d0] sm:$0xff]  ;;  %v4487_v33 = vmul.f32 %v4483_v14, %v11348_v60  ;;  %v4878_v14 = vld [vmem:[%s12288_s27 + $0x8] sm:$0xff] }
0x12b5   :  { %8953 = vmatprep.subr.bf16.mxu0 %v8952_v34  ;;  %v8964_v23 = vpack.c.bf16 %v4580_v54, %v4579_v8  ;;  %v9016_v34 = vpack.c.bf16 %v5042_v32, %v5041_v43  ;;  %v5030_v8 = vld [vmem:[%s12287_s30 + $0x38] sm:$0xff]  ;;  %v5047_v54 = vld [vmem:[%s12287_s30 + $0xc0] sm:$0xff]  ;;  %v4879_v43 = vld [vmem:[%s12288_s27 + $0x10] sm:$0xff]  ;;  %v8977_v32 = vpack.c.bf16 %v4878_v14, %v4877_v31 }
0x12b7   :  { %8978 = vmatpush1.bf16.msra.mxu1 %v8977_v32 }
0x12b8   :  { %8955 = vmatpush3.bf16.msra.mxu0 %v8954_v20  ;;  %v5044_v20 = vld [vmem:[%s12287_s30 + $0xa8] sm:$0xff]  ;;  %8979 = vmatprep.subr.bf16.mxu1 %v10378_v12 }
0x12b9   :  { %8957 = vmatprep.subr.bf16.mxu0 %v8956_v56  ;;  %v9018_v56 = vpack.c.bf16 %v5026_v38, %v5025_v35  ;;  %v9020_v28 = vpack.c.bf16 %v5044_v20, %v5043_v53  ;;  %v4884_v35 = vld [vmem:[%s12288_s27 + $0x38] sm:$0xff]  ;;  %v4886_v53 = vld [vmem:[%s12288_s27 + $0x48] sm:$0xff] }
0x12ba   :  { %v8989_v20 = vpack.c.bf16 %v4886_v53, %v4885_v21 }
0x12bc   :  { %8959 = vmatpush3.bf16.msra.mxu0 %v8958_v61  ;;  %v5045_v61 = vld [vmem:[%s12287_s30 + $0xb0] sm:$0xff] }
0x12bd   :  { %8961 = vmatprep.subr.bf16.mxu0 %v8960_v63  ;;  %v5046_v63 = vld [vmem:[%s12287_s30 + $0xb8] sm:$0xff] }
0x12be   :  { %v9024_v1 = vpack.c.bf16 %v5046_v63, %v5045_v61  ;;  %v4891_v63 = vld [vmem:[%s12288_s27 + $0x70] sm:$0xff] }
0x12c0   :  { %8963 = vmatpush3.bf16.msra.mxu0 %v8962_v5  ;;  %v5048_v5 = vld [vmem:[%s12287_s30 + $0xc8] sm:$0xff] }
0x12c1   :  { %8965 = vmatprep.subr.bf16.mxu0 %v8964_v23  ;;  %v9026_v23 = vpack.c.bf16 %v5030_v8, %v5029_v2  ;;  %v9028_v6 = vpack.c.bf16 %v5048_v5, %v5047_v54  ;;  %v4893_v8 = vld [vmem:[%s12288_s27 + $0x80] sm:$0xff]  ;;  %v4894_v54 = vld [vmem:[%s12288_s27 + $0x88] sm:$0xff] }
0x12c4   :  { %8967 = vmatpush3.bf16.msra.mxu0 %v8966_v19  ;;  %v9030_v19 = vpack.c.bf16 %v5032_v41, %v5031_v17  ;;  %v4895_v41 = vld [vmem:[%s12288_s27 + $0x90] sm:$0xff] }
0x12c5   :  { %8969 = vmatprep.subr.bf16.mxu0 %v8968_v51 }
0x12c8   :  { %8971 = vmatpush3.bf16.msra.mxu0 %v8970_v11  ;;  %v9034_v11 = vpack.c.bf16 %v5034_v40, %v5033_v7  ;;  %v6485_v7 = vld [vmem:[#allocation33] ss:$0 sm:$0xff] }
0x12c9   :  { %8973 = vmatprep.subr.bf16.mxu0 %v8972_v57  ;;  %v9036_v57 = vpack.c.bf16 %v5052_v46, %v5051_v39 }
0x12cc   :  { %8975 = vmatpush3.bf16.msra.mxu0 %v8974_v18  ;;  %v5037_v18 = vld [vmem:[%s12287_s30 + $0x70] sm:$0xff] }
0x12cd   :  { %9013 = vmatprep.subr.bf16.mxu0 %v9012_v27  ;;  %v5038_v27 = vld [vmem:[%s12287_s30 + $0x78] sm:$0xff] }
0x12ce   :  { %v9042_v4 = vpack.c.bf16 %v5038_v27, %v5037_v18  ;;  %v4899_v18 = vld [vmem:[%s12288_s27 + $0xb0] sm:$0xff]  ;;  %v4900_v27 = vld [vmem:[%s12288_s27 + $0xb8] sm:$0xff] }
0x12cf   :  { %4807 = vmatmul.mubr.f32.vlgmr.msra.gmra.mrb[66].mxu0 %v4487_v33  ;;  %v9010_v14 = vpack.c.bf16 %v4900_v27, %v4899_v18 }
0x12d0   :  { %4811 = vmatprep.mubr.f32.mxu0 %v11634_v10  ;;  %9015 = vmatpush3.bf16.msra.mxu0 %v9014_v13  ;;  %v9022_v10 = vpack.c.bf16 %v5028_v37, %v5027_v59  ;;  %v4880_v13 = vld [vmem:[%s12288_s27 + $0x18] sm:$0xff]  ;;  %v4889_v59 = vld [vmem:[%s12288_s27 + $0x60] sm:$0xff]  ;;  %v4890_v37 = vld [vmem:[%s12288_s27 + $0x68] sm:$0xff] }
0x12d1   :  { %9017 = vmatprep.subr.bf16.mxu0 %v9016_v34  ;;  %v8980_v33 = vpack.c.bf16 %v4880_v13, %v4879_v43  ;;  %v4881_v34 = vld [vmem:[%s12288_s27 + $0x20] sm:$0xff]  ;;  %v8995_v61 = vpack.c.bf16 %v4890_v37, %v4889_v59 }
0x12d3   :  { %4812 = vmatmul.mubr.f32.gmra.mrb[68].mxu0 %v4488_v58  ;;  %8981 = vmatpush1.bf16.msra.mxu1 %v8980_v33  ;;  %v4888_v58 = vld [vmem:[%s12288_s27 + $0x58] sm:$0xff] }
0x12d4   :  { %9019 = vmatpush3.bf16.msra.mxu0 %v9018_v56  ;;  %5126 = vmatprep.mubr.f32.mxu0 %v11608_v29  ;;  %v5049_v29 = vld [vmem:[%s12287_s30 + $0xd0] sm:$0xff] }
0x12d5   :  { %9021 = vmatprep.subr.bf16.mxu0 %v9020_v28  ;;  %v9032_v51 = vpack.c.bf16 %v5050_v22, %v5049_v29  ;;  %8982 = vmatprep.subr.bf16.mxu1 %v10378_v12  ;;  %v4887_v56 = vld [vmem:[%s12288_s27 + $0x50] sm:$0xff]  ;;  %v4896_v29 = vld [vmem:[%s12288_s27 + $0x98] sm:$0xff] }
0x12d6   :  { %v8992_v28 = vpack.c.bf16 %v4888_v58, %v4887_v56  ;;  %v9004_v46 = vpack.c.bf16 %v4896_v29, %v4895_v41 }
0x12d8   :  { %9023 = vmatpush3.bf16.msra.mxu0 %v9022_v10  ;;  %v4892_v10 = vld [vmem:[%s12288_s27 + $0x78] sm:$0xff] }
0x12d9   :  { %9025 = vmatprep.subr.bf16.mxu0 %v9024_v1  ;;  %v8998_v1 = vpack.c.bf16 %v4892_v10, %v4891_v63 }
0x12dc   :  { %9027 = vmatpush3.bf16.msra.mxu0 %v9026_v23 }
0x12dd   :  { %9029 = vmatprep.subr.bf16.mxu0 %v9028_v6  ;;  %v9001_v6 = vpack.c.bf16 %v4894_v54, %v4893_v8 }
0x12e0   :  { %9031 = vmatpush3.bf16.msra.mxu0 %v9030_v19 }
0x12e1   :  { %9033 = vmatprep.subr.bf16.mxu0 %v9032_v51 }
0x12e4   :  { %9035 = vmatpush3.bf16.msra.mxu0 %v9034_v11  ;;  %v4897_v11 = vld [vmem:[%s12288_s27 + $0xa0] sm:$0xff] }
0x12e5   :  { %9037 = vmatprep.subr.bf16.mxu0 %v9036_v57  ;;  %v4898_v57 = vld [vmem:[%s12288_s27 + $0xa8] sm:$0xff] }
0x12e8   :  { %9039 = vmatpush3.bf16.msra.mxu0 %v9038_v47 }
0x12e9   :  { %9041 = vmatprep.subr.bf16.mxu0 %v9040_v16  ;;  %v9007_v16 = vpack.c.bf16 %v4898_v57, %v4897_v11 }
0x12ec   :  { %9043 = vmatpush3.bf16.msra.mxu0 %v9042_v4 }
0x12ed   :  { %9080 = vmatprep.subr.bf16.mxu0 %v10378_v12 }
0x12ef   :  { %5127 = vmatmul.mubr.f32.vlgmr.msra.gmra.mrb[70].mxu0 %v11793_v45  ;;  %v4882_v45 = vld [vmem:[%s12288_s27 + $0x28] sm:$0xff] }
0x12f0   :  { %5131 = vmatprep.mubr.f32.mxu0 %v11613_v15  ;;  %v8983_v15 = vpack.c.bf16 %v4882_v45, %v4881_v34 }
0x12f2   :  { %8984 = vmatpush1.bf16.msra.mxu1 %v8983_v15 }
0x12f3   :  { %5132 = vmatmul.mubr.f32.gmra.mrb[72].mxu0 %v11802_v30  ;;  %v4883_v30 = vld [vmem:[%s12288_s27 + $0x30] sm:$0xff]  ;;  %8985 = vmatprep.subr.bf16.mxu1 %v10378_v12 }
0x12f4   :  { %v8986_v38 = vpack.c.bf16 %v4884_v35, %v4883_v30 }
0x12f6   :  { %8987 = vmatpush1.bf16.msra.mxu1 %v8986_v38 }
0x12f7   :  { %8988 = vmatprep.subr.bf16.mxu1 %v10378_v12 }
0x12fa   :  { %8990 = vmatpush1.bf16.msra.mxu1 %v8989_v20 }
0x12fb   :  { %8991 = vmatprep.subr.bf16.mxu1 %v10378_v12 }
0x12fe   :  { %8993 = vmatpush1.bf16.msra.mxu1 %v8992_v28 }
0x12ff   :  { %8994 = vmatprep.subr.bf16.mxu1 %v10378_v12 }
0x1302   :  { %8996 = vmatpush1.bf16.msra.mxu1 %v8995_v61 }
0x1303   :  { %8997 = vmatprep.subr.bf16.mxu1 %v10378_v12 }
0x1306   :  { %8999 = vmatpush1.bf16.msra.mxu1 %v8998_v1 }
0x1307   :  { %9000 = vmatprep.subr.bf16.mxu1 %v10378_v12 }
0x130a   :  { %9002 = vmatpush1.bf16.msra.mxu1 %v9001_v6 }
0x130b   :  { %9003 = vmatprep.subr.bf16.mxu1 %v10378_v12 }
0x130e   :  { %9005 = vmatpush1.bf16.msra.mxu1 %v9004_v46 }
0x130f   :  { %9006 = vmatprep.subr.bf16.mxu1 %v10378_v12 }
0x1312   :  { %9008 = vmatpush1.bf16.msra.mxu1 %v9007_v16 }
0x1313   :  { %9009 = vmatprep.subr.bf16.mxu1 %v10378_v12 }
0x1316   :  { %9011 = vmatpush1.bf16.msra.mxu1 %v9010_v14 }
0x1317   :  { %9044 = vmatprep.subr.bf16.mxu1 %v10378_v12 }
0x137d   :  { %v7247_v2 = vpop.f32.mrb[46].mxu1 }
0x137e   :  { %v7248_v5 = vpop.f32.mrb[47].mxu1 }
0x137f   :  { %v7249_v23 = vadd.f32 %v7248_v5, %v7247_v2 }
0x1381   :  { %v7250_v17 = vpop.f32.mrb[48].mxu1 }
0x1382   :  { %v7209_v22 = vpop.f32.mrb[62].mxu0  ;;  %v7251_v19 = vpop.f32.mrb[49].mxu1 }
0x1383   :  { %v7252_v51 = vadd.f32 %v7251_v19, %v7250_v17  ;;  %v7210_v40 = vpop.f32.mrb[63].mxu0 }
0x1384   :  { %v7211_v39 = vadd.f32 %v7210_v40, %v7209_v22 }
0x1386   :  { %v4659_v50 = vadd.f32 %v7211_v39, %v6485_v7  ;;  %v7212_v25 = vpop.f32.mrb[64].mxu0 }
0x1387   :  { %v7213_v26 = vpop.f32.mrb[65].mxu0 }
0x1388   :  { %v7214_v36 = vadd.f32 %v7213_v26, %v7212_v25  ;;  %v4734_v47 = vadd.f32 %v7249_v23, %v4659_v50 }
0x138a   :  { %v4664_v4 = vadd.f32 %v7214_v36, %v6485_v7 }
0x138c   :  { %v4739_v31 = vadd.f32 %v7252_v51, %v4664_v4 }
0x13a2   :  { %v7285_v43 = vpop.f32.mrb[66].mxu0 }
0x13a3   :  { %v7286_v32 = vpop.f32.mrb[67].mxu0 }
0x13a4   :  { %v7287_v13 = vadd.f32 %v7286_v32, %v7285_v43 }
0x13a6   :  { %v4809_v33 = vadd.f32 %v7287_v13, %v4734_v47  ;;  %v7288_v34 = vpop.f32.mrb[68].mxu0 }
0x13a7   :  { %v7289_v45 = vpop.f32.mrb[69].mxu0 }
0x13a8   :  { %v4819_v15 = vand.u32 2147483647, %v4809_v33  ;;  %v7290_v30 = vadd.f32 %v7289_v45, %v7288_v34  ;;  %v4817_v29 = vmax.f32 %v4809_v33, 0.0 }
0x13aa   :  { %v4821_v35 = vsub.f32 0.0, %v4819_v15  ;;  %v4814_v38 = vadd.f32 %v7290_v30, %v4739_v31 }
0x13ac   :  { %v4823_v21 = vmul.f32 1.442695, %v4821_v35  ;;  %v4820_v53 = vand.u32 2147483647, %v4814_v38  ;;  %v4818_v57 = vmax.f32 %v4814_v38, 0.0 }
0x13ae   :  { %9582 = vpow2.f32 %v4823_v21  ;;  %v4822_v20 = vsub.f32 0.0, %v4820_v53  ;;  %v5165_v53 = vld [vmem:[%s12289_s9] sm:$0xff] }
0x13b0   :  { %v4825_v56 = vmul.f32 1.442695, %v4822_v20  ;;  %v5166_v20 = vld [vmem:[%s12289_s9 + $0x8] sm:$0xff] }
0x13b2   :  { %9584 = vpow2.f32 %v4825_v56  ;;  %v5167_v56 = vld [vmem:[%s12289_s9 + $0x10] sm:$0xff] }
0x13b8   :  { %v9583_v58 = vpop.eup %9582 }
0x13b9   :  { %v4827_v28 = vadd.f32 1.0, %v9583_v58  ;;  %v4830_v61 = vmul.f32 -0.5, %v9583_v58  ;;  %v4833_v2 = vand.u32 2147483647, %v9583_v58 }
0x13bb   :  { %9586 = vlog2.f32 %v4827_v28  ;;  %v4831_v63 = vadd.f32 1.0, %v4830_v61  ;;  %vm4834_vm14 = vcmp.lt.f32.partialorder %v4833_v2, 0.0004427343  ;;  %v5168_v28 = vld [vmem:[%s12289_s9 + $0x18] sm:$0xff]  ;;  %v5170_v61 = vld [vmem:[%s12289_s9 + $0x28] sm:$0xff] }
0x13bc   :  { %v9585_v59 = vpop.eup %9584 }
0x13bd   :  { %v4836_v37 = vadd.f32 1.0, %v9585_v59  ;;  %v4839_v10 = vmul.f32 -0.5, %v9585_v59  ;;  %v4832_v6 = vmul.f32 %v9583_v58, %v4831_v63  ;;  %v4842_v22 = vand.u32 2147483647, %v9585_v59 }
0x13be   :  { %v9045_v58 = vpack.c.bf16 %v5166_v20, %v5165_v53 }
0x13bf   :  { %9588 = vlog2.f32 %v4836_v37  ;;  %v4840_v17 = vadd.f32 1.0, %v4839_v10  ;;  %vm4843_vm15 = vcmp.lt.f32.partialorder %v4842_v22, 0.0004427343  ;;  %v5169_v37 = vld [vmem:[%s12289_s9 + $0x20] sm:$0xff]  ;;  %v5171_v10 = vld [vmem:[%s12289_s9 + $0x30] sm:$0xff]  ;;  %v5178_v22 = vld [vmem:[%s12289_s9 + $0x68] sm:$0xff] }
0x13c0   :  { %v9051_v63 = vpack.c.bf16 %v5170_v61, %v5169_v37 }
0x13c1   :  { %v4841_v11 = vmul.f32 %v9585_v59, %v4840_v17  ;;  %v9048_v59 = vpack.c.bf16 %v5168_v28, %v5167_v56  ;;  %v5176_v17 = vld [vmem:[%s12289_s9 + $0x58] sm:$0xff] }
0x13c2   :  { %v7323_v1 = vpop.f32.mrb[70].mxu0 }
0x13c3   :  { %v7324_v8 = vpop.f32.mrb[71].mxu0 }
0x13c4   :  { %v11919_v54 = vadd.f32 %v7324_v8, %v7323_v1  ;;  %v5172_v1 = vld [vmem:[%s12289_s9 + $0x38] sm:$0xff]  ;;  %v5173_v8 = vld [vmem:[%s12289_s9 + $0x40] sm:$0xff] }
0x13c5   :  { %v9587_v5 = vpop.eup %9586  ;;  %v9054_v2 = vpack.c.bf16 %v5172_v1, %v5171_v10 }
0x13c6   :  { %v4829_v23 = vmul.f32 0.6931472, %v9587_v5  ;;  %v7326_v41 = vpop.f32.mrb[72].mxu0  ;;  %v5174_v5 = vld [vmem:[%s12289_s9 + $0x48] sm:$0xff] }
0x13c7   :  { %v7327_v19 = vpop.f32.mrb[73].mxu0 }
0x13c8   :  { %v4835_v51 = vsel %vm4834_vm14, %v4832_v6, %v4829_v23  ;;  %v11921_v7 = vadd.f32 %v7327_v19, %v7326_v41  ;;  %v9057_v23 = vpack.c.bf16 %v5174_v5, %v5173_v8  ;;  %v5175_v6 = vld [vmem:[%s12289_s9 + $0x50] sm:$0xff] }
0x13c9   :  { %v9589_v40 = vpop.eup %9588  ;;  %v4845_v39 = vadd.f32 %v4835_v51, %v4817_v29  ;;  %v9060_v41 = vpack.c.bf16 %v5176_v17, %v5175_v6  ;;  %v5177_v29 = vld [vmem:[%s12289_s9 + $0x60] sm:$0xff]  ;;  %v5179_v51 = vld [vmem:[%s12289_s9 + $0x70] sm:$0xff] }
0x13ca   :  { %v4838_v46 = vmul.f32 0.6931472, %v9589_v40  ;;  %v9063_v19 = vpack.c.bf16 %v5178_v22, %v5177_v29  ;;  %v5180_v40 = vld [vmem:[%s12289_s9 + $0x78] sm:$0xff] }
0x13cb   :  { %9590 = vtanh.f32 %v4845_v39  ;;  %v9066_v39 = vpack.c.bf16 %v5180_v40, %v5179_v51  ;;  %v6489_v40 = vld [vmem:[#allocation36] ss:$0 sm:$0xff] }
0x13cc   :  { %v4844_v50 = vsel %vm4843_vm15, %v4841_v11, %v4838_v46  ;;  %v5181_v46 = vld [vmem:[%s12289_s9 + $0x80] sm:$0xff]  ;;  %v5182_v11 = vld [vmem:[%s12289_s9 + $0x88] sm:$0xff] }
0x13cd   :  { %v4846_v25 = vadd.f32 %v4844_v50, %v4818_v57  ;;  %v9069_v57 = vpack.c.bf16 %v5182_v11, %v5181_v46  ;;  %v5183_v50 = vld [vmem:[%s12289_s9 + $0x90] sm:$0xff]  ;;  %v5129_v46 = vadd.f32 %v11919_v54, %v6489_v40 }
0x13cf   :  { %9592 = vtanh.f32 %v4846_v25  ;;  %v5184_v25 = vld [vmem:[%s12289_s9 + $0x98] sm:$0xff] }
0x13d5   :  { %v9591_v26 = vpop.eup %9590 }
0x13d6   :  { %v4849_v36 = vmul.f32 %v9591_v26, %v4809_v33  ;;  %v9072_v26 = vpack.c.bf16 %v5184_v25, %v5183_v50  ;;  %v5134_v25 = vadd.f32 %v11921_v7, %v6489_v40 }
0x13d8   :  { %4869 = vrot.lane.b32.xlu0 %v4849_v36, %s10381_s24  ;;  %v4853_v18 = vrot.slane %v4849_v36, 7  ;;  %v4861_v27 = vrot.slane %v4849_v36, 1  ;;  %v5185_v36 = vld [vmem:[%s12289_s9 + $0xa0] sm:$0xff] }
0x13d9   :  { %v9593_v47 = vpop.eup %9592 }
0x13da   :  { %v4850_v16 = vmul.f32 %v9593_v47, %v4814_v38  ;;  %v4858_v13 = vsel %vm563_vm1, 0.0, %v4853_v18  ;;  %v5186_v47 = vld [vmem:[%s12289_s9 + $0xa8] sm:$0xff] }
0x13db   :  { %v4859_v34 = vmul.f32 %v4858_v13, %v11353_v24 }
0x13dc   :  { %4871 = vrot.lane.b32.xlu1 %v4850_v16, %s10381_s24  ;;  %v4854_v4 = vrot.slane %v4850_v16, 7  ;;  %v4862_v31 = vrot.slane %v4850_v16, 1  ;;  %v9075_v16 = vpack.c.bf16 %v5186_v47, %v5185_v36 }
0x13de   :  { %v4863_v14 = vsel %vm604_vm0, %v4861_v27, %v4862_v31  ;;  %v4855_v43 = vsel %vm563_vm1, %v4853_v18, %v4854_v4  ;;  %v4866_v33 = vsel %vm604_vm0, %v4862_v31, 0.0  ;;  %v5187_v18 = vld [vmem:[%s12289_s9 + $0xb0] sm:$0xff]  ;;  %v5188_v27 = vld [vmem:[%s12289_s9 + $0xb8] sm:$0xff]  ;;  %v6486_v31 = vld [vmem:[#allocation34] ss:$0 sm:$0xff] }
0x13df   :  { %v4867_v32 = vmul.f32 %v4863_v14, %v11348_v60  ;;  %v4868_v30 = vmul.f32 %v4866_v33, %v11361_v52  ;;  %v4860_v35 = vmul.f32 %v4855_v43, %v11358_v42  ;;  %v9078_v4 = vpack.c.bf16 %v5188_v27, %v5187_v18 }
0x13e1   :  { %6487 = vmatprep.mubr.msk.f32.mxu1 %vm2421_vm9, %v4867_v32 }
0x144a   :  { %v4870_v45 = vpop.permute.xlu0 %4869 }
0x144b   :  { %v4875_v15 = vsel %vm2421_vm9, %v4859_v34, %v4870_v45 }
0x144c   :  { %4979 = vmatmul.mubr.f32.vlgmr.msra.gmra.mrb[50].mxu1 %v4875_v15 }
0x144d   :  { %6488 = vmatprep.mubr.msk.f32.mxu1 %vm2421_vm9, %v4868_v30  ;;  %9046 = vmatpush1.bf16.msra.mxu1 %v9045_v58 }
0x144e   :  { %v4872_v38 = vpop.permute.xlu1 %4871  ;;  %9047 = vmatprep.subr.bf16.mxu1 %v10378_v12 }
0x144f   :  { %v4876_v21 = vsel %vm2421_vm9, %v4860_v35, %v4872_v38 }
0x1450   :  { %4984 = vmatmul.mubr.f32.gmra.mrb[52].mxu1 %v4876_v21 }
0x1451   :  { %9049 = vmatpush1.bf16.msra.mxu1 %v9048_v59 }
0x1452   :  { %9050 = vmatprep.subr.bf16.mxu1 %v10378_v12 }
0x1455   :  { %9052 = vmatpush1.bf16.msra.mxu1 %v9051_v63 }
0x1456   :  { %9053 = vmatprep.subr.bf16.mxu1 %v10378_v12 }
0x1459   :  { %9055 = vmatpush1.bf16.msra.mxu1 %v9054_v2 }
0x145a   :  { %9056 = vmatprep.subr.bf16.mxu1 %v10378_v12 }
0x145d   :  { %9058 = vmatpush1.bf16.msra.mxu1 %v9057_v23 }
0x145e   :  { %9059 = vmatprep.subr.bf16.mxu1 %v10378_v12 }
0x1461   :  { %9061 = vmatpush1.bf16.msra.mxu1 %v9060_v41 }
0x1462   :  { %9062 = vmatprep.subr.bf16.mxu1 %v10378_v12 }
0x1465   :  { %9064 = vmatpush1.bf16.msra.mxu1 %v9063_v19 }
0x1466   :  { %9065 = vmatprep.subr.bf16.mxu1 %v10378_v12 }
0x1469   :  { %9067 = vmatpush1.bf16.msra.mxu1 %v9066_v39 }
0x146a   :  { %9068 = vmatprep.subr.bf16.mxu1 %v10378_v12 }
0x146d   :  { %9070 = vmatpush1.bf16.msra.mxu1 %v9069_v57 }
0x146e   :  { %9071 = vmatprep.subr.bf16.mxu1 %v10378_v12 }
0x1471   :  { %9073 = vmatpush1.bf16.msra.mxu1 %v9072_v26 }
0x1472   :  { %9074 = vmatprep.subr.bf16.mxu1 %v10378_v12 }
0x1475   :  { %9076 = vmatpush1.bf16.msra.mxu1 %v9075_v16 }
0x1476   :  { %9077 = vmatprep.subr.bf16.mxu1 %v10378_v12 }
0x1479   :  { %9079 = vmatpush1.bf16.msra.mxu1 %v9078_v4 }
0x151f   :  { %v4980_v14 = vpop.f32.mrb[50].mxu1 }
0x1520   :  { %v4981_v43 = vadd.f32 %v6486_v31, %v4980_v14  ;;  %v4982_v32 = vpop.f32.mrb[51].mxu1 }
0x1522   :  { %v4991_v13 = vand.u32 2147483647, %v4981_v43  ;;  %v4989_v8 = vmax.f32 %v4981_v43, 0.0 }
0x1523   :  { %v4985_v33 = vpop.f32.mrb[52].mxu1 }
0x1524   :  { %v4993_v34 = vsub.f32 0.0, %v4991_v13  ;;  %v4986_v45 = vadd.f32 %v6486_v31, %v4985_v33  ;;  %v4987_v15 = vpop.f32.mrb[53].mxu1 }
0x1526   :  { %v4995_v30 = vmul.f32 1.442695, %v4993_v34  ;;  %v4992_v35 = vand.u32 2147483647, %v4986_v45  ;;  %v4990_v22 = vmax.f32 %v4986_v45, 0.0 }
0x1528   :  { %9594 = vpow2.f32 %v4995_v30  ;;  %v4994_v38 = vsub.f32 0.0, %v4992_v35  ;;  %v5337_v30 = vld [vmem:[%s12290_s10] sm:$0xff]  ;;  %v5338_v35 = vld [vmem:[%s12290_s10 + $0x8] sm:$0xff] }
0x152a   :  { %v4997_v21 = vmul.f32 1.442695, %v4994_v38  ;;  %v5339_v38 = vld [vmem:[%s12290_s10 + $0x10] sm:$0xff] }
0x152c   :  { %9596 = vpow2.f32 %v4997_v21  ;;  %v9081_v21 = vpack.c.bf16 %v5338_v35, %v5337_v30 }
0x152e   :  { %9082 = vmatpush1.bf16.msra.mxu0 %v9081_v21 }
0x152f   :  { %9083 = vmatprep.subr.bf16.mxu0 %v10378_v12 }
0x1532   :  { %v9595_v53 = vpop.eup %9594 }
0x1533   :  { %v4999_v20 = vadd.f32 1.0, %v9595_v53  ;;  %v5002_v28 = vmul.f32 -0.5, %v9595_v53  ;;  %v5005_v61 = vand.u32 2147483647, %v9595_v53 }
0x1535   :  { %9598 = vlog2.f32 %v4999_v20  ;;  %v5003_v59 = vadd.f32 1.0, %v5002_v28  ;;  %vm5006_vm2 = vcmp.lt.f32.partialorder %v5005_v61, 0.0004427343 }
0x1536   :  { %v9597_v56 = vpop.eup %9596 }
0x1537   :  { %v5008_v58 = vadd.f32 1.0, %v9597_v56  ;;  %v5011_v37 = vmul.f32 -0.5, %v9597_v56  ;;  %v5004_v1 = vmul.f32 %v9595_v53, %v5003_v59  ;;  %v5014_v5 = vand.u32 2147483647, %v9597_v56  ;;  %v5340_v53 = vld [vmem:[%s12290_s10 + $0x18] sm:$0xff]  ;;  %v5343_v59 = vld [vmem:[%s12290_s10 + $0x30] sm:$0xff] }
0x1538   :  { %v9084_v20 = vpack.c.bf16 %v5340_v53, %v5339_v38 }
0x1539   :  { %9600 = vlog2.f32 %v5008_v58  ;;  %v5012_v2 = vadd.f32 1.0, %v5011_v37  ;;  %vm5015_vm4 = vcmp.lt.f32.partialorder %v5014_v5, 0.0004427343  ;;  %v5342_v58 = vld [vmem:[%s12290_s10 + $0x28] sm:$0xff]  ;;  %v5344_v37 = vld [vmem:[%s12290_s10 + $0x38] sm:$0xff] }
0x153a   :  { %9085 = vmatpush1.bf16.msra.mxu0 %v9084_v20  ;;  %v9090_v61 = vpack.c.bf16 %v5344_v37, %v5343_v59 }
0x153b   :  { %v5013_v29 = vmul.f32 %v9597_v56, %v5012_v2  ;;  %v5341_v56 = vld [vmem:[%s12290_s10 + $0x20] sm:$0xff]  ;;  %9086 = vmatprep.subr.bf16.mxu0 %v10378_v12  ;;  %v5347_v2 = vld [vmem:[%s12290_s10 + $0x50] sm:$0xff] }
0x153c   :  { %v9087_v28 = vpack.c.bf16 %v5342_v58, %v5341_v56 }
0x153e   :  { %9088 = vmatpush1.bf16.msra.mxu0 %v9087_v28 }
0x153f   :  { %v9599_v63 = vpop.eup %9598  ;;  %9089 = vmatprep.subr.bf16.mxu0 %v10378_v12 }
0x1540   :  { %v5001_v10 = vmul.f32 0.6931472, %v9599_v63  ;;  %v5345_v63 = vld [vmem:[%s12290_s10 + $0x40] sm:$0xff] }
0x1542   :  { %v5007_v23 = vsel %vm5006_vm2, %v5004_v1, %v5001_v10  ;;  %v5346_v10 = vld [vmem:[%s12290_s10 + $0x48] sm:$0xff]  ;;  %9091 = vmatpush1.bf16.msra.mxu0 %v9090_v61 }
0x1543   :  { %v9601_v6 = vpop.eup %9600  ;;  %v5017_v17 = vadd.f32 %v5007_v23, %v4989_v8  ;;  %v9093_v1 = vpack.c.bf16 %v5346_v10, %v5345_v63  ;;  %9092 = vmatprep.subr.bf16.mxu0 %v10378_v12  ;;  %v5348_v8 = vld [vmem:[%s12290_s10 + $0x58] sm:$0xff]  ;;  %v5349_v23 = vld [vmem:[%s12290_s10 + $0x60] sm:$0xff] }
0x1544   :  { %v5010_v41 = vmul.f32 0.6931472, %v9601_v6  ;;  %v9096_v5 = vpack.c.bf16 %v5348_v8, %v5347_v2  ;;  %v5350_v6 = vld [vmem:[%s12290_s10 + $0x68] sm:$0xff] }
0x1545   :  { %9602 = vtanh.f32 %v5017_v17  ;;  %v9099_v17 = vpack.c.bf16 %v5350_v6, %v5349_v23 }
0x1546   :  { %v5016_v19 = vsel %vm5015_vm4, %v5013_v29, %v5010_v41  ;;  %9094 = vmatpush1.bf16.msra.mxu0 %v9093_v1  ;;  %v5351_v41 = vld [vmem:[%s12290_s10 + $0x70] sm:$0xff]  ;;  %v5352_v29 = vld [vmem:[%s12290_s10 + $0x78] sm:$0xff] }
0x1547   :  { %v5018_v51 = vadd.f32 %v5016_v19, %v4990_v22  ;;  %9095 = vmatprep.subr.bf16.mxu0 %v10378_v12  ;;  %v9102_v22 = vpack.c.bf16 %v5352_v29, %v5351_v41  ;;  %v5353_v19 = vld [vmem:[%s12290_s10 + $0x80] sm:$0xff] }
0x1549   :  { %9604 = vtanh.f32 %v5018_v51  ;;  %v5354_v51 = vld [vmem:[%s12290_s10 + $0x88] sm:$0xff] }
0x154a   :  { %9097 = vmatpush1.bf16.msra.mxu0 %v9096_v5  ;;  %v9105_v40 = vpack.c.bf16 %v5354_v51, %v5353_v19 }
0x154b   :  { %9098 = vmatprep.subr.bf16.mxu0 %v10378_v12 }
0x154e   :  { %9100 = vmatpush1.bf16.msra.mxu0 %v9099_v17 }
0x154f   :  { %v9603_v39 = vpop.eup %9602  ;;  %9101 = vmatprep.subr.bf16.mxu0 %v10378_v12 }
0x1550   :  { %v5021_v11 = vmul.f32 %v9603_v39, %v4981_v43  ;;  %v5355_v39 = vld [vmem:[%s12290_s10 + $0x90] sm:$0xff] }
0x1552   :  { %v11973_v57 = vadd.f32 %v5129_v46, %v5021_v11  ;;  %9103 = vmatpush1.bf16.msra.mxu0 %v9102_v22  ;;  %v5356_v46 = vld [vmem:[%s12290_s10 + $0x98] sm:$0xff] }
0x1553   :  { %v9605_v50 = vpop.eup %9604  ;;  %9104 = vmatprep.subr.bf16.mxu0 %v10378_v12  ;;  %v9108_v11 = vpack.c.bf16 %v5356_v46, %v5355_v39 }
0x1554   :  { %v5022_v26 = vmul.f32 %v9605_v50, %v4986_v45  ;;  %5157 = vrot.lane.b32.xlu0 %v11973_v57, %s10381_s24  ;;  %v5149_v47 = vrot.slane %v11973_v57, 1  ;;  %v5141_v7 = vrot.slane %v11973_v57, 7  ;;  %v5357_v50 = vld [vmem:[%s12290_s10 + $0xa0] sm:$0xff] }
0x1556   :  { %v11978_v36 = vadd.f32 %v5134_v25, %v5022_v26  ;;  %v5146_v27 = vsel %vm563_vm1, 0.0, %v5141_v7  ;;  %9106 = vmatpush1.bf16.msra.mxu0 %v9105_v40  ;;  %v5358_v25 = vld [vmem:[%s12290_s10 + $0xa8] sm:$0xff] }
0x1557   :  { %v5147_v14 = vmul.f32 %v5146_v27, %v11353_v24  ;;  %9107 = vmatprep.subr.bf16.mxu0 %v10378_v12  ;;  %v9111_v26 = vpack.c.bf16 %v5358_v25, %v5357_v50 }
0x1558   :  { %5159 = vrot.lane.b32.xlu1 %v11978_v36, %s10381_s24  ;;  %v5150_v16 = vrot.slane %v11978_v36, 1  ;;  %v5142_v4 = vrot.slane %v11978_v36, 7 }
0x155a   :  { %v5151_v54 = vsel %vm604_vm0, %v5149_v47, %v5150_v16  ;;  %v5154_v31 = vsel %vm604_vm0, %v5150_v16, 0.0  ;;  %v5143_v32 = vsel %vm563_vm1, %v5141_v7, %v5142_v4  ;;  %9109 = vmatpush1.bf16.msra.mxu0 %v9108_v11  ;;  %v5359_v47 = vld [vmem:[%s12290_s10 + $0xb0] sm:$0xff]  ;;  %v5360_v16 = vld [vmem:[%s12290_s10 + $0xb8] sm:$0xff] }
0x155b   :  { %v5155_v18 = vmul.f32 %v5151_v54, %v11348_v60  ;;  %v5156_v33 = vmul.f32 %v5154_v31, %v11361_v52  ;;  %v5148_v34 = vmul.f32 %v5143_v32, %v11358_v42  ;;  %9110 = vmatprep.subr.bf16.mxu0 %v10378_v12  ;;  %v9114_v54 = vpack.c.bf16 %v5360_v16, %v5359_v47 }
0x155d   :  { %6491 = vmatprep.mubr.msk.f32.mxu1 %vm2421_vm9, %v5155_v18  ;;  %v6490_v18 = vld [vmem:[#allocation37] ss:$0 sm:$0xff] }
0x155e   :  { %9112 = vmatpush1.bf16.msra.mxu0 %v9111_v26 }
0x155f   :  { %9113 = vmatprep.subr.bf16.mxu0 %v10378_v12 }
0x1562   :  { %9115 = vmatpush1.bf16.msra.mxu0 %v9114_v54 }
0x15c6   :  { %v5158_v43 = vpop.permute.xlu0 %5157 }
0x15c7   :  { %v5163_v13 = vsel %vm2421_vm9, %v5147_v14, %v5158_v43 }
0x15c8   :  { %5267 = vmatmul.mubr.f32.vlgmr.msra.gmra.mrb[54].mxu1 %v5163_v13 }
0x15c9   :  { %6492 = vmatprep.mubr.msk.f32.mxu1 %vm2421_vm9, %v5156_v33 }
0x15ca   :  { %v5160_v45 = vpop.permute.xlu1 %5159 }
0x15cb   :  { %v5164_v15 = vsel %vm2421_vm9, %v5148_v34, %v5160_v45 }
0x15cc   :  { %5272 = vmatmul.mubr.f32.gmra.mrb[56].mxu1 %v5164_v15 }
0x169b   :  { %v5268_v7 = vpop.f32.mrb[54].mxu1 }
0x169c   :  { %v5269_v27 = vadd.f32 %v6490_v18, %v5268_v7  ;;  %v5270_v4 = vpop.f32.mrb[55].mxu1 }
0x169e   :  { %v5279_v31 = vand.u32 2147483647, %v5269_v27  ;;  %v5277_v61 = vmax.f32 %v5269_v27, 0.0 }
0x169f   :  { %v5273_v14 = vpop.f32.mrb[56].mxu1 }
0x16a0   :  { %v5281_v43 = vsub.f32 0.0, %v5279_v31  ;;  %v5274_v32 = vadd.f32 %v6490_v18, %v5273_v14  ;;  %v5275_v13 = vpop.f32.mrb[57].mxu1  ;;  %v5511_v14 = vld [vmem:[%s12291_s11] sm:$0xff] }
0x16a2   :  { %v5283_v33 = vmul.f32 1.442695, %v5281_v43  ;;  %v5280_v34 = vand.u32 2147483647, %v5274_v32  ;;  %v5278_v23 = vmax.f32 %v5274_v32, 0.0  ;;  %v5512_v43 = vld [vmem:[%s12291_s11 + $0x8] sm:$0xff] }
0x16a3   :  { %v9116_v13 = vpack.c.bf16 %v5512_v43, %v5511_v14 }
0x16a4   :  { %9606 = vpow2.f32 %v5283_v33  ;;  %v5282_v45 = vsub.f32 0.0, %v5280_v34  ;;  %v5514_v33 = vld [vmem:[%s12291_s11 + $0x18] sm:$0xff] }
0x16a5   :  { %v5612_v34 = vld [vmem:[#allocation40] sm:$0xff]  ;;  %9117 = vmatprep.subr.bf16.mxu1 %v9116_v13 }
0x16a6   :  { %v5285_v15 = vmul.f32 1.442695, %v5282_v45  ;;  %v5613_v45 = vld [vmem:[#allocation40 + $0x8] sm:$0xff]  ;;  %9119 = vmatpush3.bf16.msra.mxu1 %v9116_v13 }
0x16a8   :  { %9608 = vpow2.f32 %v5285_v15 }
0x16ae   :  { %v9607_v30 = vpop.eup %9606 }
0x16af   :  { %v5287_v35 = vadd.f32 1.0, %v9607_v30  ;;  %v5290_v21 = vmul.f32 -0.5, %v9607_v30  ;;  %v5293_v56 = vand.u32 2147483647, %v9607_v30 }
0x16b1   :  { %9610 = vlog2.f32 %v5287_v35  ;;  %v5291_v53 = vadd.f32 1.0, %v5290_v21  ;;  %vm5294_vm5 = vcmp.lt.f32.partialorder %v5293_v56, 0.0004427343  ;;  %v5515_v35 = vld [vmem:[%s12291_s11 + $0x20] sm:$0xff]  ;;  %v5615_v21 = vld [vmem:[#allocation40 + $0x18] sm:$0xff] }
0x16b2   :  { %v9609_v12 = vpop.eup %9608  ;;  %v5617_v56 = vld [vmem:[#allocation40 + $0x28] sm:$0xff] }
0x16b3   :  { %v5296_v38 = vadd.f32 1.0, %v9609_v12  ;;  %v5299_v20 = vmul.f32 -0.5, %v9609_v12  ;;  %v5292_v59 = vmul.f32 %v9607_v30, %v5291_v53  ;;  %v5302_v63 = vand.u32 2147483647, %v9609_v12 }
0x16b4   :  { %v9148_v30 = vpack.c.bf16 %v5613_v45, %v5612_v34 }
0x16b5   :  { %9612 = vlog2.f32 %v5296_v38  ;;  %v5300_v37 = vadd.f32 1.0, %v5299_v20  ;;  %vm5303_vm6 = vcmp.lt.f32.partialorder %v5302_v63, 0.0004427343  ;;  %v5614_v38 = vld [vmem:[#allocation40 + $0x10] sm:$0xff]  ;;  %v5616_v20 = vld [vmem:[#allocation40 + $0x20] sm:$0xff]  ;;  %v5619_v63 = vld [vmem:[#allocation40 + $0x38] sm:$0xff] }
0x16b6   :  { %9149 = vmatprep.subr.bf16.mxu0 %v9148_v30  ;;  %v9152_v53 = vpack.c.bf16 %v5615_v21, %v5614_v38 }
0x16b7   :  { %v5301_v5 = vmul.f32 %v9609_v12, %v5300_v37  ;;  %v5516_v12 = vld [vmem:[%s12291_s11 + $0x28] sm:$0xff]  ;;  %v9156_v37 = vpack.c.bf16 %v5617_v56, %v5616_v20 }
0x16bb   :  { %v9611_v58 = vpop.eup %9610 }
0x16bc   :  { %v5289_v28 = vmul.f32 0.6931472, %v9611_v58  ;;  %v9124_v58 = vpack.c.bf16 %v5516_v12, %v5515_v35 }
0x16be   :  { %v5295_v10 = vsel %vm5294_vm5, %v5292_v59, %v5289_v28  ;;  %v5517_v28 = vld [vmem:[%s12291_s11 + $0x30] sm:$0xff]  ;;  %v5518_v59 = vld [vmem:[%s12291_s11 + $0x38] sm:$0xff] }
0x16bf   :  { %v9613_v1 = vpop.eup %9612  ;;  %v5305_v2 = vadd.f32 %v5295_v10, %v5277_v61  ;;  %v5618_v61 = vld [vmem:[#allocation40 + $0x30] sm:$0xff]  ;;  %v9128_v10 = vpack.c.bf16 %v5518_v59, %v5517_v28 }
0x16c0   :  { %v5298_v8 = vmul.f32 0.6931472, %v9613_v1  ;;  %v5519_v1 = vld [vmem:[%s12291_s11 + $0x40] sm:$0xff] }
0x16c1   :  { %9614 = vtanh.f32 %v5305_v2  ;;  %v5520_v2 = vld [vmem:[%s12291_s11 + $0x48] sm:$0xff] }
0x16c2   :  { %v5304_v6 = vsel %vm5303_vm6, %v5301_v5, %v5298_v8  ;;  %v9160_v8 = vpack.c.bf16 %v5619_v63, %v5618_v61  ;;  %v5620_v5 = vld [vmem:[#allocation40 + $0x40] sm:$0xff] }
0x16c3   :  { %v5306_v17 = vadd.f32 %v5304_v6, %v5278_v23  ;;  %v5621_v23 = vld [vmem:[#allocation40 + $0x48] sm:$0xff]  ;;  %v9132_v6 = vpack.c.bf16 %v5520_v2, %v5519_v1  ;;  %v5525_v2 = vld [vmem:[%s12291_s11 + $0x70] sm:$0xff] }
0x16c5   :  { %9616 = vtanh.f32 %v5306_v17  ;;  %v5521_v17 = vld [vmem:[%s12291_s11 + $0x50] sm:$0xff] }
0x16cb   :  { %v9615_v41 = vpop.eup %9614 }
0x16cc   :  { %v5309_v29 = vmul.f32 %v9615_v41, %v5269_v27  ;;  %v5522_v41 = vld [vmem:[%s12291_s11 + $0x58] sm:$0xff] }
0x16ce   :  { %5329 = vrot.lane.b32.xlu0 %v5309_v29, %s10381_s24  ;;  %v5313_v51 = vrot.slane %v5309_v29, 7  ;;  %v5321_v40 = vrot.slane %v5309_v29, 1  ;;  %v9164_v29 = vpack.c.bf16 %v5621_v23, %v5620_v5  ;;  %v5624_v23 = vld [vmem:[#allocation40 + $0x60] sm:$0xff] }
0x16cf   :  { %v9617_v22 = vpop.eup %9616 }
0x16d0   :  { %v5310_v19 = vmul.f32 %v9617_v22, %v5274_v32  ;;  %v5318_v26 = vsel %vm563_vm1, 0.0, %v5313_v51  ;;  %v5513_v32 = vld [vmem:[%s12291_s11 + $0x10] sm:$0xff]  ;;  %v5622_v22 = vld [vmem:[#allocation40 + $0x50] sm:$0xff] }
0x16d1   :  { %v5319_v16 = vmul.f32 %v5318_v26, %v11353_v24  ;;  %v9120_v15 = vpack.c.bf16 %v5514_v33, %v5513_v32 }
0x16d2   :  { %5331 = vrot.lane.b32.xlu1 %v5310_v19, %s10381_s24  ;;  %v5314_v39 = vrot.slane %v5310_v19, 7  ;;  %v5322_v46 = vrot.slane %v5310_v19, 1  ;;  %v5623_v19 = vld [vmem:[#allocation40 + $0x58] sm:$0xff] }
0x16d3   :  { %9121 = vmatprep.subr.bf16.mxu1 %v9120_v15 }
0x16d4   :  { %v5323_v11 = vsel %vm604_vm0, %v5321_v40, %v5322_v46  ;;  %v5315_v50 = vsel %vm563_vm1, %v5313_v51, %v5314_v39  ;;  %v5326_v47 = vsel %vm604_vm0, %v5322_v46, 0.0  ;;  %9123 = vmatpush3.bf16.msra.mxu1 %v9120_v15  ;;  %v9136_v51 = vpack.c.bf16 %v5522_v41, %v5521_v17  ;;  %v5523_v40 = vld [vmem:[%s12291_s11 + $0x60] sm:$0xff]  ;;  %v5524_v39 = vld [vmem:[%s12291_s11 + $0x68] sm:$0xff] }
0x16d5   :  { %v5327_v25 = vmul.f32 %v5323_v11, %v11348_v60  ;;  %v5328_v7 = vmul.f32 %v5326_v47, %v11361_v52  ;;  %v5320_v27 = vmul.f32 %v5315_v50, %v11358_v42  ;;  %9125 = vmatprep.subr.bf16.mxu1 %v9124_v58  ;;  %v9168_v46 = vpack.c.bf16 %v5623_v19, %v5622_v22  ;;  %v6493_v50 = vld [vmem:[#allocation39] ss:$0 sm:$0xff] }
0x16d6   :  { %v9140_v11 = vpack.c.bf16 %v5524_v39, %v5523_v40  ;;  %v5627_v22 = vld [vmem:[#allocation40 + $0x78] sm:$0xff] }
0x16d7   :  { %6494 = vmatprep.mubr.msk.f32.mxu0 %vm2421_vm9, %v5327_v25 }
0x16d8   :  { %9127 = vmatpush3.bf16.msra.mxu1 %v9124_v58 }
0x16d9   :  { %9129 = vmatprep.subr.bf16.mxu1 %v9128_v10 }
0x16dc   :  { %9131 = vmatpush3.bf16.msra.mxu1 %v9128_v10 }
0x16dd   :  { %9133 = vmatprep.subr.bf16.mxu1 %v9132_v6 }
0x16e0   :  { %9135 = vmatpush3.bf16.msra.mxu1 %v9132_v6  ;;  %v5625_v6 = vld [vmem:[#allocation40 + $0x68] sm:$0xff] }
0x16e1   :  { %9137 = vmatprep.subr.bf16.mxu1 %v9136_v51  ;;  %v9172_v17 = vpack.c.bf16 %v5625_v6, %v5624_v23 }
0x16e4   :  { %9139 = vmatpush3.bf16.msra.mxu1 %v9136_v51 }
0x16e5   :  { %9141 = vmatprep.subr.bf16.mxu1 %v9140_v11 }
0x16e8   :  { %9143 = vmatpush3.bf16.msra.mxu1 %v9140_v11 }
0x1740   :  { %v5330_v54 = vpop.permute.xlu0 %5329 }
0x1741   :  { %v5335_v18 = vsel %vm2421_vm9, %v5319_v16, %v5330_v54 }
0x1742   :  { %5439 = vmatmul.mubr.f32.vlgmr.msra.gmra.mrb[74].mxu0 %v5335_v18 }
0x1743   :  { %6495 = vmatprep.mubr.msk.f32.mxu0 %vm2421_vm9, %v5328_v7  ;;  %9151 = vmatpush3.bf16.msra.mxu0 %v9148_v30 }
0x1744   :  { %v5332_v4 = vpop.permute.xlu1 %5331  ;;  %9153 = vmatprep.subr.bf16.mxu0 %v9152_v53 }
0x1745   :  { %v5336_v31 = vsel %vm2421_vm9, %v5320_v27, %v5332_v4 }
0x1746   :  { %5444 = vmatmul.mubr.f32.gmra.mrb[76].mxu0 %v5336_v31 }
0x1747   :  { %9155 = vmatpush3.bf16.msra.mxu0 %v9152_v53 }
0x1748   :  { %9157 = vmatprep.subr.bf16.mxu0 %v9156_v37 }
0x174b   :  { %9159 = vmatpush3.bf16.msra.mxu0 %v9156_v37 }
0x174c   :  { %9161 = vmatprep.subr.bf16.mxu0 %v9160_v8 }
0x174f   :  { %9163 = vmatpush3.bf16.msra.mxu0 %v9160_v8  ;;  %v5526_v8 = vld [vmem:[%s12291_s11 + $0x78] sm:$0xff] }
0x1750   :  { %9165 = vmatprep.subr.bf16.mxu0 %v9164_v29  ;;  %v9144_v5 = vpack.c.bf16 %v5526_v8, %v5525_v2  ;;  %v5957_v2 = vld [vmem:[%s12292_s25 + $0x28] sm:$0xff]  ;;  %v5974_v8 = vld [vmem:[%s12292_s25 + $0xb0] sm:$0xff] }
0x1752   :  { %9145 = vmatprep.subr.bf16.mxu1 %v9144_v5 }
0x1753   :  { %9167 = vmatpush3.bf16.msra.mxu0 %v9164_v29  ;;  %9147 = vmatpush3.bf16.msra.mxu1 %v9144_v5  ;;  %v5626_v29 = vld [vmem:[#allocation40 + $0x70] sm:$0xff]  ;;  %v5975_v5 = vld [vmem:[%s12292_s25 + $0xb8] sm:$0xff] }
0x1754   :  { %9169 = vmatprep.subr.bf16.mxu0 %v9168_v46  ;;  %v9176_v51 = vpack.c.bf16 %v5627_v22, %v5626_v29  ;;  %v9200_v6 = vpack.c.bf16 %v5975_v5, %v5974_v8  ;;  %v5976_v29 = vld [vmem:[%s12292_s25 + $0xc0] sm:$0xff]  ;;  %v5977_v22 = vld [vmem:[%s12292_s25 + $0xc8] sm:$0xff]  ;;  %v5982_v8 = vld [vmem:[%s12292_s25 + $0xf0] sm:$0xff] }
0x1755   :  { %v5983_v5 = vld [vmem:[%s12292_s25 + $0xf8] sm:$0xff] }
0x1757   :  { %9171 = vmatpush3.bf16.msra.mxu0 %v9168_v46 }
0x1758   :  { %9173 = vmatprep.subr.bf16.mxu0 %v9172_v17 }
0x175b   :  { %9175 = vmatpush3.bf16.msra.mxu0 %v9172_v17  ;;  %v5958_v17 = vld [vmem:[%s12292_s25 + $0x30] sm:$0xff] }
0x175c   :  { %9177 = vmatprep.subr.bf16.mxu0 %v9176_v51 }
0x175f   :  { %9179 = vmatpush3.bf16.msra.mxu0 %v9176_v51  ;;  %v9204_v51 = vpack.c.bf16 %v5977_v22, %v5976_v29  ;;  %v5967_v29 = vld [vmem:[%s12292_s25 + $0x78] sm:$0xff] }
0x1815   :  { %v5440_v25 = vpop.f32.mrb[74].mxu0 }
0x1816   :  { %v5441_v26 = vadd.f32 %v6493_v50, %v5440_v25  ;;  %v5442_v47 = vpop.f32.mrb[75].mxu0 }
0x1818   :  { %v5451_v16 = vand.u32 2147483647, %v5441_v26  ;;  %v5449_v20 = vmax.f32 %v5441_v26, 0.0 }
0x1819   :  { %v5445_v54 = vpop.f32.mrb[76].mxu0 }
0x181a   :  { %v5453_v18 = vsub.f32 0.0, %v5451_v16  ;;  %v5446_v7 = vadd.f32 %v6493_v50, %v5445_v54  ;;  %v5447_v27 = vpop.f32.mrb[77].mxu0 }
0x181c   :  { %v5455_v4 = vmul.f32 1.442695, %v5453_v18  ;;  %v5452_v31 = vand.u32 2147483647, %v5446_v7  ;;  %v5450_v63 = vmax.f32 %v5446_v7, 0.0 }
0x181e   :  { %9618 = vpow2.f32 %v5455_v4  ;;  %v5454_v14 = vsub.f32 0.0, %v5452_v31 }
0x1820   :  { %v5457_v43 = vmul.f32 1.442695, %v5454_v14 }
0x1822   :  { %9620 = vpow2.f32 %v5457_v43 }
0x1828   :  { %v9619_v32 = vpop.eup %9618 }
0x1829   :  { %v5459_v13 = vadd.f32 1.0, %v9619_v32  ;;  %v5462_v45 = vmul.f32 -0.5, %v9619_v32  ;;  %v5465_v35 = vand.u32 2147483647, %v9619_v32 }
0x182b   :  { %9622 = vlog2.f32 %v5459_v13  ;;  %v5463_v15 = vadd.f32 1.0, %v5462_v45  ;;  %vm5466_vm7 = vcmp.lt.f32.partialorder %v5465_v35, 0.0004427343  ;;  %v5969_v35 = vld [vmem:[%s12292_s25 + $0x88] sm:$0xff] }
0x182c   :  { %v9621_v33 = vpop.eup %9620 }
0x182d   :  { %v5468_v34 = vadd.f32 1.0, %v9621_v33  ;;  %v5471_v30 = vmul.f32 -0.5, %v9621_v33  ;;  %v5464_v21 = vmul.f32 %v9619_v32, %v5463_v15  ;;  %v5474_v56 = vand.u32 2147483647, %v9621_v33 }
0x182f   :  { %9624 = vlog2.f32 %v5468_v34  ;;  %v5472_v53 = vadd.f32 1.0, %v5471_v30  ;;  %vm5475_vm8 = vcmp.lt.f32.partialorder %v5474_v56, 0.0004427343  ;;  %v5968_v30 = vld [vmem:[%s12292_s25 + $0x80] sm:$0xff] }
0x1831   :  { %v5473_v61 = vmul.f32 %v9621_v33, %v5472_v53  ;;  %v5970_v53 = vld [vmem:[%s12292_s25 + $0x90] sm:$0xff] }
0x1835   :  { %v9623_v12 = vpop.eup %9622 }
0x1836   :  { %v5461_v38 = vmul.f32 0.6931472, %v9623_v12  ;;  %v5952_v12 = vld [vmem:[%s12292_s25] sm:$0xff] }
0x1838   :  { %v5467_v58 = vsel %vm5466_vm7, %v5464_v21, %v5461_v38  ;;  %v9188_v38 = vpack.c.bf16 %v5969_v35, %v5968_v30  ;;  %v5953_v21 = vld [vmem:[%s12292_s25 + $0x8] sm:$0xff]  ;;  %v5706_v30 = vld [vmem:[%s10650_s12 + $0x18] sm:$0xff] }
0x1839   :  { %v9625_v28 = vpop.eup %9624  ;;  %v5477_v59 = vadd.f32 %v5467_v58, %v5449_v20  ;;  %v5971_v20 = vld [vmem:[%s12292_s25 + $0x98] sm:$0xff]  ;;  %v9190_v56 = vpack.c.bf16 %v5953_v21, %v5952_v12  ;;  %v5990_v12 = vld [vmem:[%s12292_s25 + $0x130] sm:$0xff] }
0x183a   :  { %v5470_v37 = vmul.f32 0.6931472, %v9625_v28  ;;  %v9192_v58 = vpack.c.bf16 %v5971_v20, %v5970_v53  ;;  %v5954_v28 = vld [vmem:[%s12292_s25 + $0x10] sm:$0xff]  ;;  %9189 = vmatprep.subr.bf16.mxu0 %v9188_v38  ;;  %v5991_v38 = vld [vmem:[%s12292_s25 + $0x138] sm:$0xff]  ;;  %v5992_v53 = vld [vmem:[%s12292_s25 + $0x140] sm:$0xff] }
0x183b   :  { %9626 = vtanh.f32 %v5477_v59  ;;  %v5955_v59 = vld [vmem:[%s12292_s25 + $0x18] sm:$0xff]  ;;  %v9232_v21 = vpack.c.bf16 %v5991_v38, %v5990_v12  ;;  %v5993_v20 = vld [vmem:[%s12292_s25 + $0x148] sm:$0xff] }
0x183c   :  { %v5476_v10 = vsel %vm5475_vm8, %v5473_v61, %v5470_v37  ;;  %v5972_v37 = vld [vmem:[%s12292_s25 + $0xa0] sm:$0xff]  ;;  %v5973_v61 = vld [vmem:[%s12292_s25 + $0xa8] sm:$0xff] }
0x183d   :  { %v5478_v1 = vadd.f32 %v5476_v10, %v5450_v63  ;;  %v9194_v63 = vpack.c.bf16 %v5955_v59, %v5954_v28  ;;  %v9196_v10 = vpack.c.bf16 %v5973_v61, %v5972_v37  ;;  %v5981_v28 = vld [vmem:[%s12292_s25 + $0xe8] sm:$0xff]  ;;  %v5994_v59 = vld [vmem:[%s12292_s25 + $0x150] sm:$0xff]  ;;  %v5995_v61 = vld [vmem:[%s12292_s25 + $0x158] sm:$0xff] }
0x183f   :  { %9628 = vtanh.f32 %v5478_v1  ;;  %v5956_v1 = vld [vmem:[%s12292_s25 + $0x20] sm:$0xff] }
0x1840   :  { %v9198_v23 = vpack.c.bf16 %v5957_v2, %v5956_v1  ;;  %v9240_v1 = vpack.c.bf16 %v5995_v61, %v5994_v59 }
0x1845   :  { %v9627_v41 = vpop.eup %9626 }
0x1846   :  { %v5481_v19 = vmul.f32 %v9627_v41, %v5441_v26  ;;  %v5959_v41 = vld [vmem:[%s12292_s25 + $0x38] sm:$0xff] }
0x1848   :  { %v5483_v39 = vadd.f32 %v5481_v19, %v11973_v57  ;;  %v9202_v19 = vpack.c.bf16 %v5959_v41, %v5958_v17  ;;  %v5997_v17 = vld [vmem:[%s12292_s25 + $0x168] sm:$0xff]  ;;  %v5966_v41 = vld [vmem:[%s12292_s25 + $0x70] sm:$0xff] }
0x1849   :  { %v9629_v40 = vpop.eup %9628 }
0x184a   :  { %v5482_v46 = vmul.f32 %v9629_v40, %v5446_v7  ;;  %v5495_v25 = vrot.slane %v5483_v39, 1  ;;  %v5487_v57 = vrot.slane %v5483_v39, 7  ;;  %v5960_v40 = vld [vmem:[%s12292_s25 + $0x40] sm:$0xff] }
0x184c   :  { %v5484_v11 = vadd.f32 %v5482_v46, %v11978_v36  ;;  %v5492_v4 = vsel %vm563_vm1, 0.0, %v5487_v57  ;;  %v5978_v46 = vld [vmem:[%s12292_s25 + $0xd0] sm:$0xff] }
0x184e   :  { %v9385_v50 = vpack.i.bf16 %v5484_v11, %v5483_v39  ;;  %v5496_v47 = vrot.slane %v5484_v11, 1  ;;  %v5488_v7 = vrot.slane %v5484_v11, 7 }
0x1850   :  { %9386 = vrot.lane.b32.xlu1 %v9385_v50, %s10381_s24  ;;  %v5497_v16 = vsel %vm604_vm0, %v5495_v25, %v5496_v47  ;;  %v5500_v54 = vsel %vm604_vm0, %v5496_v47, 0.0  ;;  %v5489_v36 = vsel %vm563_vm1, %v5487_v57, %v5488_v7  ;;  %v5962_v47 = vld [vmem:[%s12292_s25 + $0x50] sm:$0xff] }
0x1851   :  { %v5501_v26 = vmul.f32 %v5497_v16, %v11348_v60  ;;  %v5502_v18 = vmul.f32 %v5500_v54, %v11361_v52  ;;  %v5494_v32 = vmul.f32 %v5489_v36, %v11358_v42  ;;  %v5493_v60 = vmul.f32 %v5492_v4, %v11353_v24  ;;  %v5707_v24 = vld [vmem:[%s10655_s14] sm:$0xff]  ;;  %v5963_v16 = vld [vmem:[%s12292_s25 + $0x58] sm:$0xff] }
0x1852   :  { %v9210_v54 = vpack.c.bf16 %v5963_v16, %v5962_v47  ;;  %v5984_v4 = vld [vmem:[%s12292_s25 + $0x100] sm:$0xff] }
0x1853   :  { %v9380_v27 = vpack.i.bf16 %v5502_v18, %v5501_v26 }
0x1855   :  { %9381 = vrot.lane.b32.xlu0 %v9380_v27, %s10381_s24 }
0x18c2   :  { %v9387_v31 = vpop.permute.xlu1 %9386 }
0x18c3   :  { %v9389_v14 = vunpack.i.h.bf16 %v9387_v31  ;;  %v9388_v43 = vunpack.i.l.bf16 %v9387_v31  ;;  %v5985_v31 = vld [vmem:[%s12292_s25 + $0x108] sm:$0xff] }
0x18c5   :  { %v5510_v52 = vsel %vm2421_vm9, %v5494_v32, %v9389_v14  ;;  %v5509_v13 = vsel %vm2421_vm9, %v5493_v60, %v9388_v43  ;;  %v5708_v14 = vld [vmem:[%s10655_s14 + $0x8] sm:$0xff]  ;;  %v5709_v43 = vld [vmem:[%s10655_s14 + $0x10] sm:$0xff]  ;;  %v9220_v32 = vpack.c.bf16 %v5985_v31, %v5984_v4  ;;  %v5710_v60 = vld [vmem:[%s10655_s14 + $0x18] sm:$0xff] }
0x18c6   :  { %7935 = vmatprep.mubr.f32.mxu1 %v5509_v13  ;;  %v5986_v13 = vld [vmem:[%s12292_s25 + $0x110] sm:$0xff] }
0x18c7   :  { %v9382_v33 = vpop.permute.xlu0 %9381  ;;  %7936 = vmatmul.mubr.f32.vlgmr.msra.gmra.mrb[58].mxu1 %v5510_v52  ;;  %v5703_v52 = vld [vmem:[%s10650_s12] sm:$0xff] }
0x18c8   :  { %v9384_v34 = vunpack.i.h.bf16 %v9382_v33  ;;  %v9383_v45 = vunpack.i.l.bf16 %v9382_v33  ;;  %7977 = vmatprep.mubr.msk.f32.mxu1 %vm708_vm3, %v5707_v24  ;;  %v5987_v33 = vld [vmem:[%s12292_s25 + $0x118] sm:$0xff]  ;;  %v5989_v24 = vld [vmem:[%s12292_s25 + $0x128] sm:$0xff] }
0x18ca   :  { %v5611_v15 = vsel %vm2421_vm9, %v5484_v11, %v9384_v34  ;;  %v5610_v42 = vsel %vm2421_vm9, %v5483_v39, %v9383_v45  ;;  %v5961_v39 = vld [vmem:[%s12292_s25 + $0x48] sm:$0xff]  ;;  %v5979_v11 = vld [vmem:[%s12292_s25 + $0xd8] sm:$0xff]  ;;  %v5705_v45 = vld [vmem:[%s10650_s12 + $0x10] sm:$0xff] }
0x18cb   :  { %7970 = vmatprep.mubr.f32.mxu0 %v5610_v42  ;;  %v9206_v50 = vpack.c.bf16 %v5961_v39, %v5960_v40  ;;  %v9208_v25 = vpack.c.bf16 %v5979_v11, %v5978_v46  ;;  %v5704_v34 = vld [vmem:[%s10650_s12 + $0x8] sm:$0xff]  ;;  %v5988_v42 = vld [vmem:[%s12292_s25 + $0x120] sm:$0xff]  ;;  %v5999_v40 = vld [vmem:[%s12292_s25 + $0x178] sm:$0xff] }
0x18cc   :  { %7971 = vmatmul.mubr.f32.vlgmr.msra.gmra.mrb[78].mxu0 %v5611_v15  ;;  %v9224_v15 = vpack.c.bf16 %v5987_v33, %v5986_v13  ;;  %v9228_v35 = vpack.c.bf16 %v5989_v24, %v5988_v42  ;;  %v6504_v46 = vld [vmem:[#allocation42] ss:$0 sm:$0xff] }
0x18cd   :  { %9191 = vmatpush3.bf16.msra.mxu0 %v9190_v56  ;;  %v9236_v56 = vpack.c.bf16 %v5993_v20, %v5992_v53  ;;  %v6248_v53 = vld [vmem:[#allocation21 + $0x18] sm:$0xff] }
0x18ce   :  { %9193 = vmatprep.subr.bf16.mxu0 %v9192_v58  ;;  %v5980_v58 = vld [vmem:[%s12292_s25 + $0xe0] sm:$0xff] }
0x18cf   :  { %v9212_v37 = vpack.c.bf16 %v5981_v28, %v5980_v58  ;;  %v6252_v28 = vld [vmem:[#allocation21 + $0x38] sm:$0xff] }
0x18d1   :  { %9195 = vmatpush3.bf16.msra.mxu0 %v9194_v63  ;;  %v5964_v63 = vld [vmem:[%s12292_s25 + $0x60] sm:$0xff] }
0x18d2   :  { %9197 = vmatprep.subr.bf16.mxu0 %v9196_v10  ;;  %v5965_v10 = vld [vmem:[%s12292_s25 + $0x68] sm:$0xff] }
0x18d3   :  { %v9214_v2 = vpack.c.bf16 %v5965_v10, %v5964_v63  ;;  %v6255_v63 = vld [vmem:[#allocation21 + $0x50] sm:$0xff]  ;;  %v6256_v10 = vld [vmem:[#allocation21 + $0x58] sm:$0xff] }
0x18d5   :  { %9199 = vmatpush3.bf16.msra.mxu0 %v9198_v23  ;;  %v5996_v23 = vld [vmem:[%s12292_s25 + $0x160] sm:$0xff] }
0x18d6   :  { %9201 = vmatprep.subr.bf16.mxu0 %v9200_v6  ;;  %v9216_v6 = vpack.c.bf16 %v5983_v5, %v5982_v8  ;;  %v9244_v22 = vpack.c.bf16 %v5997_v17, %v5996_v23  ;;  %v6258_v8 = vld [vmem:[#allocation21 + $0x68] sm:$0xff]  ;;  %v6259_v23 = vld [vmem:[#allocation21 + $0x70] sm:$0xff] }
0x18d9   :  { %9203 = vmatpush3.bf16.msra.mxu0 %v9202_v19  ;;  %v9218_v19 = vpack.c.bf16 %v5967_v29, %v5966_v41 }
0x18da   :  { %9205 = vmatprep.subr.bf16.mxu0 %v9204_v51  ;;  %v5998_v51 = vld [vmem:[%s12292_s25 + $0x170] sm:$0xff] }
0x18db   :  { %v9248_v39 = vpack.c.bf16 %v5999_v40, %v5998_v51 }
0x18dd   :  { %9207 = vmatpush3.bf16.msra.mxu0 %v9206_v50 }
0x18de   :  { %9209 = vmatprep.subr.bf16.mxu0 %v9208_v25 }
0x18e1   :  { %9211 = vmatpush3.bf16.msra.mxu0 %v9210_v54 }
0x18e2   :  { %9213 = vmatprep.subr.bf16.mxu0 %v9212_v37  ;;  %v6254_v37 = vld [vmem:[#allocation21 + $0x48] sm:$0xff] }
0x18e5   :  { %9215 = vmatpush3.bf16.msra.mxu0 %v9214_v2  ;;  %v6257_v2 = vld [vmem:[#allocation21 + $0x60] sm:$0xff] }
0x18e6   :  { %9217 = vmatprep.subr.bf16.mxu0 %v9216_v6  ;;  %v9276_v5 = vpack.c.bf16 %v6258_v8, %v6257_v2  ;;  %v6260_v6 = vld [vmem:[#allocation21 + $0x78] sm:$0xff] }
0x18e7   :  { %v9280_v17 = vpack.c.bf16 %v6260_v6, %v6259_v23 }
0x18e9   :  { %9219 = vmatpush3.bf16.msra.mxu0 %v9218_v19 }
0x199a   :  { %v7937_v26 = vpop.f32.mrb[58].mxu1 }
0x199b   :  { %v5593_v18 = vpop.f32.mrb[59].mxu1 }
0x199c   :  { %v9184_v27 = vpack.c.bf16 %v7937_v26, %v5593_v18 }
0x199f   :  { %v7972_v57 = vpop.f32.mrb[78].mxu0 }
0x19a0   :  { %v5694_v7 = vpop.f32.mrb[79].mxu0 }
0x19a1   :  { %v9180_v36 = vpack.c.bf16 %v7972_v57, %v5694_v7 }
0x19a3   :  { %9181 = vmatprep.subr.bf16.mxu1 %v9180_v36 }
0x19a4   :  { %9183 = vmatpush3.bf16.msra.mxu1 %v9180_v36 }
0x19a5   :  { %9185 = vmatprep.subr.bf16.mxu1 %v9184_v27 }
0x19a7   :  { %7978 = vmatmul.mubr.msk.f32.vlgmr.msra.gmra.mrb[60].mxu1 %vm708_vm3, %v5708_v14 }
0x19a8   :  { %9187 = vmatpush3.bf16.msra.mxu1 %v9184_v27  ;;  %7980 = vmatprep.mubr.msk.f32.mxu1 %vm708_vm3, %v5709_v43 }
0x19a9   :  { %9221 = vmatprep.subr.bf16.mxu1 %v9220_v32 }
0x19ab   :  { %7981 = vmatmul.mubr.msk.f32.gmra.mrb[62].mxu1 %vm708_vm3, %v5710_v60 }
0x19ac   :  { %7987 = vmatprep.mubr.msk.f32.mxu1 %vm708_vm3, %v5703_v52 }
0x19af   :  { %7988 = vmatmul.mubr.msk.f32.vlgmr.msra.gmra.mrb[60].mxu1 %vm708_vm3, %v5704_v34 }
0x19b0   :  { %7990 = vmatprep.mubr.msk.f32.mxu1 %vm708_vm3, %v5705_v45  ;;  %9223 = vmatpush3.bf16.msra.mxu1 %v9220_v32 }
0x19b1   :  { %9225 = vmatprep.subr.bf16.mxu1 %v9224_v15 }
0x19b3   :  { %7991 = vmatmul.mubr.msk.f32.gmra.mrb[62].mxu1 %vm708_vm3, %v5706_v30 }
0x19b4   :  { %9227 = vmatpush3.bf16.msra.mxu1 %v9224_v15 }
0x19b5   :  { %9229 = vmatprep.subr.bf16.mxu1 %v9228_v35 }
0x19b8   :  { %9231 = vmatpush3.bf16.msra.mxu1 %v9228_v35 }
0x19b9   :  { %9233 = vmatprep.subr.bf16.mxu1 %v9232_v21 }
0x19bc   :  { %9235 = vmatpush3.bf16.msra.mxu1 %v9232_v21  ;;  %v6247_v21 = vld [vmem:[#allocation21 + $0x10] sm:$0xff] }
0x19bd   :  { %9237 = vmatprep.subr.bf16.mxu1 %v9236_v56  ;;  %v9256_v20 = vpack.c.bf16 %v6248_v53, %v6247_v21 }
0x19c0   :  { %9239 = vmatpush3.bf16.msra.mxu1 %v9236_v56  ;;  %v6249_v56 = vld [vmem:[#allocation21 + $0x20] sm:$0xff] }
0x19c1   :  { %9241 = vmatprep.subr.bf16.mxu1 %v9240_v1 }
0x19c4   :  { %9243 = vmatpush3.bf16.msra.mxu1 %v9240_v1  ;;  %v9272_v1 = vpack.c.bf16 %v6256_v10, %v6255_v63 }
0x19c5   :  { %9245 = vmatprep.subr.bf16.mxu1 %v9244_v22 }
0x19c8   :  { %9247 = vmatpush3.bf16.msra.mxu1 %v9244_v22  ;;  %v6505_v22 = vld [vmem:[#allocation19] ss:$0 sm:$0xff] }
0x19c9   :  { %9249 = vmatprep.subr.bf16.mxu1 %v9248_v39 }
0x19cc   :  { %9251 = vmatpush3.bf16.msra.mxu1 %v9248_v39 }
0x1a82   :  { %v7989_v11 = vpop.f32.mrb[60].mxu1 }
0x1a83   :  { %v5913_v50 = vadd.f32 %v7989_v11, %v6504_v46  ;;  %v5886_v25 = vpop.f32.mrb[61].mxu1 }
0x1a84   :  { %v5912_v47 = vadd.f32 %v6504_v46, %v5886_v25 }
0x1a85   :  { %v5921_v16 = vrot.slane %v5913_v50, 7  ;;  %v5937_v54 = vrot.slane %v5913_v50, 1 }
0x1a86   :  { %v5920_v26 = vrot.slane %v5912_v47, 7  ;;  %v5936_v18 = vrot.slane %v5912_v47, 1  ;;  %v7992_v27 = vpop.f32.mrb[62].mxu1  ;;  %6071 = vmatprep.mubr.f32.mxu0 %v5912_v47 }
0x1a87   :  { %v5915_v57 = vadd.f32 %v7992_v27, %v6504_v46  ;;  %v5896_v7 = vpop.f32.mrb[63].mxu1 }
0x1a88   :  { %v5931_v36 = vsel %vm563_vm1, 0.0, %v5920_v26  ;;  %v5914_v4 = vadd.f32 %v6504_v46, %v5896_v7  ;;  %v5938_v31 = vsel %vm604_vm0, %v5936_v18, %v5937_v54  ;;  %v5922_v14 = vsel %vm563_vm1, %v5920_v26, %v5921_v16 }
0x1a89   :  { %v5925_v43 = vrot.slane %v5915_v57, 7  ;;  %v5941_v32 = vrot.slane %v5915_v57, 1  ;;  %v5932_v60 = vmul.f32 %v5931_v36, %v10899_v62  ;;  %v5948_v52 = vmul.f32 %v5938_v31, %v10872_v44 }
0x1a8a   :  { %v5923_v13 = vrot.slane %v5914_v4, 7  ;;  %v5939_v33 = vrot.slane %v5914_v4, 1  ;;  %v5933_v24 = vmul.f32 %v5922_v14, %v10902_v0  ;;  %v6245_v0 = vld [vmem:[#allocation21] sm:$0xff] }
0x1a8b   :  { %6072 = vmatmul.mubr.f32.vlgmr.msra.gmra.mrb[80].mxu0 %v5932_v60  ;;  %8025 = vmatprep.mubr.f32.mxu1 %v5948_v52  ;;  %v5947_v44 = vsel %vm604_vm0, %v5941_v32, 0.0 }
0x1a8c   :  { %v5940_v34 = vsel %vm604_vm0, %v5937_v54, %v5939_v33  ;;  %6076 = vmatprep.mubr.f32.mxu0 %v5913_v50  ;;  %v5942_v45 = vsel %vm604_vm0, %v5939_v33, %v5941_v32  ;;  %v5924_v15 = vsel %vm563_vm1, %v5921_v16, %v5923_v13  ;;  %v5926_v62 = vsel %vm563_vm1, %v5923_v13, %v5925_v43 }
0x1a8d   :  { %v5949_v42 = vmul.f32 %v5940_v34, %v10879_v49  ;;  %v5950_v30 = vmul.f32 %v5942_v45, %v10877_v48  ;;  %v5934_v35 = vmul.f32 %v5924_v15, %v10912_v9  ;;  %v5951_v12 = vmul.f32 %v5947_v44, %v10886_v55  ;;  %v6246_v48 = vld [vmem:[#allocation21 + $0x8] sm:$0xff]  ;;  %v6251_v55 = vld [vmem:[#allocation21 + $0x30] sm:$0xff] }
0x1a8e   :  { %v5935_v49 = vmul.f32 %v5926_v62, %v10906_v3  ;;  %v9252_v38 = vpack.c.bf16 %v6246_v48, %v6245_v0  ;;  %v6250_v9 = vld [vmem:[#allocation21 + $0x28] sm:$0xff]  ;;  %v9264_v59 = vpack.c.bf16 %v6252_v28, %v6251_v55  ;;  %v6253_v3 = vld [vmem:[#allocation21 + $0x40] sm:$0xff] }
0x1a8f   :  { %6077 = vmatmul.mubr.f32.gmra.mrb[82].mxu0 %v5933_v24  ;;  %8026 = vmatmul.mubr.f32.vlgmr.msra.gmra.mrb[64].mxu1 %v5949_v42  ;;  %v9260_v58 = vpack.c.bf16 %v6250_v9, %v6249_v56  ;;  %v9268_v61 = vpack.c.bf16 %v6254_v37, %v6253_v3 }
0x1a90   :  { %6081 = vmatprep.mubr.f32.mxu0 %v5914_v4  ;;  %8028 = vmatprep.mubr.f32.mxu1 %v5950_v30 }
0x1a91   :  { %9253 = vmatprep.subr.bf16.mxu0 %v9252_v38 }
0x1a92   :  { %9255 = vmatpush3.bf16.msra.mxu0 %v9252_v38 }
0x1a93   :  { %6082 = vmatmul.mubr.f32.gmra.mrb[84].mxu0 %v5934_v35  ;;  %8029 = vmatmul.mubr.f32.gmra.mrb[66].mxu1 %v5951_v12 }
0x1a94   :  { %6086 = vmatprep.mubr.f32.mxu0 %v5915_v57  ;;  %9257 = vmatprep.subr.bf16.mxu0 %v9256_v20 }
0x1a96   :  { %9259 = vmatpush3.bf16.msra.mxu0 %v9256_v20 }
0x1a97   :  { %6087 = vmatmul.mubr.f32.gmra.mrb[86].mxu0 %v5935_v49  ;;  %9261 = vmatprep.subr.bf16.mxu0 %v9260_v58 }
0x1a9a   :  { %9263 = vmatpush3.bf16.msra.mxu0 %v9260_v58 }
0x1a9b   :  { %9265 = vmatprep.subr.bf16.mxu0 %v9264_v59 }
0x1a9e   :  { %9267 = vmatpush3.bf16.msra.mxu0 %v9264_v59 }
0x1a9f   :  { %9269 = vmatprep.subr.bf16.mxu0 %v9268_v61 }
0x1aa2   :  { %9271 = vmatpush3.bf16.msra.mxu0 %v9268_v61 }
0x1aa3   :  { %9273 = vmatprep.subr.bf16.mxu0 %v9272_v1 }
0x1aa6   :  { %9275 = vmatpush3.bf16.msra.mxu0 %v9272_v1 }
0x1aa7   :  { %9277 = vmatprep.subr.bf16.mxu0 %v9276_v5 }
0x1aaa   :  { %9279 = vmatpush3.bf16.msra.mxu0 %v9276_v5 }
0x1aab   :  { %9281 = vmatprep.subr.bf16.mxu0 %v9280_v17 }
0x1aae   :  { %9283 = vmatpush3.bf16.msra.mxu0 %v9280_v17 }
0x1b5e   :  { %v7409_v41 = vpop.f32.mrb[80].mxu0 }
0x1b5f   :  { %v7410_v29 = vpop.f32.mrb[81].mxu0 }
0x1b60   :  { %v7411_v19 = vadd.f32 %v7410_v29, %v7409_v41 }
0x1b62   :  { %v7412_v51 = vpop.f32.mrb[82].mxu0  ;;  %v8027_v40 = vpop.f32.mrb[64].mxu1  ;;  %v6074_v39 = vadd.f32 %v7411_v19, %v6505_v22 }
0x1b63   :  { %v7413_v46 = vpop.f32.mrb[83].mxu0  ;;  %v6158_v11 = vpop.f32.mrb[65].mxu1 }
0x1b64   :  { %v7414_v50 = vadd.f32 %v7413_v46, %v7412_v51  ;;  %v12159_v25 = vadd.f32 %v6158_v11, %v6074_v39 }
0x1b66   :  { %v6079_v47 = vadd.f32 %v7414_v50, %v6505_v22  ;;  %v6181_v16 = vand.u32 2147483647, %v12159_v25  ;;  %v7415_v54 = vpop.f32.mrb[84].mxu0  ;;  %v8030_v26 = vpop.f32.mrb[66].mxu1  ;;  %v6177_v63 = vmax.f32 %v12159_v25, 0.0 }
0x1b67   :  { %v7416_v18 = vpop.f32.mrb[85].mxu0  ;;  %v6168_v27 = vpop.f32.mrb[67].mxu1 }
0x1b68   :  { %v12162_v57 = vadd.f32 %v8027_v40, %v6079_v47  ;;  %v6185_v7 = vsub.f32 0.0, %v6181_v16  ;;  %v7417_v36 = vadd.f32 %v7416_v18, %v7415_v54 }
0x1b6a   :  { %v6182_v4 = vand.u32 2147483647, %v12162_v57  ;;  %v6189_v31 = vmul.f32 1.442695, %v6185_v7  ;;  %v6084_v14 = vadd.f32 %v7417_v36, %v6505_v22  ;;  %v7418_v43 = vpop.f32.mrb[86].mxu0  ;;  %v6178_v17 = vmax.f32 %v12162_v57, 0.0 }
0x1b6b   :  { %v7419_v32 = vpop.f32.mrb[87].mxu0 }
0x1b6c   :  { %v6186_v60 = vsub.f32 0.0, %v6182_v4  ;;  %9630 = vpow2.f32 %v6189_v31  ;;  %v12165_v52 = vadd.f32 %v6168_v27, %v6084_v14  ;;  %v7420_v13 = vadd.f32 %v7419_v32, %v7418_v43 }
0x1b6e   :  { %v6191_v33 = vmul.f32 1.442695, %v6186_v60  ;;  %v6183_v34 = vand.u32 2147483647, %v12165_v52  ;;  %v6089_v45 = vadd.f32 %v7420_v13, %v6505_v22  ;;  %v6179_v46 = vmax.f32 %v12165_v52, 0.0 }
0x1b70   :  { %9632 = vpow2.f32 %v6191_v33  ;;  %v6187_v15 = vsub.f32 0.0, %v6183_v34  ;;  %v12168_v42 = vadd.f32 %v8030_v26, %v6089_v45  ;;  %v6506_v33 = vld [vmem:[#allocation22] ss:$0 sm:$0xff] }
0x1b72   :  { %v6193_v24 = vmul.f32 1.442695, %v6187_v15  ;;  %v6184_v30 = vand.u32 2147483647, %v12168_v42  ;;  %v6180_v18 = vmax.f32 %v12168_v42, 0.0 }
0x1b74   :  { %9634 = vpow2.f32 %v6193_v24  ;;  %v6188_v62 = vsub.f32 0.0, %v6184_v30 }
0x1b76   :  { %v9631_v44 = vpop.eup %9630  ;;  %v6195_v35 = vmul.f32 1.442695, %v6188_v62 }
0x1b77   :  { %v6197_v12 = vadd.f32 1.0, %v9631_v44  ;;  %v6200_v48 = vmul.f32 -0.5, %v9631_v44  ;;  %v6203_v56 = vand.u32 2147483647, %v9631_v44 }
0x1b78   :  { %9636 = vpow2.f32 %v6195_v35 }
0x1b79   :  { %9638 = vlog2.f32 %v6197_v12  ;;  %v6201_v20 = vadd.f32 1.0, %v6200_v48  ;;  %vm6204_vm0 = vcmp.lt.f32.partialorder %v6203_v56, 0.0004427343 }
0x1b7a   :  { %v9633_v49 = vpop.eup %9632 }
0x1b7b   :  { %v6206_v0 = vadd.f32 1.0, %v9633_v49  ;;  %v6209_v53 = vmul.f32 -0.5, %v9633_v49  ;;  %v6202_v3 = vmul.f32 %v9631_v44, %v6201_v20  ;;  %v6212_v61 = vand.u32 2147483647, %v9633_v49 }
0x1b7d   :  { %9640 = vlog2.f32 %v6206_v0  ;;  %v6210_v28 = vadd.f32 1.0, %v6209_v53  ;;  %vm6213_vm1 = vcmp.lt.f32.partialorder %v6212_v61, 0.0004427343 }
0x1b7e   :  { %v9635_v38 = vpop.eup %9634 }
0x1b7f   :  { %v6215_v21 = vadd.f32 1.0, %v9635_v38  ;;  %v6218_v37 = vmul.f32 -0.5, %v9635_v38  ;;  %v6211_v5 = vmul.f32 %v9633_v49, %v6210_v28  ;;  %v6221_v41 = vand.u32 2147483647, %v9635_v38 }
0x1b81   :  { %9642 = vlog2.f32 %v6215_v21  ;;  %v6219_v23 = vadd.f32 1.0, %v6218_v37  ;;  %vm6222_vm3 = vcmp.lt.f32.partialorder %v6221_v41, 0.0004427343 }
0x1b82   :  { %v9637_v9 = vpop.eup %9636 }
0x1b83   :  { %v9639_v58 = vpop.eup %9638  ;;  %v6224_v55 = vadd.f32 1.0, %v9637_v9  ;;  %v6227_v6 = vmul.f32 -0.5, %v9637_v9  ;;  %v6220_v40 = vmul.f32 %v9635_v38, %v6219_v23  ;;  %v6230_v11 = vand.u32 2147483647, %v9637_v9 }
0x1b84   :  { %v6199_v59 = vmul.f32 0.6931472, %v9639_v58 }
0x1b85   :  { %9644 = vlog2.f32 %v6224_v55  ;;  %v6228_v39 = vadd.f32 1.0, %v6227_v6  ;;  %vm6231_vm9 = vcmp.lt.f32.partialorder %v6230_v11, 0.0004427343 }
0x1b86   :  { %v6205_v10 = vsel %vm6204_vm0, %v6202_v3, %v6199_v59 }
0x1b87   :  { %v9641_v1 = vpop.eup %9640  ;;  %v6233_v2 = vadd.f32 %v6205_v10, %v6177_v63  ;;  %v6229_v26 = vmul.f32 %v9637_v9, %v6228_v39 }
0x1b88   :  { %v6208_v8 = vmul.f32 0.6931472, %v9641_v1 }
0x1b89   :  { %9646 = vtanh.f32 %v6233_v2 }
0x1b8a   :  { %v6214_v29 = vsel %vm6213_vm1, %v6211_v5, %v6208_v8 }
0x1b8b   :  { %v9643_v22 = vpop.eup %9642  ;;  %v6234_v19 = vadd.f32 %v6214_v29, %v6178_v17 }
0x1b8c   :  { %v6217_v51 = vmul.f32 0.6931472, %v9643_v22 }
0x1b8d   :  { %9648 = vtanh.f32 %v6234_v19 }
0x1b8e   :  { %v6223_v50 = vsel %vm6222_vm3, %v6220_v40, %v6217_v51 }
0x1b8f   :  { %v9645_v47 = vpop.eup %9644  ;;  %v6235_v16 = vadd.f32 %v6223_v50, %v6179_v46 }
0x1b90   :  { %v6226_v54 = vmul.f32 0.6931472, %v9645_v47 }
0x1b91   :  { %9650 = vtanh.f32 %v6235_v16 }
0x1b92   :  { %v6232_v27 = vsel %vm6231_vm9, %v6229_v26, %v6226_v54 }
0x1b93   :  { %v9647_v7 = vpop.eup %9646  ;;  %v6236_v36 = vadd.f32 %v6232_v27, %v6180_v18 }
0x1b94   :  { %v6241_v4 = vmul.f32 %v9647_v7, %v12159_v25 }
0x1b95   :  { %9652 = vtanh.f32 %v6236_v36 }
0x1b96   :  { %8063 = vmatprep.mubr.f32.mxu0 %v6241_v4 }
0x1b97   :  { %v9649_v31 = vpop.eup %9648 }
0x1b98   :  { %v6242_v14 = vmul.f32 %v9649_v31, %v12162_v57 }
0x1b9a   :  { %8064 = vmatmul.mubr.f32.vlgmr.msra.gmra.mrb[88].mxu0 %v6242_v14 }
0x1b9b   :  { %v9651_v43 = vpop.eup %9650 }
0x1b9c   :  { %v6243_v32 = vmul.f32 %v9651_v43, %v12165_v52 }
0x1b9e   :  { %8066 = vmatprep.mubr.f32.mxu0 %v6243_v32 }
0x1b9f   :  { %v9653_v60 = vpop.eup %9652 }
0x1ba0   :  { %v6244_v13 = vmul.f32 %v9653_v60, %v12168_v42 }
0x1ba2   :  { %8067 = vmatmul.mubr.f32.gmra.mrb[90].mxu0 %v6244_v13 }
0x1c6d   :  { %v8065_v34 = vpop.f32.mrb[88].mxu0 }
0x1c6e   :  { %v6340_v45 = vadd.f32 %v8065_v34, %v6506_v33  ;;  %v6334_v15 = vpop.f32.mrb[89].mxu0 }
0x1c6f   :  { %v6335_v24 = vadd.f32 %v6506_v33, %v6334_v15 }
0x1c70   :  { %v6508_v25 = vmul.f32 -1.442695, %v6340_v45 }
0x1c71   :  { %v6507_v30 = vmul.f32 -1.442695, %v6335_v24 }
0x1c72   :  { %9654 = vpow2.f32 %v6508_v25 }
0x1c73   :  { %9656 = vpow2.f32 %v6507_v30 }
0x1c75   :  { %v8068_v62 = vpop.f32.mrb[90].mxu0 }
0x1c76   :  { %v6350_v57 = vadd.f32 %v8068_v62, %v6506_v33  ;;  %v6344_v44 = vpop.f32.mrb[91].mxu0 }
0x1c77   :  { %v6345_v35 = vadd.f32 %v6506_v33, %v6344_v44 }
0x1c78   :  { %v6510_v12 = vmul.f32 -1.442695, %v6350_v57 }
0x1c79   :  { %v6509_v52 = vmul.f32 -1.442695, %v6345_v35 }
0x1c7a   :  { %9658 = vpow2.f32 %v6510_v12 }
0x1c7b   :  { %9660 = vpow2.f32 %v6509_v52 }
0x1c7c   :  { %v9655_v42 = vpop.eup %9654 }
0x1c7d   :  { %v9657_v49 = vpop.eup %9656  ;;  %v6366_v0 = vadd.f32 1.0, %v9655_v42 }
0x1c7e   :  { %v6365_v48 = vadd.f32 1.0, %v9657_v49 }
0x1c7f   :  { %9662 = vrcp.f32 %v6366_v0 }
0x1c80   :  { %9664 = vrcp.f32 %v6365_v48 }
0x1c84   :  { %v9659_v38 = vpop.eup %9658 }
0x1c85   :  { %v9661_v21 = vpop.eup %9660  ;;  %v6368_v53 = vadd.f32 1.0, %v9659_v38 }
0x1c86   :  { %v6367_v20 = vadd.f32 1.0, %v9661_v21 }
0x1c87   :  { %9666 = vrcp.f32 %v6368_v53 }
0x1c88   :  { %9668 = vrcp.f32 %v6367_v20 }
0x1c89   :  { %v9663_v56 = vpop.eup %9662 }
0x1c8a   :  { %v9665_v9 = vpop.eup %9664  ;;  %6378 = vst [vmem:[%s10665_s29 + $0x8] sm:$0xff] %v9663_v56 }
0x1c8b   :  { %6377 = vst [vmem:[%s10665_s29] sm:$0xff] %v9665_v9 }
0x1c91   :  { %v9667_v58 = vpop.eup %9666 }
0x1c92   :  { %v9669_v55 = vpop.eup %9668  ;;  %6380 = vst [vmem:[%s10665_s29 + $0x18] sm:$0xff] %v9667_v58 }
0x1c93   :  { %6379 = vst [vmem:[%s10665_s29 + $0x10] sm:$0xff] %v9669_v55 }
0x1c94   :  { %6385 = vsyncpa [#allocation3], 1 }
0x1c95   :  { %6386 = vsyncpa [#allocation5], 1 }
0x1c96   :  { %6387 = vsyncpa [#allocation8], 1 }
0x1c97   :  { %6388 = vsyncpa [#allocation11], 1 }
0x1c98   :  { %6389 = vsyncpa [#allocation14], 1 }
0x1c99   :  { %6390 = vsyncpa [#allocation17], 1 }
0x1c9a   :  { %6391 = vsyncpa [#allocation20], 1 }
0x1c9b   :  { %6392 = vsyncpa [#allocation23], 1 }
0x1c9c   :  { %6393 = vsyncpa [#allocation26], 1 }
0x1c9d   :  { %6394 = vsyncpa [#allocation29], 1 }
0x1c9e   :  { %6395 = vsyncpa [#allocation32], 1 }
0x1c9f   :  { %6396 = vsyncpa [#allocation35], 1 }
0x1ca0   :  { %6397 = vsyncpa [#allocation38], 1 }
0x1ca1   :  { %6398 = vsyncpa [#allocation41], 1 }

</bundles_post_ra>
